<compile_context>
chip_gen: v5e
topology: v5e:2x2
jax: 0.10.0
libtpu: 0.0.40
codegen_flags: <defaults>
</compile_context>

<pallas_src>
import functools
import math

import jax
import jax.numpy as jnp
from jax.experimental import pallas as pl
from jax.experimental.pallas import tpu as pltpu

BN_EPS = 1e-5                              # nn.BatchNorm1d default eps
BN_SCALE = 1.0 / math.sqrt(1.0 + BN_EPS)   # eval-mode scale with fresh stats
NEG_INF_LOGIT = -1e30                      # mask value baked into padded b3 cols


def _round_up(n, m):
    return ((n + m - 1) // m) * m


def _pick_out_tile(d4p):
    """Column tile for linear3: prefer >=2 blocks so the wide weight stream
    is pipelined block-by-block.  (Sweep tn per generation: e.g. tn=1536 on
    v5e may overlap better; tn=3072 keeps per-step overhead low on v6e/v7x.)"""
    for t in (3072, 2048, 1536, 1024, 512, 256, 128):
        if d4p % t == 0 and d4p // t >= 2:
            return t
    return d4p


# ------------------------------ kernel -------------------------------------


def _output_xent_kernel(x_ref, w1_ref, b1_ref, w2_ref, w3_ref, b3_ref,
                        out_ref, h2_ref, m_ref, s_ref, *, tn, n_blocks):
    """Fused Linear1+ReLU(+BN1 folded) -> Linear2(+BN2 folded) -> Linear3+bias
    -> online LogSoftmax.

    Grid: (row blocks "parallel", linear3 column blocks "arbitrary").
    x changes per row block; w1/b1/w2 have constant block indices (resident);
    w3/b3 stream one (d3p, tn) block per j step; out block is resident across j.
    """
    j = pl.program_id(1)

    # ---- narrow hidden matmuls + softmax-stat init, once per row block ------
    @pl.when(j == 0)
    def _():
        h1 = jnp.dot(x_ref[...], w1_ref[...],
                     preferred_element_type=jnp.float32)          # Linear1
        h1 = jnp.maximum(h1 + b1_ref[...], 0.0)                   # +bias, ReLU
        h2_ref[...] = jnp.dot(h1.astype(jnp.bfloat16), w2_ref[...],
                              preferred_element_type=jnp.float32  # Linear2
                              ).astype(jnp.bfloat16)              # (BN1/BN2 folded)
        m_ref[...] = jnp.full_like(m_ref, -jnp.inf)
        s_ref[...] = jnp.zeros_like(s_ref)

    # ---- linear3: one output-column block per grid step ---------------------
    # Padded logit columns already carry b3 = -1e30, so no in-kernel mask.
    blk = jnp.dot(h2_ref[...], w3_ref[...],
                  preferred_element_type=jnp.float32) + b3_ref[...]

    # Online softmax statistics (f32), updated under the next block's DMA.
    m_old = m_ref[...]
    m_new = jnp.maximum(m_old, blk.max(axis=-1, keepdims=True))
    s_ref[...] = (s_ref[...] * jnp.exp(m_old - m_new)
                  + jnp.sum(jnp.exp(blk - m_new), axis=-1, keepdims=True))
    m_ref[...] = m_new

    # Write raw logits directly into the VMEM-resident output block.
    # Static lane-aligned slices dispatched with pl.when (nj is tiny).
    for jj in range(n_blocks):
        @pl.when(j == jj)
        def _(jj=jj):
            out_ref[:, jj * tn:(jj + 1) * tn] = blk

    # ---- in-place log-softmax once the last column block is stored ----------
    @pl.when(j == n_blocks - 1)
    def _():
        lse = m_ref[...] + jnp.log(s_ref[...])
        out_ref[...] = out_ref[...] - lse


# ------------------------------ wrapper -------------------------------------


def output_xent_forward(x, weights, *, out_dim):
    """x: (B, T, linear1_in) f32 -> log-probs (B, T, out_dim) f32."""
    B, T, d1 = x.shape
    d1p, d2p = weights["w1"].shape
    d3p = weights["w2"].shape[1]
    d4p = weights["w3"].shape[1]

    N = B * T
    # Row tiling: multiple of 16 (bf16 sublane packing); 256-row tiles at scale
    # so the resident out block / h2 / softmax scratch stay bounded in VMEM and
    # the leading axis can shard across TensorCores (v7x megacore).
    if N <= 256:
        Np = max(_round_up(N, 16), 16)
        tm = Np
    else:
        tm = 256
        Np = _round_up(N, tm)
    n_i = Np // tm

    tn = _pick_out_tile(d4p)
    nj = d4p // tn

    # Activations are tiny (N x d1); pad + cast once per call.
    xp = jnp.zeros((Np, d1p), jnp.bfloat16)
    xp = xp.at[:N, :d1].set(x.reshape(N, d1).astype(jnp.bfloat16))

    kernel = functools.partial(_output_xent_kernel, tn=tn, n_blocks=nj)

    # NOTE: w1/b1/w2 have constant block indices; Mosaic may still allocate two
    # pipeline buffers each (~1.6 MB) -- acceptable at these shapes (verify in
    # the VMEM report before shrinking with pipeline_mode if headroom is tight).
    out = pl.pallas_call(
        kernel,
        out_shape=jax.ShapeDtypeStruct((Np, d4p), jnp.float32),
        grid_spec=pltpu.PrefetchScalarGridSpec(
            num_scalar_prefetch=0,
            grid=(n_i, nj),
            in_specs=[
                pl.BlockSpec((tm, d1p), lambda i, j: (i, 0)),    # x        (per row tile)
                pl.BlockSpec((d1p, d2p), lambda i, j: (0, 0)),   # w1 bf16  (resident)
                pl.BlockSpec((1, d2p), lambda i, j: (0, 0)),     # b1 f32   (resident)
                pl.BlockSpec((d2p, d3p), lambda i, j: (0, 0)),   # w2 bf16  (resident, BN1 folded)
                pl.BlockSpec((d3p, tn), lambda i, j: (0, j)),    # w3 bf16  (streamed, BN2 folded)
                pl.BlockSpec((1, tn), lambda i, j: (0, j)),      # b3 f32   (streamed, mask folded)
            ],
            out_specs=pl.BlockSpec((tm, d4p), lambda i, j: (i, 0)),  # resident across j
            scratch_shapes=[
                pltpu.VMEM((tm, d3p), jnp.bfloat16),             # h2 intermediate
                pltpu.VMEM((tm, 1), jnp.float32),                # running max m
                pltpu.VMEM((tm, 1), jnp.float32),                # running sum s
            ],
        ),
        compiler_params=pltpu.CompilerParams(
            dimension_semantics=("parallel", "arbitrary"),       # softmax couples j
            vmem_limit_bytes=32 * 1024 * 1024),
    )(xp, weights["w1"], weights["b1"], weights["w2"],
      weights["w3"], weights["b3"])

    return out[:N, :out_dim].reshape(B, T, out_dim)


# ------------------------------ parameters ----------------------------------


def init_output_xent_params(key, linear1_in, linear2_in, linear3_in, out_dim):
    """PyTorch-style Linear init, then:
      * pad to TPU-friendly shapes and cast weights to bf16 ONCE,
      * fold the eval-mode BN scales into w2 / w3 rows,
      * fold the padded-logit-column mask into b3 (-1e30 on padded columns)."""
    d1p = _round_up(linear1_in, 128)
    d2p = _round_up(linear2_in, 128)
    d3p = _round_up(linear3_in, 128)
    d4p = _round_up(out_dim, 128)

    ks = jax.random.split(key, 5)

    def uniform(k, shape, fan_in):
        bound = 1.0 / math.sqrt(fan_in)
        return jax.random.uniform(k, shape, jnp.float32, -bound, bound)

    w1 = uniform(ks[0], (linear1_in, linear2_in), linear1_in)
    b1 = uniform(ks[1], (linear2_in,), linear1_in)
    w2 = uniform(ks[2], (linear2_in, linear3_in), linear2_in)   # bias=False
    w3 = uniform(ks[3], (linear3_in, out_dim), linear3_in)
    b3 = uniform(ks[4], (out_dim,), linear3_in)

    def pad2(a, rp, cp, fill=0.0):
        return jnp.full((rp, cp), fill, jnp.float32).at[:a.shape[0], :a.shape[1]].set(a)

    return {
        "w1": pad2(w1, d1p, d2p).astype(jnp.bfloat16),
        "b1": pad2(b1[None, :], 1, d2p),                             # f32
        "w2": pad2(w2 * BN_SCALE, d2p, d3p).astype(jnp.bfloat16),    # BN1 folded
        "w3": pad2(w3 * BN_SCALE, d3p, d4p).astype(jnp.bfloat16),    # BN2 folded
        "b3": pad2(b3[None, :], 1, d4p, fill=NEG_INF_LOGIT),         # f32, mask folded
    }


# ------------------------------ reference -----------------------------------


def reference_forward(x, weights, out_dim):
    """Plain-JAX reference with the same folded bf16 weights / f32 accumulation."""
    B, T, d1 = x.shape
    d1p = weights["w1"].shape[0]
    N = B * T
    xp = jnp.zeros((N, d1p), jnp.bfloat16).at[:, :d1].set(
        x.reshape(N, d1).astype(jnp.bfloat16))
    h1 = jnp.dot(xp, weights["w1"], preferred_element_type=jnp.float32)
    h1 = jnp.maximum(h1 + weights["b1"], 0.0)
    h2 = jnp.dot(h1.astype(jnp.bfloat16), weights["w2"],
                 preferred_element_type=jnp.float32)
    logits = jnp.dot(h2.astype(jnp.bfloat16), weights["w3"],
                     preferred_element_type=jnp.float32) + weights["b3"]
    logits = logits[:, :out_dim]
    return jax.nn.log_softmax(logits, axis=-1).reshape(B, T, out_dim)


# --------------------------------- main --------------------------------------


if __name__ == "__main__":
    key = jax.random.PRNGKey(0)
    k_params, k_x = jax.random.split(key)

    # FTDNN OutputXentLayer dims: 256 -> 1536 -> 256 -> 6024
    D1, D2, D3, D_OUT = 256, 1536, 256, 6024
    B, T = 2, 8

    weights = init_output_xent_params(k_params, D1, D2, D3, D_OUT)
    x = jax.random.normal(k_x, (B, T, D1), jnp.float32)

    fwd = jax.jit(functools.partial(output_xent_forward, out_dim=D_OUT))
    out = jax.block_until_ready(fwd(x, weights))

    assert out.shape == (B, T, D_OUT), out.shape
    assert bool(jnp.all(jnp.isfinite(out)))

    ref = reference_forward(x, weights, D_OUT)
    max_err = float(jnp.max(jnp.abs(out - ref)))
    assert bool(jnp.allclose(out, ref, atol=1e-2, rtol=1e-3)), max_err
    # log-softmax rows must exponentiate-sum to 1
    assert bool(jnp.allclose(jnp.sum(jnp.exp(out), axis=-1), 1.0, atol=1e-3))

    print("KERNEL_OK")
</pallas_src>

<mosaic_0001>
module attributes {stable_mosaic.version = 11 : i64} {
  func.func @_output_xent_kernel(%arg0: i32, %arg1: i32, %arg2: memref<16x256xbf16, #tpu.memory_space<vmem>>, %arg3: memref<256x1536xbf16, #tpu.memory_space<vmem>>, %arg4: memref<1x1536xf32, #tpu.memory_space<vmem>>, %arg5: memref<1536x256xbf16, #tpu.memory_space<vmem>>, %arg6: memref<256x3072xbf16, #tpu.memory_space<vmem>>, %arg7: memref<1x3072xf32, #tpu.memory_space<vmem>>, %arg8: memref<16x6144xf32, #tpu.memory_space<vmem>>, %arg9: memref<16x256xbf16, #tpu.memory_space<vmem>>, %arg10: memref<16x1xf32, #tpu.memory_space<vmem>>, %arg11: memref<16x1xf32, #tpu.memory_space<vmem>>) attributes {dimension_semantics = [#tpu.dimension_semantics<parallel>, #tpu.dimension_semantics<arbitrary>], iteration_bounds = array<i64: 1, 2>, scalar_prefetch = 0 : i64, scratch_operands = 3 : i64, tpu.core_type = #tpu.core_type<tc>, window_params = [{transform_indices = @transform_0, window_bounds = array<i64: 16, 256>}, {pipeline_mode = #tpu.pipeline_mode<synchronous>, transform_indices = @transform_1, window_bounds = array<i64: 256, 1536>}, {pipeline_mode = #tpu.pipeline_mode<synchronous>, transform_indices = @transform_2, window_bounds = array<i64: 1, 1536>}, {pipeline_mode = #tpu.pipeline_mode<synchronous>, transform_indices = @transform_3, window_bounds = array<i64: 1536, 256>}, {transform_indices = @transform_4, window_bounds = array<i64: 256, 3072>}, {transform_indices = @transform_5, window_bounds = array<i64: 1, 3072>}, {transform_indices = @transform_6, window_bounds = array<i64: 16, 6144>}]} {
    %c0_i32 = arith.constant 0 : i32
    %0 = arith.cmpi eq, %arg1, %c0_i32 : i32
    %1 = arith.extui %0 : i1 to i32
    %c0_i32_0 = arith.constant 0 : i32
    %2 = arith.cmpi ne, %1, %c0_i32_0 : i32
    scf.if %2 {
      %c0_21 = arith.constant 0 : index
      %c0_22 = arith.constant 0 : index
      %34 = vector.load %arg2[%c0_21, %c0_22] : memref<16x256xbf16, #tpu.memory_space<vmem>>, vector<16x256xbf16>
      %c0_23 = arith.constant 0 : index
      %c0_24 = arith.constant 0 : index
      %35 = vector.load %arg3[%c0_23, %c0_24] : memref<256x1536xbf16, #tpu.memory_space<vmem>>, vector<256x1536xbf16>
      %cst_25 = arith.constant dense<0.000000e+00> : vector<16x1536xf32>
      %36 = tpu.matmul %34, %35, %cst_25 {dimension_numbers = #tpu.dot_dimension_numbers<[1], [0], [0], [1], [0, 0, 1, 1], [], []>} : vector<16x256xbf16>, vector<256x1536xbf16>, vector<16x1536xf32> -> vector<16x1536xf32>
      %c0_26 = arith.constant 0 : index
      %c0_27 = arith.constant 0 : index
      %37 = vector.load %arg4[%c0_26, %c0_27] : memref<1x1536xf32, #tpu.memory_space<vmem>>, vector<1x1536xf32>
      %38 = vector.broadcast %37 : vector<1x1536xf32> to vector<16x1536xf32>
      %39 = arith.addf %36, %38 : vector<16x1536xf32>
      %cst_28 = arith.constant 0.000000e+00 : f32
      %40 = vector.broadcast %cst_28 : f32 to vector<16x1536xf32>
      %41 = arith.maximumf %39, %40 : vector<16x1536xf32>
      %42 = arith.truncf %41 : vector<16x1536xf32> to vector<16x1536xbf16>
      %c0_29 = arith.constant 0 : index
      %c0_30 = arith.constant 0 : index
      %43 = vector.load %arg5[%c0_29, %c0_30] : memref<1536x256xbf16, #tpu.memory_space<vmem>>, vector<1536x256xbf16>
      %cst_31 = arith.constant dense<0.000000e+00> : vector<16x256xf32>
      %44 = tpu.matmul %42, %43, %cst_31 {dimension_numbers = #tpu.dot_dimension_numbers<[1], [0], [0], [1], [0, 0, 1, 1], [], []>} : vector<16x1536xbf16>, vector<1536x256xbf16>, vector<16x256xf32> -> vector<16x256xf32>
      %45 = arith.truncf %44 : vector<16x256xf32> to vector<16x256xbf16>
      %c0_32 = arith.constant 0 : index
      %c0_33 = arith.constant 0 : index
      %46 = vector.load %arg9[%c0_32, %c0_33] : memref<16x256xbf16, #tpu.memory_space<vmem>>, vector<16x256xbf16>
      tpu.vector_store %arg9[%c0_32, %c0_33], %45 {strides = array<i32>} : memref<16x256xbf16, #tpu.memory_space<vmem>>, vector<16x256xbf16>,
      %cst_34 = arith.constant 0xFF800000 : f32
      %47 = vector.broadcast %cst_34 : f32 to vector<16x1xf32>
      %c0_35 = arith.constant 0 : index
      %c0_36 = arith.constant 0 : index
      %48 = vector.load %arg10[%c0_35, %c0_36] : memref<16x1xf32, #tpu.memory_space<vmem>>, vector<16x1xf32>
      tpu.vector_store %arg10[%c0_35, %c0_36], %47 {strides = array<i32>} : memref<16x1xf32, #tpu.memory_space<vmem>>, vector<16x1xf32>,
      %cst_37 = arith.constant 0.000000e+00 : f32
      %49 = vector.broadcast %cst_37 : f32 to vector<16x1xf32>
      %c0_38 = arith.constant 0 : index
      %c0_39 = arith.constant 0 : index
      %50 = vector.load %arg11[%c0_38, %c0_39] : memref<16x1xf32, #tpu.memory_space<vmem>>, vector<16x1xf32>
      tpu.vector_store %arg11[%c0_38, %c0_39], %49 {strides = array<i32>} : memref<16x1xf32, #tpu.memory_space<vmem>>, vector<16x1xf32>,
    } else {
    }
    %c0 = arith.constant 0 : index
    %c0_1 = arith.constant 0 : index
    %3 = vector.load %arg9[%c0, %c0_1] : memref<16x256xbf16, #tpu.memory_space<vmem>>, vector<16x256xbf16>
    %c0_2 = arith.constant 0 : index
    %c0_3 = arith.constant 0 : index
    %4 = vector.load %arg6[%c0_2, %c0_3] : memref<256x3072xbf16, #tpu.memory_space<vmem>>, vector<256x3072xbf16>
    %cst = arith.constant dense<0.000000e+00> : vector<16x3072xf32>
    %5 = tpu.matmul %3, %4, %cst {dimension_numbers = #tpu.dot_dimension_numbers<[1], [0], [0], [1], [0, 0, 1, 1], [], []>} : vector<16x256xbf16>, vector<256x3072xbf16>, vector<16x3072xf32> -> vector<16x3072xf32>
    %c0_4 = arith.constant 0 : index
    %c0_5 = arith.constant 0 : index
    %6 = vector.load %arg7[%c0_4, %c0_5] : memref<1x3072xf32, #tpu.memory_space<vmem>>, vector<1x3072xf32>
    %7 = vector.broadcast %6 : vector<1x3072xf32> to vector<16x3072xf32>
    %8 = arith.addf %5, %7 : vector<16x3072xf32>
    %c0_6 = arith.constant 0 : index
    %c0_7 = arith.constant 0 : index
    %9 = vector.load %arg10[%c0_6, %c0_7] : memref<16x1xf32, #tpu.memory_space<vmem>>, vector<16x1xf32>
    %cst_8 = arith.constant dense<0xFF800000> : vector<16xf32>
    %10 = vector.multi_reduction <maximumf>, %8, %cst_8 [1] : vector<16x3072xf32> to vector<16xf32>
    %11 = vector.shape_cast %10 : vector<16xf32> to vector<16x1xf32>
    %12 = arith.maximumf %9, %11 : vector<16x1xf32>
    %c0_9 = arith.constant 0 : index
    %c0_10 = arith.constant 0 : index
    %13 = vector.load %arg11[%c0_9, %c0_10] : memref<16x1xf32, #tpu.memory_space<vmem>>, vector<16x1xf32>
    %14 = arith.subf %9, %12 : vector<16x1xf32>
    %15 = math.exp %14 : vector<16x1xf32>
    %16 = arith.mulf %13, %15 : vector<16x1xf32>
    %17 = vector.broadcast %12 : vector<16x1xf32> to vector<16x3072xf32>
    %18 = arith.subf %8, %17 : vector<16x3072xf32>
    %19 = math.exp %18 : vector<16x3072xf32>
    %cst_11 = arith.constant dense<0.000000e+00> : vector<16xf32>
    %20 = vector.multi_reduction <add>, %19, %cst_11 [1] : vector<16x3072xf32> to vector<16xf32>
    %21 = vector.shape_cast %20 : vector<16xf32> to vector<16x1xf32>
    %22 = arith.addf %16, %21 : vector<16x1xf32>
    %c0_12 = arith.constant 0 : index
    %c0_13 = arith.constant 0 : index
    %23 = vector.load %arg11[%c0_12, %c0_13] : memref<16x1xf32, #tpu.memory_space<vmem>>, vector<16x1xf32>
    tpu.vector_store %arg11[%c0_12, %c0_13], %22 {strides = array<i32>} : memref<16x1xf32, #tpu.memory_space<vmem>>, vector<16x1xf32>,
    %c0_14 = arith.constant 0 : index
    %c0_15 = arith.constant 0 : index
    %24 = vector.load %arg10[%c0_14, %c0_15] : memref<16x1xf32, #tpu.memory_space<vmem>>, vector<16x1xf32>
    tpu.vector_store %arg10[%c0_14, %c0_15], %12 {strides = array<i32>} : memref<16x1xf32, #tpu.memory_space<vmem>>, vector<16x1xf32>,
    %c0_i32_16 = arith.constant 0 : i32
    %25 = arith.cmpi eq, %arg1, %c0_i32_16 : i32
    %26 = arith.extui %25 : i1 to i32
    %c0_i32_17 = arith.constant 0 : i32
    %27 = arith.cmpi ne, %26, %c0_i32_17 : i32
    scf.if %27 {
      %c0_21 = arith.constant 0 : index
      %c0_22 = arith.constant 0 : index
      %34 = vector.load %arg8[%c0_21, %c0_22] : memref<16x6144xf32, #tpu.memory_space<vmem>>, vector<16x3072xf32>
      tpu.vector_store %arg8[%c0_21, %c0_22], %8 {strides = array<i32>} : memref<16x6144xf32, #tpu.memory_space<vmem>>, vector<16x3072xf32>,
    } else {
    }
    %c1_i32 = arith.constant 1 : i32
    %28 = arith.cmpi eq, %arg1, %c1_i32 : i32
    %29 = arith.extui %28 : i1 to i32
    %c0_i32_18 = arith.constant 0 : i32
    %30 = arith.cmpi ne, %29, %c0_i32_18 : i32
    scf.if %30 {
      %c0_21 = arith.constant 0 : index
      %c3072 = arith.constant 3072 : index
      %34 = vector.load %arg8[%c0_21, %c3072] : memref<16x6144xf32, #tpu.memory_space<vmem>>, vector<16x3072xf32>
      tpu.vector_store %arg8[%c0_21, %c3072], %8 {strides = array<i32>} : memref<16x6144xf32, #tpu.memory_space<vmem>>, vector<16x3072xf32>,
    } else {
    }
    %c1_i32_19 = arith.constant 1 : i32
    %31 = arith.cmpi eq, %arg1, %c1_i32_19 : i32
    %32 = arith.extui %31 : i1 to i32
    %c0_i32_20 = arith.constant 0 : i32
    %33 = arith.cmpi ne, %32, %c0_i32_20 : i32
    scf.if %33 {
      %c0_21 = arith.constant 0 : index
      %c0_22 = arith.constant 0 : index
      %34 = vector.load %arg10[%c0_21, %c0_22] : memref<16x1xf32, #tpu.memory_space<vmem>>, vector<16x1xf32>
      %c0_23 = arith.constant 0 : index
      %c0_24 = arith.constant 0 : index
      %35 = vector.load %arg11[%c0_23, %c0_24] : memref<16x1xf32, #tpu.memory_space<vmem>>, vector<16x1xf32>
      %36 = math.log %35 : vector<16x1xf32>
      %37 = arith.addf %34, %36 : vector<16x1xf32>
      %c0_25 = arith.constant 0 : index
      %c0_26 = arith.constant 0 : index
      %38 = vector.load %arg8[%c0_25, %c0_26] : memref<16x6144xf32, #tpu.memory_space<vmem>>, vector<16x6144xf32>
      %39 = vector.broadcast %37 : vector<16x1xf32> to vector<16x6144xf32>
      %40 = arith.subf %38, %39 : vector<16x6144xf32>
      %c0_27 = arith.constant 0 : index
      %c0_28 = arith.constant 0 : index
      %41 = vector.load %arg8[%c0_27, %c0_28] : memref<16x6144xf32, #tpu.memory_space<vmem>>, vector<16x6144xf32>
      tpu.vector_store %arg8[%c0_27, %c0_28], %40 {strides = array<i32>} : memref<16x6144xf32, #tpu.memory_space<vmem>>, vector<16x6144xf32>,
    } else {
    }
    return
  }
  func.func @transform_0(%arg0: i32, %arg1: i32) -> (i32, i32) {
    %c0_i32 = arith.constant 0 : i32
    %c0_i32_0 = arith.constant 0 : i32
    return %arg0, %c0_i32 : i32, i32
  }
  func.func @transform_1(%arg0: i32, %arg1: i32) -> (i32, i32) {
    %c0_i32 = arith.constant 0 : i32
    %c0_i32_0 = arith.constant 0 : i32
    %c0_i32_1 = arith.constant 0 : i32
    return %c0_i32, %c0_i32_0 : i32, i32
  }
  func.func @transform_2(%arg0: i32, %arg1: i32) -> (i32, i32) {
    %c0_i32 = arith.constant 0 : i32
    %c0_i32_0 = arith.constant 0 : i32
    %c0_i32_1 = arith.constant 0 : i32
    return %c0_i32, %c0_i32_0 : i32, i32
  }
  func.func @transform_3(%arg0: i32, %arg1: i32) -> (i32, i32) {
    %c0_i32 = arith.constant 0 : i32
    %c0_i32_0 = arith.constant 0 : i32
    %c0_i32_1 = arith.constant 0 : i32
    return %c0_i32, %c0_i32_0 : i32, i32
  }
  func.func @transform_4(%arg0: i32, %arg1: i32) -> (i32, i32) {
    %c0_i32 = arith.constant 0 : i32
    %c0_i32_0 = arith.constant 0 : i32
    return %c0_i32, %arg1 : i32, i32
  }
  func.func @transform_5(%arg0: i32, %arg1: i32) -> (i32, i32) {
    %c0_i32 = arith.constant 0 : i32
    %c0_i32_0 = arith.constant 0 : i32
    return %c0_i32, %arg1 : i32, i32
  }
  func.func @transform_6(%arg0: i32, %arg1: i32) -> (i32, i32) {
    %c0_i32 = arith.constant 0 : i32
    %c0_i32_0 = arith.constant 0 : i32
    return %arg0, %c0_i32 : i32, i32
  }
}

</mosaic_0001>

<bundles_post_ra>
// kernel: output_xent_forward.1
= control target key start
LH: loop header
LB: loop body
LE: loop exit
PB: predicated region body
PF: predicated region fallthrough
CT: control target
= control target key end

     0   :  { %s13971_s0 = inlined_call_operand.vmem [shape: bf16[16,256], index: 0, kind: input, shape index: {}]   ;;  %s13972_s1 = inlined_call_operand.hbm [shape: bf16[256,1536], index: 1, kind: input, shape index: {}]   ;;  %s13973_s2 = inlined_call_operand.hbm [shape: f32[1,1536], index: 2, kind: input, shape index: {}]   ;;  %s13974_s3 = inlined_call_operand.hbm [shape: bf16[1536,256], index: 3, kind: input, shape index: {}]   ;;  %s13975_s4 = inlined_call_operand.hbm [shape: bf16[256,6144], index: 4, kind: input, shape index: {}]   ;;  %s13976_s5 = inlined_call_operand.hbm [shape: f32[1,6144], index: 5, kind: input, shape index: {}]   ;;  %s13977_s6 = inlined_call_operand.vmem [shape: f32[16,6144], index: 6, kind: output, shape index: {}]  }
   0x1   :  { %13999 = sst [smem:[#allocation33_spill]] %s13972_s1 }
   0x2   :  { %14000 = sst [smem:[#allocation34_spill]] %s13973_s2 }
   0x3   :  { %14001 = sst [smem:[#allocation35_spill]] %s13974_s3 }
   0x4   :  { %14002 = sst [smem:[#allocation36_spill]] %s13975_s4 }
   0x5   :  { %14003 = sst [smem:[#allocation37_spill]] %s13977_s6 }
   0x6   :  { %11 = vsyncpa [#allocation6], 0 }
   0x7   :  { %12 = vsyncpa [#allocation8], 0 }
   0x8   :  { %13 = vsyncpa [#allocation11], 0 }
   0x9   :  { %15 = vsyncpa [#allocation11 + $0x1], 0  ;;  %s11686_s21 = smov 0   ;;  %s11688_s22 = smov 0  }
   0xa   :  { %s11690_s23 = smov 0   ;;  %s11692_s24 = smov 0  }
   0xb   :  { %s11694_s25 = smov 0   ;;  %s11696_s26 = smov 0  }
   0xc LB: > { %s13978_s27 = sadd.s32 4294967295, %s11635_s26   ;;  %s129_s28 = sadd.s32 1, %s11623_s23  ;;  %s11635_s26 = sphi %s11696_s26, %s21_s26   ;;  %s11631_s25 = sphi %s11694_s25, %s14088_s25   ;;  %s11627_s24 = sphi %s11692_s24, %s14087_s24   ;;  %s11623_s23 = sphi %s11690_s23, %s14086_s23   ;;  %s11619_s22 = sphi %s11688_s22, %s14085_s22   ;;  %s11615_s21 = sphi %s11686_s21, %s14084_s21  }
   0xd   : > { %p136_p0 = scmp.ne.s32.totalorder %s11623_s23, %s11619_s22  ;;  %p137_p1 = scmp.eq.s32.totalorder %s11635_s26, 0 }
   0xe   : > { %p142_p2 = scmp.ne.s32.totalorder %s11619_s22, %s11615_s21  ;;  %p11722_p3 = scmp.eq.s32.totalorder %s13978_s27, 0 }
   0xf   : > { %p11726_p4 = por %p137_p1, %p136_p0  ;;  %p7335_p5 = scmp.ge.s32.totalorder %s11635_s26, 1 }
  0x10   : > { %p11733_p6 = por %p11722_p3, %p142_p2  ;;  %p205_p7 = scmp.lt.s32.totalorder %s11635_s26, 3 }
  0x11   : > { %s14007_s2 = sld [smem:[#allocation34_spill]]  ;;  %s11637_s12 = smov [#allocation7]  }
  0x12   : > { %p11741_p8 = pnand %p7335_p5, %p205_p7  ;;  %s243_s13 = sshll.u32 %s11637_s12, 4  ;;  %s244_s13 = int_to_ptr.vmem [resolvable:$true] %s243_s13 }
  0x13   : > { %p11254_p10 = scmp.lt.s32.totalorder %s11635_s26, 2  ;;  %s30_s16 = sadd.s32 1, %s11631_s25 }
  0x14   : > { %p11234_p9 = pneg %p11741_p8  ;;  %p31_p13 = scmp.ge.s32.totalorder %s30_s16, 2 }
  0x15   : > { %p11756_p12 = pnand %p11254_p10, %p11726_p4  ;;  %s268_s17 = sand.u32 1, %s11635_s26  }
  0x16   : > { %p11750_p11 = pnand %p11234_p9, %p11722_p3  ;;  %s13979_s18 = sand.u32 1, %s11623_s23  }
  0x17   : > { %s241_s10 = sshll.u32 %s14007_s2, 4  ;;  %s14090_s16 = smov (%p31_p13, %s30_s16), 0  ;;  %s242_s10 = int_to_ptr.hbm [resolvable:$true] %s241_s10 }
  0x18   : > { %11240 = dma.hbm_to_vmem [thread:$0]  (!%p11750_p11), %s242_s10, 192, %s244_s13, [#allocation8]  }
  0x19   : > { %14011 = sst [smem:[#allocation16_spill]] %s14090_s16  ;;  %s11214_s19 = smul.u32 3072, %s13979_s18 }
  0x1a   : > { %s126_s20 = ssub.s32 %s11631_s25, %s14090_s16  ;;  %s10441_s21 = smul.u32 96, %s11631_s25 }
  0x1b   : > { %p127_p0 = scmp.eq.s32.totalorder %s126_s20, 0  ;;  %s14012_s4 = sld [smem:[#allocation36_spill]] }
  0x1c   : > { %s272_s12 = scalar_lea.vmem [#allocation10], %s11214_s19  ;;  %s11780_s2 = scalar_lea.sflag [#allocation11], %s268_s17 }
  0x1d   : > { %s280_s27 = sshll.u32 %s272_s12, 4  ;;  %s11638_s18 = smov 3072   ;;  %s281_s27 = int_to_ptr.vmem [resolvable:$true] %s280_s27 }
  0x1e   : > { %s11778_s10 = scalar_select %p127_p0, %s11623_s23, %s129_s28  }
  0x1f   : > { %s11639_s16 = smov 1536   ;;  %s11640_s6 = smov 96  }
  0x20   : > { %s14013_s1 = sld [smem:[#allocation33_spill]]  ;;  %s11641_s28 = smov [#allocation5]  }
  0x21   : > { %s277_s9 = scalar_lea.hbm %s14012_s4, %s10441_s21  ;;  %s228_s21 = sshll.u32 %s11641_s28, 4  ;;  %s229_s21 = int_to_ptr.vmem [resolvable:$true] %s228_s21 }
  0x22   : > { %s278_s13 = sshll.u32 %s277_s9, 4  ;;  %s14014_s3 = sld [smem:[#allocation35_spill]]  ;;  %s279_s13 = int_to_ptr.hbm [resolvable:$true] %s278_s13 }
  0x23   : > { %11247 = dma.hbm_to_vmem [thread:$0]  (!%p11756_p12), %s279_s13, 49152, %s281_s27, %s11780_s2, %s11638_s18, %s11639_s16, %s11640_s6  }
  0x24   : > { %s11642_s12 = smov 768   ;;  %s11643_s4 = smov 48  }
  0x25   : > { %s11644_s6 = smov [#allocation9]   ;;  %s11645_s16 = smov 128  }
  0x26   : > { %s226_s19 = sshll.u32 %s14013_s1, 4  ;;  %s254_s27 = sshll.u32 %s11644_s6, 4  ;;  %s227_s19 = int_to_ptr.hbm [resolvable:$true] %s226_s19  ;;  %s255_s27 = int_to_ptr.vmem [resolvable:$true] %s254_s27 }
  0x27   : > { %11237 = dma.hbm_to_vmem [thread:$0]  (!%p11750_p11), %s227_s19, 24576, %s229_s21, [#allocation6], %s11642_s12, %s11642_s12, %s11643_s4  }
  0x28   : > { %s252_s9 = sshll.u32 %s14014_s3, 4  ;;  %s11646_s18 = smov 8   ;;  %s253_s9 = int_to_ptr.hbm [resolvable:$true] %s252_s9 }
  0x29   : > { %11243 = dma.hbm_to_vmem [thread:$0]  (!%p11750_p11), %s253_s9, 24576, %s255_s27, [#allocation8], %s11645_s16, %s11645_s16, %s11646_s18  }
  0x2a   : > { %s14015_s13 = sand.u32 1, %s11623_s23   ;;  %s295_s30 = smul.u32 24, %s11631_s25 }
  0x2b   : > { %s11215_s20 = smul.u32 24, %s14015_s13 }
  0x2c   : > { %s298_s17 = scalar_lea.hbm %s13976_s5, %s295_s30  ;;  %311 = sbr.rel (%p11741_p8) target bundleno = 1853 (0x73d), region = 44 }
  0x2d   : > { %s294_s1 = scalar_lea.vmem [#allocation12], %s11215_s20  ;;  %s300_s4 = sshll.u32 %s298_s17, 4  ;;  %s301_s4 = int_to_ptr.hbm [resolvable:$true] %s300_s4 }
  0x2e   : > { %s302_s3 = sshll.u32 %s294_s1, 4  ;;  %s303_s3 = int_to_ptr.vmem [resolvable:$true] %s302_s3 }
  0x2f   : > { %11250 = dma.hbm_to_vmem [thread:$0]  (!%p11756_p12), %s301_s4, 384, %s303_s3, %s11780_s2  }
  0x31   : > { %11602 = dma.done.wait (%p11722_p3), [#allocation6], 24576  }
  0x32   : > { %11604 = vsyncadd (%p11722_p3), [#allocation6], 4294942720 }
  0x33   : > { %11606 = dma.done.wait (%p11722_p3), [#allocation8], 24768  }
  0x34   : > { %11608 = vsyncadd (%p11722_p3), [#allocation8], 4294942528  ;;  %s14016_s1 = sadd.s32 4294967295, %s11635_s26   ;;  %s330_s3 = sand.u32 1, %s11619_s22  }
  0x35   : > { %s328_s2 = sand.u32 1, %s14016_s1   ;;  %s11216_s11 = smul.u32 3072, %s330_s3 }
  0x36   : > { %s329_s14 = scalar_lea.sflag [#allocation11], %s328_s2 }
  0x37   : > { %s11817_s15 = scalar_lea.vmem [#allocation10], %s11216_s11 }
  0x38   : > { %11610 = dma.done.wait (%p11733_p6), %s329_s14, 49536  }
  0x39   : > { %11612 = vsyncadd (%p11733_p6), %s329_s14, 4294917760  ;;  %s11217_s19 = smul.u32 24, %s330_s3  ;;  %p7346_p1 = scmp.ne.s32.totalorder %s11627_s24, 0 }
  0x3b   : > { %s11823_s21 = scalar_lea.vmem [#allocation12], %s11217_s19  ;;  %403 = sbr.rel (%p7346_p1) target bundleno = 618 (0x26a), region = 68 }
  0x40   : > { %v7693_v0 = vld [vmem:[#allocation5 + $0x2a0] sm:$0xf]  ;;  %v10534_v1 = vld [vmem:[#allocation5 + $0x2cc] sm:$0xf0]  ;;  %v10528_v5 = vld [vmem:[#allocation5 + $0x2a4] sm:$0xf] }
  0x41   : > { %v8077_v2 = vld [vmem:[#allocation5 + $0x5a0] sm:$0xf]  ;;  %v7694_v3 = vor.u32 %v10534_v1, %v7693_v0  ;;  %v10630_v4 = vld [vmem:[#allocation5 + $0x5cc] sm:$0xf0]  ;;  %v7695_v6 = vld [vmem:[#allocation5 + $0x2d0] sm:$0xf0] }
  0x42   : > { %v8078_v7 = vor.u32 %v10630_v4, %v8077_v2  ;;  %v7698_v8 = vor.u32 %v10528_v5, %v7695_v6  ;;  %v10624_v9 = vld [vmem:[#allocation5 + $0x5a4] sm:$0xf]  ;;  %v8079_v10 = vld [vmem:[#allocation5 + $0x5d0] sm:$0xf0]  ;;  %v7645_v11 = vld [vmem:[#allocation5 + $0x240] sm:$0xf] }
  0x43   : > { %1596 = vmatpush.bf16.msra.mxu0 %v7694_v3  ;;  %v8082_v12 = vor.u32 %v10624_v9, %v8079_v10  ;;  %v10522_v13 = vld [vmem:[#allocation5 + $0x26c] sm:$0xf0]  ;;  %v8029_v14 = vld [vmem:[#allocation5 + $0x540] sm:$0xf]  ;;  %v10516_v18 = vld [vmem:[#allocation5 + $0x244] sm:$0xf] }
  0x44   : > { %v10618_v15 = vld [vmem:[#allocation5 + $0x56c] sm:$0xf0]  ;;  %1610 = vmatpush.bf16.msra.mxu1 %v8078_v7  ;;  %1624 = vmatpush.bf16.msra.mxu2 %v7698_v8  ;;  %v7646_v16 = vor.u32 %v10522_v13, %v7645_v11  ;;  %v7647_v19 = vld [vmem:[#allocation5 + $0x270] sm:$0xf0]  ;;  %v10612_v20 = vld [vmem:[#allocation5 + $0x544] sm:$0xf] }
  0x45   : > { %v8030_v17 = vor.u32 %v10618_v15, %v8029_v14  ;;  %1638 = vmatpush.bf16.msra.mxu3 %v8082_v12  ;;  %v7650_v21 = vor.u32 %v10516_v18, %v7647_v19  ;;  %v8031_v22 = vld [vmem:[#allocation5 + $0x570] sm:$0xf0]  ;;  %v7597_v23 = vld [vmem:[#allocation5 + $0x1e0] sm:$0xf]  ;;  %v10510_v24 = vld [vmem:[#allocation5 + $0x20c] sm:$0xf0] }
  0x46   : > { %v8034_v25 = vor.u32 %v10612_v20, %v8031_v22  ;;  %v7981_v26 = vld [vmem:[#allocation5 + $0x4e0] sm:$0xf]  ;;  %v10606_v27 = vld [vmem:[#allocation5 + $0x50c] sm:$0xf0]  ;;  %v10504_v28 = vld [vmem:[#allocation5 + $0x1e4] sm:$0xf]  ;;  %v7598_v29 = vor.u32 %v10510_v24, %v7597_v23 }
  0x47   : > { %1597 = vmatpush.bf16.msra.mxu0 %v7646_v16  ;;  %v7599_v30 = vld [vmem:[#allocation5 + $0x210] sm:$0xf0]  ;;  %v10600_v31 = vld [vmem:[#allocation5 + $0x4e4] sm:$0xf]  ;;  %v7982_v33 = vor.u32 %v10606_v27, %v7981_v26  ;;  %v7549_v35 = vld [vmem:[#allocation5 + $0x180] sm:$0xf] }
  0x48   : > { %v7983_v32 = vld [vmem:[#allocation5 + $0x510] sm:$0xf0]  ;;  %1611 = vmatpush.bf16.msra.mxu1 %v8030_v17  ;;  %1625 = vmatpush.bf16.msra.mxu2 %v7650_v21  ;;  %v7602_v34 = vor.u32 %v10504_v28, %v7599_v30  ;;  %v10498_v36 = vld [vmem:[#allocation5 + $0x1ac] sm:$0xf0]  ;;  %v7933_v37 = vld [vmem:[#allocation5 + $0x480] sm:$0xf] }
  0x49   : > { %1639 = vmatpush.bf16.msra.mxu3 %v8034_v25  ;;  %v7986_v38 = vor.u32 %v10600_v31, %v7983_v32  ;;  %v10594_v39 = vld [vmem:[#allocation5 + $0x4ac] sm:$0xf0]  ;;  %v10492_v40 = vld [vmem:[#allocation5 + $0x184] sm:$0xf]  ;;  %v7551_v41 = vld [vmem:[#allocation5 + $0x1b0] sm:$0xf0]  ;;  %v7550_v44 = vor.u32 %v10498_v36, %v7549_v35 }
  0x4a   : > { %v10588_v42 = vld [vmem:[#allocation5 + $0x484] sm:$0xf]  ;;  %v7935_v43 = vld [vmem:[#allocation5 + $0x4b0] sm:$0xf0]  ;;  %v7934_v45 = vor.u32 %v10594_v39, %v7933_v37  ;;  %v7554_v46 = vor.u32 %v10492_v40, %v7551_v41  ;;  %v7501_v47 = vld [vmem:[#allocation5 + $0x120] sm:$0xf] }
  0x4b   : > { %1598 = vmatpush.bf16.msra.mxu0 %v7598_v29  ;;  %v10486_v48 = vld [vmem:[#allocation5 + $0x14c] sm:$0xf0]  ;;  %v7885_v49 = vld [vmem:[#allocation5 + $0x420] sm:$0xf]  ;;  %v7938_v50 = vor.u32 %v10588_v42, %v7935_v43  ;;  %v10480_v52 = vld [vmem:[#allocation5 + $0x124] sm:$0xf] }
  0x4c   : > { %1612 = vmatpush.bf16.msra.mxu1 %v7982_v33  ;;  %1626 = vmatpush.bf16.msra.mxu2 %v7602_v34  ;;  %v10582_v51 = vld [vmem:[#allocation5 + $0x44c] sm:$0xf0]  ;;  %v7503_v53 = vld [vmem:[#allocation5 + $0x150] sm:$0xf0]  ;;  %v10576_v54 = vld [vmem:[#allocation5 + $0x424] sm:$0xf]  ;;  %v7502_v56 = vor.u32 %v10486_v48, %v7501_v47 }
  0x4d   : > { %1640 = vmatpush.bf16.msra.mxu3 %v7986_v38  ;;  %v7887_v55 = vld [vmem:[#allocation5 + $0x450] sm:$0xf0]  ;;  %v7886_v57 = vor.u32 %v10582_v51, %v7885_v49  ;;  %v7506_v58 = vor.u32 %v10480_v52, %v7503_v53  ;;  %v7453_v59 = vld [vmem:[#allocation5 + $0xc0] sm:$0xf]  ;;  %v10474_v60 = vld [vmem:[#allocation5 + $0xec] sm:$0xf0] }
  0x4e   : > { %v7837_v61 = vld [vmem:[#allocation5 + $0x3c0] sm:$0xf]  ;;  %v7890_v62 = vor.u32 %v10576_v54, %v7887_v55  ;;  %v10570_v63 = vld [vmem:[#allocation5 + $0x3ec] sm:$0xf0]  ;;  %v10468_v0 = vld [vmem:[#allocation5 + $0xc4] sm:$0xf]  ;;  %v7454_v4 = vor.u32 %v10474_v60, %v7453_v59 }
  0x4f   : > { %1599 = vmatpush.bf16.msra.mxu0 %v7550_v44  ;;  %v7455_v1 = vld [vmem:[#allocation5 + $0xf0] sm:$0xf0]  ;;  %v10564_v2 = vld [vmem:[#allocation5 + $0x3c4] sm:$0xf]  ;;  %v7838_v5 = vor.u32 %v10570_v63, %v7837_v61  ;;  %v7405_v7 = vld [vmem:[#allocation5 + $0x60] sm:$0xf] }
  0x50   : > { %1613 = vmatpush.bf16.msra.mxu1 %v7934_v45  ;;  %1627 = vmatpush.bf16.msra.mxu2 %v7554_v46  ;;  %v7839_v3 = vld [vmem:[#allocation5 + $0x3f0] sm:$0xf0]  ;;  %v7458_v6 = vor.u32 %v10468_v0, %v7455_v1  ;;  %v10462_v8 = vld [vmem:[#allocation5 + $0x8c] sm:$0xf0]  ;;  %v7789_v9 = vld [vmem:[#allocation5 + $0x360] sm:$0xf] }
  0x51   : > { %1641 = vmatpush.bf16.msra.mxu3 %v7938_v50  ;;  %v7842_v10 = vor.u32 %v10564_v2, %v7839_v3  ;;  %v10558_v11 = vld [vmem:[#allocation5 + $0x38c] sm:$0xf0]  ;;  %v10456_v12 = vld [vmem:[#allocation5 + $0x64] sm:$0xf]  ;;  %v7407_v13 = vld [vmem:[#allocation5 + $0x90] sm:$0xf0]  ;;  %v7406_v16 = vor.u32 %v10462_v8, %v7405_v7 }
  0x52   : > { %v10552_v14 = vld [vmem:[#allocation5 + $0x364] sm:$0xf]  ;;  %v7791_v15 = vld [vmem:[#allocation5 + $0x390] sm:$0xf0]  ;;  %v7357_v17 = vld [vmem:[#allocation5] sm:$0xf]  ;;  %v7790_v19 = vor.u32 %v10558_v11, %v7789_v9  ;;  %v7410_v20 = vor.u32 %v10456_v12, %v7407_v13 }
  0x53   : > { %1600 = vmatpush.bf16.msra.mxu0 %v7502_v56  ;;  %v10450_v18 = vld [vmem:[#allocation5 + $0x2c] sm:$0xf0]  ;;  %v7741_v21 = vld [vmem:[#allocation5 + $0x300] sm:$0xf]  ;;  %v10444_v23 = vld [vmem:[#allocation5 + $0x4] sm:$0xf]  ;;  %v7794_v24 = vor.u32 %v10552_v14, %v7791_v15 }
  0x54   : > { %1614 = vmatpush.bf16.msra.mxu1 %v7886_v57  ;;  %1628 = vmatpush.bf16.msra.mxu2 %v7506_v58  ;;  %v10546_v22 = vld [vmem:[#allocation5 + $0x32c] sm:$0xf0]  ;;  %v7359_v25 = vld [vmem:[#allocation5 + $0x30] sm:$0xf0]  ;;  %v10540_v26 = vld [vmem:[#allocation5 + $0x304] sm:$0xf]  ;;  %v7358_v31 = vor.u32 %v10450_v18, %v7357_v17 }
  0x55   : > { %1642 = vmatpush.bf16.msra.mxu3 %v7890_v62  ;;  %v7743_v27 = vld [vmem:[#allocation5 + $0x330] sm:$0xf0]  ;;  %v7701_v28 = vld [vmem:[#allocation5 + $0x2a8] sm:$0xf]  ;;  %v10535_v29 = vld [vmem:[#allocation5 + $0x2d4] sm:$0xf0]  ;;  %v7742_v35 = vor.u32 %v10546_v22, %v7741_v21  ;;  %v7362_v36 = vor.u32 %v10444_v23, %v7359_v25 }
  0x56   : > { %v8085_v30 = vld [vmem:[#allocation5 + $0x5a8] sm:$0xf]  ;;  %v10631_v32 = vld [vmem:[#allocation5 + $0x5d4] sm:$0xf0]  ;;  %v10529_v33 = vld [vmem:[#allocation5 + $0x2ac] sm:$0xf]  ;;  %v7746_v39 = vor.u32 %v10540_v26, %v7743_v27  ;;  %v7702_v40 = vor.u32 %v10535_v29, %v7701_v28 }
  0x57   : > { %1601 = vmatpush.bf16.msra.mxu0 %v7454_v4  ;;  %v7703_v34 = vld [vmem:[#allocation5 + $0x2d8] sm:$0xf0]  ;;  %v10625_v37 = vld [vmem:[#allocation5 + $0x5ac] sm:$0xf]  ;;  %v7653_v41 = vld [vmem:[#allocation5 + $0x248] sm:$0xf]  ;;  %v8086_v42 = vor.u32 %v10631_v32, %v8085_v30 }
  0x58   : > { %1615 = vmatpush.bf16.msra.mxu1 %v7838_v5  ;;  %1629 = vmatpush.bf16.msra.mxu2 %v7458_v6  ;;  %v8087_v38 = vld [vmem:[#allocation5 + $0x5d8] sm:$0xf0]  ;;  %v7706_v43 = vor.u32 %v10529_v33, %v7703_v34  ;;  %v10523_v44 = vld [vmem:[#allocation5 + $0x274] sm:$0xf0]  ;;  %v8037_v45 = vld [vmem:[#allocation5 + $0x548] sm:$0xf] }
  0x59   : > { %1643 = vmatpush.bf16.msra.mxu3 %v7842_v10  ;;  %v10619_v46 = vld [vmem:[#allocation5 + $0x574] sm:$0xf0]  ;;  %v8090_v47 = vor.u32 %v10625_v37, %v8087_v38  ;;  %v10517_v48 = vld [vmem:[#allocation5 + $0x24c] sm:$0xf]  ;;  %v7655_v49 = vld [vmem:[#allocation5 + $0x278] sm:$0xf0]  ;;  %v7654_v54 = vor.u32 %v10523_v44, %v7653_v41 }
  0x5a   : > { %v10613_v50 = vld [vmem:[#allocation5 + $0x54c] sm:$0xf]  ;;  %v8039_v51 = vld [vmem:[#allocation5 + $0x578] sm:$0xf0]  ;;  %v7349_v52 = vld [vmem:[%s13971_s0] sm:$0xf]  ;;  %v8038_v58 = vor.u32 %v10619_v46, %v8037_v45  ;;  %v7658_v59 = vor.u32 %v10517_v48, %v7655_v49 }
  0x5b   : > { %1602 = vmatpush.bf16.msra.mxu0 %v7406_v16  ;;  %v10443_v53 = vld [vmem:[%s13971_s0 + $0x4] sm:$0xf0]  ;;  %v7605_v55 = vld [vmem:[#allocation5 + $0x1e8] sm:$0xf]  ;;  %v10505_v62 = vld [vmem:[#allocation5 + $0x1ec] sm:$0xf]  ;;  %v8042_v63 = vor.u32 %v10613_v50, %v8039_v51 }
  0x5c   : > { %1616 = vmatpush.bf16.msra.mxu1 %v7790_v19  ;;  %1630 = vmatpush.bf16.msra.mxu2 %v7410_v20  ;;  %v10511_v56 = vld [vmem:[#allocation5 + $0x214] sm:$0xf0]  ;;  %v11834_v57 = vor.u32 %v10443_v53, %v7349_v52  ;;  %v7989_v60 = vld [vmem:[#allocation5 + $0x4e8] sm:$0xf]  ;;  %v7607_v0 = vld [vmem:[#allocation5 + $0x218] sm:$0xf0] }
  0x5d   : > { %1644 = vmatpush.bf16.msra.mxu3 %v7794_v24  ;;  %v10607_v61 = vld [vmem:[#allocation5 + $0x514] sm:$0xf0]  ;;  %v10442_v1 = vld [vmem:[%s13971_s0 + $0x4] sm:$0xf]  ;;  %v7351_v2 = vld [vmem:[%s13971_s0 + $0x8] sm:$0xf0]  ;;  %v7606_v6 = vor.u32 %v10511_v56, %v7605_v55  ;;  %v7610_v8 = vor.u32 %v10505_v62, %v7607_v0 }
  0x5e   : > { %v10601_v3 = vld [vmem:[#allocation5 + $0x4ec] sm:$0xf]  ;;  %v7991_v4 = vld [vmem:[#allocation5 + $0x518] sm:$0xf0]  ;;  %v11843_v5 = vor.u32 %v10442_v1, %v7351_v2  ;;  %v7990_v7 = vor.u32 %v10607_v61, %v7989_v60  ;;  %v7557_v9 = vld [vmem:[#allocation5 + $0x188] sm:$0xf] }
  0x5f   : > { %1603 = vmatpush.bf16.msra.mxu0 %v7358_v31  ;;  %v10499_v10 = vld [vmem:[#allocation5 + $0x1b4] sm:$0xf0]  ;;  %v7941_v11 = vld [vmem:[#allocation5 + $0x488] sm:$0xf]  ;;  %v7994_v12 = vor.u32 %v10601_v3, %v7991_v4  ;;  %v10493_v14 = vld [vmem:[#allocation5 + $0x18c] sm:$0xf] }
  0x60   : > { %1617 = vmatpush.bf16.msra.mxu1 %v7742_v35  ;;  %1631 = vmatpush.bf16.msra.mxu2 %v7362_v36  ;;  %v10595_v13 = vld [vmem:[#allocation5 + $0x4b4] sm:$0xf0]  ;;  %v7559_v15 = vld [vmem:[#allocation5 + $0x1b8] sm:$0xf0]  ;;  %v10589_v16 = vld [vmem:[#allocation5 + $0x48c] sm:$0xf]  ;;  %v7558_v18 = vor.u32 %v10499_v10, %v7557_v9 }
  0x61   : > { %1645 = vmatpush.bf16.msra.mxu3 %v7746_v39  ;;  %v7943_v17 = vld [vmem:[#allocation5 + $0x4b8] sm:$0xf0]  ;;  %v7942_v19 = vor.u32 %v10595_v13, %v7941_v11  ;;  %v7562_v20 = vor.u32 %v10493_v14, %v7559_v15  ;;  %v7509_v21 = vld [vmem:[#allocation5 + $0x128] sm:$0xf]  ;;  %v10487_v22 = vld [vmem:[#allocation5 + $0x154] sm:$0xf0] }
  0x62   : > { %1604 = vmatmul.bf16.vlgmr.msra.gmra.mxu0 %v11834_v57  ;;  %v7893_v23 = vld [vmem:[#allocation5 + $0x428] sm:$0xf]  ;;  %v7946_v24 = vor.u32 %v10589_v16, %v7943_v17  ;;  %v10583_v25 = vld [vmem:[#allocation5 + $0x454] sm:$0xf0]  ;;  %v10481_v26 = vld [vmem:[#allocation5 + $0x12c] sm:$0xf]  ;;  %v7510_v30 = vor.u32 %v10487_v22, %v7509_v21 }
  0x63   : > { %1652 = vmatpush.bf16.msrb.mxu0 %v7702_v40  ;;  %1632 = vmatmul.bf16.vlgmr.msra.gmra.mxu2 %v11834_v57  ;;  %v7511_v27 = vld [vmem:[#allocation5 + $0x158] sm:$0xf0]  ;;  %v10577_v28 = vld [vmem:[#allocation5 + $0x42c] sm:$0xf]  ;;  %v7894_v31 = vor.u32 %v10583_v25, %v7893_v23  ;;  %v7461_v33 = vld [vmem:[#allocation5 + $0xc8] sm:$0xf] }
  0x64   : > { %1666 = vmatpush.bf16.msrb.mxu1 %v8086_v42  ;;  %1680 = vmatpush.bf16.msrb.mxu2 %v7706_v43  ;;  %v7895_v29 = vld [vmem:[#allocation5 + $0x458] sm:$0xf0]  ;;  %v7514_v32 = vor.u32 %v10481_v26, %v7511_v27  ;;  %v10475_v34 = vld [vmem:[#allocation5 + $0xf4] sm:$0xf0]  ;;  %v7845_v35 = vld [vmem:[#allocation5 + $0x3c8] sm:$0xf] }
  0x65   : > { %1694 = vmatpush.bf16.msrb.mxu3 %v8090_v47  ;;  %1618 = vmatmul.bf16.vlgmr.msra.gmra.mxu1 %v11843_v5  ;;  %v7898_v36 = vor.u32 %v10577_v28, %v7895_v29  ;;  %v10571_v37 = vld [vmem:[#allocation5 + $0x3f4] sm:$0xf0]  ;;  %v10469_v38 = vld [vmem:[#allocation5 + $0xcc] sm:$0xf]  ;;  %v7463_v39 = vld [vmem:[#allocation5 + $0xf8] sm:$0xf0]  ;;  %v7462_v42 = vor.u32 %v10475_v34, %v7461_v33 }
  0x66   : > { %1646 = vmatmul.bf16.vlgmr.msra.gmra.mxu3 %v11843_v5  ;;  %v10565_v40 = vld [vmem:[#allocation5 + $0x3cc] sm:$0xf]  ;;  %v7847_v41 = vld [vmem:[#allocation5 + $0x3f8] sm:$0xf0]  ;;  %v7846_v43 = vor.u32 %v10571_v37, %v7845_v35  ;;  %v7466_v44 = vor.u32 %v10469_v38, %v7463_v39  ;;  %v7413_v45 = vld [vmem:[#allocation5 + $0x68] sm:$0xf] }
  0x67   : > { %1653 = vmatpush.bf16.msrb.mxu0 %v7654_v54  ;;  %v10463_v46 = vld [vmem:[#allocation5 + $0x94] sm:$0xf0]  ;;  %v7797_v47 = vld [vmem:[#allocation5 + $0x368] sm:$0xf]  ;;  %v7850_v48 = vor.u32 %v10565_v40, %v7847_v41  ;;  %v10457_v50 = vld [vmem:[#allocation5 + $0x6c] sm:$0xf] }
  0x68   : > { %1667 = vmatpush.bf16.msrb.mxu1 %v8038_v58  ;;  %1681 = vmatpush.bf16.msrb.mxu2 %v7658_v59  ;;  %v10559_v49 = vld [vmem:[#allocation5 + $0x394] sm:$0xf0]  ;;  %v7415_v51 = vld [vmem:[#allocation5 + $0x98] sm:$0xf0]  ;;  %v10553_v52 = vld [vmem:[#allocation5 + $0x36c] sm:$0xf]  ;;  %v7414_v54 = vor.u32 %v10463_v46, %v7413_v45 }
  0x69   : > { %1695 = vmatpush.bf16.msrb.mxu3 %v8042_v63  ;;  %v7799_v53 = vld [vmem:[#allocation5 + $0x398] sm:$0xf0]  ;;  %v7365_v55 = vld [vmem:[#allocation5 + $0x8] sm:$0xf]  ;;  %v10451_v56 = vld [vmem:[#allocation5 + $0x34] sm:$0xf0]  ;;  %v7798_v58 = vor.u32 %v10559_v49, %v7797_v47  ;;  %v7418_v59 = vor.u32 %v10457_v50, %v7415_v51 }
  0x6a   : > { %v7749_v60 = vld [vmem:[#allocation5 + $0x308] sm:$0xf]  ;;  %v10547_v61 = vld [vmem:[#allocation5 + $0x334] sm:$0xf0]  ;;  %v10445_v62 = vld [vmem:[#allocation5 + $0xc] sm:$0xf]  ;;  %v7802_v63 = vor.u32 %v10553_v52, %v7799_v53 }
  0x6b   : > { %1654 = vmatpush.bf16.msrb.mxu0 %v7606_v6  ;;  %v7367_v0 = vld [vmem:[#allocation5 + $0x38] sm:$0xf0]  ;;  %v10541_v1 = vld [vmem:[#allocation5 + $0x30c] sm:$0xf]  ;;  %v7709_v3 = vld [vmem:[#allocation5 + $0x2b0] sm:$0xf]  ;;  %v7750_v11 = vor.u32 %v10547_v61, %v7749_v60 }
  0x6c   : > { %1668 = vmatpush.bf16.msrb.mxu1 %v7990_v7  ;;  %1682 = vmatpush.bf16.msrb.mxu2 %v7610_v8  ;;  %v7751_v2 = vld [vmem:[#allocation5 + $0x338] sm:$0xf0]  ;;  %v10536_v4 = vld [vmem:[#allocation5 + $0x2dc] sm:$0xf0]  ;;  %v8093_v6 = vld [vmem:[#allocation5 + $0x5b0] sm:$0xf]  ;;  %v7366_v7 = vor.u32 %v10451_v56, %v7365_v55 }
  0x6d   : > { %1696 = vmatpush.bf16.msrb.mxu3 %v7994_v12  ;;  %v10632_v8 = vld [vmem:[#allocation5 + $0x5dc] sm:$0xf0]  ;;  %v10530_v9 = vld [vmem:[#allocation5 + $0x2b4] sm:$0xf]  ;;  %v7711_v10 = vld [vmem:[#allocation5 + $0x2e0] sm:$0xf0]  ;;  %v7370_v12 = vor.u32 %v10445_v62, %v7367_v0  ;;  %v7754_v15 = vor.u32 %v10541_v1, %v7751_v2  ;;  %v7710_v16 = vor.u32 %v10536_v4, %v7709_v3 }
  0x6e   : > { %v10626_v13 = vld [vmem:[#allocation5 + $0x5b4] sm:$0xf]  ;;  %v8095_v14 = vld [vmem:[#allocation5 + $0x5e0] sm:$0xf0]  ;;  %v8094_v17 = vor.u32 %v10632_v8, %v8093_v6  ;;  %v8045_v21 = vld [vmem:[#allocation5 + $0x550] sm:$0xf] }
  0x6f   : > { %1655 = vmatpush.bf16.msrb.mxu0 %v7558_v18  ;;  %v7714_v18 = vor.u32 %v10530_v9, %v7711_v10  ;;  %v8098_v22 = vor.u32 %v10626_v13, %v8095_v14  ;;  %v10620_v23 = vld [vmem:[#allocation5 + $0x57c] sm:$0xf0]  ;;  %v7663_v25 = vld [vmem:[#allocation5 + $0x280] sm:$0xf0]  ;;  %v10614_v26 = vld [vmem:[#allocation5 + $0x554] sm:$0xf] }
  0x70   : > { %1669 = vmatpush.bf16.msrb.mxu1 %v7942_v19  ;;  %1683 = vmatpush.bf16.msrb.mxu2 %v7562_v20  ;;  %v7661_v19 = vld [vmem:[#allocation5 + $0x250] sm:$0xf]  ;;  %v10524_v20 = vld [vmem:[#allocation5 + $0x27c] sm:$0xf0]  ;;  %v8047_v27 = vld [vmem:[#allocation5 + $0x580] sm:$0xf0]  ;;  %v8046_v29 = vor.u32 %v10620_v23, %v8045_v21 }
  0x71   : > { %1697 = vmatpush.bf16.msrb.mxu3 %v7946_v24  ;;  %v10518_v24 = vld [vmem:[#allocation5 + $0x254] sm:$0xf]  ;;  %v7662_v28 = vor.u32 %v10524_v20, %v7661_v19  ;;  %v7997_v33 = vld [vmem:[#allocation5 + $0x4f0] sm:$0xf]  ;;  %v8050_v34 = vor.u32 %v10614_v26, %v8047_v27  ;;  %v10608_v35 = vld [vmem:[#allocation5 + $0x51c] sm:$0xf0] }
  0x72   : > { %v7615_v37 = vld [vmem:[#allocation5 + $0x220] sm:$0xf0]  ;;  %v10602_v38 = vld [vmem:[#allocation5 + $0x4f4] sm:$0xf]  ;;  %v7998_v41 = vor.u32 %v10608_v35, %v7997_v33  ;;  %v7949_v45 = vld [vmem:[#allocation5 + $0x490] sm:$0xf] }
  0x73   : > { %1656 = vmatpush.bf16.msrb.mxu0 %v7510_v30  ;;  %v7666_v30 = vor.u32 %v10518_v24, %v7663_v25  ;;  %v7999_v39 = vld [vmem:[#allocation5 + $0x520] sm:$0xf0]  ;;  %v10596_v47 = vld [vmem:[#allocation5 + $0x4bc] sm:$0xf0]  ;;  %v10590_v50 = vld [vmem:[#allocation5 + $0x494] sm:$0xf] }
  0x74   : > { %1670 = vmatpush.bf16.msrb.mxu1 %v7894_v31  ;;  %1684 = vmatpush.bf16.msrb.mxu2 %v7514_v32  ;;  %v7613_v31 = vld [vmem:[#allocation5 + $0x1f0] sm:$0xf]  ;;  %v10512_v32 = vld [vmem:[#allocation5 + $0x21c] sm:$0xf0]  ;;  %v8002_v46 = vor.u32 %v10602_v38, %v7999_v39  ;;  %v7567_v49 = vld [vmem:[#allocation5 + $0x1c0] sm:$0xf0]  ;;  %v7950_v53 = vor.u32 %v10596_v47, %v7949_v45 }
  0x75   : > { %1698 = vmatpush.bf16.msrb.mxu3 %v7898_v36  ;;  %v10506_v36 = vld [vmem:[#allocation5 + $0x1f4] sm:$0xf]  ;;  %v7614_v40 = vor.u32 %v10512_v32, %v7613_v31  ;;  %v7951_v51 = vld [vmem:[#allocation5 + $0x4c0] sm:$0xf0]  ;;  %v7517_v55 = vld [vmem:[#allocation5 + $0x130] sm:$0xf] }
  0x76   : > { %v10488_v56 = vld [vmem:[#allocation5 + $0x15c] sm:$0xf0]  ;;  %v10482_v61 = vld [vmem:[#allocation5 + $0x134] sm:$0xf]  ;;  %v7519_v62 = vld [vmem:[#allocation5 + $0x160] sm:$0xf0] }
  0x77   : > { %1657 = vmatpush.bf16.msrb.mxu0 %v7462_v42  ;;  %v7618_v42 = vor.u32 %v10506_v36, %v7615_v37  ;;  %v10584_v60 = vld [vmem:[#allocation5 + $0x45c] sm:$0xf0]  ;;  %v7903_v0 = vld [vmem:[#allocation5 + $0x460] sm:$0xf0]  ;;  %v7518_v1 = vor.u32 %v10488_v56, %v7517_v55  ;;  %v7522_v3 = vor.u32 %v10482_v61, %v7519_v62  ;;  %v7469_v4 = vld [vmem:[#allocation5 + $0xd0] sm:$0xf] }
  0x78   : > { %1671 = vmatpush.bf16.msrb.mxu1 %v7846_v43  ;;  %1685 = vmatpush.bf16.msrb.mxu2 %v7466_v44  ;;  %v7565_v43 = vld [vmem:[#allocation5 + $0x190] sm:$0xf]  ;;  %v10500_v44 = vld [vmem:[#allocation5 + $0x1bc] sm:$0xf0]  ;;  %v10470_v10 = vld [vmem:[#allocation5 + $0xd4] sm:$0xf] }
  0x79   : > { %1699 = vmatpush.bf16.msrb.mxu3 %v7850_v48  ;;  %v10494_v48 = vld [vmem:[#allocation5 + $0x194] sm:$0xf]  ;;  %v7566_v52 = vor.u32 %v10500_v44, %v7565_v43  ;;  %v10476_v6 = vld [vmem:[#allocation5 + $0xfc] sm:$0xf0]  ;;  %v7855_v13 = vld [vmem:[#allocation5 + $0x400] sm:$0xf0] }
  0x7a   : > { %v10572_v9 = vld [vmem:[#allocation5 + $0x3fc] sm:$0xf0]  ;;  %v7470_v14 = vor.u32 %v10476_v6, %v7469_v4  ;;  %v7805_v19 = vld [vmem:[#allocation5 + $0x370] sm:$0xf]  ;;  %v7423_v23 = vld [vmem:[#allocation5 + $0xa0] sm:$0xf0] }
  0x7b   : > { %1658 = vmatpush.bf16.msrb.mxu0 %v7414_v54  ;;  %v7570_v54 = vor.u32 %v10494_v48, %v7567_v49  ;;  %v10560_v21 = vld [vmem:[#allocation5 + $0x39c] sm:$0xf0]  ;;  %v10554_v24 = vld [vmem:[#allocation5 + $0x374] sm:$0xf]  ;;  %v7807_v25 = vld [vmem:[#allocation5 + $0x3a0] sm:$0xf0] }
  0x7c   : > { %1672 = vmatpush.bf16.msrb.mxu1 %v7798_v58  ;;  %1686 = vmatpush.bf16.msrb.mxu2 %v7418_v59  ;;  %v7901_v58 = vld [vmem:[#allocation5 + $0x430] sm:$0xf]  ;;  %v7954_v59 = vor.u32 %v10590_v50, %v7951_v51  ;;  %v10548_v32 = vld [vmem:[#allocation5 + $0x33c] sm:$0xf0]  ;;  %v10446_v33 = vld [vmem:[#allocation5 + $0x14] sm:$0xf] }
  0x7d   : > { %1700 = vmatpush.bf16.msrb.mxu3 %v7802_v63  ;;  %v10578_v63 = vld [vmem:[#allocation5 + $0x434] sm:$0xf]  ;;  %v7902_v2 = vor.u32 %v10584_v60, %v7901_v58  ;;  %v7373_v27 = vld [vmem:[#allocation5 + $0x10] sm:$0xf]  ;;  %v7375_v35 = vld [vmem:[#allocation5 + $0x40] sm:$0xf0] }
  0x7e   : > { %v7906_v8 = vor.u32 %v10578_v63, %v7903_v0  ;;  %v7757_v31 = vld [vmem:[#allocation5 + $0x310] sm:$0xf]  ;;  %v10542_v36 = vld [vmem:[#allocation5 + $0x314] sm:$0xf]  ;;  %v7759_v37 = vld [vmem:[#allocation5 + $0x340] sm:$0xf0] }
  0x7f   : > { %1659 = vmatpush.bf16.msrb.mxu0 %v7366_v7  ;;  %v7853_v7 = vld [vmem:[#allocation5 + $0x3d0] sm:$0xf]  ;;  %v7717_v38 = vld [vmem:[#allocation5 + $0x2b8] sm:$0xf]  ;;  %v10537_v39 = vld [vmem:[#allocation5 + $0x2e4] sm:$0xf0]  ;;  %v7758_v45 = vor.u32 %v10548_v32, %v7757_v31  ;;  %v7762_v49 = vor.u32 %v10542_v36, %v7759_v37 }
  0x80   : > { %1673 = vmatpush.bf16.msrb.mxu1 %v7750_v11  ;;  %1687 = vmatpush.bf16.msrb.mxu2 %v7370_v12  ;;  %v7471_v11 = vld [vmem:[#allocation5 + $0x100] sm:$0xf0]  ;;  %v10566_v12 = vld [vmem:[#allocation5 + $0x3d4] sm:$0xf]  ;;  %v10531_v43 = vld [vmem:[#allocation5 + $0x2bc] sm:$0xf]  ;;  %v7718_v50 = vor.u32 %v10537_v39, %v7717_v38 }
  0x81   : > { %1701 = vmatpush.bf16.msrb.mxu3 %v7754_v15  ;;  %v7854_v15 = vor.u32 %v10572_v9, %v7853_v7  ;;  %v7858_v20 = vor.u32 %v10566_v12, %v7855_v13  ;;  %v7719_v44 = vld [vmem:[#allocation5 + $0x2e8] sm:$0xf0]  ;;  %v10627_v47 = vld [vmem:[#allocation5 + $0x5bc] sm:$0xf]  ;;  %v8053_v55 = vld [vmem:[#allocation5 + $0x558] sm:$0xf] }
  0x82   : > { %1660 = vmatmul.bf16.vlgmr.msrb.gmra.mxu0 %v11834_v57  ;;  %v8103_v48 = vld [vmem:[#allocation5 + $0x5e8] sm:$0xf0]  ;;  %v10621_v58 = vld [vmem:[#allocation5 + $0x584] sm:$0xf0]  ;;  %v10615_v61 = vld [vmem:[#allocation5 + $0x55c] sm:$0xf] }
  0x83   : > { %1708 = vmatpush.bf16.msra.mxu0 %v7710_v16  ;;  %1688 = vmatmul.bf16.vlgmr.msrb.gmra.mxu2 %v11834_v57  ;;  %v7474_v16 = vor.u32 %v10470_v10, %v7471_v11  ;;  %v8106_v56 = vor.u32 %v10627_v47, %v8103_v48  ;;  %v7671_v60 = vld [vmem:[#allocation5 + $0x288] sm:$0xf0]  ;;  %v8054_v0 = vor.u32 %v10621_v58, %v8053_v55  ;;  %v8005_v4 = vld [vmem:[#allocation5 + $0x4f8] sm:$0xf]  ;;  %v10609_v7 = vld [vmem:[#allocation5 + $0x524] sm:$0xf0] }
  0x84   : > { %1722 = vmatpush.bf16.msra.mxu1 %v8094_v17  ;;  %1736 = vmatpush.bf16.msra.mxu2 %v7714_v18  ;;  %v7421_v17 = vld [vmem:[#allocation5 + $0x70] sm:$0xf]  ;;  %v10464_v18 = vld [vmem:[#allocation5 + $0x9c] sm:$0xf0]  ;;  %v8055_v62 = vld [vmem:[#allocation5 + $0x588] sm:$0xf0]  ;;  %v8006_v13 = vor.u32 %v10609_v7, %v8005_v4 }
  0x85   : > { %1750 = vmatpush.bf16.msra.mxu3 %v8098_v22  ;;  %1674 = vmatmul.bf16.vlgmr.msrb.gmra.mxu1 %v11843_v5  ;;  %v10458_v22 = vld [vmem:[#allocation5 + $0x74] sm:$0xf]  ;;  %v7422_v26 = vor.u32 %v10464_v18, %v7421_v17  ;;  %v8058_v6 = vor.u32 %v10615_v61, %v8055_v62  ;;  %v7623_v9 = vld [vmem:[#allocation5 + $0x228] sm:$0xf0]  ;;  %v10603_v10 = vld [vmem:[#allocation5 + $0x4fc] sm:$0xf] }
  0x86   : > { %1702 = vmatmul.bf16.vlgmr.msrb.gmra.mxu3 %v11843_v5  ;;  %v8007_v11 = vld [vmem:[#allocation5 + $0x528] sm:$0xf0]  ;;  %v7957_v17 = vld [vmem:[#allocation5 + $0x498] sm:$0xf]  ;;  %v10585_v31 = vld [vmem:[#allocation5 + $0x464] sm:$0xf0] }
  0x87   : > { %1709 = vmatpush.bf16.msra.mxu0 %v7662_v28  ;;  %v10452_v28 = vld [vmem:[#allocation5 + $0x3c] sm:$0xf0]  ;;  %v8010_v18 = vor.u32 %v10603_v10, %v8007_v11  ;;  %v10483_v32 = vld [vmem:[#allocation5 + $0x13c] sm:$0xf]  ;;  %v7477_v39 = vld [vmem:[#allocation5 + $0xd8] sm:$0xf] }
  0x88   : > { %1723 = vmatpush.bf16.msra.mxu1 %v8046_v29  ;;  %1737 = vmatpush.bf16.msra.mxu2 %v7666_v30  ;;  %v7806_v29 = vor.u32 %v10560_v21, %v7805_v19  ;;  %v7426_v30 = vor.u32 %v10458_v22, %v7423_v23  ;;  %v10597_v19 = vld [vmem:[#allocation5 + $0x4c4] sm:$0xf0]  ;;  %v7575_v21 = vld [vmem:[#allocation5 + $0x1c8] sm:$0xf0]  ;;  %v10591_v22 = vld [vmem:[#allocation5 + $0x49c] sm:$0xf] }
  0x89   : > { %1751 = vmatpush.bf16.msra.mxu3 %v8050_v34  ;;  %v7810_v34 = vor.u32 %v10554_v24, %v7807_v25  ;;  %v7959_v23 = vld [vmem:[#allocation5 + $0x4c8] sm:$0xf0]  ;;  %v7958_v25 = vor.u32 %v10597_v19, %v7957_v17  ;;  %v10561_v55 = vld [vmem:[#allocation5 + $0x3a4] sm:$0xf0]  ;;  %v7381_v62 = vld [vmem:[#allocation5 + $0x18] sm:$0xf] }
  0x8a   : > { %v7863_v47 = vld [vmem:[#allocation5 + $0x408] sm:$0xf0]  ;;  %v10447_v4 = vld [vmem:[#allocation5 + $0x1c] sm:$0xf]  ;;  %v7725_v10 = vld [vmem:[#allocation5 + $0x2c0] sm:$0xf] }
  0x8b   : > { %1710 = vmatpush.bf16.msra.mxu0 %v7614_v40  ;;  %v8101_v40 = vld [vmem:[#allocation5 + $0x5b8] sm:$0xf]  ;;  %v7431_v58 = vld [vmem:[#allocation5 + $0xa8] sm:$0xf0]  ;;  %v10538_v11 = vld [vmem:[#allocation5 + $0x2ec] sm:$0xf0] }
  0x8c   : > { %1724 = vmatpush.bf16.msra.mxu1 %v7998_v41  ;;  %1738 = vmatpush.bf16.msra.mxu2 %v7618_v42  ;;  %v7374_v41 = vor.u32 %v10452_v28, %v7373_v27  ;;  %v10633_v42 = vld [vmem:[#allocation5 + $0x5e4] sm:$0xf0]  ;;  %v7525_v27 = vld [vmem:[#allocation5 + $0x138] sm:$0xf]  ;;  %v7383_v7 = vld [vmem:[#allocation5 + $0x48] sm:$0xf0] }
  0x8d   : > { %1752 = vmatpush.bf16.msra.mxu3 %v8002_v46  ;;  %v7378_v46 = vor.u32 %v10446_v33, %v7375_v35  ;;  %v8102_v51 = vor.u32 %v10633_v42, %v8101_v40  ;;  %v10489_v28 = vld [vmem:[#allocation5 + $0x164] sm:$0xf0]  ;;  %v7527_v33 = vld [vmem:[#allocation5 + $0x168] sm:$0xf0]  ;;  %v10628_v19 = vld [vmem:[#allocation5 + $0x5c4] sm:$0xf] }
  0x8e   : > { %v7911_v35 = vld [vmem:[#allocation5 + $0x468] sm:$0xf0]  ;;  %v7526_v36 = vor.u32 %v10489_v28, %v7525_v27  ;;  %v7530_v38 = vor.u32 %v10483_v32, %v7527_v33  ;;  %v10477_v40 = vld [vmem:[#allocation5 + $0x104] sm:$0xf0]  ;;  %v8061_v27 = vld [vmem:[#allocation5 + $0x560] sm:$0xf] }
  0x8f   : > { %1711 = vmatpush.bf16.msra.mxu0 %v7566_v52  ;;  %v7722_v52 = vor.u32 %v10531_v43, %v7719_v44  ;;  %v10573_v43 = vld [vmem:[#allocation5 + $0x404] sm:$0xf0]  ;;  %v10471_v44 = vld [vmem:[#allocation5 + $0xdc] sm:$0xf]  ;;  %v7478_v48 = vor.u32 %v10477_v40, %v7477_v39  ;;  %v10616_v32 = vld [vmem:[#allocation5 + $0x564] sm:$0xf] }
  0x90   : > { %1725 = vmatpush.bf16.msra.mxu1 %v7950_v53  ;;  %1739 = vmatpush.bf16.msra.mxu2 %v7570_v54  ;;  %v7669_v53 = vld [vmem:[#allocation5 + $0x258] sm:$0xf]  ;;  %v10525_v54 = vld [vmem:[#allocation5 + $0x284] sm:$0xf0]  ;;  %v8063_v33 = vld [vmem:[#allocation5 + $0x590] sm:$0xf0] }
  0x91   : > { %1753 = vmatpush.bf16.msra.mxu3 %v7954_v59  ;;  %v10519_v59 = vld [vmem:[#allocation5 + $0x25c] sm:$0xf]  ;;  %v7670_v63 = vor.u32 %v10525_v54, %v7669_v53  ;;  %v7813_v53 = vld [vmem:[#allocation5 + $0x378] sm:$0xf]  ;;  %v8013_v39 = vld [vmem:[#allocation5 + $0x500] sm:$0xf]  ;;  %v8066_v40 = vor.u32 %v10616_v32, %v8063_v33 }
  0x92   : > { %v7389_v33 = vld [vmem:[#allocation5 + $0x20] sm:$0xf]  ;;  %vm3460_vm0 = vcmask 7168  }
  0x93   : > { %1712 = vmatpush.bf16.msra.mxu0 %v7518_v1  ;;  %v7674_v1 = vor.u32 %v10519_v59, %v7671_v60  ;;  %v10555_v59 = vld [vmem:[#allocation5 + $0x37c] sm:$0xf]  ;;  %v7815_v60 = vld [vmem:[#allocation5 + $0x3a8] sm:$0xf0] }
  0x94   : > { %1726 = vmatpush.bf16.msra.mxu1 %v7902_v2  ;;  %1740 = vmatpush.bf16.msra.mxu2 %v7522_v3  ;;  %v7621_v2 = vld [vmem:[#allocation5 + $0x1f8] sm:$0xf]  ;;  %v10513_v3 = vld [vmem:[#allocation5 + $0x224] sm:$0xf0] }
  0x95   : > { %1754 = vmatpush.bf16.msra.mxu3 %v7906_v8  ;;  %v10507_v8 = vld [vmem:[#allocation5 + $0x1fc] sm:$0xf]  ;;  %v7622_v12 = vor.u32 %v10513_v3, %v7621_v2  ;;  %v7765_v2 = vld [vmem:[#allocation5 + $0x318] sm:$0xf]  ;;  %v10549_v3 = vld [vmem:[#allocation5 + $0x344] sm:$0xf0] }
  0x96   : > { %v7766_v17 = vor.u32 %v10549_v3, %v7765_v2  ;;  %v10586_v2 = vld [vmem:[#allocation5 + $0x46c] sm:$0xf0]  ;;  %v10484_v3 = vld [vmem:[#allocation5 + $0x144] sm:$0xf] }
  0x97   : > { %1713 = vmatpush.bf16.msra.mxu0 %v7470_v14  ;;  %v7626_v14 = vor.u32 %v10507_v8, %v7623_v9  ;;  %v10543_v8 = vld [vmem:[#allocation5 + $0x31c] sm:$0xf]  ;;  %v7767_v9 = vld [vmem:[#allocation5 + $0x348] sm:$0xf0] }
  0x98   : > { %1727 = vmatpush.bf16.msra.mxu1 %v7854_v15  ;;  %1741 = vmatpush.bf16.msra.mxu2 %v7474_v16  ;;  %v7573_v15 = vld [vmem:[#allocation5 + $0x198] sm:$0xf]  ;;  %v10501_v16 = vld [vmem:[#allocation5 + $0x1c4] sm:$0xf0] }
  0x99   : > { %1755 = vmatpush.bf16.msra.mxu3 %v7858_v20  ;;  %v10495_v20 = vld [vmem:[#allocation5 + $0x19c] sm:$0xf]  ;;  %v7574_v24 = vor.u32 %v10501_v16, %v7573_v15  ;;  %v10532_v15 = vld [vmem:[#allocation5 + $0x2c4] sm:$0xf]  ;;  %v7727_v16 = vld [vmem:[#allocation5 + $0x2f0] sm:$0xf0] }
  0x9b   : > { %1714 = vmatpush.bf16.msra.mxu0 %v7422_v26  ;;  %v7578_v26 = vor.u32 %v10495_v20, %v7575_v21  ;;  %v8111_v20 = vld [vmem:[#allocation5 + $0x5f0] sm:$0xf0]  ;;  %v7770_v21 = vor.u32 %v10543_v8, %v7767_v9 }
  0x9c   : > { %1728 = vmatpush.bf16.msra.mxu1 %v7806_v29  ;;  %1742 = vmatpush.bf16.msra.mxu2 %v7426_v30  ;;  %v7909_v29 = vld [vmem:[#allocation5 + $0x438] sm:$0xf]  ;;  %v7962_v30 = vor.u32 %v10591_v22, %v7959_v23  ;;  %v7726_v22 = vor.u32 %v10538_v11, %v7725_v10  ;;  %v8114_v28 = vor.u32 %v10628_v19, %v8111_v20  ;;  %v7485_v11 = vld [vmem:[#allocation5 + $0xe0] sm:$0xf]  ;;  %v7871_v19 = vld [vmem:[#allocation5 + $0x410] sm:$0xf0] }
  0x9d   : > { %1756 = vmatpush.bf16.msra.mxu3 %v7810_v34  ;;  %v10579_v34 = vld [vmem:[#allocation5 + $0x43c] sm:$0xf]  ;;  %v7910_v37 = vor.u32 %v10585_v31, %v7909_v29  ;;  %v10622_v29 = vld [vmem:[#allocation5 + $0x58c] sm:$0xf0]  ;;  %v7679_v31 = vld [vmem:[#allocation5 + $0x290] sm:$0xf0] }
  0x9e   : > { %v7914_v42 = vor.u32 %v10579_v34, %v7911_v35  ;;  %v8062_v35 = vor.u32 %v10622_v29, %v8061_v27  ;;  %v10562_v27 = vld [vmem:[#allocation5 + $0x3ac] sm:$0xf0]  ;;  %v7439_v29 = vld [vmem:[#allocation5 + $0xb0] sm:$0xf0] }
  0x9f   : > { %1715 = vmatpush.bf16.msra.mxu0 %v7374_v41  ;;  %v7861_v41 = vld [vmem:[#allocation5 + $0x3d8] sm:$0xf] }
  0xa0   : > { %1729 = vmatpush.bf16.msra.mxu1 %v7758_v45  ;;  %1743 = vmatpush.bf16.msra.mxu2 %v7378_v46  ;;  %v7479_v45 = vld [vmem:[#allocation5 + $0x108] sm:$0xf0]  ;;  %v10567_v46 = vld [vmem:[#allocation5 + $0x3dc] sm:$0xf] }
  0xa1   : > { %1757 = vmatpush.bf16.msra.mxu3 %v7762_v49  ;;  %v7862_v49 = vor.u32 %v10573_v43, %v7861_v41  ;;  %v7866_v54 = vor.u32 %v10567_v46, %v7863_v47  ;;  %v10610_v41 = vld [vmem:[#allocation5 + $0x52c] sm:$0xf0]  ;;  %v7631_v43 = vld [vmem:[#allocation5 + $0x230] sm:$0xf0] }
  0xa2   : > { %1716 = vmatmul.bf16.vlgmr.msra.gmra.mxu0 %v11834_v57  ;;  %v8014_v47 = vor.u32 %v10610_v41, %v8013_v39  ;;  %v10448_v39 = vld [vmem:[#allocation5 + $0x24] sm:$0xf]  ;;  %v7391_v41 = vld [vmem:[#allocation5 + $0x50] sm:$0xf0] }
  0xa3   : > { %1764 = vmatpush.bf16.msrb.mxu0 %v7718_v50  ;;  %1744 = vmatmul.bf16.vlgmr.msra.gmra.mxu2 %v11834_v57  ;;  %v7482_v50 = vor.u32 %v10471_v44, %v7479_v45  ;;  %v10604_v44 = vld [vmem:[#allocation5 + $0x504] sm:$0xf]  ;;  %v8015_v45 = vld [vmem:[#allocation5 + $0x530] sm:$0xf0] }
  0xa4   : > { %1778 = vmatpush.bf16.msrb.mxu1 %v8102_v51  ;;  %1792 = vmatpush.bf16.msrb.mxu2 %v7722_v52  ;;  %v7429_v51 = vld [vmem:[#allocation5 + $0x78] sm:$0xf]  ;;  %v10465_v52 = vld [vmem:[#allocation5 + $0xa4] sm:$0xf0] }
  0xa5   : > { %1806 = vmatpush.bf16.msrb.mxu3 %v8106_v56  ;;  %1730 = vmatmul.bf16.vlgmr.msra.gmra.mxu1 %v11843_v5  ;;  %v10459_v56 = vld [vmem:[#allocation5 + $0x7c] sm:$0xf]  ;;  %v7430_v61 = vor.u32 %v10465_v52, %v7429_v51  ;;  %v7965_v51 = vld [vmem:[#allocation5 + $0x4a0] sm:$0xf]  ;;  %v8018_v52 = vor.u32 %v10604_v44, %v8015_v45  ;;  %v7733_v44 = vld [vmem:[#allocation5 + $0x2c8] sm:$0xf] }
  0xa6   : > { %1758 = vmatmul.bf16.vlgmr.msra.gmra.mxu3 %v11843_v5  ;;  %v10539_v45 = vld [vmem:[#allocation5 + $0x2f4] sm:$0xf0] }
  0xa7   : > { %1765 = vmatpush.bf16.msrb.mxu0 %v7670_v63  ;;  %v10453_v63 = vld [vmem:[#allocation5 + $0x44] sm:$0xf0] }
  0xa8   : > { %1779 = vmatpush.bf16.msrb.mxu1 %v8054_v0  ;;  %1793 = vmatpush.bf16.msrb.mxu2 %v7674_v1  ;;  %v7814_v0 = vor.u32 %v10561_v55, %v7813_v53  ;;  %v7434_v1 = vor.u32 %v10459_v56, %v7431_v58  ;;  %v10598_v53 = vld [vmem:[#allocation5 + $0x4cc] sm:$0xf0]  ;;  %v7583_v55 = vld [vmem:[#allocation5 + $0x1d0] sm:$0xf0]  ;;  %v10592_v56 = vld [vmem:[#allocation5 + $0x4a4] sm:$0xf] }
  0xa9   : > { %1807 = vmatpush.bf16.msrb.mxu3 %v8058_v6  ;;  %v7818_v6 = vor.u32 %v10555_v59, %v7815_v60  ;;  %v7967_v58 = vld [vmem:[#allocation5 + $0x4d0] sm:$0xf0]  ;;  %v7966_v60 = vor.u32 %v10598_v53, %v7965_v51  ;;  %v10629_v53 = vld [vmem:[#allocation5 + $0x5cc] sm:$0xf] }
  0xab   : > { %1766 = vmatpush.bf16.msrb.mxu0 %v7622_v12  ;;  %v8109_v12 = vld [vmem:[#allocation5 + $0x5c0] sm:$0xf] }
  0xac   : > { %1780 = vmatpush.bf16.msrb.mxu1 %v8006_v13  ;;  %1794 = vmatpush.bf16.msrb.mxu2 %v7626_v14  ;;  %v7382_v13 = vor.u32 %v10453_v63, %v7381_v62  ;;  %v10634_v14 = vld [vmem:[#allocation5 + $0x5ec] sm:$0xf0]  ;;  %v7533_v62 = vld [vmem:[#allocation5 + $0x140] sm:$0xf] }
  0xad   : > { %1808 = vmatpush.bf16.msrb.mxu3 %v8010_v18  ;;  %v7386_v18 = vor.u32 %v10447_v4, %v7383_v7  ;;  %v8110_v23 = vor.u32 %v10634_v14, %v8109_v12  ;;  %v10490_v63 = vld [vmem:[#allocation5 + $0x16c] sm:$0xf0]  ;;  %v7535_v4 = vld [vmem:[#allocation5 + $0x170] sm:$0xf0] }
  0xae   : > { %v7919_v7 = vld [vmem:[#allocation5 + $0x470] sm:$0xf0]  ;;  %v7534_v8 = vor.u32 %v10490_v63, %v7533_v62  ;;  %v7538_v10 = vor.u32 %v10484_v3, %v7535_v4  ;;  %v10478_v12 = vld [vmem:[#allocation5 + $0x10c] sm:$0xf0]  ;;  %v8069_v62 = vld [vmem:[#allocation5 + $0x568] sm:$0xf] }
  0xaf   : > { %1767 = vmatpush.bf16.msrb.mxu0 %v7574_v24  ;;  %v7730_v24 = vor.u32 %v10532_v15, %v7727_v16  ;;  %v10574_v15 = vld [vmem:[#allocation5 + $0x40c] sm:$0xf0]  ;;  %v10472_v16 = vld [vmem:[#allocation5 + $0xe4] sm:$0xf]  ;;  %v7486_v20 = vor.u32 %v10478_v12, %v7485_v11  ;;  %v10617_v3 = vld [vmem:[#allocation5 + $0x56c] sm:$0xf] }
  0xb0   : > { %1781 = vmatpush.bf16.msrb.mxu1 %v7958_v25  ;;  %1795 = vmatpush.bf16.msrb.mxu2 %v7578_v26  ;;  %v7677_v25 = vld [vmem:[#allocation5 + $0x260] sm:$0xf]  ;;  %v10526_v26 = vld [vmem:[#allocation5 + $0x28c] sm:$0xf0]  ;;  %v8071_v4 = vld [vmem:[#allocation5 + $0x598] sm:$0xf0] }
  0xb1   : > { %1809 = vmatpush.bf16.msrb.mxu3 %v7962_v30  ;;  %v10520_v30 = vld [vmem:[#allocation5 + $0x264] sm:$0xf]  ;;  %v7678_v34 = vor.u32 %v10526_v26, %v7677_v25  ;;  %v7821_v25 = vld [vmem:[#allocation5 + $0x380] sm:$0xf]  ;;  %v8021_v11 = vld [vmem:[#allocation5 + $0x508] sm:$0xf]  ;;  %v8074_v12 = vor.u32 %v10617_v3, %v8071_v4 }
  0xb2   : > { %v7831_v3 = vld [vmem:[#allocation5 + $0x3b8] sm:$0xf0] }
  0xb3   : > { %1768 = vmatpush.bf16.msrb.mxu0 %v7526_v36  ;;  %v7682_v36 = vor.u32 %v10520_v30, %v7679_v31  ;;  %v10556_v30 = vld [vmem:[#allocation5 + $0x384] sm:$0xf]  ;;  %v7823_v31 = vld [vmem:[#allocation5 + $0x3b0] sm:$0xf0] }
  0xb4   : > { %1782 = vmatpush.bf16.msrb.mxu1 %v7910_v37  ;;  %1796 = vmatpush.bf16.msrb.mxu2 %v7530_v38  ;;  %v7629_v37 = vld [vmem:[#allocation5 + $0x200] sm:$0xf]  ;;  %v10514_v38 = vld [vmem:[#allocation5 + $0x22c] sm:$0xf0] }
  0xb5   : > { %1810 = vmatpush.bf16.msrb.mxu3 %v7914_v42  ;;  %v10508_v42 = vld [vmem:[#allocation5 + $0x204] sm:$0xf]  ;;  %v7630_v46 = vor.u32 %v10514_v38, %v7629_v37  ;;  %v7773_v37 = vld [vmem:[#allocation5 + $0x320] sm:$0xf]  ;;  %v10550_v38 = vld [vmem:[#allocation5 + $0x34c] sm:$0xf0] }
  0xb6   : > { %v7774_v51 = vor.u32 %v10550_v38, %v7773_v37  ;;  %v10587_v37 = vld [vmem:[#allocation5 + $0x474] sm:$0xf0]  ;;  %v10485_v38 = vld [vmem:[#allocation5 + $0x14c] sm:$0xf] }
  0xb7   : > { %1769 = vmatpush.bf16.msrb.mxu0 %v7478_v48  ;;  %v7634_v48 = vor.u32 %v10508_v42, %v7631_v43  ;;  %v10544_v42 = vld [vmem:[#allocation5 + $0x324] sm:$0xf]  ;;  %v7775_v43 = vld [vmem:[#allocation5 + $0x350] sm:$0xf0] }
  0xb8   : > { %1783 = vmatpush.bf16.msrb.mxu1 %v7862_v49  ;;  %1797 = vmatpush.bf16.msrb.mxu2 %v7482_v50  ;;  %v7581_v49 = vld [vmem:[#allocation5 + $0x1a0] sm:$0xf]  ;;  %v10502_v50 = vld [vmem:[#allocation5 + $0x1cc] sm:$0xf0] }
  0xb9   : > { %1811 = vmatpush.bf16.msrb.mxu3 %v7866_v54  ;;  %v10496_v54 = vld [vmem:[#allocation5 + $0x1a4] sm:$0xf]  ;;  %v7582_v59 = vor.u32 %v10502_v50, %v7581_v49  ;;  %v10533_v49 = vld [vmem:[#allocation5 + $0x2cc] sm:$0xf]  ;;  %v7735_v50 = vld [vmem:[#allocation5 + $0x2f8] sm:$0xf0] }
  0xbb   : > { %1770 = vmatpush.bf16.msrb.mxu0 %v7430_v61  ;;  %v7586_v61 = vor.u32 %v10496_v54, %v7583_v55  ;;  %v8119_v54 = vld [vmem:[#allocation5 + $0x5f8] sm:$0xf0]  ;;  %v7778_v55 = vor.u32 %v10544_v42, %v7775_v43 }
  0xbc   : > { %1784 = vmatpush.bf16.msrb.mxu1 %v7814_v0  ;;  %1798 = vmatpush.bf16.msrb.mxu2 %v7434_v1  ;;  %v7917_v0 = vld [vmem:[#allocation5 + $0x440] sm:$0xf]  ;;  %v7970_v1 = vor.u32 %v10592_v56, %v7967_v58  ;;  %v7734_v56 = vor.u32 %v10539_v45, %v7733_v44  ;;  %v8122_v63 = vor.u32 %v10629_v53, %v8119_v54  ;;  %v7493_v45 = vld [vmem:[#allocation5 + $0xe8] sm:$0xf]  ;;  %v7879_v53 = vld [vmem:[#allocation5 + $0x418] sm:$0xf0] }
  0xbd   : > { %1812 = vmatpush.bf16.msrb.mxu3 %v7818_v6  ;;  %v10580_v6 = vld [vmem:[#allocation5 + $0x444] sm:$0xf]  ;;  %v7918_v9 = vor.u32 %v10586_v2, %v7917_v0  ;;  %v10623_v0 = vld [vmem:[#allocation5 + $0x594] sm:$0xf0]  ;;  %v7687_v2 = vld [vmem:[#allocation5 + $0x298] sm:$0xf0] }
  0xbe   : > { %v7922_v14 = vor.u32 %v10580_v6, %v7919_v7  ;;  %v8070_v7 = vor.u32 %v10623_v0, %v8069_v62  ;;  %v10563_v62 = vld [vmem:[#allocation5 + $0x3b4] sm:$0xf0]  ;;  %v7447_v0 = vld [vmem:[#allocation5 + $0xb8] sm:$0xf0] }
  0xbf   : > { %1771 = vmatpush.bf16.msrb.mxu0 %v7382_v13  ;;  %v7869_v13 = vld [vmem:[#allocation5 + $0x3e0] sm:$0xf] }
  0xc0   : > { %1785 = vmatpush.bf16.msrb.mxu1 %v7766_v17  ;;  %1799 = vmatpush.bf16.msrb.mxu2 %v7386_v18  ;;  %v7487_v17 = vld [vmem:[#allocation5 + $0x110] sm:$0xf0]  ;;  %v10568_v18 = vld [vmem:[#allocation5 + $0x3e4] sm:$0xf] }
  0xc1   : > { %1813 = vmatpush.bf16.msrb.mxu3 %v7770_v21  ;;  %v7870_v21 = vor.u32 %v10574_v15, %v7869_v13  ;;  %v7874_v26 = vor.u32 %v10568_v18, %v7871_v19  ;;  %v10611_v13 = vld [vmem:[#allocation5 + $0x534] sm:$0xf0]  ;;  %v7639_v15 = vld [vmem:[#allocation5 + $0x238] sm:$0xf0] }
  0xc2   : > { %1772 = vmatmul.bf16.vlgmr.msrb.gmra.mxu0 %v11834_v57  ;;  %v8022_v19 = vor.u32 %v10611_v13, %v8021_v11  ;;  %v7781_v11 = vld [vmem:[#allocation5 + $0x328] sm:$0xf]  ;;  %v10449_v13 = vld [vmem:[#allocation5 + $0x2c] sm:$0xf] }
  0xc3   : > { %1820 = vmatpush.bf16.msra.mxu0 %v7726_v22  ;;  %1800 = vmatmul.bf16.vlgmr.msrb.gmra.mxu2 %v11834_v57  ;;  %v7490_v22 = vor.u32 %v10472_v16, %v7487_v17  ;;  %v10605_v16 = vld [vmem:[#allocation5 + $0x50c] sm:$0xf]  ;;  %v8023_v17 = vld [vmem:[#allocation5 + $0x538] sm:$0xf0] }
  0xc4   : > { %1834 = vmatpush.bf16.msra.mxu1 %v8110_v23  ;;  %1848 = vmatpush.bf16.msra.mxu2 %v7730_v24  ;;  %v7437_v23 = vld [vmem:[#allocation5 + $0x80] sm:$0xf]  ;;  %v10466_v24 = vld [vmem:[#allocation5 + $0xac] sm:$0xf0] }
  0xc5   : > { %1862 = vmatpush.bf16.msra.mxu3 %v8114_v28  ;;  %1786 = vmatmul.bf16.vlgmr.msrb.gmra.mxu1 %v11843_v5  ;;  %v10460_v28 = vld [vmem:[#allocation5 + $0x84] sm:$0xf]  ;;  %v7438_v32 = vor.u32 %v10466_v24, %v7437_v23  ;;  %v7973_v23 = vld [vmem:[#allocation5 + $0x4a8] sm:$0xf]  ;;  %v8026_v24 = vor.u32 %v10605_v16, %v8023_v17  ;;  %v10545_v16 = vld [vmem:[#allocation5 + $0x32c] sm:$0xf] }
  0xc6   : > { %1814 = vmatmul.bf16.vlgmr.msrb.gmra.mxu3 %v11843_v5  ;;  %v7783_v17 = vld [vmem:[#allocation5 + $0x358] sm:$0xf0] }
  0xc7   : > { %1821 = vmatpush.bf16.msra.mxu0 %v7678_v34  ;;  %v10454_v34 = vld [vmem:[#allocation5 + $0x4c] sm:$0xf0] }
  0xc8   : > { %1835 = vmatpush.bf16.msra.mxu1 %v8062_v35  ;;  %1849 = vmatpush.bf16.msra.mxu2 %v7682_v36  ;;  %v7822_v35 = vor.u32 %v10562_v27, %v7821_v25  ;;  %v7442_v36 = vor.u32 %v10460_v28, %v7439_v29  ;;  %v10599_v25 = vld [vmem:[#allocation5 + $0x4d4] sm:$0xf0]  ;;  %v7591_v27 = vld [vmem:[#allocation5 + $0x1d8] sm:$0xf0]  ;;  %v10593_v28 = vld [vmem:[#allocation5 + $0x4ac] sm:$0xf] }
  0xc9   : > { %1863 = vmatpush.bf16.msra.mxu3 %v8066_v40  ;;  %v7826_v40 = vor.u32 %v10556_v30, %v7823_v31  ;;  %v7975_v29 = vld [vmem:[#allocation5 + $0x4d8] sm:$0xf0]  ;;  %v7974_v31 = vor.u32 %v10599_v25, %v7973_v23  ;;  %v10667_v23 = vld [vmem:[#allocation9 + $0xf4] sm:$0xf0] }
  0xca   : > { %v10683_v25 = vld [vmem:[#allocation9 + $0x174] sm:$0xf0] }
  0xcb   : > { %1822 = vmatpush.bf16.msra.mxu0 %v7630_v46  ;;  %v8117_v46 = vld [vmem:[#allocation5 + $0x5c8] sm:$0xf] }
  0xcc   : > { %1836 = vmatpush.bf16.msra.mxu1 %v8014_v47  ;;  %1850 = vmatpush.bf16.msra.mxu2 %v7634_v48  ;;  %v7390_v47 = vor.u32 %v10454_v34, %v7389_v33  ;;  %v10635_v48 = vld [vmem:[#allocation5 + $0x5f4] sm:$0xf0]  ;;  %v7541_v33 = vld [vmem:[#allocation5 + $0x148] sm:$0xf] }
  0xcd   : > { %1864 = vmatpush.bf16.msra.mxu3 %v8018_v52  ;;  %v7394_v52 = vor.u32 %v10448_v39, %v7391_v41  ;;  %v8118_v58 = vor.u32 %v10635_v48, %v8117_v46  ;;  %v10491_v34 = vld [vmem:[#allocation5 + $0x174] sm:$0xf0]  ;;  %v7543_v39 = vld [vmem:[#allocation5 + $0x178] sm:$0xf0] }
  0xce   : > { %v7927_v41 = vld [vmem:[#allocation5 + $0x478] sm:$0xf0]  ;;  %v7542_v42 = vor.u32 %v10491_v34, %v7541_v33  ;;  %v7546_v44 = vor.u32 %v10485_v38, %v7543_v39  ;;  %v10479_v46 = vld [vmem:[#allocation5 + $0x114] sm:$0xf0]  ;;  %v10665_v38 = vld [vmem:[#allocation9 + $0xe4] sm:$0xf0] }
  0xcf   : > { %1823 = vmatpush.bf16.msra.mxu0 %v7582_v59  ;;  %v7738_v59 = vor.u32 %v10533_v49, %v7735_v50  ;;  %v10575_v49 = vld [vmem:[#allocation5 + $0x414] sm:$0xf0]  ;;  %v10473_v50 = vld [vmem:[#allocation5 + $0xec] sm:$0xf]  ;;  %v7494_v54 = vor.u32 %v10479_v46, %v7493_v45 }
  0xd0   : > { %1837 = vmatpush.bf16.msra.mxu1 %v7966_v60  ;;  %1851 = vmatpush.bf16.msra.mxu2 %v7586_v61  ;;  %v7685_v60 = vld [vmem:[#allocation5 + $0x268] sm:$0xf]  ;;  %v10527_v61 = vld [vmem:[#allocation5 + $0x294] sm:$0xf0]  ;;  %v8301_v39 = vld [vmem:[#allocation9 + $0x160] sm:$0xf] }
  0xd1   : > { %1865 = vmatpush.bf16.msra.mxu3 %v7970_v1  ;;  %v10521_v1 = vld [vmem:[#allocation5 + $0x26c] sm:$0xf]  ;;  %v7686_v6 = vor.u32 %v10527_v61, %v7685_v60  ;;  %v7829_v60 = vld [vmem:[#allocation5 + $0x388] sm:$0xf] }
  0xd2   : > { %v8365_v46 = vld [vmem:[#allocation9 + $0x1e0] sm:$0xf] }
  0xd3   : > { %1824 = vmatpush.bf16.msra.mxu0 %v7534_v8  ;;  %v7690_v8 = vor.u32 %v10521_v1, %v7687_v2  ;;  %v10557_v2 = vld [vmem:[#allocation5 + $0x38c] sm:$0xf] }
  0xd4   : > { %1838 = vmatpush.bf16.msra.mxu1 %v7918_v9  ;;  %1852 = vmatpush.bf16.msra.mxu2 %v7538_v10  ;;  %v7637_v9 = vld [vmem:[#allocation5 + $0x208] sm:$0xf]  ;;  %v10515_v10 = vld [vmem:[#allocation5 + $0x234] sm:$0xf0] }
  0xd5   : > { %1866 = vmatpush.bf16.msra.mxu3 %v7922_v14  ;;  %v10509_v14 = vld [vmem:[#allocation5 + $0x20c] sm:$0xf]  ;;  %v7638_v18 = vor.u32 %v10515_v10, %v7637_v9  ;;  %v7830_v9 = vor.u32 %v10563_v62, %v7829_v60  ;;  %v8357_v62 = vld [vmem:[#allocation9 + $0x1d0] sm:$0xf] }
  0xd7   : > { %1825 = vmatpush.bf16.msra.mxu0 %v7486_v20  ;;  %v7642_v20 = vor.u32 %v10509_v14, %v7639_v15  ;;  %v7834_v14 = vor.u32 %v10557_v2, %v7831_v3  ;;  %v7399_v15 = vld [vmem:[#allocation5 + $0x58] sm:$0xf0]  ;;  %v8157_v3 = vld [vmem:[#allocation9 + $0x40] sm:$0xf] }
  0xd8   : > { %1839 = vmatpush.bf16.msra.mxu1 %v7870_v21  ;;  %1853 = vmatpush.bf16.msra.mxu2 %v7490_v22  ;;  %v7589_v21 = vld [vmem:[#allocation5 + $0x1a8] sm:$0xf]  ;;  %v10503_v22 = vld [vmem:[#allocation5 + $0x1d4] sm:$0xf0] }
  0xd9   : > { %1867 = vmatpush.bf16.msra.mxu3 %v7874_v26  ;;  %v10497_v26 = vld [vmem:[#allocation5 + $0x1ac] sm:$0xf]  ;;  %v7590_v30 = vor.u32 %v10503_v22, %v7589_v21 }
  0xdb   : > { %1826 = vmatpush.bf16.msra.mxu0 %v7438_v32  ;;  %v7594_v32 = vor.u32 %v10497_v26, %v7591_v27 }
  0xdc   : > { %1840 = vmatpush.bf16.msra.mxu1 %v7822_v35  ;;  %1854 = vmatpush.bf16.msra.mxu2 %v7442_v36  ;;  %v7925_v35 = vld [vmem:[#allocation5 + $0x448] sm:$0xf]  ;;  %v7978_v36 = vor.u32 %v10593_v28, %v7975_v29  ;;  %v7402_v28 = vor.u32 %v10449_v13, %v7399_v15  ;;  %v7786_v29 = vor.u32 %v10545_v16, %v7783_v17  ;;  %v10693_v15 = vld [vmem:[#allocation9 + $0x1c4] sm:$0xf0] }
  0xdd   : > { %1868 = vmatpush.bf16.msra.mxu3 %v7826_v40  ;;  %v10581_v40 = vld [vmem:[#allocation5 + $0x44c] sm:$0xf]  ;;  %v7926_v43 = vor.u32 %v10587_v37, %v7925_v35 }
  0xde   : > { %v7930_v48 = vor.u32 %v10581_v40, %v7927_v41  ;;  %v8173_v35 = vld [vmem:[#allocation9 + $0x60] sm:$0xf]  ;;  %v10681_v40 = vld [vmem:[#allocation9 + $0x164] sm:$0xf0] }
  0xdf   : > { %1827 = vmatpush.bf16.msra.mxu0 %v7390_v47  ;;  %v7877_v47 = vld [vmem:[#allocation5 + $0x3e8] sm:$0xf]  ;;  %v11864_v1 = vpop.f32.mrf.mxu0  ;;  %v8237_v37 = vld [vmem:[#allocation9 + $0xe0] sm:$0xf] }
  0xe0   : > { %1841 = vmatpush.bf16.msra.mxu1 %v7774_v51  ;;  %1855 = vmatpush.bf16.msra.mxu2 %v7394_v52  ;;  %v7495_v51 = vld [vmem:[#allocation5 + $0x118] sm:$0xf0]  ;;  %v10569_v52 = vld [vmem:[#allocation5 + $0x3ec] sm:$0xf] }
  0xe1   : > { %1869 = vmatpush.bf16.msra.mxu3 %v7778_v55  ;;  %v7878_v55 = vor.u32 %v10575_v49, %v7877_v47  ;;  %v7882_v61 = vor.u32 %v10569_v52, %v7879_v53  ;;  %v10697_v47 = vld [vmem:[#allocation9 + $0x1e4] sm:$0xf0]  ;;  %v8302_v49 = vor.u32 %v10681_v40, %v8301_v39  ;;  %v8229_v52 = vld [vmem:[#allocation9 + $0xd0] sm:$0xf]  ;;  %v10663_v53 = vld [vmem:[#allocation9 + $0xd4] sm:$0xf0] }
  0xe2   : > { %1828 = vmatmul.bf16.vlgmr.msra.gmra.mxu0 %v11834_v57  ;;  %v11866_v4 = vpop.f32.mrf.mxu1  ;;  %v8269_v40 = vld [vmem:[#allocation9 + $0x120] sm:$0xf] }
  0xe3   : > { %1876 = vmatpush.bf16.msrb.mxu0 %v7734_v56  ;;  %1856 = vmatmul.bf16.vlgmr.msra.gmra.mxu2 %v11834_v57  ;;  %v7498_v56 = vor.u32 %v10473_v50, %v7495_v51  ;;  %v8165_v50 = vld [vmem:[#allocation9 + $0x50] sm:$0xf]  ;;  %v10647_v51 = vld [vmem:[#allocation9 + $0x54] sm:$0xf0] }
  0xe4   : > { %1890 = vmatpush.bf16.msrb.mxu1 %v8118_v58  ;;  %1904 = vmatpush.bf16.msrb.mxu2 %v7738_v59  ;;  %v7445_v58 = vld [vmem:[#allocation5 + $0x88] sm:$0xf]  ;;  %v10467_v59 = vld [vmem:[#allocation5 + $0xb4] sm:$0xf0]  ;;  %v8166_v60 = vor.u32 %v10647_v51, %v8165_v50 }
  0xe5   : > { %1918 = vmatpush.bf16.msrb.mxu3 %v8122_v63  ;;  %1842 = vmatmul.bf16.vlgmr.msra.gmra.mxu1 %v11843_v5  ;;  %v10461_v63 = vld [vmem:[#allocation5 + $0x8c] sm:$0xf] }
  0xe6   : > { %1870 = vmatmul.bf16.vlgmr.msra.gmra.mxu3 %v11843_v5  ;;  %v7450_v10 = vor.u32 %v10461_v63, %v7447_v0  ;;  %v11868_v21 = vpop.f32.mrf.mxu2  ;;  %v10695_v63 = vld [vmem:[#allocation9 + $0x1d4] sm:$0xf0]  ;;  %v8230_v0 = vor.u32 %v10663_v53, %v8229_v52  ;;  %v8333_v53 = vld [vmem:[#allocation9 + $0x1a0] sm:$0xf] }
  0xe7   : > { %1877 = vmatpush.bf16.msrb.mxu0 %v7686_v6  ;;  %v7446_v6 = vor.u32 %v10467_v59, %v7445_v58  ;;  %v11872_v41 = vpop.f32.mrf.mxu0  ;;  %v8366_v59 = vor.u32 %v10697_v47, %v8365_v46 }
  0xe8   : > { %1891 = vmatpush.bf16.msrb.mxu1 %v8070_v7  ;;  %1905 = vmatpush.bf16.msrb.mxu2 %v7690_v8  ;;  %v7397_v7 = vld [vmem:[#allocation5 + $0x28] sm:$0xf]  ;;  %v10455_v8 = vld [vmem:[#allocation5 + $0x54] sm:$0xf0] }
  0xe9   : > { %1919 = vmatpush.bf16.msrb.mxu3 %v8074_v12  ;;  %v10551_v12 = vld [vmem:[#allocation5 + $0x354] sm:$0xf0]  ;;  %v7398_v22 = vor.u32 %v10455_v8, %v7397_v7  ;;  %v11870_v26 = vpop.f32.mrf.mxu3  ;;  %v8285_v7 = vld [vmem:[#allocation9 + $0x140] sm:$0xf]  ;;  %v10677_v8 = vld [vmem:[#allocation9 + $0x144] sm:$0xf0] }
  0xea   : > { %v7782_v27 = vor.u32 %v10551_v12, %v7781_v11  ;;  %v8358_v11 = vor.u32 %v10695_v63, %v8357_v62  ;;  %v8286_v17 = vor.u32 %v10677_v8, %v8285_v7  ;;  %v8197_v62 = vld [vmem:[#allocation9 + $0x90] sm:$0xf]  ;;  %v10655_v63 = vld [vmem:[#allocation9 + $0x94] sm:$0xf0] }
  0xeb   : > { %1878 = vmatpush.bf16.msrb.mxu0 %v7638_v18  ;;  %v8181_v18 = vld [vmem:[#allocation9 + $0x70] sm:$0xf] }
  0xec   : > { %1892 = vmatpush.bf16.msrb.mxu1 %v8022_v19  ;;  %1906 = vmatpush.bf16.msrb.mxu2 %v7642_v20  ;;  %v10651_v19 = vld [vmem:[#allocation9 + $0x74] sm:$0xf0]  ;;  %v8245_v20 = vld [vmem:[#allocation9 + $0xf0] sm:$0xf] }
  0xed   : > { %1920 = vmatpush.bf16.msrb.mxu3 %v8026_v24  ;;  %v8309_v24 = vld [vmem:[#allocation9 + $0x170] sm:$0xf]  ;;  %v8246_v33 = vor.u32 %v10667_v23, %v8245_v20  ;;  %v10643_v20 = vld [vmem:[#allocation9 + $0x34] sm:$0xf0] }
  0xee   : > { %v8310_v34 = vor.u32 %v10683_v25, %v8309_v24  ;;  %v10659_v23 = vld [vmem:[#allocation9 + $0xb4] sm:$0xf0]  ;;  %v8277_v24 = vld [vmem:[#allocation9 + $0x130] sm:$0xf] }
  0xef   : > { %1879 = vmatpush.bf16.msrb.mxu0 %v7590_v30  ;;  %v8182_v30 = vor.u32 %v10651_v19, %v8181_v18  ;;  %v8149_v19 = vld [vmem:[#allocation9 + $0x30] sm:$0xf]  ;;  %v10675_v25 = vld [vmem:[#allocation9 + $0x134] sm:$0xf0] }
  0xf0   : > { %1893 = vmatpush.bf16.msrb.mxu1 %v7974_v31  ;;  %1907 = vmatpush.bf16.msrb.mxu2 %v7594_v32  ;;  %v8373_v31 = vld [vmem:[#allocation9 + $0x1f0] sm:$0xf]  ;;  %v10699_v32 = vld [vmem:[#allocation9 + $0x1f4] sm:$0xf0] }
  0xf1   : > { %1921 = vmatpush.bf16.msrb.mxu3 %v7978_v36  ;;  %v10649_v36 = vld [vmem:[#allocation9 + $0x64] sm:$0xf0] }
  0xf2   : > { %v8174_v45 = vor.u32 %v10649_v36, %v8173_v35  ;;  %v8278_v35 = vor.u32 %v10675_v25, %v8277_v24 }
  0xf3   : > { %1880 = vmatpush.bf16.msrb.mxu0 %v7542_v42  ;;  %v11874_v42 = vpop.f32.mrf.mxu1 }
  0xf4   : > { %1894 = vmatpush.bf16.msrb.mxu1 %v7926_v43  ;;  %1908 = vmatpush.bf16.msrb.mxu2 %v7546_v44  ;;  %v11876_v43 = vld [vmem:[#allocation7] sm:$0xff]  ;;  %v8374_v44 = vor.u32 %v10699_v32, %v8373_v31  ;;  %v8341_v31 = vld [vmem:[#allocation9 + $0x1b0] sm:$0xf] }
  0xf5   : > { %1922 = vmatpush.bf16.msrb.mxu3 %v7930_v48  ;;  %v8238_v48 = vor.u32 %v10665_v38, %v8237_v37  ;;  %v602_v58 = vperm.slane %v11876_v43, 0  ;;  %v10691_v32 = vld [vmem:[#allocation9 + $0x1b4] sm:$0xf0]  ;;  %v10641_v37 = vld [vmem:[#allocation9 + $0x24] sm:$0xf0]  ;;  %v605_v46 = vperm.slane %v11876_v43, 3 }
  0xf6   : > { %v8205_v38 = vld [vmem:[#allocation9 + $0xa0] sm:$0xf]  ;;  %v8342_v47 = vor.u32 %v10691_v32, %v8341_v31 }
  0xf7   : > { %1881 = vmatpush.bf16.msrb.mxu0 %v7494_v54  ;;  %v8293_v54 = vld [vmem:[#allocation9 + $0x150] sm:$0xf] }
  0xf8   : > { %1895 = vmatpush.bf16.msrb.mxu1 %v7878_v55  ;;  %1909 = vmatpush.bf16.msrb.mxu2 %v7498_v56  ;;  %v10679_v55 = vld [vmem:[#allocation9 + $0x154] sm:$0xf0]  ;;  %v11882_v56 = vpop.f32.mrf.mxu2 }
  0xf9   : > { %1923 = vmatpush.bf16.msrb.mxu3 %v7882_v61  ;;  %v11885_v61 = vpop.f32.mrf.mxu3  ;;  %v8294_v2 = vor.u32 %v10679_v55, %v8293_v54  ;;  %v10689_v54 = vld [vmem:[#allocation9 + $0x1a4] sm:$0xf0] }
  0xfb   : > { %1882 = vmatpush.bf16.msrb.mxu0 %v7446_v6  ;;  %v8221_v6 = vld [vmem:[#allocation9 + $0xc0] sm:$0xf] }
  0xfc   : > { %1896 = vmatpush.bf16.msrb.mxu1 %v7830_v9  ;;  %1910 = vmatpush.bf16.msrb.mxu2 %v7450_v10  ;;  %v603_v9 = vperm.slane %v11876_v43, 1  ;;  %v1606_v10 = vadd.f32 %v11864_v1, %v602_v58 }
  0xfd   : > { %1924 = vmatpush.bf16.msrb.mxu3 %v7834_v14  ;;  %v8349_v14 = vld [vmem:[#allocation9 + $0x1c0] sm:$0xf] }
  0xfe   : > { %v1634_v1 = vadd.f32 %v11868_v21, %v603_v9  ;;  %v10657_v21 = vld [vmem:[#allocation9 + $0xa4] sm:$0xf0]  ;;  %v1636_v55 = vadd.f32 %v11882_v56, %v603_v9  ;;  %v8325_v9 = vld [vmem:[#allocation9 + $0x190] sm:$0xf] }
  0xff   : > { %1883 = vmatpush.bf16.msrb.mxu0 %v7398_v22  ;;  %v1661_v13 = vpop.f32.mrf.mxu0  ;;  %v8213_v22 = vld [vmem:[#allocation9 + $0xb0] sm:$0xf]  ;;  %v8206_v51 = vor.u32 %v10657_v21, %v8205_v38  ;;  %v8317_v21 = vld [vmem:[#allocation9 + $0x180] sm:$0xf] }
 0x100   : > { %1897 = vmatpush.bf16.msrb.mxu1 %v7782_v27  ;;  %1911 = vmatpush.bf16.msrb.mxu2 %v7402_v28  ;;  %v604_v27 = vperm.slane %v11876_v43, 2  ;;  %v11892_v28 = vadd.f32 %v11866_v4, %v1606_v10  ;;  %v11895_v4 = vadd.f32 %v11870_v26, %v1634_v1  ;;  %v10687_v10 = vld [vmem:[#allocation9 + $0x194] sm:$0xf0] }
 0x101   : > { %1925 = vmatpush.bf16.msrb.mxu3 %v7786_v29  ;;  %v8350_v29 = vor.u32 %v10693_v15, %v8349_v14  ;;  %v8326_v25 = vor.u32 %v10687_v10, %v8325_v9  ;;  %v10715_v1 = vld [vmem:[#allocation9 + $0x274] sm:$0xf0]  ;;  %v8413_v10 = vld [vmem:[#allocation9 + $0x240] sm:$0xf] }
 0x102   : > { %1884 = vmatmul.bf16.vlgmr.msrb.gmra.mxu0 %v11834_v57  ;;  %v1675_v18 = vpop.f32.mrf.mxu1 }
 0x103   : > { %3120 = vmatpush.bf16.msra.mxu0 %v8182_v30  ;;  %1898 = vmatmul.bf16.vlgmr.msrb.gmra.mxu1 %v11843_v5  ;;  %v8150_v30 = vor.u32 %v10643_v20, %v8149_v19 }
 0x104   : > { %3134 = vmatpush.bf16.msra.mxu1 %v8246_v33  ;;  %3148 = vmatpush.bf16.msra.mxu2 %v8310_v34  ;;  %v8141_v33 = vld [vmem:[#allocation9 + $0x20] sm:$0xf]  ;;  %v8214_v34 = vor.u32 %v10659_v23, %v8213_v22  ;;  %v10669_v22 = vld [vmem:[#allocation9 + $0x104] sm:$0xf0]  ;;  %v8437_v23 = vld [vmem:[#allocation9 + $0x270] sm:$0xf] }
 0x105   : > { %1912 = vmatmul.bf16.vlgmr.msrb.gmra.mxu2 %v11834_v57  ;;  %1926 = vmatmul.bf16.vlgmr.msrb.gmra.mxu3 %v11843_v5  ;;  %v10645_v57 = vld [vmem:[#allocation9 + $0x44] sm:$0xf0]  ;;  %v8142_v50 = vor.u32 %v10641_v37, %v8141_v33  ;;  %v8565_v33 = vld [vmem:[#allocation9 + $0x370] sm:$0xf] }
 0x106   : > { %3162 = vmatpush.bf16.msra.mxu3 %v8374_v44  ;;  %v10661_v5 = vld [vmem:[#allocation9 + $0xc4] sm:$0xf0]  ;;  %v8158_v12 = vor.u32 %v10645_v57, %v8157_v3  ;;  %v1689_v36 = vpop.f32.mrf.mxu2  ;;  %v1933_v3 = vmax.f32 %v11895_v4, 0.0  ;;  %v10743_v4 = vld [vmem:[#allocation9 + $0x354] sm:$0xf0] }
 0x107   : > { %3121 = vmatpush.bf16.msra.mxu0 %v8174_v45  ;;  %v8222_v16 = vor.u32 %v10661_v5, %v8221_v6  ;;  %v10673_v44 = vld [vmem:[#allocation9 + $0x124] sm:$0xf0]  ;;  %v1608_v45 = vadd.f32 %v11872_v41, %v602_v58  ;;  %v1663_v52 = vpop.f32.mrf.mxu0  ;;  %v8133_v58 = vld [vmem:[#allocation9 + $0x10] sm:$0xf]  ;;  %v1690_v6 = vadd.f32 %v1689_v36, %v605_v46  ;;  %v8334_v5 = vor.u32 %v10689_v54, %v8333_v53  ;;  %v8557_v53 = vld [vmem:[#allocation9 + $0x360] sm:$0xf] }
 0x108   : > { %3135 = vmatpush.bf16.msra.mxu1 %v8238_v48  ;;  %3149 = vmatpush.bf16.msra.mxu2 %v8302_v49  ;;  %v1932_v48 = vmax.f32 %v11892_v28, 0.0  ;;  %v1662_v49 = vadd.f32 %v1661_v13, %v604_v27  ;;  %v8270_v26 = vor.u32 %v10673_v44, %v8269_v40  ;;  %v8198_v13 = vor.u32 %v10655_v63, %v8197_v62 }
 0x109   : > { %v1703_v39 = vpop.f32.mrf.mxu3  ;;  %v11903_v57 = vadd.f32 %v11874_v42, %v1608_v45  ;;  %v8189_v42 = vld [vmem:[#allocation9 + $0x80] sm:$0xf]  ;;  %v8438_v40 = vor.u32 %v10715_v1, %v8437_v23  ;;  %v8405_v23 = vld [vmem:[#allocation9 + $0x230] sm:$0xf] }
 0x10a   : > { %3163 = vmatpush.bf16.msra.mxu3 %v8366_v59  ;;  %v1664_v59 = vadd.f32 %v1663_v52, %v604_v27  ;;  %v1677_v41 = vpop.f32.mrf.mxu1  ;;  %v1676_v7 = vadd.f32 %v1675_v18, %v1662_v49  ;;  %v8253_v18 = vld [vmem:[#allocation9 + $0x100] sm:$0xf]  ;;  %v1704_v24 = vadd.f32 %v1703_v39, %v1690_v6  ;;  %v8501_v27 = vld [vmem:[#allocation9 + $0x2f0] sm:$0xf]  ;;  %v10685_v39 = vld [vmem:[#allocation9 + $0x184] sm:$0xf0] }
 0x10b   : > { %3122 = vmatpush.bf16.msra.mxu0 %v8166_v60  ;;  %v10639_v60 = vld [vmem:[#allocation9 + $0x14] sm:$0xf0]  ;;  %v8254_v38 = vor.u32 %v10669_v22, %v8253_v18  ;;  %v8429_v45 = vld [vmem:[#allocation9 + $0x260] sm:$0xf]  ;;  %v8469_v1 = vld [vmem:[#allocation9 + $0x2b0] sm:$0xf] }
 0x10c   : > { %3136 = vmatpush.bf16.msra.mxu1 %v8230_v0  ;;  %3150 = vmatpush.bf16.msra.mxu2 %v8294_v2  ;;  %v8261_v0 = vld [vmem:[#allocation9 + $0x110] sm:$0xf]  ;;  %v10671_v2 = vld [vmem:[#allocation9 + $0x114] sm:$0xf0]  ;;  %v1678_v56 = vadd.f32 %v1677_v41, %v1664_v59  ;;  %v8134_v8 = vor.u32 %v10639_v60, %v8133_v58  ;;  %v1935_v49 = vmax.f32 %v1704_v24, 0.0  ;;  %v8318_v58 = vor.u32 %v10685_v39, %v8317_v21 }
 0x10d   : > { %v8262_v14 = vor.u32 %v10671_v2, %v8261_v0  ;;  %v10763_v59 = vld [vmem:[#allocation9 + $0x3f4] sm:$0xf0]  ;;  %v8421_v0 = vld [vmem:[#allocation9 + $0x250] sm:$0xf]  ;;  %v10705_v21 = vld [vmem:[#allocation9 + $0x224] sm:$0xf0] }
 0x10e   : > { %3164 = vmatpush.bf16.msra.mxu3 %v8358_v11  ;;  %v8125_v11 = vld [vmem:[#allocation9] sm:$0xf]  ;;  %v1691_v15 = vpop.f32.mrf.mxu2  ;;  %v10711_v2 = vld [vmem:[#allocation9 + $0x254] sm:$0xf0] }
 0x10f   : > { %3123 = vmatpush.bf16.msra.mxu0 %v8158_v12  ;;  %v1650_v12 = vadd.f32 %v11885_v61, %v1636_v55  ;;  %v1692_v19 = vadd.f32 %v1691_v15, %v605_v46  ;;  %v1946_v61 = vmax.f32 %v1678_v56, 0.0  ;;  %v10713_v46 = vld [vmem:[#allocation9 + $0x264] sm:$0xf0]  ;;  %v10727_v6 = vld [vmem:[#allocation9 + $0x2d4] sm:$0xf0] }
 0x110   : > { %3137 = vmatpush.bf16.msra.mxu1 %v8222_v16  ;;  %3151 = vmatpush.bf16.msra.mxu2 %v8286_v17  ;;  %v10637_v16 = vld [vmem:[#allocation9 + $0x4] sm:$0xf0]  ;;  %v8430_v62 = vor.u32 %v10713_v46, %v8429_v45  ;;  %v10707_v24 = vld [vmem:[#allocation9 + $0x234] sm:$0xf0] }
 0x111   : > { %v10653_v17 = vld [vmem:[#allocation9 + $0x84] sm:$0xf0]  ;;  %v1705_v20 = vpop.f32.mrf.mxu3  ;;  %v8126_v32 = vor.u32 %v10637_v16, %v8125_v11  ;;  %v1945_v36 = vmax.f32 %v1650_v12, 0.0  ;;  %v8477_v12 = vld [vmem:[#allocation9 + $0x2c0] sm:$0xf] }
 0x112   : > { %3165 = vmatpush.bf16.msra.mxu3 %v8350_v29  ;;  %v10731_v29 = vld [vmem:[#allocation9 + $0x2f4] sm:$0xf0]  ;;  %v1706_v31 = vadd.f32 %v1705_v20, %v1692_v19  ;;  %v8190_v37 = vor.u32 %v10653_v17, %v8189_v42  ;;  %v10745_v55 = vld [vmem:[#allocation9 + $0x364] sm:$0xf0]  ;;  %v8541_v16 = vld [vmem:[#allocation9 + $0x340] sm:$0xf] }
 0x113   : > { %3124 = vmatpush.bf16.msra.mxu0 %v8150_v30  ;;  %v1934_v30 = vmax.f32 %v1676_v7, 0.0  ;;  %v8502_v44 = vor.u32 %v10731_v29, %v8501_v27  ;;  %v11915_v60 = vpack.c.bf16 %v1945_v36, %v1933_v3  ;;  %v8558_v28 = vor.u32 %v10745_v55, %v8557_v53  ;;  %v8621_v3 = vld [vmem:[#allocation9 + $0x3e0] sm:$0xf]  ;;  %v10761_v56 = vld [vmem:[#allocation9 + $0x3e4] sm:$0xf0] }
 0x114   : > { %3138 = vmatpush.bf16.msra.mxu1 %v8214_v34  ;;  %3152 = vmatpush.bf16.msra.mxu2 %v8278_v35  ;;  %v10747_v34 = vld [vmem:[#allocation9 + $0x374] sm:$0xf0]  ;;  %v1944_v35 = vmax.f32 %v11903_v57, 0.0  ;;  %v8485_v57 = vld [vmem:[#allocation9 + $0x2d0] sm:$0xf]  ;;  %v8622_v15 = vor.u32 %v10761_v56, %v8621_v3  ;;  %v607_v36 = vperm.slane %v11876_v43, 5 }
 0x115   : > { %v8566_v52 = vor.u32 %v10747_v34, %v8565_v33  ;;  %v11907_v54 = vpack.c.bf16 %v1946_v61, %v1934_v30  ;;  %v8486_v9 = vor.u32 %v10727_v6, %v8485_v57  ;;  %v10709_v11 = vld [vmem:[#allocation9 + $0x244] sm:$0xf0]  ;;  %v8613_v17 = vld [vmem:[#allocation9 + $0x3d0] sm:$0xf]  ;;  %v10759_v19 = vld [vmem:[#allocation9 + $0x3d4] sm:$0xf0] }
 0x116   : > { %3166 = vmatpush.bf16.msra.mxu3 %v8342_v47  ;;  %v8493_v47 = vld [vmem:[#allocation9 + $0x2e0] sm:$0xf]  ;;  %v11911_v41 = vpack.c.bf16 %v1944_v35, %v1932_v48  ;;  %v10741_v42 = vld [vmem:[#allocation9 + $0x344] sm:$0xf0]  ;;  %v8414_v20 = vor.u32 %v10709_v11, %v8413_v10  ;;  %v10723_v27 = vld [vmem:[#allocation9 + $0x2b4] sm:$0xf0]  ;;  %v8614_v30 = vor.u32 %v10759_v19, %v8613_v17  ;;  %v8406_v35 = vor.u32 %v10707_v24, %v8405_v23 }
 0x117   : > { %3125 = vmatpush.bf16.msra.mxu0 %v8142_v50  ;;  %v1947_v50 = vmax.f32 %v1706_v31, 0.0  ;;  %v8542_v29 = vor.u32 %v10741_v42, %v8541_v16  ;;  %v8533_v61 = vld [vmem:[#allocation9 + $0x330] sm:$0xf]  ;;  %v10739_v31 = vld [vmem:[#allocation9 + $0x334] sm:$0xf0]  ;;  %v606_v34 = vperm.slane %v11876_v43, 4 }
 0x118   : > { %3139 = vmatpush.bf16.msra.mxu1 %v8206_v51  ;;  %3153 = vmatpush.bf16.msra.mxu2 %v8270_v26  ;;  %v10729_v51 = vld [vmem:[#allocation9 + $0x2e4] sm:$0xf0]  ;;  %v8629_v26 = vld [vmem:[#allocation9 + $0x3f0] sm:$0xf]  ;;  %v8534_v45 = vor.u32 %v10739_v31, %v8533_v61  ;;  %v10719_v6 = vld [vmem:[#allocation9 + $0x294] sm:$0xf0] }
 0x119   : > { %v8494_v63 = vor.u32 %v10729_v51, %v8493_v47  ;;  %v8630_v48 = vor.u32 %v10763_v59, %v8629_v26  ;;  %v11918_v7 = vpack.c.bf16 %v1947_v50, %v1935_v49  ;;  %v10757_v33 = vld [vmem:[#allocation9 + $0x3c4] sm:$0xf0]  ;;  %v8525_v47 = vld [vmem:[#allocation9 + $0x320] sm:$0xf]  ;;  %v8597_v51 = vld [vmem:[#allocation9 + $0x3b0] sm:$0xf] }
 0x11a   : > { %3167 = vmatpush.bf16.msra.mxu3 %v8334_v5  ;;  %v8549_v5 = vld [vmem:[#allocation9 + $0x350] sm:$0xf]  ;;  %v10737_v50 = vld [vmem:[#allocation9 + $0x324] sm:$0xf0]  ;;  %v8589_v3 = vld [vmem:[#allocation9 + $0x3a0] sm:$0xf] }
 0x11b   : > { %3126 = vmatpush.bf16.msra.mxu0 %v8134_v8  ;;  %v8422_v8 = vor.u32 %v10711_v2, %v8421_v0  ;;  %v8453_v57 = vld [vmem:[#allocation9 + $0x290] sm:$0xf]  ;;  %v10753_v56 = vld [vmem:[#allocation9 + $0x3a4] sm:$0xf0]  ;;  %v8381_v10 = vld [vmem:[#allocation9 + $0x200] sm:$0xf] }
 0x11c   : > { %3140 = vmatpush.bf16.msra.mxu1 %v8198_v13  ;;  %3154 = vmatpush.bf16.msra.mxu2 %v8262_v14  ;;  %v10725_v13 = vld [vmem:[#allocation9 + $0x2c4] sm:$0xf0]  ;;  %v8550_v14 = vor.u32 %v10743_v4, %v8549_v5  ;;  %v8517_v5 = vld [vmem:[#allocation9 + $0x310] sm:$0xf]  ;;  %v10735_v4 = vld [vmem:[#allocation9 + $0x314] sm:$0xf0] }
 0x11d   : > { %v8478_v22 = vor.u32 %v10725_v13, %v8477_v12  ;;  %v8454_v13 = vor.u32 %v10719_v6, %v8453_v57  ;;  %v10779_v16 = vld [vmem:[#allocation9 + $0x474] sm:$0xf0]  ;;  %v8445_v17 = vld [vmem:[#allocation9 + $0x280] sm:$0xf]  ;;  %v10717_v19 = vld [vmem:[#allocation9 + $0x284] sm:$0xf0] }
 0x11e   : > { %3168 = vmatpush.bf16.msra.mxu3 %v8326_v25  ;;  %v8581_v61 = vld [vmem:[#allocation9 + $0x390] sm:$0xf]  ;;  %v10751_v31 = vld [vmem:[#allocation9 + $0x394] sm:$0xf0] }
 0x11f   : > { %3127 = vmatpush.bf16.msra.mxu0 %v8126_v32  ;;  %v1717_v18 = vpop.f32.mrf.mxu0  ;;  %v8605_v32 = vld [vmem:[#allocation9 + $0x3c0] sm:$0xf]  ;;  %v10775_v57 = vld [vmem:[#allocation9 + $0x454] sm:$0xf0]  ;;  %v8741_v6 = vld [vmem:[#allocation9 + $0x4d0] sm:$0xf] }
 0x120   : > { %3141 = vmatpush.bf16.msra.mxu1 %v8190_v37  ;;  %3155 = vmatpush.bf16.msra.mxu2 %v8254_v38  ;;  %v8470_v37 = vor.u32 %v10723_v27, %v8469_v1  ;;  %v8397_v38 = vld [vmem:[#allocation9 + $0x220] sm:$0xf]  ;;  %v8606_v46 = vor.u32 %v10757_v33, %v8605_v32  ;;  %v1718_v53 = vadd.f32 %v1717_v18, %v606_v34  ;;  %v10733_v27 = vld [vmem:[#allocation9 + $0x304] sm:$0xf0] }
 0x121   : > { %v8398_v26 = vor.u32 %v10705_v21, %v8397_v38  ;;  %v8518_v18 = vor.u32 %v10735_v4, %v8517_v5  ;;  %v8509_v1 = vld [vmem:[#allocation9 + $0x300] sm:$0xf]  ;;  %v10777_v21 = vld [vmem:[#allocation9 + $0x464] sm:$0xf0] }
 0x122   : > { %3128 = vmatmul.bf16.vlgmr.msra.gmra.mxu0 %v11911_v41  ;;  %3169 = vmatpush.bf16.msra.mxu3 %v8318_v58  ;;  %v1731_v25 = vpop.f32.mrf.mxu1  ;;  %v8669_v4 = vld [vmem:[#allocation9 + $0x440] sm:$0xf] }
 0x123   : > { %3176 = vmatpush.bf16.msrb.mxu0 %v8438_v40  ;;  %3142 = vmatmul.bf16.vlgmr.msra.gmra.mxu1 %v11915_v60  ;;  %v8461_v40 = vld [vmem:[#allocation9 + $0x2a0] sm:$0xf] }
 0x124   : > { %3190 = vmatpush.bf16.msrb.mxu1 %v8502_v44  ;;  %3204 = vmatpush.bf16.msrb.mxu2 %v8566_v52  ;;  %v10721_v44 = vld [vmem:[#allocation9 + $0x2a4] sm:$0xf0]  ;;  %v10755_v52 = vld [vmem:[#allocation9 + $0x3b4] sm:$0xf0] }
 0x125   : > { %3156 = vmatmul.bf16.vlgmr.msra.gmra.mxu2 %v11907_v54  ;;  %3170 = vmatmul.bf16.vlgmr.msra.gmra.mxu3 %v11918_v7  ;;  %v8462_v58 = vor.u32 %v10721_v44, %v8461_v40  ;;  %v10811_v40 = vld [vmem:[#allocation9 + $0x574] sm:$0xf0] }
 0x126   : > { %3218 = vmatpush.bf16.msrb.mxu3 %v8630_v48  ;;  %v1745_v39 = vpop.f32.mrf.mxu2  ;;  %v8598_v48 = vor.u32 %v10755_v52, %v8597_v51  ;;  %v8573_v51 = vld [vmem:[#allocation9 + $0x380] sm:$0xf]  ;;  %v10749_v52 = vld [vmem:[#allocation9 + $0x384] sm:$0xf0] }
 0x127   : > { %3177 = vmatpush.bf16.msrb.mxu0 %v8430_v62  ;;  %v1746_v55 = vadd.f32 %v1745_v39, %v607_v36  ;;  %v1719_v59 = vpop.f32.mrf.mxu0  ;;  %v8389_v62 = vld [vmem:[#allocation9 + $0x210] sm:$0xf] }
 0x128   : > { %3191 = vmatpush.bf16.msrb.mxu1 %v8494_v63  ;;  %3205 = vmatpush.bf16.msrb.mxu2 %v8558_v28  ;;  %v10703_v63 = vld [vmem:[#allocation9 + $0x214] sm:$0xf0]  ;;  %v1720_v0 = vadd.f32 %v1719_v59, %v606_v34  ;;  %v8526_v28 = vor.u32 %v10737_v50, %v8525_v47  ;;  %v8510_v47 = vor.u32 %v10733_v27, %v8509_v1  ;;  %v8813_v59 = vld [vmem:[#allocation9 + $0x560] sm:$0xf] }
 0x129   : > { %v1759_v49 = vpop.f32.mrf.mxu3  ;;  %v8390_v12 = vor.u32 %v10703_v63, %v8389_v62  ;;  %v10809_v63 = vld [vmem:[#allocation9 + $0x564] sm:$0xf0]  ;;  %v10823_v1 = vld [vmem:[#allocation9 + $0x5d4] sm:$0xf0] }
 0x12a   : > { %3219 = vmatpush.bf16.msrb.mxu3 %v8622_v15  ;;  %v1733_v2 = vpop.f32.mrf.mxu1  ;;  %v1760_v11 = vadd.f32 %v1759_v49, %v1746_v55  ;;  %v8693_v15 = vld [vmem:[#allocation9 + $0x470] sm:$0xf]  ;;  %v8582_v49 = vor.u32 %v10751_v31, %v8581_v61  ;;  %v10787_v61 = vld [vmem:[#allocation9 + $0x4b4] sm:$0xf0] }
 0x12b   : > { %3178 = vmatpush.bf16.msrb.mxu0 %v8422_v8  ;;  %v1732_v8 = vadd.f32 %v1731_v25, %v1718_v53  ;;  %v10795_v25 = vld [vmem:[#allocation9 + $0x4f4] sm:$0xf0]  ;;  %v8694_v38 = vor.u32 %v10779_v16, %v8693_v15  ;;  %v8677_v55 = vld [vmem:[#allocation9 + $0x450] sm:$0xf]  ;;  %v10789_v15 = vld [vmem:[#allocation9 + $0x4c4] sm:$0xf0] }
 0x12c   : > { %3192 = vmatpush.bf16.msrb.mxu1 %v8486_v9  ;;  %3206 = vmatpush.bf16.msrb.mxu2 %v8550_v14  ;;  %v1734_v9 = vadd.f32 %v1733_v2, %v1720_v0  ;;  %v10701_v14 = vld [vmem:[#allocation9 + $0x204] sm:$0xf0]  ;;  %v1937_v32 = vmax.f32 %v1760_v11, 0.0  ;;  %v8885_v0 = vld [vmem:[#allocation9 + $0x5f0] sm:$0xf] }
 0x12d   : > { %v8382_v34 = vor.u32 %v10701_v14, %v8381_v10  ;;  %v10827_v2 = vld [vmem:[#allocation9 + $0x5f4] sm:$0xf0]  ;;  %v8877_v11 = vld [vmem:[#allocation9 + $0x5e0] sm:$0xf] }
 0x12e   : > { %3220 = vmatpush.bf16.msrb.mxu3 %v8614_v30  ;;  %v1747_v42 = vpop.f32.mrf.mxu2  ;;  %v1948_v30 = vmax.f32 %v1734_v9, 0.0  ;;  %v8886_v5 = vor.u32 %v10827_v2, %v8885_v0  ;;  %v10807_v10 = vld [vmem:[#allocation9 + $0x554] sm:$0xf0]  ;;  %v8733_v14 = vld [vmem:[#allocation9 + $0x4c0] sm:$0xf] }
 0x12f   : > { %3179 = vmatpush.bf16.msrb.mxu0 %v8414_v20  ;;  %v8757_v20 = vld [vmem:[#allocation9 + $0x4f0] sm:$0xf]  ;;  %v1748_v23 = vadd.f32 %v1747_v42, %v607_v36  ;;  %v608_v42 = vperm.slane %v11876_v43, 6  ;;  %v10801_v0 = vld [vmem:[#allocation9 + $0x524] sm:$0xf0] }
 0x130   : > { %3193 = vmatpush.bf16.msrb.mxu1 %v8478_v22  ;;  %3207 = vmatpush.bf16.msrb.mxu2 %v8542_v29  ;;  %v8590_v22 = vor.u32 %v10753_v56, %v8589_v3  ;;  %v1936_v29 = vmax.f32 %v1732_v8, 0.0  ;;  %v8758_v39 = vor.u32 %v10795_v25, %v8757_v20  ;;  %v8821_v36 = vld [vmem:[#allocation9 + $0x570] sm:$0xf]  ;;  %v8814_v3 = vor.u32 %v10809_v63, %v8813_v59  ;;  %v8797_v20 = vld [vmem:[#allocation9 + $0x540] sm:$0xf] }
 0x131   : > { %v1761_v24 = vpop.f32.mrf.mxu3  ;;  %v8805_v56 = vld [vmem:[#allocation9 + $0x550] sm:$0xf]  ;;  %v8678_v8 = vor.u32 %v10775_v57, %v8677_v55  ;;  %v10819_v57 = vld [vmem:[#allocation9 + $0x5b4] sm:$0xf0] }
 0x132   : > { %3221 = vmatpush.bf16.msrb.mxu3 %v8606_v46  ;;  %v1762_v33 = vadd.f32 %v1761_v24, %v1748_v23  ;;  %v10793_v46 = vld [vmem:[#allocation9 + $0x4e4] sm:$0xf0]  ;;  %v11925_v50 = vpack.c.bf16 %v1948_v30, %v1936_v29  ;;  %v8734_v23 = vor.u32 %v10789_v15, %v8733_v14  ;;  %v8869_v25 = vld [vmem:[#allocation9 + $0x5d0] sm:$0xf]  ;;  %v10771_v29 = vld [vmem:[#allocation9 + $0x434] sm:$0xf0] }
 0x133   : > { %3180 = vmatpush.bf16.msrb.mxu0 %v8406_v35  ;;  %v8446_v35 = vor.u32 %v10717_v19, %v8445_v17  ;;  %v8661_v17 = vld [vmem:[#allocation9 + $0x430] sm:$0xf]  ;;  %v8806_v19 = vor.u32 %v10807_v10, %v8805_v56  ;;  %v10805_v24 = vld [vmem:[#allocation9 + $0x544] sm:$0xf0]  ;;  %v8870_v31 = vor.u32 %v10823_v1, %v8869_v25  ;;  %v10650_v15 = vld [vmem:[#allocation9 + $0x74] sm:$0xf] }
 0x134   : > { %3194 = vmatpush.bf16.msrb.mxu1 %v8470_v37  ;;  %3208 = vmatpush.bf16.msrb.mxu2 %v8534_v45  ;;  %v8685_v37 = vld [vmem:[#allocation9 + $0x460] sm:$0xf]  ;;  %v1949_v44 = vmax.f32 %v1762_v33, 0.0  ;;  %v8725_v30 = vld [vmem:[#allocation9 + $0x4b0] sm:$0xf] }
 0x135   : > { %v8749_v45 = vld [vmem:[#allocation9 + $0x4e0] sm:$0xf]  ;;  %v8853_v2 = vld [vmem:[#allocation9 + $0x5b0] sm:$0xf]  ;;  %v10765_v10 = vld [vmem:[#allocation9 + $0x404] sm:$0xf0] }
 0x136   : > { %3222 = vmatpush.bf16.msrb.mxu3 %v8598_v48  ;;  %v11927_v53 = vpack.c.bf16 %v1949_v44, %v1937_v32  ;;  %v8750_v62 = vor.u32 %v10793_v46, %v8749_v45  ;;  %v8574_v48 = vor.u32 %v10749_v52, %v8573_v51  ;;  %v8653_v33 = vld [vmem:[#allocation9 + $0x420] sm:$0xf]  ;;  %v10785_v45 = vld [vmem:[#allocation9 + $0x4a4] sm:$0xf0]  ;;  %v609_v46 = vperm.slane %v11876_v43, 7 }
 0x137   : > { %3181 = vmatpush.bf16.msrb.mxu0 %v8398_v26  ;;  %v8822_v26 = vor.u32 %v10811_v40, %v8821_v36  ;;  %v10821_v36 = vld [vmem:[#allocation9 + $0x5c4] sm:$0xf0]  ;;  %v8717_v44 = vld [vmem:[#allocation9 + $0x4a0] sm:$0xf]  ;;  %v8645_v52 = vld [vmem:[#allocation9 + $0x410] sm:$0xf] }
 0x138   : > { %3195 = vmatpush.bf16.msrb.mxu1 %v8462_v58  ;;  %3209 = vmatpush.bf16.msrb.mxu2 %v8526_v28  ;;  %v8686_v58 = vor.u32 %v10777_v21, %v8685_v37  ;;  %v10791_v28 = vld [vmem:[#allocation9 + $0x4d4] sm:$0xf0]  ;;  %v8662_v37 = vor.u32 %v10771_v29, %v8661_v17  ;;  %v10769_v40 = vld [vmem:[#allocation9 + $0x424] sm:$0xf0]  ;;  %v8718_v63 = vor.u32 %v10785_v45, %v8717_v44  ;;  %v8247_v25 = vld [vmem:[#allocation9 + $0xf8] sm:$0xf0] }
 0x139   : > { %v8742_v9 = vor.u32 %v10791_v28, %v8741_v6  ;;  %v10803_v21 = vld [vmem:[#allocation9 + $0x534] sm:$0xf0]  ;;  %v10817_v17 = vld [vmem:[#allocation9 + $0x5a4] sm:$0xf0]  ;;  %v10682_v44 = vld [vmem:[#allocation9 + $0x174] sm:$0xf] }
 0x13a   : > { %3223 = vmatpush.bf16.msrb.mxu3 %v8590_v22  ;;  %v10767_v43 = vld [vmem:[#allocation9 + $0x414] sm:$0xf0]  ;;  %v8311_v45 = vld [vmem:[#allocation9 + $0x178] sm:$0xf0] }
 0x13b   : > { %3182 = vmatpush.bf16.msrb.mxu0 %v8390_v12  ;;  %v10825_v12 = vld [vmem:[#allocation9 + $0x5e4] sm:$0xf0] }
 0x13c   : > { %3196 = vmatpush.bf16.msrb.mxu1 %v8454_v13  ;;  %3210 = vmatpush.bf16.msrb.mxu2 %v8518_v18  ;;  %v10773_v13 = vld [vmem:[#allocation9 + $0x444] sm:$0xf0]  ;;  %v8878_v16 = vor.u32 %v10825_v12, %v8877_v11  ;;  %v8773_v12 = vld [vmem:[#allocation9 + $0x510] sm:$0xf] }
 0x13d   : > { %v8670_v22 = vor.u32 %v10773_v13, %v8669_v4  ;;  %v8646_v13 = vor.u32 %v10767_v43, %v8645_v52  ;;  %v8239_v52 = vld [vmem:[#allocation9 + $0xe8] sm:$0xf0] }
 0x13e   : > { %3224 = vmatpush.bf16.msrb.mxu3 %v8582_v49  ;;  %v8303_v43 = vld [vmem:[#allocation9 + $0x168] sm:$0xf0] }
 0x13f   : > { %3183 = vmatpush.bf16.msrb.mxu0 %v8382_v34  ;;  %v1773_v18 = vpop.f32.mrf.mxu0  ;;  %v8798_v34 = vor.u32 %v10805_v24, %v8797_v20  ;;  %v8701_v20 = vld [vmem:[#allocation9 + $0x480] sm:$0xf]  ;;  %v10666_v24 = vld [vmem:[#allocation9 + $0xf4] sm:$0xf] }
 0x140   : > { %3197 = vmatpush.bf16.msrb.mxu1 %v8446_v35  ;;  %3211 = vmatpush.bf16.msrb.mxu2 %v8510_v47  ;;  %v1774_v32 = vadd.f32 %v1773_v18, %v608_v42  ;;  %v8789_v35 = vld [vmem:[#allocation9 + $0x530] sm:$0xf]  ;;  %v10781_v18 = vld [vmem:[#allocation9 + $0x484] sm:$0xf0] }
 0x141   : > { %v8790_v55 = vor.u32 %v10803_v21, %v8789_v35  ;;  %v10648_v35 = vld [vmem:[#allocation9 + $0x64] sm:$0xf]  ;;  %v10815_v21 = vld [vmem:[#allocation9 + $0x594] sm:$0xf0] }
 0x142   : > { %3184 = vmatmul.bf16.vlgmr.msrb.gmra.mxu0 %v11925_v50  ;;  %3225 = vmatpush.bf16.msrb.mxu3 %v8574_v48  ;;  %v1787_v27 = vpop.f32.mrf.mxu1  ;;  %v8709_v48 = vld [vmem:[#allocation9 + $0x490] sm:$0xf] }
 0x143   : > { %3232 = vmatpush.bf16.msra.mxu0 %v8694_v38  ;;  %3198 = vmatmul.bf16.vlgmr.msrb.gmra.mxu1 %v11927_v53  ;;  %v8726_v38 = vor.u32 %v10787_v61, %v8725_v30  ;;  %v1788_v49 = vadd.f32 %v1787_v27, %v1774_v32  ;;  %v8765_v61 = vld [vmem:[#allocation9 + $0x500] sm:$0xf] }
 0x144   : > { %3246 = vmatpush.bf16.msra.mxu1 %v8758_v39  ;;  %3260 = vmatpush.bf16.msra.mxu2 %v8822_v26  ;;  %v8861_v39 = vld [vmem:[#allocation9 + $0x5c0] sm:$0xf] }
 0x145   : > { %v8862_v47 = vor.u32 %v10821_v36, %v8861_v39  ;;  %v8781_v26 = vld [vmem:[#allocation9 + $0x520] sm:$0xf]  ;;  %v1938_v56 = vmax.f32 %v1788_v49, 0.0  ;;  %v8175_v36 = vld [vmem:[#allocation9 + $0x68] sm:$0xf0] }
 0x146   : > { %3274 = vmatpush.bf16.msra.mxu3 %v8886_v5  ;;  %v1801_v51 = vpop.f32.mrf.mxu2  ;;  %v10783_v5 = vld [vmem:[#allocation9 + $0x494] sm:$0xf0]  ;;  %v8782_v11 = vor.u32 %v10801_v0, %v8781_v26  ;;  %v10813_v0 = vld [vmem:[#allocation9 + $0x584] sm:$0xf0] }
 0x147   : > { %3233 = vmatpush.bf16.msra.mxu0 %v8686_v58  ;;  %v1775_v59 = vpop.f32.mrf.mxu0  ;;  %v1802_v4 = vadd.f32 %v1801_v51, %v609_v46  ;;  %v8710_v14 = vor.u32 %v10783_v5, %v8709_v48  ;;  %v10664_v51 = vld [vmem:[#allocation9 + $0xe4] sm:$0xf]  ;;  %v8231_v5 = vld [vmem:[#allocation9 + $0xd8] sm:$0xf0] }
 0x148   : > { %3247 = vmatpush.bf16.msra.mxu1 %v8750_v62  ;;  %3261 = vmatpush.bf16.msra.mxu2 %v8814_v3  ;;  %v8654_v62 = vor.u32 %v10769_v40, %v8653_v33  ;;  %v1776_v6 = vadd.f32 %v1775_v59, %v608_v42  ;;  %v8854_v3 = vor.u32 %v10819_v57, %v8853_v2  ;;  %v8845_v42 = vld [vmem:[#allocation9 + $0x5a0] sm:$0xf]  ;;  %v10646_v59 = vld [vmem:[#allocation9 + $0x54] sm:$0xf] }
 0x149   : > { %v1815_v58 = vpop.f32.mrf.mxu3  ;;  %v8846_v1 = vor.u32 %v10817_v17, %v8845_v42  ;;  %v8250_v40 = vor.u32 %v10666_v24, %v8247_v25  ;;  %v8178_v2 = vor.u32 %v10648_v35, %v8175_v36  ;;  %v8242_v57 = vor.u32 %v10664_v51, %v8239_v52  ;;  %v8367_v42 = vld [vmem:[#allocation9 + $0x1e8] sm:$0xf0]  ;;  %v10676_v25 = vld [vmem:[#allocation9 + $0x144] sm:$0xf]  ;;  %v8215_v35 = vld [vmem:[#allocation9 + $0xb8] sm:$0xf0] }
 0x14a   : > { %3275 = vmatpush.bf16.msra.mxu3 %v8878_v16  ;;  %v1789_v28 = vpop.f32.mrf.mxu1  ;;  %v10799_v16 = vld [vmem:[#allocation9 + $0x514] sm:$0xf0]  ;;  %v8159_v17 = vld [vmem:[#allocation9 + $0x48] sm:$0xf0] }
 0x14b   : > { %3234 = vmatpush.bf16.msra.mxu0 %v8678_v8  ;;  %v1790_v8 = vadd.f32 %v1789_v28, %v1776_v6  ;;  %v8774_v30 = vor.u32 %v10799_v16, %v8773_v12  ;;  %v10662_v6 = vld [vmem:[#allocation9 + $0xd4] sm:$0xf]  ;;  %v10680_v28 = vld [vmem:[#allocation9 + $0x164] sm:$0xf]  ;;  %v8351_v51 = vld [vmem:[#allocation9 + $0x1c8] sm:$0xf0] }
 0x14c   : > { %3248 = vmatpush.bf16.msra.mxu1 %v8742_v9  ;;  %3262 = vmatpush.bf16.msra.mxu2 %v8806_v19  ;;  %v8637_v9 = vld [vmem:[#allocation9 + $0x400] sm:$0xf]  ;;  %v10678_v12 = vld [vmem:[#allocation9 + $0x154] sm:$0xf]  ;;  %v10696_v16 = vld [vmem:[#allocation9 + $0x1e4] sm:$0xf] }
 0x14d   : > { %v1950_v19 = vmax.f32 %v1790_v8, 0.0  ;;  %v8638_v33 = vor.u32 %v10765_v10, %v8637_v9  ;;  %v11939_v9 = vld [vmem:[#allocation7 + $0x8] sm:$0xf]  ;;  %v10644_v10 = vld [vmem:[#allocation9 + $0x44] sm:$0xf] }
 0x14e   : > { %3276 = vmatpush.bf16.msra.mxu3 %v8870_v31  ;;  %v1803_v29 = vpop.f32.mrf.mxu2  ;;  %v8143_v52 = vld [vmem:[#allocation9 + $0x28] sm:$0xf0] }
 0x14f   : > { %3235 = vmatpush.bf16.msra.mxu0 %v8670_v22  ;;  %v1816_v22 = vadd.f32 %v1815_v58, %v1802_v4  ;;  %v11933_v27 = vpack.c.bf16 %v1950_v19, %v1938_v56  ;;  %v1804_v31 = vadd.f32 %v1803_v29, %v609_v46  ;;  %v8167_v58 = vld [vmem:[#allocation9 + $0x58] sm:$0xf0]  ;;  %v10660_v19 = vld [vmem:[#allocation9 + $0xc4] sm:$0xf] }
 0x150   : > { %3249 = vmatpush.bf16.msra.mxu1 %v8734_v23  ;;  %3263 = vmatpush.bf16.msra.mxu2 %v8798_v34  ;;  %v8183_v23 = vld [vmem:[#allocation9 + $0x78] sm:$0xf0]  ;;  %v8702_v34 = vor.u32 %v10781_v18, %v8701_v20  ;;  %v8223_v20 = vld [vmem:[#allocation9 + $0xc8] sm:$0xf0]  ;;  %v8370_v18 = vor.u32 %v10696_v16, %v8367_v42  ;;  %v10636_v16 = vld [vmem:[#allocation9 + $0x4] sm:$0xf] }
 0x151   : > { %v1817_v32 = vpop.f32.mrf.mxu3  ;;  %3212 = vmatmul.bf16.vlgmr.msrb.gmra.mxu2 %v11933_v27  ;;  %v8186_v39 = vor.u32 %v10650_v15, %v8183_v23  ;;  %v8375_v56 = vld [vmem:[#allocation9 + $0x1f8] sm:$0xf0]  ;;  %v10642_v23 = vld [vmem:[#allocation9 + $0x34] sm:$0xf]  ;;  %v8226_v29 = vor.u32 %v10660_v19, %v8223_v20 }
 0x152   : > { %3277 = vmatpush.bf16.msra.mxu3 %v8862_v47  ;;  %v1939_v47 = vmax.f32 %v1816_v22, 0.0  ;;  %v1818_v49 = vadd.f32 %v1817_v32, %v1804_v31  ;;  %v8295_v15 = vld [vmem:[#allocation9 + $0x158] sm:$0xf0]  ;;  %v610_v22 = vperm.slane %v11939_v9, 0 }
 0x153   : > { %3236 = vmatpush.bf16.msra.mxu0 %v8662_v37  ;;  %v10797_v37 = vld [vmem:[#allocation9 + $0x504] sm:$0xf0]  ;;  %v8298_v24 = vor.u32 %v10678_v12, %v8295_v15  ;;  %v8359_v31 = vld [vmem:[#allocation9 + $0x1d8] sm:$0xf0] }
 0x154   : > { %3250 = vmatpush.bf16.msra.mxu1 %v8726_v38  ;;  %3264 = vmatpush.bf16.msra.mxu2 %v8790_v55  ;;  %v8837_v38 = vld [vmem:[#allocation9 + $0x590] sm:$0xf]  ;;  %v8766_v55 = vor.u32 %v10797_v37, %v8765_v61  ;;  %v1951_v26 = vmax.f32 %v1818_v49, 0.0  ;;  %v10694_v61 = vld [vmem:[#allocation9 + $0x1d4] sm:$0xf] }
 0x155   : > { %v8838_v46 = vor.u32 %v10815_v21, %v8837_v38  ;;  %v8362_v38 = vor.u32 %v10694_v61, %v8359_v31  ;;  %v10692_v49 = vld [vmem:[#allocation9 + $0x1c4] sm:$0xf]  ;;  %v10714_v61 = vld [vmem:[#allocation9 + $0x274] sm:$0xf]  ;;  %v8439_v31 = vld [vmem:[#allocation9 + $0x278] sm:$0xf0] }
 0x156   : > { %3278 = vmatpush.bf16.msra.mxu3 %v8854_v3  ;;  %v11936_v48 = vpack.c.bf16 %v1951_v26, %v1939_v47  ;;  %v10698_v3 = vld [vmem:[#allocation9 + $0x1f4] sm:$0xf]  ;;  %v8279_v47 = vld [vmem:[#allocation9 + $0x138] sm:$0xf0]  ;;  %v8354_v26 = vor.u32 %v10692_v49, %v8351_v51  ;;  %v8442_v49 = vor.u32 %v10714_v61, %v8439_v31  ;;  %v10712_v51 = vld [vmem:[#allocation9 + $0x264] sm:$0xf] }
 0x157   : > { %3237 = vmatpush.bf16.msra.mxu0 %v8654_v62  ;;  %v8314_v62 = vor.u32 %v10682_v44, %v8311_v45  ;;  %v8378_v8 = vor.u32 %v10698_v3, %v8375_v56  ;;  %v8135_v56 = vld [vmem:[#allocation9 + $0x18] sm:$0xf0] }
 0x158   : > { %3251 = vmatpush.bf16.msra.mxu1 %v8718_v63  ;;  %3265 = vmatpush.bf16.msra.mxu2 %v8782_v11  ;;  %v8829_v63 = vld [vmem:[#allocation9 + $0x580] sm:$0xf]  ;;  %v8306_v11 = vor.u32 %v10680_v28, %v8303_v43  ;;  %v8271_v28 = vld [vmem:[#allocation9 + $0x128] sm:$0xf0]  ;;  %v10690_v43 = vld [vmem:[#allocation9 + $0x1b4] sm:$0xf] }
 0x159   : > { %v8830_v4 = vor.u32 %v10813_v0, %v8829_v63  ;;  %3226 = vmatmul.bf16.vlgmr.msrb.gmra.mxu3 %v11936_v48  ;;  %v10672_v0 = vld [vmem:[#allocation9 + $0x124] sm:$0xf]  ;;  %v8471_v61 = vld [vmem:[#allocation9 + $0x2b8] sm:$0xf0] }
 0x15a   : > { %3279 = vmatpush.bf16.msra.mxu3 %v8846_v1  ;;  %v8162_v1 = vor.u32 %v10644_v10, %v8159_v17  ;;  %v8199_v10 = vld [vmem:[#allocation9 + $0x98] sm:$0xf0]  ;;  %v8274_v42 = vor.u32 %v10672_v0, %v8271_v28  ;;  %v10670_v17 = vld [vmem:[#allocation9 + $0x114] sm:$0xf]  ;;  %v10684_v0 = vld [vmem:[#allocation9 + $0x184] sm:$0xf] }
 0x15b   : > { %3238 = vmatpush.bf16.msra.mxu0 %v8646_v13  ;;  %v8170_v13 = vor.u32 %v10646_v59, %v8167_v58  ;;  %v611_v58 = vperm.slane %v11939_v9, 1  ;;  %v10710_v28 = vld [vmem:[#allocation9 + $0x254] sm:$0xf] }
 0x15c   : > { %3252 = vmatpush.bf16.msra.mxu1 %v8710_v14  ;;  %3266 = vmatpush.bf16.msra.mxu2 %v8774_v30  ;;  %v8234_v14 = vor.u32 %v10662_v6, %v8231_v5  ;;  %v8287_v30 = vld [vmem:[#allocation9 + $0x148] sm:$0xf0]  ;;  %v8343_v5 = vld [vmem:[#allocation9 + $0x1b8] sm:$0xf0] }
 0x15d   : > { %v8290_v36 = vor.u32 %v10676_v25, %v8287_v30  ;;  %v8335_v25 = vld [vmem:[#allocation9 + $0x1a8] sm:$0xf0] }
 0x15e   : > { %3280 = vmatpush.bf16.msra.mxu3 %v8838_v46  ;;  %v10656_v46 = vld [vmem:[#allocation9 + $0xa4] sm:$0xf] }
 0x15f   : > { %3239 = vmatpush.bf16.msra.mxu0 %v8638_v33  ;;  %v1829_v32 = vpop.f32.mrf.mxu0  ;;  %v8151_v33 = vld [vmem:[#allocation9 + $0x38] sm:$0xf0] }
 0x160   : > { %3253 = vmatpush.bf16.msra.mxu1 %v8702_v34  ;;  %3267 = vmatpush.bf16.msra.mxu2 %v8766_v55  ;;  %v10658_v34 = vld [vmem:[#allocation9 + $0xb4] sm:$0xf]  ;;  %v1830_v21 = vadd.f32 %v1829_v32, %v610_v22  ;;  %v8154_v44 = vor.u32 %v10642_v23, %v8151_v33  ;;  %v8207_v55 = vld [vmem:[#allocation9 + $0xa8] sm:$0xf0]  ;;  %v8263_v23 = vld [vmem:[#allocation9 + $0x118] sm:$0xf0] }
 0x161   : > { %v8218_v45 = vor.u32 %v10658_v34, %v8215_v35  ;;  %v8210_v6 = vor.u32 %v10656_v46, %v8207_v55  ;;  %v8266_v34 = vor.u32 %v10670_v17, %v8263_v23  ;;  %v10668_v35 = vld [vmem:[#allocation9 + $0x104] sm:$0xf]  ;;  %v8407_v17 = vld [vmem:[#allocation9 + $0x238] sm:$0xf0]  ;;  %v8479_v23 = vld [vmem:[#allocation9 + $0x2c8] sm:$0xf0] }
 0x162   : > { %3281 = vmatpush.bf16.msra.mxu3 %v8830_v4  ;;  %v1843_v37 = vpop.f32.mrf.mxu1 }
 0x163   : > { %3288 = vmatpush.bf16.msrb.mxu0 %v8186_v39  ;;  %v10640_v39 = vld [vmem:[#allocation9 + $0x24] sm:$0xf]  ;;  %v1844_v59 = vadd.f32 %v1843_v37, %v1830_v21 }
 0x164   : > { %3302 = vmatpush.bf16.msrb.mxu1 %v8250_v40  ;;  %3316 = vmatpush.bf16.msrb.mxu2 %v8314_v62  ;;  %v10674_v40 = vld [vmem:[#allocation9 + $0x134] sm:$0xf] }
 0x165   : > { %v10638_v62 = vld [vmem:[#allocation9 + $0x14] sm:$0xf]  ;;  %v8282_v63 = vor.u32 %v10674_v40, %v8279_v47 }
 0x166   : > { %3330 = vmatpush.bf16.msrb.mxu3 %v8378_v8  ;;  %v10654_v8 = vld [vmem:[#allocation9 + $0x94] sm:$0xf]  ;;  %v8138_v20 = vor.u32 %v10638_v62, %v8135_v56  ;;  %v8503_v62 = vld [vmem:[#allocation9 + $0x2f8] sm:$0xf0]  ;;  %v8495_v56 = vld [vmem:[#allocation9 + $0x2e8] sm:$0xf0] }
 0x167   : > { %3289 = vmatpush.bf16.msrb.mxu0 %v8178_v2  ;;  %v1857_v2 = vpop.f32.mrf.mxu2  ;;  %v1831_v4 = vpop.f32.mrf.mxu0  ;;  %v10686_v40 = vld [vmem:[#allocation9 + $0x194] sm:$0xf] }
 0x168   : > { %3303 = vmatpush.bf16.msrb.mxu1 %v8242_v57  ;;  %3317 = vmatpush.bf16.msrb.mxu2 %v8306_v11  ;;  %v8146_v57 = vor.u32 %v10640_v39, %v8143_v52  ;;  %v1832_v11 = vadd.f32 %v1831_v4, %v610_v22  ;;  %v1858_v15 = vadd.f32 %v1857_v2, %v611_v58  ;;  %v8191_v22 = vld [vmem:[#allocation9 + $0x88] sm:$0xf0] }
 0x169   : > { %v1871_v3 = vpop.f32.mrf.mxu3  ;;  %v8431_v52 = vld [vmem:[#allocation9 + $0x268] sm:$0xf0] }
 0x16a   : > { %3331 = vmatpush.bf16.msrb.mxu3 %v8370_v18  ;;  %v1845_v12 = vpop.f32.mrf.mxu1  ;;  %v8202_v18 = vor.u32 %v10654_v8, %v8199_v10  ;;  %v1872_v33 = vadd.f32 %v1871_v3, %v1858_v15  ;;  %v8319_v2 = vld [vmem:[#allocation9 + $0x188] sm:$0xf0]  ;;  %v10728_v3 = vld [vmem:[#allocation9 + $0x2e4] sm:$0xf] }
 0x16b   : > { %3290 = vmatpush.bf16.msrb.mxu0 %v8170_v13  ;;  %v8346_v13 = vor.u32 %v10690_v43, %v8343_v5  ;;  %v1846_v19 = vadd.f32 %v1845_v12, %v1832_v11  ;;  %v8423_v43 = vld [vmem:[#allocation9 + $0x258] sm:$0xf0]  ;;  %v8322_v5 = vor.u32 %v10684_v0, %v8319_v2  ;;  %v8498_v10 = vor.u32 %v10728_v3, %v8495_v56  ;;  %v10708_v11 = vld [vmem:[#allocation9 + $0x244] sm:$0xf]  ;;  %v8415_v12 = vld [vmem:[#allocation9 + $0x248] sm:$0xf0] }
 0x16c   : > { %3304 = vmatpush.bf16.msrb.mxu1 %v8234_v14  ;;  %3318 = vmatpush.bf16.msrb.mxu2 %v8298_v24  ;;  %v1940_v14 = vmax.f32 %v1844_v59, 0.0  ;;  %v10688_v24 = vld [vmem:[#allocation9 + $0x1a4] sm:$0xf]  ;;  %v1941_v55 = vmax.f32 %v1872_v33, 0.0  ;;  %v10730_v59 = vld [vmem:[#allocation9 + $0x2f4] sm:$0xf]  ;;  %v8426_v8 = vor.u32 %v10710_v28, %v8423_v43  ;;  %v8418_v15 = vor.u32 %v10708_v11, %v8415_v12 }
 0x16d   : > { %v1952_v30 = vmax.f32 %v1846_v19, 0.0  ;;  %v8338_v32 = vor.u32 %v10688_v24, %v8335_v25  ;;  %v612_v24 = vperm.slane %v11939_v9, 2  ;;  %v10778_v0 = vld [vmem:[#allocation9 + $0x474] sm:$0xf]  ;;  %v8695_v2 = vld [vmem:[#allocation9 + $0x478] sm:$0xf0] }
 0x16e   : > { %3332 = vmatpush.bf16.msrb.mxu3 %v8362_v38  ;;  %v8698_v3 = vor.u32 %v10778_v0, %v8695_v2  ;;  %v10744_v56 = vld [vmem:[#allocation9 + $0x364] sm:$0xf]  ;;  %v10770_v0 = vld [vmem:[#allocation9 + $0x434] sm:$0xf]  ;;  %v8663_v2 = vld [vmem:[#allocation9 + $0x438] sm:$0xf0] }
 0x16f   : > { %3291 = vmatpush.bf16.msrb.mxu0 %v8162_v1  ;;  %v8127_v1 = vld [vmem:[#allocation9 + $0x8] sm:$0xf0]  ;;  %v11943_v37 = vpack.c.bf16 %v1952_v30, %v1940_v14  ;;  %v1859_v38 = vpop.f32.mrf.mxu2  ;;  %v8487_v14 = vld [vmem:[#allocation9 + $0x2d8] sm:$0xf0]  ;;  %v10722_v30 = vld [vmem:[#allocation9 + $0x2b4] sm:$0xf] }
 0x170   : > { %3305 = vmatpush.bf16.msrb.mxu1 %v8226_v29  ;;  %3319 = vmatpush.bf16.msrb.mxu2 %v8290_v36  ;;  %v10652_v29 = vld [vmem:[#allocation9 + $0x84] sm:$0xf]  ;;  %v8130_v21 = vor.u32 %v10636_v16, %v8127_v1  ;;  %v8255_v36 = vld [vmem:[#allocation9 + $0x108] sm:$0xf0] }
 0x171   : > { %v8194_v39 = vor.u32 %v10652_v29, %v8191_v22  ;;  %v1873_v47 = vpop.f32.mrf.mxu3  ;;  %3240 = vmatmul.bf16.vlgmr.msra.gmra.mxu0 %v11943_v37  ;;  %v10704_v29 = vld [vmem:[#allocation9 + $0x224] sm:$0xf]  ;;  %v8399_v22 = vld [vmem:[#allocation9 + $0x228] sm:$0xf0] }
 0x172   : > { %3333 = vmatpush.bf16.msrb.mxu3 %v8354_v26 }
 0x173   : > { %3292 = vmatpush.bf16.msrb.mxu0 %v8154_v44  ;;  %v8327_v44 = vld [vmem:[#allocation9 + $0x198] sm:$0xf0] }
 0x174   : > { %3306 = vmatpush.bf16.msrb.mxu1 %v8218_v45  ;;  %3320 = vmatpush.bf16.msrb.mxu2 %v8282_v63  ;;  %v1860_v45 = vadd.f32 %v1859_v38, %v611_v58  ;;  %v8330_v46 = vor.u32 %v10686_v40, %v8327_v44  ;;  %v8258_v63 = vor.u32 %v10668_v35, %v8255_v36  ;;  %v10702_v38 = vld [vmem:[#allocation9 + $0x214] sm:$0xf]  ;;  %v10720_v40 = vld [vmem:[#allocation9 + $0x2a4] sm:$0xf]  ;;  %v8463_v44 = vld [vmem:[#allocation9 + $0x2a8] sm:$0xf0] }
 0x175   : > { %v8434_v58 = vor.u32 %v10712_v51, %v8431_v52  ;;  %v8474_v35 = vor.u32 %v10722_v30, %v8471_v61  ;;  %v10700_v51 = vld [vmem:[#allocation9 + $0x204] sm:$0xf]  ;;  %v8383_v52 = vld [vmem:[#allocation9 + $0x208] sm:$0xf0] }
 0x176   : > { %3334 = vmatpush.bf16.msrb.mxu3 %v8346_v13  ;;  %v1874_v26 = vadd.f32 %v1873_v47, %v1860_v45  ;;  %v10726_v13 = vld [vmem:[#allocation9 + $0x2d4] sm:$0xf] }
 0x177   : > { %3293 = vmatpush.bf16.msrb.mxu0 %v8146_v57  ;;  %v8490_v16 = vor.u32 %v10726_v13, %v8487_v14  ;;  %v8447_v13 = vld [vmem:[#allocation9 + $0x288] sm:$0xf0]  ;;  %v10776_v14 = vld [vmem:[#allocation9 + $0x464] sm:$0xf] }
 0x178   : > { %3307 = vmatpush.bf16.msrb.mxu1 %v8210_v6  ;;  %3321 = vmatpush.bf16.msrb.mxu2 %v8274_v42  ;;  %v1953_v57 = vmax.f32 %v1874_v26, 0.0  ;;  %v8506_v6 = vor.u32 %v10730_v59, %v8503_v62  ;;  %v10706_v42 = vld [vmem:[#allocation9 + $0x234] sm:$0xf]  ;;  %v8567_v59 = vld [vmem:[#allocation9 + $0x378] sm:$0xf0] }
 0x179   : > { %v8410_v25 = vor.u32 %v10706_v42, %v8407_v17  ;;  %v10746_v26 = vld [vmem:[#allocation9 + $0x374] sm:$0xf]  ;;  %v8759_v17 = vld [vmem:[#allocation9 + $0x4f8] sm:$0xf0] }
 0x17a   : > { %3335 = vmatpush.bf16.msrb.mxu3 %v8338_v32  ;;  %v11946_v4 = vpack.c.bf16 %v1953_v57, %v1941_v55  ;;  %v8402_v32 = vor.u32 %v10704_v29, %v8399_v22  ;;  %v8466_v55 = vor.u32 %v10720_v40, %v8463_v44  ;;  %v10718_v62 = vld [vmem:[#allocation9 + $0x294] sm:$0xf]  ;;  %v8570_v28 = vor.u32 %v10746_v26, %v8567_v59  ;;  %v8551_v29 = vld [vmem:[#allocation9 + $0x358] sm:$0xf0]  ;;  %v10740_v44 = vld [vmem:[#allocation9 + $0x344] sm:$0xf] }
 0x17b   : > { %3294 = vmatpush.bf16.msrb.mxu0 %v8138_v20  ;;  %v10794_v42 = vld [vmem:[#allocation9 + $0x4f4] sm:$0xf]  ;;  %v8615_v26 = vld [vmem:[#allocation9 + $0x3d8] sm:$0xf0] }
 0x17c   : > { %3308 = vmatpush.bf16.msrb.mxu1 %v8202_v18  ;;  %3322 = vmatpush.bf16.msrb.mxu2 %v8266_v34  ;;  %v10724_v18 = vld [vmem:[#allocation9 + $0x2c4] sm:$0xf]  ;;  %v8762_v61 = vor.u32 %v10794_v42, %v8759_v17  ;;  %v8727_v42 = vld [vmem:[#allocation9 + $0x4b8] sm:$0xf0] }
 0x17d   : > { %3254 = vmatmul.bf16.vlgmr.msra.gmra.mxu1 %v11946_v4  ;;  %v8482_v1 = vor.u32 %v10724_v18, %v8479_v23  ;;  %v10762_v18 = vld [vmem:[#allocation9 + $0x3f4] sm:$0xf]  ;;  %v8631_v23 = vld [vmem:[#allocation9 + $0x3f8] sm:$0xf0] }
 0x17e   : > { %3336 = vmatpush.bf16.msrb.mxu3 %v8330_v46 }
 0x17f   : > { %3295 = vmatpush.bf16.msrb.mxu0 %v8130_v21  ;;  %v1885_v19 = vpop.f32.mrf.mxu0  ;;  %v8391_v21 = vld [vmem:[#allocation9 + $0x218] sm:$0xf0] }
 0x180   : > { %3309 = vmatpush.bf16.msrb.mxu1 %v8194_v39  ;;  %3323 = vmatpush.bf16.msrb.mxu2 %v8258_v63  ;;  %v1899_v20 = vpop.f32.mrf.mxu1  ;;  %v1886_v31 = vadd.f32 %v1885_v19, %v612_v24  ;;  %v613_v39 = vperm.slane %v11939_v9, 3  ;;  %v8455_v9 = vld [vmem:[#allocation9 + $0x298] sm:$0xf0] }
 0x182   : > { %3337 = vmatpush.bf16.msrb.mxu3 %v8322_v5  ;;  %3296 = vmatmul.bf16.vlgmr.msrb.gmra.mxu0 %v11911_v41  ;;  %v1900_v41 = vadd.f32 %v1899_v20, %v1886_v31  ;;  %v8458_v5 = vor.u32 %v10718_v62, %v8455_v9  ;;  %v10774_v31 = vld [vmem:[#allocation9 + $0x454] sm:$0xf] }
 0x183   : > { %3344 = vmatpush.bf16.msra.mxu0 %v8442_v49  ;;  %v8394_v49 = vor.u32 %v10702_v38, %v8391_v21  ;;  %v10738_v62 = vld [vmem:[#allocation9 + $0x334] sm:$0xf] }
 0x184   : > { %3358 = vmatpush.bf16.msra.mxu1 %v8506_v6  ;;  %v1942_v57 = vmax.f32 %v1900_v41, 0.0  ;;  %v8386_v6 = vor.u32 %v10700_v51, %v8383_v52  ;;  %v8543_v41 = vld [vmem:[#allocation9 + $0x348] sm:$0xf0]  ;;  %v10790_v51 = vld [vmem:[#allocation9 + $0x4d4] sm:$0xf] }
 0x185   : > { %v8743_v52 = vld [vmem:[#allocation9 + $0x4d8] sm:$0xf0] }
 0x186   : > { %v8746_v9 = vor.u32 %v10790_v51, %v8743_v52  ;;  %v8823_v51 = vld [vmem:[#allocation9 + $0x578] sm:$0xf0] }
 0x187   : > { %3345 = vmatpush.bf16.msra.mxu0 %v8434_v58  ;;  %v1887_v36 = vpop.f32.mrf.mxu0 }
 0x188   : > { %3359 = vmatpush.bf16.msra.mxu1 %v8498_v10  ;;  %v1913_v33 = vpop.f32.mrf.mxu2  ;;  %v1927_v34 = vpop.f32.mrf.mxu3  ;;  %v1888_v45 = vadd.f32 %v1887_v36, %v612_v24  ;;  %v10716_v10 = vld [vmem:[#allocation9 + $0x284] sm:$0xf]  ;;  %v8623_v36 = vld [vmem:[#allocation9 + $0x3e8] sm:$0xf0] }
 0x189   : > { %v1901_v47 = vpop.f32.mrf.mxu1  ;;  %v1914_v63 = vadd.f32 %v1913_v33, %v613_v39  ;;  %v8450_v24 = vor.u32 %v10716_v10, %v8447_v13  ;;  %v8634_v33 = vor.u32 %v10762_v18, %v8631_v23  ;;  %v10736_v10 = vld [vmem:[#allocation9 + $0x324] sm:$0xf]  ;;  %v10734_v23 = vld [vmem:[#allocation9 + $0x314] sm:$0xf] }
 0x18a   : > { %v1902_v46 = vadd.f32 %v1901_v47, %v1888_v45  ;;  %v10772_v47 = vld [vmem:[#allocation9 + $0x444] sm:$0xf] }
 0x18b   : > { %3346 = vmatpush.bf16.msra.mxu0 %v8426_v8  ;;  %v8559_v8 = vld [vmem:[#allocation9 + $0x368] sm:$0xf0]  ;;  %v1928_v11 = vadd.f32 %v1927_v34, %v1914_v63  ;;  %v10792_v34 = vld [vmem:[#allocation9 + $0x4e4] sm:$0xf]  ;;  %v8535_v63 = vld [vmem:[#allocation9 + $0x338] sm:$0xf0] }
 0x18c   : > { %3360 = vmatpush.bf16.msra.mxu1 %v8490_v16  ;;  %v1954_v58 = vmax.f32 %v1902_v46, 0.0  ;;  %v8562_v20 = vor.u32 %v10744_v56, %v8559_v8  ;;  %v8546_v46 = vor.u32 %v10740_v44, %v8543_v41  ;;  %v8666_v8 = vor.u32 %v10770_v0, %v8663_v2  ;;  %v10768_v13 = vld [vmem:[#allocation9 + $0x424] sm:$0xf]  ;;  %v8511_v44 = vld [vmem:[#allocation9 + $0x308] sm:$0xf0] }
 0x18d   : > { %3310 = vmatmul.bf16.vlgmr.msrb.gmra.mxu1 %v11915_v60  ;;  %v1943_v22 = vmax.f32 %v1928_v11, 0.0  ;;  %v8527_v11 = vld [vmem:[#allocation9 + $0x328] sm:$0xf0]  ;;  %v10764_v41 = vld [vmem:[#allocation9 + $0x404] sm:$0xf] }
 0x18e   : > { %v11953_v43 = vpack.c.bf16 %v1954_v58, %v1942_v57  ;;  %v8530_v17 = vor.u32 %v10736_v10, %v8527_v11  ;;  %v8887_v10 = vld [vmem:[#allocation9 + $0x5f8] sm:$0xf0] }
 0x18f   : > { %3347 = vmatpush.bf16.msra.mxu0 %v8418_v15  ;;  %v8687_v15 = vld [vmem:[#allocation9 + $0x468] sm:$0xf0] }
 0x190   : > { %3361 = vmatpush.bf16.msra.mxu1 %v8482_v1  ;;  %v1915_v60 = vpop.f32.mrf.mxu2  ;;  %v1929_v16 = vpop.f32.mrf.mxu3  ;;  %3268 = vmatmul.bf16.vlgmr.msra.gmra.mxu2 %v11953_v43  ;;  %v10742_v1 = vld [vmem:[#allocation9 + $0x354] sm:$0xf] }
 0x191   : > { %v1916_v12 = vadd.f32 %v1915_v60, %v613_v39  ;;  %3372 = vmatpush.bf16.msra.mxu2 %v8570_v28  ;;  %v8554_v21 = vor.u32 %v10742_v1, %v8551_v29  ;;  %v10760_v39 = vld [vmem:[#allocation9 + $0x3e4] sm:$0xf]  ;;  %v8735_v28 = vld [vmem:[#allocation9 + $0x4c8] sm:$0xf0]  ;;  %v10766_v29 = vld [vmem:[#allocation9 + $0x414] sm:$0xf] }
 0x193   : > { %3348 = vmatpush.bf16.msra.mxu0 %v8410_v25  ;;  %v1930_v19 = vadd.f32 %v1929_v16, %v1916_v12  ;;  %v8690_v25 = vor.u32 %v10776_v14, %v8687_v15  ;;  %v8655_v14 = vld [vmem:[#allocation9 + $0x428] sm:$0xf0]  ;;  %v10786_v16 = vld [vmem:[#allocation9 + $0x4b4] sm:$0xf] }
 0x194   : > { %3362 = vmatpush.bf16.msra.mxu1 %v8474_v35  ;;  %v8751_v35 = vld [vmem:[#allocation9 + $0x4e8] sm:$0xf0]  ;;  %v8658_v18 = vor.u32 %v10768_v13, %v8655_v14  ;;  %v8730_v1 = vor.u32 %v10786_v16, %v8727_v42  ;;  %v10806_v13 = vld [vmem:[#allocation9 + $0x554] sm:$0xf]  ;;  %v8807_v14 = vld [vmem:[#allocation9 + $0x558] sm:$0xf0] }
 0x195   : > { %v1955_v30 = vmax.f32 %v1930_v19, 0.0  ;;  %3373 = vmatpush.bf16.msra.mxu2 %v8562_v20  ;;  %v8754_v45 = vor.u32 %v10792_v34, %v8751_v35  ;;  %v10754_v19 = vld [vmem:[#allocation9 + $0x3b4] sm:$0xf]  ;;  %v8599_v20 = vld [vmem:[#allocation9 + $0x3b8] sm:$0xf0] }
 0x196   : > { %v10752_v35 = vld [vmem:[#allocation9 + $0x3a4] sm:$0xf] }
 0x197   : > { %3349 = vmatpush.bf16.msra.mxu0 %v8402_v32  ;;  %v8679_v32 = vld [vmem:[#allocation9 + $0x458] sm:$0xf0]  ;;  %v11957_v38 = vpack.c.bf16 %v1955_v30, %v1943_v22 }
 0x198   : > { %3363 = vmatpush.bf16.msra.mxu1 %v8466_v55  ;;  %v8682_v40 = vor.u32 %v10774_v31, %v8679_v32  ;;  %v10758_v55 = vld [vmem:[#allocation9 + $0x3d4] sm:$0xf]  ;;  %v8647_v22 = vld [vmem:[#allocation9 + $0x418] sm:$0xf0]  ;;  %v10784_v31 = vld [vmem:[#allocation9 + $0x4a4] sm:$0xf] }
 0x199   : > { %3282 = vmatmul.bf16.vlgmr.msra.gmra.mxu3 %v11957_v38  ;;  %3374 = vmatpush.bf16.msra.mxu2 %v8554_v21  ;;  %v8618_v58 = vor.u32 %v10758_v55, %v8615_v26  ;;  %v8719_v32 = vld [vmem:[#allocation9 + $0x4a8] sm:$0xf0]  ;;  %v10782_v55 = vld [vmem:[#allocation9 + $0x494] sm:$0xf]  ;;  %v8711_v26 = vld [vmem:[#allocation9 + $0x498] sm:$0xf0] }
 0x19a   : > { %3386 = vmatpush.bf16.msra.mxu3 %v8634_v33  ;;  %v8591_v21 = vld [vmem:[#allocation9 + $0x3a8] sm:$0xf0] }
 0x19b   : > { %3350 = vmatpush.bf16.msra.mxu0 %v8394_v49  ;;  %v8626_v49 = vor.u32 %v10760_v39, %v8623_v36  ;;  %v8650_v36 = vor.u32 %v10766_v29, %v8647_v22  ;;  %v8791_v29 = vld [vmem:[#allocation9 + $0x538] sm:$0xf0] }
 0x19c   : > { %3364 = vmatpush.bf16.msra.mxu1 %v8458_v5  ;;  %v8538_v5 = vor.u32 %v10738_v62, %v8535_v63  ;;  %v10750_v62 = vld [vmem:[#allocation9 + $0x394] sm:$0xf]  ;;  %v8583_v63 = vld [vmem:[#allocation9 + $0x398] sm:$0xf0] }
 0x19d   : > { %3375 = vmatpush.bf16.msra.mxu2 %v8546_v46  ;;  %v8594_v46 = vor.u32 %v10752_v35, %v8591_v21  ;;  %v8855_v35 = vld [vmem:[#allocation9 + $0x5b8] sm:$0xf0]  ;;  %v10798_v21 = vld [vmem:[#allocation9 + $0x514] sm:$0xf] }
 0x19e   : > { %3387 = vmatpush.bf16.msra.mxu3 %v8626_v49  ;;  %v10810_v49 = vld [vmem:[#allocation9 + $0x574] sm:$0xf] }
 0x19f   : > { %3351 = vmatpush.bf16.msra.mxu0 %v8386_v6  ;;  %v3129_v57 = vpop.f32.mrf.mxu0  ;;  %v10788_v6 = vld [vmem:[#allocation9 + $0x4c4] sm:$0xf]  ;;  %v8826_v0 = vor.u32 %v10810_v49, %v8823_v51  ;;  %v10814_v49 = vld [vmem:[#allocation9 + $0x594] sm:$0xf]  ;;  %v8839_v51 = vld [vmem:[#allocation9 + $0x598] sm:$0xf0] }
 0x1a0   : > { %3365 = vmatpush.bf16.msra.mxu1 %v8450_v24  ;;  %v3143_v60 = vpop.f32.mrf.mxu1  ;;  %v8738_v12 = vor.u32 %v10788_v6, %v8735_v28  ;;  %3324 = vmatmul.bf16.vlgmr.msrb.gmra.mxu2 %v11907_v54  ;;  %v8519_v24 = vld [vmem:[#allocation9 + $0x318] sm:$0xf0]  ;;  %v8602_v54 = vor.u32 %v10754_v19, %v8599_v20  ;;  %v8586_v28 = vor.u32 %v10750_v62, %v8583_v63  ;;  %v10824_v19 = vld [vmem:[#allocation9 + $0x5e4] sm:$0xf]  ;;  %v8879_v20 = vld [vmem:[#allocation9 + $0x5e8] sm:$0xf0] }
 0x1a1   : > { %v3144_v56 = vadd.f32 %v3143_v60, %v3129_v57  ;;  %3376 = vmatpush.bf16.msra.mxu2 %v8538_v5  ;;  %v8522_v34 = vor.u32 %v10734_v23, %v8519_v24  ;;  %v10808_v57 = vld [vmem:[#allocation9 + $0x564] sm:$0xf]  ;;  %v8703_v5 = vld [vmem:[#allocation9 + $0x488] sm:$0xf0]  ;;  %v8882_v24 = vor.u32 %v10824_v19, %v8879_v20 }
 0x1a2   : > { %3352 = vmatmul.bf16.vlgmr.msra.gmra.mxu0 %v11925_v50  ;;  %v8671_v50 = vld [vmem:[#allocation9 + $0x448] sm:$0xf0]  ;;  %3388 = vmatpush.bf16.msra.mxu3 %v8618_v58  ;;  %v10780_v60 = vld [vmem:[#allocation9 + $0x484] sm:$0xf] }
 0x1a3   : > { %3400 = vmatpush.bf16.msrb.mxu0 %v8698_v3  ;;  %3366 = vmatmul.bf16.vlgmr.msra.gmra.mxu1 %v11927_v53  ;;  %v8674_v59 = vor.u32 %v10772_v47, %v8671_v50  ;;  %v10756_v53 = vld [vmem:[#allocation9 + $0x3c4] sm:$0xf]  ;;  %v8607_v3 = vld [vmem:[#allocation9 + $0x3c8] sm:$0xf0]  ;;  %v8722_v47 = vor.u32 %v10784_v31, %v8719_v32 }
 0x1a4   : > { %3414 = vmatpush.bf16.msrb.mxu1 %v8762_v61  ;;  %v8610_v15 = vor.u32 %v10756_v53, %v8607_v3  ;;  %v8639_v50 = vld [vmem:[#allocation9 + $0x408] sm:$0xf0]  ;;  %v10748_v53 = vld [vmem:[#allocation9 + $0x384] sm:$0xf] }
 0x1a5   : > { %3377 = vmatpush.bf16.msra.mxu2 %v8530_v17  ;;  %v8815_v58 = vld [vmem:[#allocation9 + $0x568] sm:$0xf0]  ;;  %v8810_v17 = vor.u32 %v10806_v13, %v8807_v14  ;;  %v10800_v31 = vld [vmem:[#allocation9 + $0x524] sm:$0xf] }
 0x1a6   : > { %3389 = vmatpush.bf16.msra.mxu3 %v8610_v15  ;;  %v8575_v3 = vld [vmem:[#allocation9 + $0x388] sm:$0xf0] }
 0x1a7   : > { %3401 = vmatpush.bf16.msrb.mxu0 %v8690_v25  ;;  %v3131_v61 = vpop.f32.mrf.mxu0  ;;  %v8578_v16 = vor.u32 %v10748_v53, %v8575_v3  ;;  %v8799_v23 = vld [vmem:[#allocation9 + $0x548] sm:$0xf0] }
 0x1a8   : > { %3415 = vmatpush.bf16.msrb.mxu1 %v8754_v45  ;;  %v3157_v25 = vpop.f32.mrf.mxu2  ;;  %v3145_v33 = vpop.f32.mrf.mxu1  ;;  %v8783_v32 = vld [vmem:[#allocation9 + $0x528] sm:$0xf0] }
 0x1a9   : > { %v3158_v30 = vadd.f32 %v3157_v25, %v3144_v56  ;;  %v3146_v39 = vadd.f32 %v3145_v33, %v3131_v61  ;;  %v3171_v45 = vpop.f32.mrf.mxu3  ;;  %3338 = vmatmul.bf16.vlgmr.msrb.gmra.mxu3 %v11918_v7  ;;  %3378 = vmatpush.bf16.msra.mxu2 %v8522_v34  ;;  %v8714_v7 = vor.u32 %v10782_v55, %v8711_v26  ;;  %v10820_v61 = vld [vmem:[#allocation9 + $0x5c4] sm:$0xf]  ;;  %v10818_v34 = vld [vmem:[#allocation9 + $0x5b4] sm:$0xf]  ;;  %v8831_v26 = vld [vmem:[#allocation9 + $0x588] sm:$0xf0] }
 0x1aa   : > { %3390 = vmatpush.bf16.msra.mxu3 %v8602_v54  ;;  %v8818_v56 = vor.u32 %v10808_v57, %v8815_v58  ;;  %v8863_v54 = vld [vmem:[#allocation9 + $0x5c8] sm:$0xf0]  ;;  %v10812_v55 = vld [vmem:[#allocation9 + $0x584] sm:$0xf] }
 0x1ab   : > { %3402 = vmatpush.bf16.msrb.mxu0 %v8682_v40  ;;  %v10732_v40 = vld [vmem:[#allocation9 + $0x304] sm:$0xf]  ;;  %v11963_v52 = vadd.f32 %v3171_v45, %v3158_v30  ;;  %v8866_v33 = vor.u32 %v10820_v61, %v8863_v54  ;;  %v8767_v45 = vld [vmem:[#allocation9 + $0x508] sm:$0xf0] }
 0x1ac   : > { %3416 = vmatpush.bf16.msrb.mxu1 %v8746_v9  ;;  %v8642_v9 = vor.u32 %v10764_v41, %v8639_v50  ;;  %v10796_v41 = vld [vmem:[#allocation9 + $0x504] sm:$0xf] }
 0x1ad   : > { %v8770_v50 = vor.u32 %v10796_v41, %v8767_v45 }
 0x1ae   : > { %3391 = vmatpush.bf16.msra.mxu3 %v8594_v46  ;;  %v8842_v46 = vor.u32 %v10814_v49, %v8839_v51 }
 0x1af   : > { %3403 = vmatpush.bf16.msrb.mxu0 %v8674_v59  ;;  %v8514_v59 = vor.u32 %v10732_v40, %v8511_v44  ;;  %v10816_v40 = vld [vmem:[#allocation9 + $0x5a4] sm:$0xf]  ;;  %v8847_v44 = vld [vmem:[#allocation9 + $0x5a8] sm:$0xf0] }
 0x1b0   : > { %3417 = vmatpush.bf16.msrb.mxu1 %v8738_v12  ;;  %v3159_v2 = vpop.f32.mrf.mxu2  ;;  %v8706_v12 = vor.u32 %v10780_v60, %v8703_v5 }
 0x1b1   : > { %v3160_v6 = vadd.f32 %v3159_v2, %v3146_v39  ;;  %3379 = vmatpush.bf16.msra.mxu2 %v8514_v59  ;;  %v3173_v11 = vpop.f32.mrf.mxu3  ;;  %v8775_v39 = vld [vmem:[#allocation9 + $0x518] sm:$0xf0]  ;;  %v8834_v59 = vor.u32 %v10812_v55, %v8831_v26 }
 0x1b2   : > { %3392 = vmatpush.bf16.msra.mxu3 %v8586_v28 }
 0x1b3   : > { %3404 = vmatpush.bf16.msrb.mxu0 %v8666_v8  ;;  %v10826_v8 = vld [vmem:[#allocation9 + $0x5f4] sm:$0xf]  ;;  %v11965_v15 = vadd.f32 %v3173_v11, %v3160_v6 }
 0x1b4   : > { %3418 = vmatpush.bf16.msrb.mxu1 %v8730_v1  ;;  %3380 = vmatmul.bf16.vlgmr.msra.gmra.mxu2 %v11933_v27  ;;  %v8890_v42 = vor.u32 %v10826_v8, %v8887_v10  ;;  %v10822_v1 = vld [vmem:[#allocation9 + $0x5d4] sm:$0xf]  ;;  %v8871_v27 = vld [vmem:[#allocation9 + $0x5d8] sm:$0xf0] }
 0x1b5   : > { %3428 = vmatpush.bf16.msrb.mxu2 %v8826_v0  ;;  %v8874_v22 = vor.u32 %v10822_v1, %v8871_v27  ;;  %v11647_v1 = vmov -inf  }
 0x1b6   : > { %3393 = vmatpush.bf16.msra.mxu3 %v8578_v16  ;;  %3461 = vst.msk [vmem:[#allocation3] sm:$0xff] %vm3460_vm0, %v11647_v1 }
 0x1b7   : > { %3405 = vmatpush.bf16.msrb.mxu0 %v8658_v18  ;;  %v10804_v18 = vld [vmem:[#allocation9 + $0x544] sm:$0xf]  ;;  %3462 = vst.msk [vmem:[#allocation3 + $0x8] sm:$0xff] %vm3460_vm0, %v11647_v1 }
 0x1b8   : > { %3419 = vmatpush.bf16.msrb.mxu1 %v8722_v47  ;;  %v8802_v25 = vor.u32 %v10804_v18, %v8799_v23  ;;  %v8850_v47 = vor.u32 %v10816_v40, %v8847_v44 }
 0x1b9   : > { %3429 = vmatpush.bf16.msrb.mxu2 %v8818_v56  ;;  %3394 = vmatmul.bf16.vlgmr.msra.gmra.mxu3 %v11936_v48  ;;  %v8858_v48 = vor.u32 %v10818_v34, %v8855_v35 }
 0x1ba   : > { %3442 = vmatpush.bf16.msrb.mxu3 %v8890_v42 }
 0x1bb   : > { %3406 = vmatpush.bf16.msrb.mxu0 %v8650_v36  ;;  %v8778_v36 = vor.u32 %v10798_v21, %v8775_v39 }
 0x1bc   : > { %3420 = vmatpush.bf16.msrb.mxu1 %v8714_v7 }
 0x1bd   : > { %3430 = vmatpush.bf16.msrb.mxu2 %v8810_v17 }
 0x1be   : > { %3443 = vmatpush.bf16.msrb.mxu3 %v8882_v24 }
 0x1bf   : > { %3407 = vmatpush.bf16.msrb.mxu0 %v8642_v9  ;;  %v3185_v62 = vpop.f32.mrf.mxu0 }
 0x1c0   : > { %3421 = vmatpush.bf16.msrb.mxu1 %v8706_v12  ;;  %v3199_v63 = vpop.f32.mrf.mxu1 }
 0x1c1   : > { %3431 = vmatpush.bf16.msrb.mxu2 %v8802_v25 }
 0x1c2   : > { %3408 = vmatmul.bf16.vlgmr.msrb.gmra.mxu0 %v11943_v37  ;;  %v10802_v37 = vld [vmem:[#allocation9 + $0x534] sm:$0xf]  ;;  %3444 = vmatpush.bf16.msrb.mxu3 %v8874_v22  ;;  %v11648_v22 = vmov 0.0  }
 0x1c3   : > { %3422 = vmatmul.bf16.vlgmr.msrb.gmra.mxu1 %v11946_v4  ;;  %v8794_v30 = vor.u32 %v10802_v37, %v8791_v29  ;;  %v8786_v4 = vor.u32 %v10800_v31, %v8783_v32  ;;  %3463 = vst.msk [vmem:[#allocation4] sm:$0xff] %vm3460_vm0, %v11648_v22 }
 0x1c4   : > { %3464 = vst.msk [vmem:[#allocation4 + $0x8] sm:$0xff] %vm3460_vm0, %v11648_v22 }
 0x1c5   : > { %3432 = vmatpush.bf16.msrb.mxu2 %v8794_v30  ;;  %v3186_v30 = vadd.f32 %v3185_v62, %v11963_v52 }
 0x1c6   : > { %3445 = vmatpush.bf16.msrb.mxu3 %v8866_v33 }
 0x1c7   : > { %v3187_v0 = vpop.f32.mrf.mxu0 }
 0x1c8   : > { %v3201_v7 = vpop.f32.mrf.mxu1 }
 0x1c9   : > { %3433 = vmatpush.bf16.msrb.mxu2 %v8786_v4  ;;  %v3200_v4 = vadd.f32 %v3199_v63, %v3186_v30 }
 0x1ca   : > { %3446 = vmatpush.bf16.msrb.mxu3 %v8858_v48 }
 0x1cd   : > { %3434 = vmatpush.bf16.msrb.mxu2 %v8778_v36  ;;  %v3188_v36 = vadd.f32 %v3187_v0, %v11965_v15 }
 0x1ce   : > { %3447 = vmatpush.bf16.msrb.mxu3 %v8850_v47 }
 0x1cf   : > { %v3202_v49 = vadd.f32 %v3201_v7, %v3188_v36 }
 0x1d1   : > { %3435 = vmatpush.bf16.msrb.mxu2 %v8770_v50 }
 0x1d2   : > { %3448 = vmatpush.bf16.msrb.mxu3 %v8842_v46 }
 0x1d4   : > { %3436 = vmatmul.bf16.vlgmr.msrb.gmra.mxu2 %v11953_v43  ;;  %v3213_v9 = vpop.f32.mrf.mxu2 }
 0x1d5   : > { %v3214_v39 = vadd.f32 %v3213_v9, %v3200_v4 }
 0x1d6   : > { %3449 = vmatpush.bf16.msrb.mxu3 %v8834_v59 }
 0x1d9   : > { %3450 = vmatmul.bf16.vlgmr.msrb.gmra.mxu3 %v11957_v38 }
 0x1dc   : > { %v3227_v2 = vpop.f32.mrf.mxu3  ;;  %v3215_v57 = vpop.f32.mrf.mxu2 }
 0x1dd   : > { %v3228_v40 = vadd.f32 %v3227_v2, %v3214_v39  ;;  %v3216_v26 = vadd.f32 %v3215_v57, %v3202_v49 }
 0x1e4   : > { %v11973_v6 = vpop.f32.mrf.mxu3 }
 0x1e5   : > { %v3230_v9 = vadd.f32 %v11973_v6, %v3216_v26 }
 0x1ee   : > { %v3241_v58 = vpop.f32.mrf.mxu0 }
 0x1ef   : > { %v3242_v50 = vadd.f32 %v3241_v58, %v3228_v40 }
 0x1f6   : > { %v11975_v5 = vpop.f32.mrf.mxu0 }
 0x1f7   : > { %v3244_v2 = vadd.f32 %v11975_v5, %v3230_v9 }
 0x1fa   : > { %v3255_v28 = vpop.f32.mrf.mxu1 }
 0x1fb   : > { %v3256_v51 = vadd.f32 %v3255_v28, %v3242_v50 }
 0x1ff   : > { %v3297_v38 = vpop.f32.mrf.mxu0 }
 0x202   : > { %v11977_v43 = vpop.f32.mrf.mxu1 }
 0x203   : > { %v3258_v7 = vadd.f32 %v11977_v43, %v3244_v2 }
 0x207   : > { %v3299_v11 = vpop.f32.mrf.mxu0 }
 0x20a   : > { %v3311_v8 = vpop.f32.mrf.mxu1 }
 0x20b   : > { %v3312_v17 = vadd.f32 %v3311_v8, %v3297_v38 }
 0x212   : > { %v3313_v13 = vpop.f32.mrf.mxu1 }
 0x213   : > { %v3269_v60 = vpop.f32.mrf.mxu2  ;;  %v3314_v24 = vadd.f32 %v3313_v13, %v3299_v11 }
 0x214   : > { %v3270_v59 = vadd.f32 %v3269_v60, %v3256_v51 }
 0x21b   : > { %v11979_v3 = vpop.f32.mrf.mxu2 }
 0x21c   : > { %v3283_v53 = vpop.f32.mrf.mxu3  ;;  %v3272_v57 = vadd.f32 %v11979_v3, %v3258_v7 }
 0x21d   : > { %v3284_v8 = vadd.f32 %v3283_v53, %v3270_v59 }
 0x21f   : > { %v3353_v16 = vpop.f32.mrf.mxu0 }
 0x220   : > { %v3367_v20 = vpop.f32.mrf.mxu1 }
 0x223   : > { %v3325_v10 = vpop.f32.mrf.mxu2 }
 0x224   : > { %v11981_v56 = vpop.f32.mrf.mxu3  ;;  %v3326_v19 = vadd.f32 %v3325_v10, %v3312_v17 }
 0x225   : > { %v3286_v13 = vadd.f32 %v11981_v56, %v3272_v57 }
 0x227   : > { %v3355_v27 = vpop.f32.mrf.mxu0 }
 0x228   : > { %v3369_v31 = vpop.f32.mrf.mxu1 }
 0x22b   : > { %v3327_v14 = vpop.f32.mrf.mxu2 }
 0x22c   : > { %v3339_v12 = vpop.f32.mrf.mxu3  ;;  %v3328_v29 = vadd.f32 %v3327_v14, %v3314_v24 }
 0x22d   : > { %v3340_v23 = vadd.f32 %v3339_v12, %v3326_v19 }
 0x22f   : > { %v3354_v25 = vadd.f32 %v3353_v16, %v3340_v23 }
 0x231   : > { %v3368_v54 = vadd.f32 %v3367_v20, %v3354_v25 }
 0x234   : > { %v3341_v42 = vpop.f32.mrf.mxu3 }
 0x235   : > { %v3342_v61 = vadd.f32 %v3341_v42, %v3328_v29 }
 0x237   : > { %v3381_v18 = vpop.f32.mrf.mxu2  ;;  %v3356_v34 = vadd.f32 %v3355_v27, %v3342_v61 }
 0x238   : > { %v3382_v33 = vadd.f32 %v3381_v18, %v3368_v54 }
 0x239   : > { %v3370_v41 = vadd.f32 %v3369_v31, %v3356_v34 }
 0x23c   : > { %v3395_v37 = vpop.f32.mrf.mxu3 }
 0x23d   : > { %v3396_v35 = vadd.f32 %v3395_v37, %v3382_v33 }
 0x23f   : > { %v3383_v32 = vpop.f32.mrf.mxu2  ;;  %v3409_v21 = vpop.f32.mrf.mxu0 }
 0x240   : > { %v3410_v44 = vadd.f32 %v3409_v21, %v3396_v35  ;;  %v3423_v45 = vpop.f32.mrf.mxu1  ;;  %v3384_v52 = vadd.f32 %v3383_v32, %v3370_v41 }
 0x242   : > { %v3424_v55 = vadd.f32 %v3423_v45, %v3410_v44 }
 0x244   : > { %v3397_v48 = vpop.f32.mrf.mxu3 }
 0x245   : > { %v3398_v46 = vadd.f32 %v3397_v48, %v3384_v52 }
 0x247   : > { %v3411_v63 = vpop.f32.mrf.mxu0 }
 0x248   : > { %v3412_v15 = vadd.f32 %v3411_v63, %v3398_v46  ;;  %v3425_v11 = vpop.f32.mrf.mxu1 }
 0x24a   : > { %v3426_v28 = vadd.f32 %v3425_v11, %v3412_v15 }
 0x257   : > { %v3437_v47 = vpop.f32.mrf.mxu2 }
 0x258   : > { %v3438_v62 = vadd.f32 %v3437_v47, %v3424_v55 }
 0x25c   : > { %v3451_v38 = vpop.f32.mrf.mxu3 }
 0x25d   : > { %v3452_v0 = vadd.f32 %v3451_v38, %v3438_v62 }
 0x25f   : > { %v3456_v10 = vpack.c.bf16 %v3452_v0, %v3284_v8  ;;  %v3439_v58 = vpop.f32.mrf.mxu2 }
 0x260   : > { %v3440_v60 = vadd.f32 %v3439_v58, %v3426_v28 }
 0x261   : > { %3458 = vst [vmem:[#allocation2] sm:$0xff] %v3456_v10 }
 0x264   : > { %v3453_v12 = vpop.f32.mrf.mxu3 }
 0x265   : > { %v3454_v14 = vadd.f32 %v3453_v12, %v3440_v60 }
 0x267   : > { %v3457_v6 = vpack.c.bf16 %v3454_v14, %v3286_v13 }
 0x269   : > { %3459 = vst [vmem:[#allocation2 + $0x8] sm:$0xff] %v3457_v6 }
 0x26a PF: > { %v9573_v5 = vld [vmem:[%s11817_s15 + $0x540] sm:$0xf]  ;;  %v10998_v16 = vld [vmem:[%s11817_s15 + $0x544] sm:$0xf]  ;;  %vm6777_vm1 = vcmask 7168   ;;  %s14049_s30 = sld [smem:[#allocation37_spill]] (!%p7346_p1) }
 0x26b   : > { %v11010_v53 = vld [vmem:[%s11817_s15 + $0x59c] sm:$0xf0]  ;;  %v9575_v42 = vld [vmem:[%s11817_s15 + $0x5a0] sm:$0xf0] }
 0x26c   : > { %v10341_v43 = vld [vmem:[%s11817_s15 + $0xb40] sm:$0xf]  ;;  %v9574_v3 = vor.u32 %v11010_v53, %v9573_v5  ;;  %v9578_v19 = vor.u32 %v10998_v16, %v9575_v42  ;;  %v11190_v20 = vld [vmem:[%s11817_s15 + $0xb44] sm:$0xf] }
 0x26d   : > { %v11202_v56 = vld [vmem:[%s11817_s15 + $0xb9c] sm:$0xf0]  ;;  %v10343_v18 = vld [vmem:[%s11817_s15 + $0xba0] sm:$0xf0] }
 0x26e   : > { %v10342_v17 = vor.u32 %v11202_v56, %v10341_v43  ;;  %v9477_v23 = vld [vmem:[%s11817_s15 + $0x480] sm:$0xf]  ;;  %5835 = vmatpush.bf16.msra.mxu0 %v9574_v3  ;;  %v10346_v24 = vor.u32 %v11190_v20, %v10343_v18  ;;  %5863 = vmatpush.bf16.msra.mxu2 %v9578_v19  ;;  %v10974_v22 = vld [vmem:[%s11817_s15 + $0x484] sm:$0xf] }
 0x26f   : > { %v10986_v25 = vld [vmem:[%s11817_s15 + $0x4dc] sm:$0xf0]  ;;  %v9479_v30 = vld [vmem:[%s11817_s15 + $0x4e0] sm:$0xf0] }
 0x270   : > { %v10245_v1 = vld [vmem:[%s11817_s15 + $0xa80] sm:$0xf]  ;;  %5849 = vmatpush.bf16.msra.mxu1 %v10342_v17  ;;  %v9478_v37 = vor.u32 %v10986_v25, %v9477_v23  ;;  %v11166_v61 = vld [vmem:[%s11817_s15 + $0xa84] sm:$0xf]  ;;  %5877 = vmatpush.bf16.msra.mxu3 %v10346_v24  ;;  %v9482_v54 = vor.u32 %v10974_v22, %v9479_v30 }
 0x271   : > { %v11178_v27 = vld [vmem:[%s11817_s15 + $0xadc] sm:$0xf0]  ;;  %v10247_v31 = vld [vmem:[%s11817_s15 + $0xae0] sm:$0xf0] }
 0x272   : > { %v10246_v29 = vor.u32 %v11178_v27, %v10245_v1  ;;  %v9381_v32 = vld [vmem:[%s11817_s15 + $0x3c0] sm:$0xf]  ;;  %v10250_v4 = vor.u32 %v11166_v61, %v10247_v31  ;;  %v10950_v21 = vld [vmem:[%s11817_s15 + $0x3c4] sm:$0xf]  ;;  %5836 = vmatpush.bf16.msra.mxu0 %v9478_v37  ;;  %5864 = vmatpush.bf16.msra.mxu2 %v9482_v54 }
 0x273   : > { %v10962_v33 = vld [vmem:[%s11817_s15 + $0x41c] sm:$0xf0]  ;;  %v9383_v48 = vld [vmem:[%s11817_s15 + $0x420] sm:$0xf0] }
 0x274   : > { %v10149_v34 = vld [vmem:[%s11817_s15 + $0x9c0] sm:$0xf]  ;;  %v9382_v39 = vor.u32 %v10962_v33, %v9381_v32  ;;  %v11142_v36 = vld [vmem:[%s11817_s15 + $0x9c4] sm:$0xf]  ;;  %5850 = vmatpush.bf16.msra.mxu1 %v10246_v29  ;;  %v9386_v41 = vor.u32 %v10950_v21, %v9383_v48  ;;  %5878 = vmatpush.bf16.msra.mxu3 %v10250_v4  ;;  %v9581_v21 = vld [vmem:[%s11817_s15 + $0x548] sm:$0xf] }
 0x275   : > { %v11154_v35 = vld [vmem:[%s11817_s15 + $0xa1c] sm:$0xf0]  ;;  %v10151_v40 = vld [vmem:[%s11817_s15 + $0xa20] sm:$0xf0]  ;;  %v10349_v48 = vld [vmem:[%s11817_s15 + $0xb48] sm:$0xf] }
 0x276   : > { %v10150_v44 = vor.u32 %v11154_v35, %v10149_v34  ;;  %v9285_v45 = vld [vmem:[%s11817_s15 + $0x300] sm:$0xf]  ;;  %v10154_v52 = vor.u32 %v11142_v36, %v10151_v40  ;;  %v10926_v51 = vld [vmem:[%s11817_s15 + $0x304] sm:$0xf]  ;;  %5837 = vmatpush.bf16.msra.mxu0 %v9382_v39  ;;  %5865 = vmatpush.bf16.msra.mxu2 %v9386_v41  ;;  %v11011_v39 = vld [vmem:[%s11817_s15 + $0x5a4] sm:$0xf0] }
 0x277   : > { %v10938_v47 = vld [vmem:[%s11817_s15 + $0x35c] sm:$0xf0]  ;;  %v9287_v46 = vld [vmem:[%s11817_s15 + $0x360] sm:$0xf0]  ;;  %v11203_v40 = vld [vmem:[%s11817_s15 + $0xba4] sm:$0xf0] }
 0x278   : > { %v10053_v50 = vld [vmem:[%s11817_s15 + $0x900] sm:$0xf]  ;;  %v11118_v55 = vld [vmem:[%s11817_s15 + $0x904] sm:$0xf]  ;;  %v9286_v59 = vor.u32 %v10938_v47, %v9285_v45  ;;  %5851 = vmatpush.bf16.msra.mxu1 %v10150_v44  ;;  %v9290_v63 = vor.u32 %v10926_v51, %v9287_v46  ;;  %5879 = vmatpush.bf16.msra.mxu3 %v10154_v52  ;;  %v10999_v44 = vld [vmem:[%s11817_s15 + $0x54c] sm:$0xf]  ;;  %v9582_v51 = vor.u32 %v11011_v39, %v9581_v21 }
 0x279   : > { %v11130_v49 = vld [vmem:[%s11817_s15 + $0x95c] sm:$0xf0]  ;;  %v10055_v26 = vld [vmem:[%s11817_s15 + $0x960] sm:$0xf0]  ;;  %v9583_v41 = vld [vmem:[%s11817_s15 + $0x5a8] sm:$0xf0] }
 0x27a   : > { %v10054_v62 = vor.u32 %v11130_v49, %v10053_v50  ;;  %v9189_v38 = vld [vmem:[%s11817_s15 + $0x240] sm:$0xf]  ;;  %v10058_v15 = vor.u32 %v11118_v55, %v10055_v26  ;;  %v10902_v2 = vld [vmem:[%s11817_s15 + $0x244] sm:$0xf]  ;;  %5838 = vmatpush.bf16.msra.mxu0 %v9286_v59  ;;  %5866 = vmatpush.bf16.msra.mxu2 %v9290_v63  ;;  %v11191_v50 = vld [vmem:[%s11817_s15 + $0xb4c] sm:$0xf]  ;;  %v10350_v55 = vor.u32 %v11203_v40, %v10349_v48 }
 0x27b   : > { %v10914_v9 = vld [vmem:[%s11817_s15 + $0x29c] sm:$0xf0]  ;;  %v9191_v10 = vld [vmem:[%s11817_s15 + $0x2a0] sm:$0xf0]  ;;  %v10351_v52 = vld [vmem:[%s11817_s15 + $0xba8] sm:$0xf0]  ;;  %v9586_v26 = vor.u32 %v10999_v44, %v9583_v41 }
 0x27c   : > { %v9957_v8 = vld [vmem:[%s11817_s15 + $0x840] sm:$0xf]  ;;  %v11094_v11 = vld [vmem:[%s11817_s15 + $0x844] sm:$0xf]  ;;  %v9190_v7 = vor.u32 %v10914_v9, %v9189_v38  ;;  %5852 = vmatpush.bf16.msra.mxu1 %v10054_v62  ;;  %v9194_v57 = vor.u32 %v10902_v2, %v9191_v10  ;;  %5880 = vmatpush.bf16.msra.mxu3 %v10058_v15  ;;  %v9485_v46 = vld [vmem:[%s11817_s15 + $0x488] sm:$0xf]  ;;  %v10354_v38 = vor.u32 %v11191_v50, %v10351_v52 }
 0x27d   : > { %v11106_v0 = vld [vmem:[%s11817_s15 + $0x89c] sm:$0xf0]  ;;  %v9959_v58 = vld [vmem:[%s11817_s15 + $0x8a0] sm:$0xf0]  ;;  %v10987_v59 = vld [vmem:[%s11817_s15 + $0x4e4] sm:$0xf0] }
 0x27e   : > { %v9958_v28 = vor.u32 %v11106_v0, %v9957_v8  ;;  %v9093_v60 = vld [vmem:[%s11817_s15 + $0x180] sm:$0xf]  ;;  %v9962_v14 = vor.u32 %v11094_v11, %v9959_v58  ;;  %v10878_v5 = vld [vmem:[%s11817_s15 + $0x184] sm:$0xf]  ;;  %5839 = vmatpush.bf16.msra.mxu0 %v9190_v7  ;;  %5867 = vmatpush.bf16.msra.mxu2 %v9194_v57  ;;  %v10253_v62 = vld [vmem:[%s11817_s15 + $0xa88] sm:$0xf]  ;;  %v9486_v11 = vor.u32 %v10987_v59, %v9485_v46 }
 0x27f   : > { %v10890_v12 = vld [vmem:[%s11817_s15 + $0x1dc] sm:$0xf0]  ;;  %v9095_v53 = vld [vmem:[%s11817_s15 + $0x1e0] sm:$0xf0]  ;;  %v11179_v63 = vld [vmem:[%s11817_s15 + $0xae4] sm:$0xf0] }
 0x280   : > { %v9861_v13 = vld [vmem:[%s11817_s15 + $0x780] sm:$0xf]  ;;  %v11070_v43 = vld [vmem:[%s11817_s15 + $0x784] sm:$0xf]  ;;  %v9094_v56 = vor.u32 %v10890_v12, %v9093_v60  ;;  %5853 = vmatpush.bf16.msra.mxu1 %v9958_v28  ;;  %v9098_v42 = vor.u32 %v10878_v5, %v9095_v53  ;;  %5881 = vmatpush.bf16.msra.mxu3 %v9962_v14  ;;  %v10975_v9 = vld [vmem:[%s11817_s15 + $0x48c] sm:$0xf]  ;;  %v10254_v57 = vor.u32 %v11179_v63, %v10253_v62 }
 0x281   : > { %v11082_v6 = vld [vmem:[%s11817_s15 + $0x7dc] sm:$0xf0]  ;;  %v9863_v3 = vld [vmem:[%s11817_s15 + $0x7e0] sm:$0xf0]  ;;  %v9487_v8 = vld [vmem:[%s11817_s15 + $0x4e8] sm:$0xf0] }
 0x282   : > { %v9862_v16 = vor.u32 %v11082_v6, %v9861_v13  ;;  %v8997_v17 = vld [vmem:[%s11817_s15 + $0xc0] sm:$0xf]  ;;  %v9866_v18 = vor.u32 %v11070_v43, %v9863_v3  ;;  %v10854_v24 = vld [vmem:[%s11817_s15 + $0xc4] sm:$0xf]  ;;  %5840 = vmatpush.bf16.msra.mxu0 %v9094_v56  ;;  %5868 = vmatpush.bf16.msra.mxu2 %v9098_v42  ;;  %v11167_v15 = vld [vmem:[%s11817_s15 + $0xa8c] sm:$0xf]  ;;  %v9490_v60 = vor.u32 %v10975_v9, %v9487_v8 }
 0x283   : > { %v10866_v19 = vld [vmem:[%s11817_s15 + $0x11c] sm:$0xf0]  ;;  %v8999_v25 = vld [vmem:[%s11817_s15 + $0x120] sm:$0xf0]  ;;  %v10255_v0 = vld [vmem:[%s11817_s15 + $0xae8] sm:$0xf0] }
 0x284   : > { %v9765_v20 = vld [vmem:[%s11817_s15 + $0x6c0] sm:$0xf]  ;;  %v11046_v1 = vld [vmem:[%s11817_s15 + $0x6c4] sm:$0xf]  ;;  %v8998_v37 = vor.u32 %v10866_v19, %v8997_v17  ;;  %5854 = vmatpush.bf16.msra.mxu1 %v9862_v16  ;;  %v9002_v61 = vor.u32 %v10854_v24, %v8999_v25  ;;  %5882 = vmatpush.bf16.msra.mxu3 %v9866_v18  ;;  %v10829_v10 = vld [vmem:[#allocation2 + $0x4] sm:$0xf0]  ;;  %v10258_v6 = vor.u32 %v11167_v15, %v10255_v0 }
 0x285   : > { %v11058_v23 = vld [vmem:[%s11817_s15 + $0x71c] sm:$0xf0]  ;;  %v9767_v27 = vld [vmem:[%s11817_s15 + $0x720] sm:$0xf0]  ;;  %v9389_v58 = vld [vmem:[%s11817_s15 + $0x3c8] sm:$0xf] }
 0x286   : > { %v8901_v29 = vld [vmem:[%s11817_s15] sm:$0xf]  ;;  %v9766_v30 = vor.u32 %v11058_v23, %v9765_v20  ;;  %v10830_v32 = vld [vmem:[%s11817_s15 + $0x4] sm:$0xf]  ;;  %v9770_v33 = vor.u32 %v11046_v1, %v9767_v27  ;;  %5841 = vmatpush.bf16.msra.mxu0 %v8998_v37  ;;  %5869 = vmatpush.bf16.msra.mxu2 %v9002_v61  ;;  %v10963_v7 = vld [vmem:[%s11817_s15 + $0x424] sm:$0xf0] }
 0x287   : > { %v10842_v22 = vld [vmem:[%s11817_s15 + $0x5c] sm:$0xf0]  ;;  %v8903_v4 = vld [vmem:[%s11817_s15 + $0x60] sm:$0xf0]  ;;  %v10157_v12 = vld [vmem:[%s11817_s15 + $0x9c8] sm:$0xf]  ;;  %v9390_v42 = vor.u32 %v10963_v7, %v9389_v58 }
 0x288   : > { %v9669_v54 = vld [vmem:[%s11817_s15 + $0x600] sm:$0xf]  ;;  %v11022_v34 = vld [vmem:[%s11817_s15 + $0x604] sm:$0xf]  ;;  %v8902_v36 = vor.u32 %v10842_v22, %v8901_v29  ;;  %5855 = vmatpush.bf16.msra.mxu1 %v9766_v30  ;;  %v8906_v47 = vor.u32 %v10830_v32, %v8903_v4  ;;  %5883 = vmatpush.bf16.msra.mxu3 %v9770_v33  ;;  %v11155_v13 = vld [vmem:[%s11817_s15 + $0xa24] sm:$0xf0] }
 0x289   : > { %v11034_v31 = vld [vmem:[%s11817_s15 + $0x65c] sm:$0xf0]  ;;  %v9671_v35 = vld [vmem:[%s11817_s15 + $0x660] sm:$0xf0]  ;;  %v10951_v14 = vld [vmem:[%s11817_s15 + $0x3cc] sm:$0xf]  ;;  %v10158_v17 = vor.u32 %v11155_v13, %v10157_v12 }
 0x28a   : > { %v9670_v45 = vor.u32 %v11034_v31, %v9669_v54  ;;  %v9674_v49 = vor.u32 %v11022_v34, %v9671_v35  ;;  %5842 = vmatpush.bf16.msra.mxu0 %v8902_v36  ;;  %5870 = vmatpush.bf16.msra.mxu2 %v8906_v47  ;;  %v8893_v2 = vld [vmem:[#allocation2] sm:$0xf]  ;;  %v9391_v5 = vld [vmem:[%s11817_s15 + $0x428] sm:$0xf0]  ;;  %v10828_v53 = vld [vmem:[#allocation2 + $0x4] sm:$0xf] }
 0x28b   : > { %v12072_v28 = vor.u32 %v10829_v10, %v8893_v2  ;;  %v8895_v43 = vld [vmem:[#allocation2 + $0x8] sm:$0xf0]  ;;  %v11143_v3 = vld [vmem:[%s11817_s15 + $0x9cc] sm:$0xf]  ;;  %v9394_v19 = vor.u32 %v10951_v14, %v9391_v5  ;;  %v9293_v20 = vld [vmem:[%s11817_s15 + $0x308] sm:$0xf] }
 0x28c   : > { %5856 = vmatpush.bf16.msra.mxu1 %v9670_v45  ;;  %5884 = vmatpush.bf16.msra.mxu3 %v9674_v49  ;;  %v10159_v56 = vld [vmem:[%s11817_s15 + $0xa28] sm:$0xf0]  ;;  %v12082_v16 = vor.u32 %v10828_v53, %v8895_v43  ;;  %v10939_v18 = vld [vmem:[%s11817_s15 + $0x364] sm:$0xf0] }
 0x28d   : > { %5843 = vmatmul.bf16.vlgmr.msra.gmra.mxu0 %v12072_v28  ;;  %5871 = vmatmul.bf16.vlgmr.msra.gmra.mxu2 %v12072_v28  ;;  %v10061_v23 = vld [vmem:[%s11817_s15 + $0x908] sm:$0xf]  ;;  %v10162_v24 = vor.u32 %v11143_v3, %v10159_v56  ;;  %v10927_v1 = vld [vmem:[%s11817_s15 + $0x30c] sm:$0xf]  ;;  %v9294_v22 = vor.u32 %v10939_v18, %v9293_v20  ;;  %v9589_v3 = vld [vmem:[%s11817_s15 + $0x550] sm:$0xf] }
 0x28e   : > { %5891 = vmatpush.bf16.msrb.mxu0 %v9582_v51  ;;  %5919 = vmatpush.bf16.msrb.mxu2 %v9586_v26  ;;  %v11131_v25 = vld [vmem:[%s11817_s15 + $0x964] sm:$0xf0]  ;;  %v9295_v27 = vld [vmem:[%s11817_s15 + $0x368] sm:$0xf0]  ;;  %v11012_v56 = vld [vmem:[%s11817_s15 + $0x5ac] sm:$0xf0] }
 0x28f   : > { %5857 = vmatmul.bf16.vlgmr.msra.gmra.mxu1 %v12082_v16  ;;  %v11119_v37 = vld [vmem:[%s11817_s15 + $0x90c] sm:$0xf]  ;;  %5885 = vmatmul.bf16.vlgmr.msra.gmra.mxu3 %v12082_v16  ;;  %v10062_v30 = vor.u32 %v11131_v25, %v10061_v23  ;;  %v9298_v61 = vor.u32 %v10927_v1, %v9295_v27  ;;  %v9197_v54 = vld [vmem:[%s11817_s15 + $0x248] sm:$0xf]  ;;  %v11000_v20 = vld [vmem:[%s11817_s15 + $0x554] sm:$0xf] }
 0x290   : > { %5905 = vmatpush.bf16.msrb.mxu1 %v10350_v55  ;;  %5933 = vmatpush.bf16.msrb.mxu3 %v10354_v38  ;;  %v10063_v29 = vld [vmem:[%s11817_s15 + $0x968] sm:$0xf0]  ;;  %v10915_v31 = vld [vmem:[%s11817_s15 + $0x2a4] sm:$0xf0]  ;;  %v9591_v18 = vld [vmem:[%s11817_s15 + $0x5b0] sm:$0xf0] }
 0x291   : > { %v9965_v32 = vld [vmem:[%s11817_s15 + $0x848] sm:$0xf]  ;;  %v10066_v33 = vor.u32 %v11119_v37, %v10063_v29  ;;  %v10903_v34 = vld [vmem:[%s11817_s15 + $0x24c] sm:$0xf]  ;;  %v9198_v48 = vor.u32 %v10915_v31, %v9197_v54  ;;  %v11192_v25 = vld [vmem:[%s11817_s15 + $0xb54] sm:$0xf]  ;;  %v9590_v37 = vor.u32 %v11012_v56, %v9589_v3 }
 0x292   : > { %5892 = vmatpush.bf16.msrb.mxu0 %v9486_v11  ;;  %5920 = vmatpush.bf16.msrb.mxu2 %v9490_v60  ;;  %v11107_v4 = vld [vmem:[%s11817_s15 + $0x8a4] sm:$0xf0]  ;;  %v9199_v35 = vld [vmem:[%s11817_s15 + $0x2a8] sm:$0xf0]  ;;  %v10359_v1 = vld [vmem:[%s11817_s15 + $0xbb0] sm:$0xf0] }
 0x293   : > { %v11095_v21 = vld [vmem:[%s11817_s15 + $0x84c] sm:$0xf]  ;;  %v9966_v36 = vor.u32 %v11107_v4, %v9965_v32  ;;  %v9202_v40 = vor.u32 %v10903_v34, %v9199_v35  ;;  %v9101_v44 = vld [vmem:[%s11817_s15 + $0x188] sm:$0xf]  ;;  %v10261_v54 = vld [vmem:[%s11817_s15 + $0xa90] sm:$0xf]  ;;  %v10362_v31 = vor.u32 %v11192_v25, %v10359_v1 }
 0x294   : > { %5906 = vmatpush.bf16.msrb.mxu1 %v10254_v57  ;;  %5934 = vmatpush.bf16.msrb.mxu3 %v10258_v6  ;;  %v9967_v39 = vld [vmem:[%s11817_s15 + $0x8a8] sm:$0xf0]  ;;  %v10891_v41 = vld [vmem:[%s11817_s15 + $0x1e4] sm:$0xf0]  ;;  %v11180_v32 = vld [vmem:[%s11817_s15 + $0xaec] sm:$0xf0] }
 0x295   : > { %v9869_v45 = vld [vmem:[%s11817_s15 + $0x788] sm:$0xf]  ;;  %v9970_v47 = vor.u32 %v11095_v21, %v9967_v39  ;;  %v10879_v52 = vld [vmem:[%s11817_s15 + $0x18c] sm:$0xf]  ;;  %v9102_v55 = vor.u32 %v10891_v41, %v9101_v44  ;;  %v9495_v4 = vld [vmem:[%s11817_s15 + $0x4f0] sm:$0xf0]  ;;  %v10262_v39 = vor.u32 %v11180_v32, %v10261_v54 }
 0x296   : > { %5893 = vmatpush.bf16.msrb.mxu0 %v9390_v42  ;;  %5921 = vmatpush.bf16.msrb.mxu2 %v9394_v19  ;;  %v11083_v50 = vld [vmem:[%s11817_s15 + $0x7e4] sm:$0xf0]  ;;  %v9103_v49 = vld [vmem:[%s11817_s15 + $0x1e8] sm:$0xf0]  ;;  %v10357_v42 = vld [vmem:[%s11817_s15 + $0xb50] sm:$0xf] }
 0x297   : > { %v11071_v51 = vld [vmem:[%s11817_s15 + $0x78c] sm:$0xf]  ;;  %v9870_v26 = vor.u32 %v11083_v50, %v9869_v45  ;;  %v9106_v59 = vor.u32 %v10879_v52, %v9103_v49  ;;  %v9005_v62 = vld [vmem:[%s11817_s15 + $0xc8] sm:$0xf]  ;;  %v11204_v19 = vld [vmem:[%s11817_s15 + $0xbac] sm:$0xf0] }
 0x298   : > { %5907 = vmatpush.bf16.msrb.mxu1 %v10158_v17  ;;  %5935 = vmatpush.bf16.msrb.mxu3 %v10162_v24  ;;  %v9871_v46 = vld [vmem:[%s11817_s15 + $0x7e8] sm:$0xf0]  ;;  %v10867_v63 = vld [vmem:[%s11817_s15 + $0x124] sm:$0xf0]  ;;  %v10358_v29 = vor.u32 %v11204_v19, %v10357_v42  ;;  %v11168_v34 = vld [vmem:[%s11817_s15 + $0xa94] sm:$0xf] }
 0x299   : > { %v9773_v38 = vld [vmem:[%s11817_s15 + $0x6c8] sm:$0xf]  ;;  %v9874_v9 = vor.u32 %v11071_v51, %v9871_v46  ;;  %v10855_v15 = vld [vmem:[%s11817_s15 + $0xcc] sm:$0xf]  ;;  %v9006_v11 = vor.u32 %v10867_v63, %v9005_v62  ;;  %v10263_v35 = vld [vmem:[%s11817_s15 + $0xaf0] sm:$0xf0] }
 0x29a   : > { %5894 = vmatpush.bf16.msrb.mxu0 %v9294_v22  ;;  %5922 = vmatpush.bf16.msrb.mxu2 %v9298_v61  ;;  %v11059_v8 = vld [vmem:[%s11817_s15 + $0x724] sm:$0xf0]  ;;  %v9007_v0 = vld [vmem:[%s11817_s15 + $0x128] sm:$0xf0]  ;;  %v9594_v22 = vor.u32 %v11000_v20, %v9591_v18  ;;  %v10988_v61 = vld [vmem:[%s11817_s15 + $0x4ec] sm:$0xf0]  ;;  %v10266_v41 = vor.u32 %v11168_v34, %v10263_v35 }
 0x29b   : > { %v11047_v2 = vld [vmem:[%s11817_s15 + $0x6cc] sm:$0xf]  ;;  %v8909_v58 = vld [vmem:[%s11817_s15 + $0x8] sm:$0xf]  ;;  %v9774_v57 = vor.u32 %v11059_v8, %v9773_v38  ;;  %v9010_v60 = vor.u32 %v10855_v15, %v9007_v0  ;;  %v10165_v44 = vld [vmem:[%s11817_s15 + $0x9d0] sm:$0xf] }
 0x29c   : > { %5908 = vmatpush.bf16.msrb.mxu1 %v10062_v30  ;;  %5936 = vmatpush.bf16.msrb.mxu3 %v10066_v33  ;;  %v9775_v10 = vld [vmem:[%s11817_s15 + $0x728] sm:$0xf0]  ;;  %v10843_v7 = vld [vmem:[%s11817_s15 + $0x64] sm:$0xf0]  ;;  %v9493_v30 = vld [vmem:[%s11817_s15 + $0x490] sm:$0xf] }
 0x29d   : > { %v9677_v12 = vld [vmem:[%s11817_s15 + $0x608] sm:$0xf]  ;;  %v10831_v14 = vld [vmem:[%s11817_s15 + $0xc] sm:$0xf]  ;;  %v9778_v6 = vor.u32 %v11047_v2, %v9775_v10  ;;  %v8910_v17 = vor.u32 %v10843_v7, %v8909_v58  ;;  %v10976_v33 = vld [vmem:[%s11817_s15 + $0x494] sm:$0xf]  ;;  %v9494_v21 = vor.u32 %v10988_v61, %v9493_v30 }
 0x29e   : > { %5895 = vmatpush.bf16.msrb.mxu0 %v9198_v48  ;;  %5923 = vmatpush.bf16.msrb.mxu2 %v9202_v40  ;;  %v11035_v13 = vld [vmem:[%s11817_s15 + $0x664] sm:$0xf0]  ;;  %v8911_v5 = vld [vmem:[%s11817_s15 + $0x68] sm:$0xf0]  ;;  %v9498_v48 = vor.u32 %v10976_v33, %v9495_v4  ;;  %v10964_v40 = vld [vmem:[%s11817_s15 + $0x42c] sm:$0xf0] }
 0x29f   : > { %v11023_v53 = vld [vmem:[%s11817_s15 + $0x60c] sm:$0xf]  ;;  %v9678_v23 = vor.u32 %v11035_v13, %v9677_v12  ;;  %v8914_v24 = vor.u32 %v10831_v14, %v8911_v5  ;;  %v11156_v45 = vld [vmem:[%s11817_s15 + $0xa2c] sm:$0xf0]  ;;  %v9399_v50 = vld [vmem:[%s11817_s15 + $0x430] sm:$0xf0] }
 0x2a0   : > { %5909 = vmatpush.bf16.msrb.mxu1 %v9966_v36  ;;  %5937 = vmatpush.bf16.msrb.mxu3 %v9970_v47  ;;  %v9679_v43 = vld [vmem:[%s11817_s15 + $0x668] sm:$0xf0]  ;;  %v9397_v36 = vld [vmem:[%s11817_s15 + $0x3d0] sm:$0xf]  ;;  %v10952_v47 = vld [vmem:[%s11817_s15 + $0x3d4] sm:$0xf]  ;;  %v10166_v46 = vor.u32 %v11156_v45, %v10165_v44 }
 0x2a1   : > { %v9682_v27 = vor.u32 %v11023_v53, %v9679_v43  ;;  %v11144_v52 = vld [vmem:[%s11817_s15 + $0x9d4] sm:$0xf]  ;;  %v9398_v51 = vor.u32 %v10964_v40, %v9397_v36  ;;  %v10069_v62 = vld [vmem:[%s11817_s15 + $0x910] sm:$0xf] }
 0x2a2   : > { %5896 = vmatpush.bf16.msrb.mxu0 %v9102_v55  ;;  %5924 = vmatpush.bf16.msrb.mxu2 %v9106_v59  ;;  %v10167_v49 = vld [vmem:[%s11817_s15 + $0xa30] sm:$0xf0]  ;;  %v9402_v55 = vor.u32 %v10952_v47, %v9399_v50  ;;  %v10940_v59 = vld [vmem:[%s11817_s15 + $0x36c] sm:$0xf0] }
 0x2a3   : > { %v10170_v63 = vor.u32 %v11144_v52, %v10167_v49  ;;  %v11132_v38 = vld [vmem:[%s11817_s15 + $0x96c] sm:$0xf0]  ;;  %v9303_v8 = vld [vmem:[%s11817_s15 + $0x370] sm:$0xf0]  ;;  %v9597_v52 = vld [vmem:[%s11817_s15 + $0x558] sm:$0xf] }
 0x2a4   : > { %5910 = vmatpush.bf16.msrb.mxu1 %v9870_v26  ;;  %5938 = vmatpush.bf16.msrb.mxu3 %v9874_v9  ;;  %v9301_v26 = vld [vmem:[%s11817_s15 + $0x310] sm:$0xf]  ;;  %v10928_v9 = vld [vmem:[%s11817_s15 + $0x314] sm:$0xf]  ;;  %v10070_v10 = vor.u32 %v11132_v38, %v10069_v62  ;;  %v11013_v49 = vld [vmem:[%s11817_s15 + $0x5b4] sm:$0xf0] }
 0x2a5   : > { %v11120_v15 = vld [vmem:[%s11817_s15 + $0x914] sm:$0xf]  ;;  %v9302_v2 = vor.u32 %v10940_v59, %v9301_v26  ;;  %v9205_v58 = vld [vmem:[%s11817_s15 + $0x250] sm:$0xf]  ;;  %v11001_v26 = vld [vmem:[%s11817_s15 + $0x55c] sm:$0xf] }
 0x2a6   : > { %5897 = vmatpush.bf16.msrb.mxu0 %v9006_v11  ;;  %5925 = vmatpush.bf16.msrb.mxu2 %v9010_v60  ;;  %v10071_v0 = vld [vmem:[%s11817_s15 + $0x970] sm:$0xf0]  ;;  %v9306_v11 = vor.u32 %v10928_v9, %v9303_v8  ;;  %v10916_v7 = vld [vmem:[%s11817_s15 + $0x2ac] sm:$0xf0]  ;;  %v9599_v59 = vld [vmem:[%s11817_s15 + $0x5b8] sm:$0xf0] }
 0x2a7   : > { %v10074_v60 = vor.u32 %v11120_v15, %v10071_v0  ;;  %v11108_v12 = vld [vmem:[%s11817_s15 + $0x8ac] sm:$0xf0]  ;;  %v10904_v13 = vld [vmem:[%s11817_s15 + $0x254] sm:$0xf]  ;;  %v9206_v53 = vor.u32 %v10916_v7, %v9205_v58  ;;  %v11193_v38 = vld [vmem:[%s11817_s15 + $0xb5c] sm:$0xf]  ;;  %v9598_v15 = vor.u32 %v11013_v49, %v9597_v52 }
 0x2a8   : > { %5911 = vmatpush.bf16.msrb.mxu1 %v9774_v57  ;;  %5939 = vmatpush.bf16.msrb.mxu3 %v9778_v6  ;;  %v9973_v57 = vld [vmem:[%s11817_s15 + $0x850] sm:$0xf]  ;;  %v9207_v14 = vld [vmem:[%s11817_s15 + $0x2b0] sm:$0xf0]  ;;  %v10367_v9 = vld [vmem:[%s11817_s15 + $0xbb8] sm:$0xf0] }
 0x2a9   : > { %v11096_v6 = vld [vmem:[%s11817_s15 + $0x854] sm:$0xf]  ;;  %v9974_v43 = vor.u32 %v11108_v12, %v9973_v57  ;;  %v9210_v3 = vor.u32 %v10904_v13, %v9207_v14  ;;  %v9109_v56 = vld [vmem:[%s11817_s15 + $0x190] sm:$0xf]  ;;  %v10269_v58 = vld [vmem:[%s11817_s15 + $0xa98] sm:$0xf]  ;;  %v10370_v7 = vor.u32 %v11193_v38, %v10367_v9 }
 0x2aa   : > { %5898 = vmatpush.bf16.msrb.mxu0 %v8910_v17  ;;  %5926 = vmatpush.bf16.msrb.mxu2 %v8914_v24  ;;  %v9975_v5 = vld [vmem:[%s11817_s15 + $0x8b0] sm:$0xf0]  ;;  %v10892_v42 = vld [vmem:[%s11817_s15 + $0x1ec] sm:$0xf0]  ;;  %v11181_v57 = vld [vmem:[%s11817_s15 + $0xaf4] sm:$0xf0] }
 0x2ab   : > { %v9877_v17 = vld [vmem:[%s11817_s15 + $0x790] sm:$0xf]  ;;  %v9978_v19 = vor.u32 %v11096_v6, %v9975_v5  ;;  %v10880_v18 = vld [vmem:[%s11817_s15 + $0x194] sm:$0xf]  ;;  %v9110_v1 = vor.u32 %v10892_v42, %v9109_v56  ;;  %v9503_v12 = vld [vmem:[%s11817_s15 + $0x4f8] sm:$0xf0]  ;;  %v10270_v5 = vor.u32 %v11181_v57, %v10269_v58 }
 0x2ac   : > { %5912 = vmatpush.bf16.msrb.mxu1 %v9678_v23  ;;  %5940 = vmatpush.bf16.msrb.mxu3 %v9682_v27  ;;  %v11084_v20 = vld [vmem:[%s11817_s15 + $0x7ec] sm:$0xf0]  ;;  %v9111_v23 = vld [vmem:[%s11817_s15 + $0x1f0] sm:$0xf0]  ;;  %v11169_v13 = vld [vmem:[%s11817_s15 + $0xa9c] sm:$0xf] }
 0x2ad   : > { %5899 = vmatmul.bf16.vlgmr.msrb.gmra.mxu0 %v12072_v28  ;;  %5927 = vmatmul.bf16.vlgmr.msrb.gmra.mxu2 %v12072_v28  ;;  %v11072_v24 = vld [vmem:[%s11817_s15 + $0x794] sm:$0xf]  ;;  %v9878_v27 = vor.u32 %v11084_v20, %v9877_v17  ;;  %v9781_v30 = vld [vmem:[%s11817_s15 + $0x6d0] sm:$0xf]  ;;  %v10271_v14 = vld [vmem:[%s11817_s15 + $0xaf8] sm:$0xf0] }
 0x2ae   : > { %5947 = vmatpush.bf16.msra.mxu0 %v9590_v37  ;;  %5975 = vmatpush.bf16.msra.mxu2 %v9594_v22  ;;  %v9879_v25 = vld [vmem:[%s11817_s15 + $0x7f0] sm:$0xf0]  ;;  %v9114_v37 = vor.u32 %v10880_v18, %v9111_v23  ;;  %v10868_v22 = vld [vmem:[%s11817_s15 + $0x12c] sm:$0xf0]  ;;  %v10173_v56 = vld [vmem:[%s11817_s15 + $0x9d8] sm:$0xf]  ;;  %v10274_v42 = vor.u32 %v11169_v13, %v10271_v14 }
 0x2af   : > { %5913 = vmatmul.bf16.vlgmr.msrb.gmra.mxu1 %v12082_v16  ;;  %5941 = vmatmul.bf16.vlgmr.msrb.gmra.mxu3 %v12082_v16  ;;  %v9882_v61 = vor.u32 %v11072_v24, %v9879_v25  ;;  %v11060_v54 = vld [vmem:[%s11817_s15 + $0x72c] sm:$0xf0]  ;;  %v9015_v32 = vld [vmem:[%s11817_s15 + $0x130] sm:$0xf0]  ;;  %v11157_v17 = vld [vmem:[%s11817_s15 + $0xa34] sm:$0xf0] }
 0x2b0   : > { %5961 = vmatpush.bf16.msra.mxu1 %v10358_v29  ;;  %5989 = vmatpush.bf16.msra.mxu3 %v10362_v31  ;;  %v9013_v29 = vld [vmem:[%s11817_s15 + $0xd0] sm:$0xf]  ;;  %v10856_v31 = vld [vmem:[%s11817_s15 + $0xd4] sm:$0xf]  ;;  %v9407_v20 = vld [vmem:[%s11817_s15 + $0x438] sm:$0xf0]  ;;  %v10174_v25 = vor.u32 %v11157_v17, %v10173_v56 }
 0x2b1   : > { %v11048_v33 = vld [vmem:[%s11817_s15 + $0x6d4] sm:$0xf]  ;;  %v9014_v34 = vor.u32 %v10868_v22, %v9013_v29  ;;  %v8917_v35 = vld [vmem:[%s11817_s15 + $0x10] sm:$0xf]  ;;  %v11145_v18 = vld [vmem:[%s11817_s15 + $0x9dc] sm:$0xf] }
 0x2b2   : > { %5948 = vmatpush.bf16.msra.mxu0 %v9494_v21  ;;  %5976 = vmatpush.bf16.msra.mxu2 %v9498_v48  ;;  %v9783_v4 = vld [vmem:[%s11817_s15 + $0x730] sm:$0xf0]  ;;  %v10844_v21 = vld [vmem:[%s11817_s15 + $0x6c] sm:$0xf0]  ;;  %v9018_v48 = vor.u32 %v10856_v31, %v9015_v32  ;;  %v10175_v23 = vld [vmem:[%s11817_s15 + $0xa38] sm:$0xf0] }
 0x2b3   : > { %v9685_v36 = vld [vmem:[%s11817_s15 + $0x610] sm:$0xf]  ;;  %v10832_v44 = vld [vmem:[%s11817_s15 + $0x14] sm:$0xf]  ;;  %v10077_v29 = vld [vmem:[%s11817_s15 + $0x918] sm:$0xf]  ;;  %v10178_v22 = vor.u32 %v11145_v18, %v10175_v23 }
 0x2b4   : > { %5962 = vmatpush.bf16.msra.mxu1 %v10262_v39  ;;  %5990 = vmatpush.bf16.msra.mxu3 %v10266_v41  ;;  %v9782_v39 = vor.u32 %v11060_v54, %v9781_v30  ;;  %v11036_v40 = vld [vmem:[%s11817_s15 + $0x66c] sm:$0xf0]  ;;  %v9786_v41 = vor.u32 %v11048_v33, %v9783_v4  ;;  %v8919_v45 = vld [vmem:[%s11817_s15 + $0x70] sm:$0xf0]  ;;  %v11133_v30 = vld [vmem:[%s11817_s15 + $0x974] sm:$0xf0] }
 0x2b5   : > { %v11024_v47 = vld [vmem:[%s11817_s15 + $0x614] sm:$0xf]  ;;  %v9686_v62 = vor.u32 %v11036_v40, %v9685_v36  ;;  %v9311_v54 = vld [vmem:[%s11817_s15 + $0x378] sm:$0xf0]  ;;  %v10078_v4 = vor.u32 %v11133_v30, %v10077_v29  ;;  %v11109_v36 = vld [vmem:[%s11817_s15 + $0x8b4] sm:$0xf0] }
 0x2b6   : > { %5949 = vmatpush.bf16.msra.mxu0 %v9398_v51  ;;  %5977 = vmatpush.bf16.msra.mxu2 %v9402_v55  ;;  %v9687_v50 = vld [vmem:[%s11817_s15 + $0x670] sm:$0xf0]  ;;  %v10365_v51 = vld [vmem:[%s11817_s15 + $0xb58] sm:$0xf]  ;;  %v11121_v31 = vld [vmem:[%s11817_s15 + $0x91c] sm:$0xf] }
 0x2b7   : > { %v11205_v55 = vld [vmem:[%s11817_s15 + $0xbb4] sm:$0xf0]  ;;  %v9690_v8 = vor.u32 %v11024_v47, %v9687_v50  ;;  %v10079_v32 = vld [vmem:[%s11817_s15 + $0x978] sm:$0xf0]  ;;  %v9605_v18 = vld [vmem:[%s11817_s15 + $0x560] sm:$0xf] }
 0x2b8   : > { %5963 = vmatpush.bf16.msra.mxu1 %v10166_v46  ;;  %5991 = vmatpush.bf16.msra.mxu3 %v10170_v63  ;;  %v8918_v46 = vor.u32 %v10844_v21, %v8917_v35  ;;  %v8922_v63 = vor.u32 %v10832_v44, %v8919_v45  ;;  %v10366_v0 = vor.u32 %v11205_v55, %v10365_v51  ;;  %v9213_v35 = vld [vmem:[%s11817_s15 + $0x258] sm:$0xf]  ;;  %v10905_v40 = vld [vmem:[%s11817_s15 + $0x25c] sm:$0xf]  ;;  %v11014_v23 = vld [vmem:[%s11817_s15 + $0x5bc] sm:$0xf0] }
 0x2b9   : > { %v10917_v21 = vld [vmem:[%s11817_s15 + $0x2b4] sm:$0xf0]  ;;  %v9215_v44 = vld [vmem:[%s11817_s15 + $0x2b8] sm:$0xf0]  ;;  %v11194_v30 = vld [vmem:[%s11817_s15 + $0xb64] sm:$0xf] }
 0x2ba   : > { %5950 = vmatpush.bf16.msra.mxu0 %v9302_v2  ;;  %5978 = vmatpush.bf16.msra.mxu2 %v9306_v11  ;;  %v9602_v2 = vor.u32 %v11001_v26, %v9599_v59  ;;  %v10989_v11 = vld [vmem:[%s11817_s15 + $0x4f4] sm:$0xf0]  ;;  %v9983_v45 = vld [vmem:[%s11817_s15 + $0x8b8] sm:$0xf0]  ;;  %v9214_v47 = vor.u32 %v10917_v21, %v9213_v35  ;;  %v9218_v52 = vor.u32 %v10905_v40, %v9215_v44  ;;  %v10277_v35 = vld [vmem:[%s11817_s15 + $0xaa0] sm:$0xf] }
 0x2bb   : > { %v9117_v49 = vld [vmem:[%s11817_s15 + $0x198] sm:$0xf]  ;;  %v10881_v59 = vld [vmem:[%s11817_s15 + $0x19c] sm:$0xf]  ;;  %v11170_v40 = vld [vmem:[%s11817_s15 + $0xaa4] sm:$0xf] }
 0x2bc   : > { %5964 = vmatpush.bf16.msra.mxu1 %v10070_v10  ;;  %5992 = vmatpush.bf16.msra.mxu3 %v10074_v60  ;;  %v9501_v10 = vld [vmem:[%s11817_s15 + $0x498] sm:$0xf]  ;;  %v10977_v60 = vld [vmem:[%s11817_s15 + $0x49c] sm:$0xf]  ;;  %v10279_v44 = vld [vmem:[%s11817_s15 + $0xb00] sm:$0xf0] }
 0x2bd   : > { %v9502_v6 = vor.u32 %v10989_v11, %v9501_v10  ;;  %v10893_v51 = vld [vmem:[%s11817_s15 + $0x1f4] sm:$0xf0]  ;;  %v9887_v38 = vld [vmem:[%s11817_s15 + $0x7f8] sm:$0xf0] }
 0x2be   : > { %5951 = vmatpush.bf16.msra.mxu0 %v9206_v53  ;;  %5979 = vmatpush.bf16.msra.mxu2 %v9210_v3  ;;  %v9506_v53 = vor.u32 %v10977_v60, %v9503_v12  ;;  %v10965_v3 = vld [vmem:[%s11817_s15 + $0x434] sm:$0xf0]  ;;  %v9118_v9 = vor.u32 %v10893_v51, %v9117_v49  ;;  %v9023_v57 = vld [vmem:[%s11817_s15 + $0x138] sm:$0xf0]  ;;  %v10181_v49 = vld [vmem:[%s11817_s15 + $0x9e0] sm:$0xf]  ;;  %v10282_v51 = vor.u32 %v11170_v40, %v10279_v44 }
 0x2bf   : > { %v11085_v26 = vld [vmem:[%s11817_s15 + $0x7f4] sm:$0xf0]  ;;  %v11049_v60 = vld [vmem:[%s11817_s15 + $0x6dc] sm:$0xf]  ;;  %v8933_v44 = vld [vmem:[%s11817_s15 + $0x20] sm:$0xf] }
 0x2c0   : > { %5965 = vmatpush.bf16.msra.mxu1 %v9974_v43  ;;  %5993 = vmatpush.bf16.msra.mxu3 %v9978_v19  ;;  %v9405_v43 = vld [vmem:[%s11817_s15 + $0x3d8] sm:$0xf]  ;;  %v10953_v19 = vld [vmem:[%s11817_s15 + $0x3dc] sm:$0xf] }
 0x2c1   : > { %v9406_v24 = vor.u32 %v10965_v3, %v9405_v43  ;;  %v9789_v10 = vld [vmem:[%s11817_s15 + $0x6d8] sm:$0xf]  ;;  %v9791_v12 = vld [vmem:[%s11817_s15 + $0x738] sm:$0xf0] }
 0x2c2   : > { %5952 = vmatpush.bf16.msra.mxu0 %v9110_v1  ;;  %5980 = vmatpush.bf16.msra.mxu2 %v9114_v37  ;;  %v9410_v1 = vor.u32 %v10953_v19, %v9407_v20  ;;  %v10941_v37 = vld [vmem:[%s11817_s15 + $0x374] sm:$0xf0]  ;;  %v10833_v56 = vld [vmem:[%s11817_s15 + $0x1c] sm:$0xf] }
 0x2c3   : > { %v11061_v58 = vld [vmem:[%s11817_s15 + $0x734] sm:$0xf0]  ;;  %v8927_v17 = vld [vmem:[%s11817_s15 + $0x78] sm:$0xf0] }
 0x2c4   : > { %5966 = vmatpush.bf16.msra.mxu1 %v9878_v27  ;;  %5994 = vmatpush.bf16.msra.mxu3 %v9882_v61  ;;  %v9309_v27 = vld [vmem:[%s11817_s15 + $0x318] sm:$0xf]  ;;  %v10929_v61 = vld [vmem:[%s11817_s15 + $0x31c] sm:$0xf] }
 0x2c5   : > { %v9310_v33 = vor.u32 %v10941_v37, %v9309_v27  ;;  %v8925_v14 = vld [vmem:[%s11817_s15 + $0x18] sm:$0xf]  ;;  %v11025_v19 = vld [vmem:[%s11817_s15 + $0x61c] sm:$0xf]  ;;  %v11002_v27 = vld [vmem:[%s11817_s15 + $0x564] sm:$0xf] }
 0x2c6   : > { %5953 = vmatpush.bf16.msra.mxu0 %v9014_v34  ;;  %5981 = vmatpush.bf16.msra.mxu2 %v9018_v48  ;;  %v9314_v34 = vor.u32 %v10929_v61, %v9311_v54  ;;  %v10082_v48 = vor.u32 %v11121_v31, %v10079_v32  ;;  %v9693_v43 = vld [vmem:[%s11817_s15 + $0x618] sm:$0xf]  ;;  %v9695_v20 = vld [vmem:[%s11817_s15 + $0x678] sm:$0xf0]  ;;  %v9607_v37 = vld [vmem:[%s11817_s15 + $0x5c0] sm:$0xf0]  ;;  %v9606_v31 = vor.u32 %v11014_v23, %v9605_v18 }
 0x2c7   : > { %v11037_v3 = vld [vmem:[%s11817_s15 + $0x674] sm:$0xf0]  ;;  %v10375_v61 = vld [vmem:[%s11817_s15 + $0xbc0] sm:$0xf0]  ;;  %v9698_v54 = vor.u32 %v11025_v19, %v9695_v20  ;;  %v9125_v23 = vld [vmem:[%s11817_s15 + $0x1a0] sm:$0xf] }
 0x2c8   : > { %5967 = vmatpush.bf16.msra.mxu1 %v9782_v39  ;;  %5995 = vmatpush.bf16.msra.mxu3 %v9786_v41  ;;  %v9981_v39 = vld [vmem:[%s11817_s15 + $0x858] sm:$0xf]  ;;  %v11097_v41 = vld [vmem:[%s11817_s15 + $0x85c] sm:$0xf]  ;;  %v9694_v29 = vor.u32 %v11037_v3, %v9693_v43  ;;  %v10378_v21 = vor.u32 %v11194_v30, %v10375_v61  ;;  %v11110_v43 = vld [vmem:[%s11817_s15 + $0x8bc] sm:$0xf0] }
 0x2c9   : > { %v9982_v50 = vor.u32 %v11109_v36, %v9981_v39  ;;  %v9986_v55 = vor.u32 %v11097_v41, %v9983_v45  ;;  %v11182_v39 = vld [vmem:[%s11817_s15 + $0xafc] sm:$0xf0]  ;;  %v9511_v36 = vld [vmem:[%s11817_s15 + $0x500] sm:$0xf0] }
 0x2ca   : > { %5954 = vmatpush.bf16.msra.mxu0 %v8918_v46  ;;  %5982 = vmatpush.bf16.msra.mxu2 %v8922_v63  ;;  %v9885_v46 = vld [vmem:[%s11817_s15 + $0x798] sm:$0xf]  ;;  %v11073_v63 = vld [vmem:[%s11817_s15 + $0x79c] sm:$0xf]  ;;  %v10278_v45 = vor.u32 %v11182_v39, %v10277_v35  ;;  %v10906_v3 = vld [vmem:[%s11817_s15 + $0x264] sm:$0xf] }
 0x2cb   : > { %v9890_v11 = vor.u32 %v11073_v63, %v9887_v38  ;;  %v9895_v30 = vld [vmem:[%s11817_s15 + $0x800] sm:$0xf0]  ;;  %v11062_v35 = vld [vmem:[%s11817_s15 + $0x73c] sm:$0xf0] }
 0x2cc   : > { %5968 = vmatpush.bf16.msra.mxu1 %v9686_v62  ;;  %5996 = vmatpush.bf16.msra.mxu3 %v9690_v8  ;;  %v9119_v62 = vld [vmem:[%s11817_s15 + $0x1f8] sm:$0xf0]  ;;  %v9886_v8 = vor.u32 %v11085_v26, %v9885_v46  ;;  %v11158_v46 = vld [vmem:[%s11817_s15 + $0xa3c] sm:$0xf0]  ;;  %v9415_v26 = vld [vmem:[%s11817_s15 + $0x440] sm:$0xf0] }
 0x2cd   : > { %5955 = vmatmul.bf16.vlgmr.msra.gmra.mxu0 %v12072_v28  ;;  %5983 = vmatmul.bf16.vlgmr.msra.gmra.mxu2 %v12072_v28  ;;  %v10182_v38 = vor.u32 %v11158_v46, %v10181_v49  ;;  %v9031_v39 = vld [vmem:[%s11817_s15 + $0x140] sm:$0xf0] }
 0x2ce   : > { %6003 = vmatpush.bf16.msrb.mxu0 %v9598_v15  ;;  %6031 = vmatpush.bf16.msrb.mxu2 %v9602_v2  ;;  %v9122_v15 = vor.u32 %v10881_v59, %v9119_v62  ;;  %v10869_v2 = vld [vmem:[%s11817_s15 + $0x134] sm:$0xf0]  ;;  %v11146_v59 = vld [vmem:[%s11817_s15 + $0x9e4] sm:$0xf] }
 0x2cf   : > { %5969 = vmatmul.bf16.vlgmr.msra.gmra.mxu1 %v12082_v16  ;;  %5997 = vmatmul.bf16.vlgmr.msra.gmra.mxu3 %v12082_v16  ;;  %v10183_v62 = vld [vmem:[%s11817_s15 + $0xa40] sm:$0xf0] }
 0x2d0   : > { %6017 = vmatpush.bf16.msrb.mxu1 %v10366_v0  ;;  %6045 = vmatpush.bf16.msrb.mxu3 %v10370_v7  ;;  %v9021_v0 = vld [vmem:[%s11817_s15 + $0xd8] sm:$0xf]  ;;  %v10857_v7 = vld [vmem:[%s11817_s15 + $0xdc] sm:$0xf]  ;;  %v10834_v49 = vld [vmem:[%s11817_s15 + $0x24] sm:$0xf] }
 0x2d1   : > { %v9022_v13 = vor.u32 %v10869_v2, %v9021_v0  ;;  %v10085_v0 = vld [vmem:[%s11817_s15 + $0x920] sm:$0xf]  ;;  %v10186_v2 = vor.u32 %v11146_v59, %v10183_v62  ;;  %v8935_v46 = vld [vmem:[%s11817_s15 + $0x80] sm:$0xf0]  ;;  %v9613_v59 = vld [vmem:[%s11817_s15 + $0x568] sm:$0xf] }
 0x2d2   : > { %6004 = vmatpush.bf16.msrb.mxu0 %v9502_v6  ;;  %6032 = vmatpush.bf16.msrb.mxu2 %v9506_v53  ;;  %v10845_v6 = vld [vmem:[%s11817_s15 + $0x74] sm:$0xf0]  ;;  %v9026_v53 = vor.u32 %v10857_v7, %v9023_v57  ;;  %v11122_v7 = vld [vmem:[%s11817_s15 + $0x924] sm:$0xf]  ;;  %v11015_v62 = vld [vmem:[%s11817_s15 + $0x5c4] sm:$0xf0] }
 0x2d3   : > { %v10087_v57 = vld [vmem:[%s11817_s15 + $0x980] sm:$0xf0] }
 0x2d4   : > { %6018 = vmatpush.bf16.msrb.mxu1 %v10270_v5  ;;  %6046 = vmatpush.bf16.msrb.mxu3 %v10274_v42  ;;  %v9790_v5 = vor.u32 %v11061_v58, %v9789_v10  ;;  %v9794_v42 = vor.u32 %v11049_v60, %v9791_v12  ;;  %v11134_v10 = vld [vmem:[%s11817_s15 + $0x97c] sm:$0xf0]  ;;  %v9319_v58 = vld [vmem:[%s11817_s15 + $0x380] sm:$0xf0] }
 0x2d5   : > { %v10086_v12 = vor.u32 %v11134_v10, %v10085_v0  ;;  %v11195_v10 = vld [vmem:[%s11817_s15 + $0xb6c] sm:$0xf] }
 0x2d6   : > { %6005 = vmatpush.bf16.msrb.mxu0 %v9406_v24  ;;  %6033 = vmatpush.bf16.msrb.mxu2 %v9410_v1  ;;  %v10373_v24 = vld [vmem:[%s11817_s15 + $0xb60] sm:$0xf] }
 0x2d7   : > { %v11206_v1 = vld [vmem:[%s11817_s15 + $0xbbc] sm:$0xf0] }
 0x2d8   : > { %6019 = vmatpush.bf16.msrb.mxu1 %v10174_v25  ;;  %6047 = vmatpush.bf16.msrb.mxu3 %v10178_v22  ;;  %v8926_v25 = vor.u32 %v10845_v6, %v8925_v14  ;;  %v8930_v22 = vor.u32 %v10833_v56, %v8927_v17  ;;  %v10374_v32 = vor.u32 %v11206_v1, %v10373_v24  ;;  %v9221_v14 = vld [vmem:[%s11817_s15 + $0x260] sm:$0xf]  ;;  %v9223_v56 = vld [vmem:[%s11817_s15 + $0x2c0] sm:$0xf0] }
 0x2d9   : > { %v10918_v6 = vld [vmem:[%s11817_s15 + $0x2bc] sm:$0xf0]  ;;  %v9991_v17 = vld [vmem:[%s11817_s15 + $0x8c0] sm:$0xf0]  ;;  %v9226_v18 = vor.u32 %v10906_v3, %v9223_v56  ;;  %v11171_v3 = vld [vmem:[%s11817_s15 + $0xaac] sm:$0xf] }
 0x2da   : > { %6006 = vmatpush.bf16.msrb.mxu0 %v9310_v33  ;;  %6034 = vmatpush.bf16.msrb.mxu2 %v9314_v34  ;;  %v9610_v33 = vor.u32 %v11002_v27, %v9607_v37  ;;  %v10990_v34 = vld [vmem:[%s11817_s15 + $0x4fc] sm:$0xf0]  ;;  %v9222_v19 = vor.u32 %v10918_v6, %v9221_v14  ;;  %v10882_v37 = vld [vmem:[%s11817_s15 + $0x1a4] sm:$0xf]  ;;  %v10285_v14 = vld [vmem:[%s11817_s15 + $0xaa8] sm:$0xf] }
 0x2db   : > { %v10894_v24 = vld [vmem:[%s11817_s15 + $0x1fc] sm:$0xf0]  ;;  %v10287_v56 = vld [vmem:[%s11817_s15 + $0xb08] sm:$0xf0] }
 0x2dc   : > { %6020 = vmatpush.bf16.msrb.mxu1 %v10078_v4  ;;  %6048 = vmatpush.bf16.msrb.mxu3 %v10082_v48  ;;  %v9509_v4 = vld [vmem:[%s11817_s15 + $0x4a0] sm:$0xf]  ;;  %v10978_v48 = vld [vmem:[%s11817_s15 + $0x4a4] sm:$0xf]  ;;  %v9126_v61 = vor.u32 %v10894_v24, %v9125_v23  ;;  %v10189_v23 = vld [vmem:[%s11817_s15 + $0x9e8] sm:$0xf] }
 0x2dd   : > { %v9510_v41 = vor.u32 %v10990_v34, %v9509_v4  ;;  %v11086_v27 = vld [vmem:[%s11817_s15 + $0x7fc] sm:$0xf0] }
 0x2de   : > { %6007 = vmatpush.bf16.msrb.mxu0 %v9214_v47  ;;  %6035 = vmatpush.bf16.msrb.mxu2 %v9218_v52  ;;  %v9514_v47 = vor.u32 %v10978_v48, %v9511_v36  ;;  %v10966_v52 = vld [vmem:[%s11817_s15 + $0x43c] sm:$0xf0]  ;;  %v11050_v48 = vld [vmem:[%s11817_s15 + $0x6e4] sm:$0xf] }
 0x2df   : > { %v9797_v4 = vld [vmem:[%s11817_s15 + $0x6e0] sm:$0xf]  ;;  %v9799_v36 = vld [vmem:[%s11817_s15 + $0x740] sm:$0xf0] }
 0x2e0   : > { %6021 = vmatpush.bf16.msrb.mxu1 %v9982_v50  ;;  %6049 = vmatpush.bf16.msrb.mxu3 %v9986_v55  ;;  %v9413_v50 = vld [vmem:[%s11817_s15 + $0x3e0] sm:$0xf]  ;;  %v10954_v55 = vld [vmem:[%s11817_s15 + $0x3e4] sm:$0xf] }
 0x2e1   : > { %v9414_v63 = vor.u32 %v10966_v52, %v9413_v50  ;;  %v9701_v50 = vld [vmem:[%s11817_s15 + $0x620] sm:$0xf] }
 0x2e2   : > { %6008 = vmatpush.bf16.msrb.mxu0 %v9118_v9  ;;  %6036 = vmatpush.bf16.msrb.mxu2 %v9122_v15  ;;  %v9418_v9 = vor.u32 %v10954_v55, %v9415_v26  ;;  %v10942_v15 = vld [vmem:[%s11817_s15 + $0x37c] sm:$0xf0]  ;;  %v11026_v55 = vld [vmem:[%s11817_s15 + $0x624] sm:$0xf] }
 0x2e3   : > { %v11038_v52 = vld [vmem:[%s11817_s15 + $0x67c] sm:$0xf0]  ;;  %v9703_v26 = vld [vmem:[%s11817_s15 + $0x680] sm:$0xf0] }
 0x2e4   : > { %6022 = vmatpush.bf16.msrb.mxu1 %v9886_v8  ;;  %6050 = vmatpush.bf16.msrb.mxu3 %v9890_v11  ;;  %v9317_v8 = vld [vmem:[%s11817_s15 + $0x320] sm:$0xf]  ;;  %v10930_v11 = vld [vmem:[%s11817_s15 + $0x324] sm:$0xf]  ;;  %v9702_v0 = vor.u32 %v11038_v52, %v9701_v50  ;;  %v9229_v50 = vld [vmem:[%s11817_s15 + $0x268] sm:$0xf] }
 0x2e5   : > { %v9318_v60 = vor.u32 %v10942_v15, %v9317_v8  ;;  %v11003_v8 = vld [vmem:[%s11817_s15 + $0x56c] sm:$0xf]  ;;  %v12350_v24 = vld [vmem:[%s11823_s21] sm:$0xff]  ;;  %v10919_v52 = vld [vmem:[%s11817_s15 + $0x2c4] sm:$0xf0] }
 0x2e6   : > { %6009 = vmatpush.bf16.msrb.mxu0 %v9022_v13  ;;  %6037 = vmatpush.bf16.msrb.mxu2 %v9026_v53  ;;  %v9322_v13 = vor.u32 %v10930_v11, %v9319_v58  ;;  %v10090_v53 = vor.u32 %v11122_v7, %v10087_v57  ;;  %v9615_v15 = vld [vmem:[%s11817_s15 + $0x5c8] sm:$0xf0]  ;;  %v9706_v58 = vor.u32 %v11026_v55, %v9703_v26 }
 0x2e7   : > { %v10383_v11 = vld [vmem:[%s11817_s15 + $0xbc8] sm:$0xf0]  ;;  %v9614_v7 = vor.u32 %v11015_v62, %v9613_v59 }
 0x2e8   : > { %6023 = vmatpush.bf16.msrb.mxu1 %v9790_v5  ;;  %6051 = vmatpush.bf16.msrb.mxu3 %v9794_v42  ;;  %v9989_v5 = vld [vmem:[%s11817_s15 + $0x860] sm:$0xf]  ;;  %v11098_v42 = vld [vmem:[%s11817_s15 + $0x864] sm:$0xf]  ;;  %v10386_v6 = vor.u32 %v11195_v10, %v10383_v11  ;;  %v10907_v55 = vld [vmem:[%s11817_s15 + $0x26c] sm:$0xf] }
 0x2e9   : > { %v9990_v20 = vor.u32 %v11110_v43, %v9989_v5  ;;  %v9994_v1 = vor.u32 %v11098_v42, %v9991_v17  ;;  %v11183_v5 = vld [vmem:[%s11817_s15 + $0xb04] sm:$0xf0]  ;;  %v9519_v43 = vld [vmem:[%s11817_s15 + $0x508] sm:$0xf0] }
 0x2ea   : > { %6010 = vmatpush.bf16.msrb.mxu0 %v8926_v25  ;;  %6038 = vmatpush.bf16.msrb.mxu2 %v8930_v22  ;;  %v9893_v25 = vld [vmem:[%s11817_s15 + $0x7a0] sm:$0xf]  ;;  %v11074_v22 = vld [vmem:[%s11817_s15 + $0x7a4] sm:$0xf]  ;;  %v9421_v17 = vld [vmem:[%s11817_s15 + $0x3e8] sm:$0xf] }
 0x2eb   : > { %v9898_v34 = vor.u32 %v11074_v22, %v9895_v30  ;;  %v10191_v22 = vld [vmem:[%s11817_s15 + $0xa48] sm:$0xf0]  ;;  %v10895_v10 = vld [vmem:[%s11817_s15 + $0x204] sm:$0xf0] }
 0x2ec   : > { %6024 = vmatpush.bf16.msrb.mxu1 %v9694_v29  ;;  %6052 = vmatpush.bf16.msrb.mxu3 %v9698_v54  ;;  %v9127_v29 = vld [vmem:[%s11817_s15 + $0x200] sm:$0xf0]  ;;  %v9894_v54 = vor.u32 %v11086_v27, %v9893_v25  ;;  %v10290_v25 = vor.u32 %v11171_v3, %v10287_v56  ;;  %v10955_v27 = vld [vmem:[%s11817_s15 + $0x3ec] sm:$0xf]  ;;  %v9901_v11 = vld [vmem:[%s11817_s15 + $0x7a8] sm:$0xf] }
 0x2ed   : > { %6011 = vmatmul.bf16.vlgmr.msrb.gmra.mxu0 %v12072_v28  ;;  %6039 = vmatmul.bf16.vlgmr.msrb.gmra.mxu2 %v12072_v28  ;;  %v9231_v26 = vld [vmem:[%s11817_s15 + $0x2c8] sm:$0xf0] }
 0x2ee   : > { %6059 = vmatpush.bf16.msra.mxu0 %v9606_v31  ;;  %6087 = vmatpush.bf16.msra.mxu2 %v9610_v33  ;;  %v9130_v31 = vor.u32 %v10882_v37, %v9127_v29  ;;  %v10870_v33 = vld [vmem:[%s11817_s15 + $0x13c] sm:$0xf0]  ;;  %v9423_v37 = vld [vmem:[%s11817_s15 + $0x448] sm:$0xf0] }
 0x2ef   : > { %6025 = vmatmul.bf16.vlgmr.msrb.gmra.mxu1 %v12082_v16  ;;  %6053 = vmatmul.bf16.vlgmr.msrb.gmra.mxu3 %v12082_v16  ;;  %v11147_v29 = vld [vmem:[%s11817_s15 + $0x9ec] sm:$0xf] }
 0x2f0   : > { %6073 = vmatpush.bf16.msra.mxu1 %v10374_v32  ;;  %6101 = vmatpush.bf16.msra.mxu3 %v10378_v21  ;;  %v9029_v32 = vld [vmem:[%s11817_s15 + $0xe0] sm:$0xf]  ;;  %v10858_v21 = vld [vmem:[%s11817_s15 + $0xe4] sm:$0xf]  ;;  %v11099_v59 = vld [vmem:[%s11817_s15 + $0x86c] sm:$0xf] }
 0x2f1   : > { %v9030_v40 = vor.u32 %v10870_v33, %v9029_v32  ;;  %v9325_v32 = vld [vmem:[%s11817_s15 + $0x328] sm:$0xf]  ;;  %v9999_v62 = vld [vmem:[%s11817_s15 + $0x8c8] sm:$0xf0] }
 0x2f2   : > { %6060 = vmatpush.bf16.msra.mxu0 %v9510_v41  ;;  %6088 = vmatpush.bf16.msra.mxu2 %v9514_v47  ;;  %v10846_v41 = vld [vmem:[%s11817_s15 + $0x7c] sm:$0xf0]  ;;  %v9034_v47 = vor.u32 %v10858_v21, %v9031_v39  ;;  %v10943_v33 = vld [vmem:[%s11817_s15 + $0x384] sm:$0xf0]  ;;  %v10931_v21 = vld [vmem:[%s11817_s15 + $0x32c] sm:$0xf] }
 0x2f3   : > { %v9327_v39 = vld [vmem:[%s11817_s15 + $0x388] sm:$0xf0] }
 0x2f4   : > { %6074 = vmatpush.bf16.msra.mxu1 %v10278_v45  ;;  %6102 = vmatpush.bf16.msra.mxu3 %v10282_v51  ;;  %v9798_v45 = vor.u32 %v11062_v35, %v9797_v4  ;;  %v9802_v51 = vor.u32 %v11050_v48, %v9799_v36  ;;  %v10093_v4 = vld [vmem:[%s11817_s15 + $0x928] sm:$0xf]  ;;  %v11123_v48 = vld [vmem:[%s11817_s15 + $0x92c] sm:$0xf] }
 0x2f5   : > { %v11135_v35 = vld [vmem:[%s11817_s15 + $0x984] sm:$0xf0]  ;;  %v10095_v36 = vld [vmem:[%s11817_s15 + $0x988] sm:$0xf0] }
 0x2f6   : > { %6061 = vmatpush.bf16.msra.mxu0 %v9414_v63  ;;  %6089 = vmatpush.bf16.msra.mxu2 %v9418_v9  ;;  %v10381_v63 = vld [vmem:[%s11817_s15 + $0xb68] sm:$0xf] }
 0x2f7   : > { %v11207_v9 = vld [vmem:[%s11817_s15 + $0xbc4] sm:$0xf0] }
 0x2f8   : > { %6075 = vmatpush.bf16.msra.mxu1 %v10182_v38  ;;  %6103 = vmatpush.bf16.msra.mxu3 %v10186_v2  ;;  %v8934_v38 = vor.u32 %v10846_v41, %v8933_v44  ;;  %v8938_v2 = vor.u32 %v10834_v49, %v8935_v46  ;;  %v10382_v57 = vor.u32 %v11207_v9, %v10381_v63  ;;  %v9997_v49 = vld [vmem:[%s11817_s15 + $0x868] sm:$0xf] }
 0x2f9   : > { %v9326_v44 = vor.u32 %v10943_v33, %v9325_v32  ;;  %v11111_v46 = vld [vmem:[%s11817_s15 + $0x8c4] sm:$0xf0]  ;;  %v9230_v9 = vor.u32 %v10919_v52, %v9229_v50  ;;  %v11208_v52 = vld [vmem:[%s11817_s15 + $0xbcc] sm:$0xf0] }
 0x2fa   : > { %6062 = vmatpush.bf16.msra.mxu0 %v9318_v60  ;;  %6090 = vmatpush.bf16.msra.mxu2 %v9322_v13  ;;  %v9618_v60 = vor.u32 %v11003_v8, %v9615_v15  ;;  %v10991_v13 = vld [vmem:[%s11817_s15 + $0x504] sm:$0xf0]  ;;  %v9998_v15 = vor.u32 %v11111_v46, %v9997_v49  ;;  %v11004_v49 = vld [vmem:[%s11817_s15 + $0x574] sm:$0xf] }
 0x2fc   : > { %6076 = vmatpush.bf16.msra.mxu1 %v10086_v12  ;;  %6104 = vmatpush.bf16.msra.mxu3 %v10090_v53  ;;  %v9517_v12 = vld [vmem:[%s11817_s15 + $0x4a8] sm:$0xf]  ;;  %v10979_v53 = vld [vmem:[%s11817_s15 + $0x4ac] sm:$0xf] }
 0x2fd   : > { %v9518_v42 = vor.u32 %v10991_v13, %v9517_v12  ;;  %v11075_v13 = vld [vmem:[%s11817_s15 + $0x7ac] sm:$0xf] }
 0x2fe   : > { %6063 = vmatpush.bf16.msra.mxu0 %v9222_v19  ;;  %6091 = vmatpush.bf16.msra.mxu2 %v9226_v18  ;;  %v10286_v19 = vor.u32 %v11183_v5, %v10285_v14  ;;  %v10967_v18 = vld [vmem:[%s11817_s15 + $0x444] sm:$0xf0]  ;;  %v9903_v14 = vld [vmem:[%s11817_s15 + $0x808] sm:$0xf0] }
 0x2ff   : > { %v9422_v30 = vor.u32 %v10967_v18, %v9421_v17  ;;  %v10871_v17 = vld [vmem:[%s11817_s15 + $0x144] sm:$0xf0] }
 0x300   : > { %6077 = vmatpush.bf16.msra.mxu1 %v9990_v20  ;;  %6105 = vmatpush.bf16.msra.mxu3 %v9994_v1  ;;  %v9522_v20 = vor.u32 %v10979_v53, %v9519_v43  ;;  %v11159_v1 = vld [vmem:[%s11817_s15 + $0xa44] sm:$0xf0] }
 0x301   : > { %v11063_v18 = vld [vmem:[%s11817_s15 + $0x744] sm:$0xf0] }
 0x302   : > { %6064 = vmatpush.bf16.msra.mxu0 %v9126_v61  ;;  %6092 = vmatpush.bf16.msra.mxu2 %v9130_v31  ;;  %v3857_v61 = vperm.slane %v12350_v24, 0  ;;  %v9426_v31 = vor.u32 %v10955_v27, %v9423_v37  ;;  %v11051_v27 = vld [vmem:[%s11817_s15 + $0x6ec] sm:$0xf] }
 0x303   : > { %v9807_v37 = vld [vmem:[%s11817_s15 + $0x748] sm:$0xf0] }
 0x304   : > { %6078 = vmatpush.bf16.msra.mxu1 %v9894_v54  ;;  %6106 = vmatpush.bf16.msra.mxu3 %v9898_v34  ;;  %v10190_v54 = vor.u32 %v11159_v1, %v10189_v23  ;;  %v10194_v34 = vor.u32 %v11147_v29, %v10191_v22  ;;  %v10859_v23 = vld [vmem:[%s11817_s15 + $0xec] sm:$0xf] }
 0x306   : > { %6065 = vmatpush.bf16.msra.mxu0 %v9030_v40  ;;  %6093 = vmatpush.bf16.msra.mxu2 %v9034_v47  ;;  %v9330_v47 = vor.u32 %v10931_v21, %v9327_v39  ;;  %v9810_v21 = vor.u32 %v11051_v27, %v9807_v37  ;;  %v8943_v39 = vld [vmem:[%s11817_s15 + $0x88] sm:$0xf0]  ;;  %v9333_v37 = vld [vmem:[%s11817_s15 + $0x330] sm:$0xf] }
 0x308   : > { %6079 = vmatpush.bf16.msra.mxu1 %v9798_v45  ;;  %6107 = vmatpush.bf16.msra.mxu3 %v9802_v51  ;;  %v10094_v45 = vor.u32 %v11135_v35, %v10093_v4  ;;  %v10098_v51 = vor.u32 %v11123_v48, %v10095_v36  ;;  %v9709_v4 = vld [vmem:[%s11817_s15 + $0x628] sm:$0xf]  ;;  %v10835_v35 = vld [vmem:[%s11817_s15 + $0x2c] sm:$0xf] }
 0x309   : > { %v11027_v48 = vld [vmem:[%s11817_s15 + $0x62c] sm:$0xf] }
 0x30a   : > { %6066 = vmatpush.bf16.msra.mxu0 %v8934_v38  ;;  %6094 = vmatpush.bf16.msra.mxu2 %v8938_v2  ;;  %v5844_v40 = vpop.f32.mrf.mxu0  ;;  %v3858_v38 = vperm.slane %v12350_v24, 1  ;;  %v9133_v2 = vld [vmem:[%s11817_s15 + $0x1a8] sm:$0xf]  ;;  %v9711_v36 = vld [vmem:[%s11817_s15 + $0x688] sm:$0xf0] }
 0x30b   : > { %v5845_v41 = vadd.f32 %v5844_v40, %v3857_v61  ;;  %v9134_v53 = vor.u32 %v10895_v10, %v9133_v2  ;;  %v10992_v2 = vld [vmem:[%s11817_s15 + $0x50c] sm:$0xf0] }
 0x30c   : > { %6080 = vmatpush.bf16.msra.mxu1 %v9702_v0  ;;  %6108 = vmatpush.bf16.msra.mxu3 %v9706_v58  ;;  %v5858_v63 = vpop.f32.mrf.mxu1  ;;  %v9234_v0 = vor.u32 %v10907_v55, %v9231_v26  ;;  %v10002_v58 = vor.u32 %v11099_v59, %v9999_v62  ;;  %v8946_v55 = vor.u32 %v10835_v35, %v8943_v39  ;;  %v11196_v26 = vld [vmem:[%s11817_s15 + $0xb74] sm:$0xf]  ;;  %v10293_v10 = vld [vmem:[%s11817_s15 + $0xab0] sm:$0xf] }
 0x30d   : > { %6067 = vmatmul.bf16.vlgmr.msra.gmra.mxu0 %v12072_v28  ;;  %6095 = vmatmul.bf16.vlgmr.msra.gmra.mxu2 %v12072_v28  ;;  %v12379_v8 = vadd.f32 %v5858_v63, %v5845_v41  ;;  %v11016_v41 = vld [vmem:[%s11817_s15 + $0x5cc] sm:$0xf0]  ;;  %v10391_v59 = vld [vmem:[%s11817_s15 + $0xbd0] sm:$0xf0]  ;;  %v9714_v62 = vor.u32 %v11027_v48, %v9711_v36 }
 0x30e   : > { %6115 = vmatpush.bf16.msrb.mxu0 %v9614_v7  ;;  %6143 = vmatpush.bf16.msrb.mxu2 %v9618_v60  ;;  %v11087_v7 = vld [vmem:[%s11817_s15 + $0x804] sm:$0xf0]  ;;  %v9135_v60 = vld [vmem:[%s11817_s15 + $0x208] sm:$0xf0]  ;;  %v10103_v35 = vld [vmem:[%s11817_s15 + $0x990] sm:$0xf0] }
 0x30f   : > { %6081 = vmatmul.bf16.vlgmr.msra.gmra.mxu1 %v12082_v16  ;;  %6109 = vmatmul.bf16.vlgmr.msra.gmra.mxu3 %v12082_v16  ;;  %v9902_v3 = vor.u32 %v11087_v7, %v9901_v11  ;;  %v11184_v7 = vld [vmem:[%s11817_s15 + $0xb0c] sm:$0xf0] }
 0x310   : > { %6129 = vmatpush.bf16.msrb.mxu1 %v10382_v57  ;;  %6157 = vmatpush.bf16.msrb.mxu3 %v10386_v6  ;;  %v10883_v57 = vld [vmem:[%s11817_s15 + $0x1ac] sm:$0xf]  ;;  %v5872_v12 = vpop.f32.mrf.mxu2 }
 0x311   : > { %v5873_v6 = vadd.f32 %v5872_v12, %v3858_v38  ;;  %v9138_v56 = vor.u32 %v10883_v57, %v9135_v60  ;;  %v10980_v57 = vld [vmem:[%s11817_s15 + $0x4b4] sm:$0xf] }
 0x312   : > { %6116 = vmatpush.bf16.msrb.mxu0 %v9518_v42  ;;  %6144 = vmatpush.bf16.msrb.mxu2 %v9522_v20  ;;  %v5846_v5 = vpop.f32.mrf.mxu0  ;;  %v9037_v42 = vld [vmem:[%s11817_s15 + $0xe8] sm:$0xf]  ;;  %v9906_v20 = vor.u32 %v11075_v13, %v9903_v14  ;;  %v5886_v1 = vpop.f32.mrf.mxu3  ;;  %v9527_v60 = vld [vmem:[%s11817_s15 + $0x510] sm:$0xf0] }
 0x313   : > { %v5847_v43 = vadd.f32 %v5846_v5, %v3857_v61  ;;  %v12397_v29 = vadd.f32 %v5886_v1, %v5873_v6  ;;  %v8941_v61 = vld [vmem:[%s11817_s15 + $0x28] sm:$0xf]  ;;  %v11172_v12 = vld [vmem:[%s11817_s15 + $0xab4] sm:$0xf]  ;;  %v10294_v6 = vor.u32 %v11184_v7, %v10293_v10  ;;  %v9530_v5 = vor.u32 %v10980_v57, %v9527_v60  ;;  %v11088_v10 = vld [vmem:[%s11817_s15 + $0x80c] sm:$0xf0] }
 0x314   : > { %6130 = vmatpush.bf16.msrb.mxu1 %v10286_v19  ;;  %6158 = vmatpush.bf16.msrb.mxu3 %v10290_v25  ;;  %v9805_v19 = vld [vmem:[%s11817_s15 + $0x6e8] sm:$0xf]  ;;  %v9039_v25 = vld [vmem:[%s11817_s15 + $0x148] sm:$0xf0]  ;;  %v5860_v22 = vpop.f32.mrf.mxu1  ;;  %v10295_v13 = vld [vmem:[%s11817_s15 + $0xb10] sm:$0xf0] }
 0x315   : > { %v9806_v32 = vor.u32 %v11063_v18, %v9805_v19  ;;  %v9042_v33 = vor.u32 %v10859_v23, %v9039_v25  ;;  %v9431_v19 = vld [vmem:[%s11817_s15 + $0x450] sm:$0xf0]  ;;  %v3859_v25 = vperm.slane %v12350_v24, 2 }
 0x316   : > { %6117 = vmatpush.bf16.msrb.mxu0 %v9422_v30  ;;  %6145 = vmatpush.bf16.msrb.mxu2 %v9426_v31  ;;  %v9038_v30 = vor.u32 %v10871_v17, %v9037_v42  ;;  %v12401_v31 = vadd.f32 %v5860_v22, %v5847_v43  ;;  %v10968_v43 = vld [vmem:[%s11817_s15 + $0x44c] sm:$0xf0]  ;;  %v10956_v17 = vld [vmem:[%s11817_s15 + $0x3f4] sm:$0xf] }
 0x317   : > { %v11160_v42 = vld [vmem:[%s11817_s15 + $0xa4c] sm:$0xf0]  ;;  %v10199_v18 = vld [vmem:[%s11817_s15 + $0xa50] sm:$0xf0]  ;;  %v9434_v27 = vor.u32 %v10956_v17, %v9431_v19 }
 0x318   : > { %6131 = vmatpush.bf16.msrb.mxu1 %v10190_v54  ;;  %6159 = vmatpush.bf16.msrb.mxu3 %v10194_v34  ;;  %v10847_v54 = vld [vmem:[%s11817_s15 + $0x84] sm:$0xf0]  ;;  %14017 = vst [vmem:[#allocation17_spill] sm:$0xff] %v12401_v31  ;;  %v5874_v40 = vpop.f32.mrf.mxu2  ;;  %v10944_v22 = vld [vmem:[%s11817_s15 + $0x38c] sm:$0xf0] }
 0x319   : > { %v11039_v34 = vld [vmem:[%s11817_s15 + $0x684] sm:$0xf0]  ;;  %v8942_v50 = vor.u32 %v10847_v54, %v8941_v61  ;;  %v11136_v54 = vld [vmem:[%s11817_s15 + $0x98c] sm:$0xf0]  ;;  %v9334_v39 = vor.u32 %v10944_v22, %v9333_v37  ;;  %v9143_v7 = vld [vmem:[%s11817_s15 + $0x210] sm:$0xf0] }
 0x31a   : > { %6118 = vmatpush.bf16.msrb.mxu0 %v9326_v44  ;;  %6146 = vmatpush.bf16.msrb.mxu2 %v9330_v47  ;;  %v9621_v44 = vld [vmem:[%s11817_s15 + $0x570] sm:$0xf]  ;;  %v5875_v47 = vadd.f32 %v5874_v40, %v3858_v38  ;;  %v9710_v46 = vor.u32 %v11039_v34, %v9709_v4  ;;  %v5888_v38 = vpop.f32.mrf.mxu3  ;;  %v11124_v34 = vld [vmem:[%s11817_s15 + $0x934] sm:$0xf] }
 0x31b   : > { %v9622_v63 = vor.u32 %v11016_v41, %v9621_v44  ;;  %v9237_v44 = vld [vmem:[%s11817_s15 + $0x270] sm:$0xf]  ;;  %v9815_v37 = vld [vmem:[%s11817_s15 + $0x750] sm:$0xf0] }
 0x31c   : > { %6132 = vmatpush.bf16.msrb.mxu1 %v10094_v45  ;;  %6160 = vmatpush.bf16.msrb.mxu3 %v10098_v51  ;;  %v10389_v45 = vld [vmem:[%s11817_s15 + $0xb70] sm:$0xf]  ;;  %v9623_v51 = vld [vmem:[%s11817_s15 + $0x5d0] sm:$0xf0]  ;;  %v12420_v11 = vadd.f32 %v5888_v38, %v5875_v47  ;;  %v10106_v47 = vor.u32 %v11124_v34, %v10103_v35 }
 0x31d   : > { %v10920_v41 = vld [vmem:[%s11817_s15 + $0x2cc] sm:$0xf0]  ;;  %v10836_v34 = vld [vmem:[%s11817_s15 + $0x34] sm:$0xf] }
 0x31e   : > { %6119 = vmatpush.bf16.msrb.mxu0 %v9230_v9  ;;  %6147 = vmatpush.bf16.msrb.mxu2 %v9234_v0  ;;  %v10390_v9 = vor.u32 %v11208_v52, %v10389_v45  ;;  %v9525_v0 = vld [vmem:[%s11817_s15 + $0x4b0] sm:$0xf]  ;;  %14018 = vst [vmem:[#allocation18_spill] sm:$0xff] %v12420_v11 }
 0x31f   : > { %v9526_v14 = vor.u32 %v10992_v2, %v9525_v0  ;;  %v10005_v45 = vld [vmem:[%s11817_s15 + $0x870] sm:$0xf] }
 0x320   : > { %6133 = vmatpush.bf16.msrb.mxu1 %v9998_v15  ;;  %6161 = vmatpush.bf16.msrb.mxu3 %v10002_v58  ;;  %v9626_v15 = vor.u32 %v11004_v49, %v9623_v51  ;;  %v10394_v58 = vor.u32 %v11196_v26, %v10391_v59  ;;  %v11112_v52 = vld [vmem:[%s11817_s15 + $0x8cc] sm:$0xf0]  ;;  %v10908_v49 = vld [vmem:[%s11817_s15 + $0x274] sm:$0xf]  ;;  %v3860_v26 = vperm.slane %v12350_v24, 3  ;;  %v9238_v59 = vor.u32 %v10920_v41, %v9237_v44 }
 0x321   : > { %v9239_v51 = vld [vmem:[%s11817_s15 + $0x2d0] sm:$0xf0]  ;;  %v9141_v38 = vld [vmem:[%s11817_s15 + $0x1b0] sm:$0xf]  ;;  %v9629_v41 = vld [vmem:[%s11817_s15 + $0x578] sm:$0xf] }
 0x322   : > { %6120 = vmatpush.bf16.msrb.mxu0 %v9134_v53  ;;  %6148 = vmatpush.bf16.msrb.mxu2 %v9138_v56  ;;  %v9429_v53 = vld [vmem:[%s11817_s15 + $0x3f0] sm:$0xf]  ;;  %v10298_v56 = vor.u32 %v11172_v12, %v10295_v13  ;;  %v11076_v13 = vld [vmem:[%s11817_s15 + $0x7b4] sm:$0xf] }
 0x323   : > { %v9430_v23 = vor.u32 %v10968_v43, %v9429_v53  ;;  %v10872_v17 = vld [vmem:[%s11817_s15 + $0x14c] sm:$0xf0] }
 0x324   : > { %6134 = vmatpush.bf16.msrb.mxu1 %v9902_v3  ;;  %6162 = vmatpush.bf16.msrb.mxu3 %v9906_v20  ;;  %v10197_v3 = vld [vmem:[%s11817_s15 + $0x9f0] sm:$0xf]  ;;  %v11148_v20 = vld [vmem:[%s11817_s15 + $0x9f4] sm:$0xf] }
 0x325   : > { %v10198_v1 = vor.u32 %v11160_v42, %v10197_v3  ;;  %v10202_v61 = vor.u32 %v11148_v20, %v10199_v18  ;;  %v9045_v42 = vld [vmem:[%s11817_s15 + $0xf0] sm:$0xf] }
 0x326   : > { %6121 = vmatpush.bf16.msrb.mxu0 %v9038_v30  ;;  %6149 = vmatpush.bf16.msrb.mxu2 %v9042_v33  ;;  %v10101_v30 = vld [vmem:[%s11817_s15 + $0x930] sm:$0xf]  ;;  %v9335_v33 = vld [vmem:[%s11817_s15 + $0x390] sm:$0xf0]  ;;  %v9046_v22 = vor.u32 %v10872_v17, %v9045_v42  ;;  %v10205_v42 = vld [vmem:[%s11817_s15 + $0x9f8] sm:$0xf] }
 0x327   : > { %v10102_v36 = vor.u32 %v11136_v54, %v10101_v30  ;;  %v9813_v19 = vld [vmem:[%s11817_s15 + $0x6f0] sm:$0xf] }
 0x328   : > { %6135 = vmatpush.bf16.msrb.mxu1 %v9806_v32  ;;  %6163 = vmatpush.bf16.msrb.mxu3 %v9810_v21  ;;  %v10932_v32 = vld [vmem:[%s11817_s15 + $0x334] sm:$0xf]  ;;  %v8949_v30 = vld [vmem:[%s11817_s15 + $0x30] sm:$0xf] }
 0x329   : > { %v9338_v40 = vor.u32 %v10932_v32, %v9335_v33  ;;  %v9717_v33 = vld [vmem:[%s11817_s15 + $0x630] sm:$0xf] }
 0x32a   : > { %6122 = vmatpush.bf16.msrb.mxu0 %v8942_v50  ;;  %6150 = vmatpush.bf16.msrb.mxu2 %v8946_v55  ;;  %v5900_v4 = vpop.f32.mrf.mxu0  ;;  %v10007_v55 = vld [vmem:[%s11817_s15 + $0x8d0] sm:$0xf0] }
 0x32b   : > { %v5901_v21 = vadd.f32 %v5900_v4, %v3859_v25  ;;  %v11040_v4 = vld [vmem:[%s11817_s15 + $0x68c] sm:$0xf0] }
 0x32c   : > { %6136 = vmatpush.bf16.msrb.mxu1 %v9710_v46  ;;  %6164 = vmatpush.bf16.msrb.mxu3 %v9714_v62  ;;  %v5914_v48 = vpop.f32.mrf.mxu1  ;;  %v11100_v46 = vld [vmem:[%s11817_s15 + $0x874] sm:$0xf]  ;;  %v10006_v62 = vor.u32 %v11112_v52, %v10005_v45  ;;  %v11017_v45 = vld [vmem:[%s11817_s15 + $0x5d4] sm:$0xf0] }
 0x32d   : > { %6123 = vmatmul.bf16.vlgmr.msrb.gmra.mxu0 %v12072_v28  ;;  %6151 = vmatmul.bf16.vlgmr.msrb.gmra.mxu2 %v12072_v28  ;;  %v12451_v50 = vadd.f32 %v5914_v48, %v5901_v21  ;;  %v10010_v0 = vor.u32 %v11100_v46, %v10007_v55  ;;  %v11028_v48 = vld [vmem:[%s11817_s15 + $0x634] sm:$0xf]  ;;  %v9631_v46 = vld [vmem:[%s11817_s15 + $0x5d8] sm:$0xf0] }
 0x32e   : > { %6171 = vmatpush.bf16.msra.mxu0 %v9622_v63  ;;  %6199 = vmatpush.bf16.msra.mxu2 %v9626_v15  ;;  %v9242_v63 = vor.u32 %v10908_v49, %v9239_v51  ;;  %v9909_v15 = vld [vmem:[%s11817_s15 + $0x7b0] sm:$0xf]  ;;  %v11209_v49 = vld [vmem:[%s11817_s15 + $0xbd4] sm:$0xf0]  ;;  %v11005_v51 = vld [vmem:[%s11817_s15 + $0x57c] sm:$0xf] }
 0x32f   : > { %6137 = vmatmul.bf16.vlgmr.msrb.gmra.mxu1 %v12082_v16  ;;  %6165 = vmatmul.bf16.vlgmr.msrb.gmra.mxu3 %v12082_v16  ;;  %v9910_v3 = vor.u32 %v11088_v10, %v9909_v15  ;;  %v10993_v10 = vld [vmem:[%s11817_s15 + $0x514] sm:$0xf0] }
 0x330   : > { %6185 = vmatpush.bf16.msra.mxu1 %v10390_v9  ;;  %6213 = vmatpush.bf16.msra.mxu3 %v10394_v58  ;;  %v10896_v9 = vld [vmem:[%s11817_s15 + $0x20c] sm:$0xf0]  ;;  %v5928_v2 = vpop.f32.mrf.mxu2  ;;  %v10884_v58 = vld [vmem:[%s11817_s15 + $0x1b4] sm:$0xf] }
 0x331   : > { %v5929_v57 = vadd.f32 %v5928_v2, %v3860_v26  ;;  %v9533_v2 = vld [vmem:[%s11817_s15 + $0x4b8] sm:$0xf] }
 0x332   : > { %6172 = vmatpush.bf16.msra.mxu0 %v9526_v14  ;;  %6200 = vmatpush.bf16.msra.mxu2 %v9530_v5  ;;  %v5902_v60 = vpop.f32.mrf.mxu0  ;;  %v5942_v12 = vpop.f32.mrf.mxu3  ;;  %v9911_v14 = vld [vmem:[%s11817_s15 + $0x810] sm:$0xf0]  ;;  %v9142_v5 = vor.u32 %v10896_v9, %v9141_v38  ;;  %v9630_v9 = vor.u32 %v11017_v45, %v9629_v41 }
 0x333   : > { %v12467_v43 = vadd.f32 %v5942_v12, %v5929_v57  ;;  %v9914_v20 = vor.u32 %v11076_v13, %v9911_v14  ;;  %v11185_v57 = vld [vmem:[%s11817_s15 + $0xb14] sm:$0xf0]  ;;  %v9535_v12 = vld [vmem:[%s11817_s15 + $0x518] sm:$0xf0] }
 0x334   : > { %6186 = vmatpush.bf16.msra.mxu1 %v10294_v6  ;;  %6214 = vmatpush.bf16.msra.mxu3 %v10298_v56  ;;  %v5903_v6 = vadd.f32 %v5902_v60, %v3859_v25  ;;  %v5916_v53 = vpop.f32.mrf.mxu1  ;;  %v9146_v56 = vor.u32 %v10884_v58, %v9143_v7  ;;  %v10860_v25 = vld [vmem:[%s11817_s15 + $0xf4] sm:$0xf]  ;;  %v10301_v58 = vld [vmem:[%s11817_s15 + $0xab8] sm:$0xf]  ;;  %v10981_v60 = vld [vmem:[%s11817_s15 + $0x4bc] sm:$0xf] }
 0x335   : > { %14019 = vst [vmem:[#allocation19_spill] sm:$0xff] %v12467_v43  ;;  %v11173_v13 = vld [vmem:[%s11817_s15 + $0xabc] sm:$0xf] }
 0x336   : > { %6173 = vmatpush.bf16.msra.mxu0 %v9430_v23  ;;  %6201 = vmatpush.bf16.msra.mxu2 %v9434_v27  ;;  %v12472_v18 = vadd.f32 %v5916_v53, %v5903_v6  ;;  %v11064_v23 = vld [vmem:[%s11817_s15 + $0x74c] sm:$0xf0]  ;;  %v11052_v27 = vld [vmem:[%s11817_s15 + $0x6f4] sm:$0xf]  ;;  %v10303_v14 = vld [vmem:[%s11817_s15 + $0xb18] sm:$0xf0]  ;;  %v9534_v6 = vor.u32 %v10993_v10, %v9533_v2  ;;  %v9538_v53 = vor.u32 %v10981_v60, %v9535_v12 }
 0x337   : > { %v9814_v54 = vor.u32 %v11064_v23, %v9813_v19  ;;  %v9818_v35 = vor.u32 %v11052_v27, %v9815_v37  ;;  %v10306_v17 = vor.u32 %v11173_v13, %v10303_v14  ;;  %v11161_v19 = vld [vmem:[%s11817_s15 + $0xa54] sm:$0xf0]  ;;  %v9439_v23 = vld [vmem:[%s11817_s15 + $0x458] sm:$0xf0]  ;;  %v3861_v37 = vperm.slane %v12350_v24, 4 }
 0x338   : > { %6187 = vmatpush.bf16.msra.mxu1 %v10198_v1  ;;  %6215 = vmatpush.bf16.msra.mxu3 %v10202_v61  ;;  %14020 = vst [vmem:[#allocation20_spill] sm:$0xff] %v12472_v18  ;;  %v9047_v1 = vld [vmem:[%s11817_s15 + $0x150] sm:$0xf0]  ;;  %v10848_v61 = vld [vmem:[%s11817_s15 + $0x8c] sm:$0xf0]  ;;  %v5930_v21 = vpop.f32.mrf.mxu2 }
 0x339   : > { %v9050_v32 = vor.u32 %v10860_v25, %v9047_v1  ;;  %v8950_v52 = vor.u32 %v10848_v61, %v8949_v30  ;;  %v11149_v25 = vld [vmem:[%s11817_s15 + $0x9fc] sm:$0xf]  ;;  %v9341_v61 = vld [vmem:[%s11817_s15 + $0x338] sm:$0xf] }
 0x33a   : > { %6174 = vmatpush.bf16.msra.mxu0 %v9334_v39  ;;  %6202 = vmatpush.bf16.msra.mxu2 %v9338_v40  ;;  %v8951_v39 = vld [vmem:[%s11817_s15 + $0x90] sm:$0xf0]  ;;  %v5931_v40 = vadd.f32 %v5930_v21, %v3860_v26  ;;  %v5944_v44 = vpop.f32.mrf.mxu3  ;;  %v9718_v26 = vor.u32 %v11040_v4, %v9717_v33  ;;  %v10207_v1 = vld [vmem:[%s11817_s15 + $0xa58] sm:$0xf0]  ;;  %v11137_v4 = vld [vmem:[%s11817_s15 + $0x994] sm:$0xf0] }
 0x33b   : > { %v10210_v33 = vor.u32 %v11149_v25, %v10207_v1  ;;  %v9149_v10 = vld [vmem:[%s11817_s15 + $0x1b8] sm:$0xf]  ;;  %v10885_v13 = vld [vmem:[%s11817_s15 + $0x1bc] sm:$0xf] }
 0x33c   : > { %6188 = vmatpush.bf16.msra.mxu1 %v10102_v36  ;;  %6216 = vmatpush.bf16.msra.mxu3 %v10106_v47  ;;  %v9719_v36 = vld [vmem:[%s11817_s15 + $0x690] sm:$0xf0]  ;;  %v10397_v47 = vld [vmem:[%s11817_s15 + $0xb78] sm:$0xf]  ;;  %v12493_v55 = vadd.f32 %v5944_v44, %v5931_v40  ;;  %v9151_v14 = vld [vmem:[%s11817_s15 + $0x218] sm:$0xf0] }
 0x33d   : > { %v9722_v38 = vor.u32 %v11028_v48, %v9719_v36  ;;  %v10398_v15 = vor.u32 %v11209_v49, %v10397_v47  ;;  %v10111_v48 = vld [vmem:[%s11817_s15 + $0x998] sm:$0xf0]  ;;  %v9245_v47 = vld [vmem:[%s11817_s15 + $0x278] sm:$0xf]  ;;  %v9154_v25 = vor.u32 %v10885_v13, %v9151_v14 }
 0x33e   : > { %6175 = vmatpush.bf16.msra.mxu0 %v9238_v59  ;;  %6203 = vmatpush.bf16.msra.mxu2 %v9242_v63  ;;  %14021 = vst [vmem:[#allocation21_spill] sm:$0xff] %v12493_v55  ;;  %v8954_v59 = vor.u32 %v10836_v34, %v8951_v39  ;;  %v10399_v63 = vld [vmem:[%s11817_s15 + $0xbd8] sm:$0xf0]  ;;  %v10013_v49 = vld [vmem:[%s11817_s15 + $0x878] sm:$0xf] }
 0x33f   : > { %v10933_v34 = vld [vmem:[%s11817_s15 + $0x33c] sm:$0xf]  ;;  %v11089_v12 = vld [vmem:[%s11817_s15 + $0x814] sm:$0xf0] }
 0x340   : > { %6189 = vmatpush.bf16.msra.mxu1 %v10006_v62  ;;  %6217 = vmatpush.bf16.msra.mxu3 %v10010_v0  ;;  %v11197_v62 = vld [vmem:[%s11817_s15 + $0xb7c] sm:$0xf]  ;;  %v9634_v0 = vor.u32 %v11005_v51, %v9631_v46  ;;  %v9053_v1 = vld [vmem:[%s11817_s15 + $0xf8] sm:$0xf] }
 0x341   : > { %v10402_v7 = vor.u32 %v11197_v62, %v10399_v63  ;;  %v11125_v39 = vld [vmem:[%s11817_s15 + $0x93c] sm:$0xf] }
 0x342   : > { %6176 = vmatpush.bf16.msra.mxu0 %v9142_v5  ;;  %6204 = vmatpush.bf16.msra.mxu2 %v9146_v56  ;;  %v10302_v5 = vor.u32 %v11185_v57, %v10301_v58  ;;  %v10969_v56 = vld [vmem:[%s11817_s15 + $0x454] sm:$0xf0]  ;;  %v10114_v51 = vor.u32 %v11125_v39, %v10111_v48  ;;  %v9247_v62 = vld [vmem:[%s11817_s15 + $0x2d8] sm:$0xf0] }
 0x343   : > { %v11101_v63 = vld [vmem:[%s11817_s15 + $0x87c] sm:$0xf]  ;;  %v10897_v58 = vld [vmem:[%s11817_s15 + $0x214] sm:$0xf0] }
 0x344   : > { %6190 = vmatpush.bf16.msra.mxu1 %v9910_v3  ;;  %6218 = vmatpush.bf16.msra.mxu3 %v9914_v20  ;;  %v9437_v3 = vld [vmem:[%s11817_s15 + $0x3f8] sm:$0xf]  ;;  %v10957_v20 = vld [vmem:[%s11817_s15 + $0x3fc] sm:$0xf] }
 0x345   : > { %v9438_v27 = vor.u32 %v10969_v56, %v9437_v3  ;;  %v9442_v30 = vor.u32 %v10957_v20, %v9439_v23  ;;  %v11077_v3 = vld [vmem:[%s11817_s15 + $0x7bc] sm:$0xf] }
 0x346   : > { %6177 = vmatpush.bf16.msra.mxu0 %v9046_v22  ;;  %6205 = vmatpush.bf16.msra.mxu2 %v9050_v32  ;;  %v10206_v22 = vor.u32 %v11161_v19, %v10205_v42  ;;  %v10109_v32 = vld [vmem:[%s11817_s15 + $0x938] sm:$0xf]  ;;  %v9919_v56 = vld [vmem:[%s11817_s15 + $0x818] sm:$0xf0] }
 0x347   : > { %v10110_v41 = vor.u32 %v11137_v4, %v10109_v32  ;;  %v9055_v32 = vld [vmem:[%s11817_s15 + $0x158] sm:$0xf0] }
 0x348   : > { %6191 = vmatpush.bf16.msra.mxu1 %v9814_v54  ;;  %6219 = vmatpush.bf16.msra.mxu3 %v9818_v35  ;;  %v10945_v54 = vld [vmem:[%s11817_s15 + $0x394] sm:$0xf0]  ;;  %v9343_v35 = vld [vmem:[%s11817_s15 + $0x398] sm:$0xf0] }
 0x349   : > { %v9342_v40 = vor.u32 %v10945_v54, %v9341_v61  ;;  %v9346_v45 = vor.u32 %v10933_v34, %v9343_v35  ;;  %v11065_v61 = vld [vmem:[%s11817_s15 + $0x754] sm:$0xf0]  ;;  %v10861_v54 = vld [vmem:[%s11817_s15 + $0xfc] sm:$0xf] }
 0x34a   : > { %6178 = vmatpush.bf16.msra.mxu0 %v8950_v52  ;;  %6206 = vmatpush.bf16.msra.mxu2 %v8954_v59  ;;  %v5956_v21 = vpop.f32.mrf.mxu0  ;;  %v10921_v52 = vld [vmem:[%s11817_s15 + $0x2d4] sm:$0xf0]  ;;  %v10909_v59 = vld [vmem:[%s11817_s15 + $0x27c] sm:$0xf]  ;;  %v9058_v48 = vor.u32 %v10861_v54, %v9055_v32  ;;  %v11162_v32 = vld [vmem:[%s11817_s15 + $0xa5c] sm:$0xf0] }
 0x34b   : > { %v5957_v36 = vadd.f32 %v5956_v21, %v3861_v37  ;;  %v9250_v2 = vor.u32 %v10909_v59, %v9247_v62  ;;  %v9823_v4 = vld [vmem:[%s11817_s15 + $0x758] sm:$0xf0]  ;;  %v8957_v35 = vld [vmem:[%s11817_s15 + $0x38] sm:$0xf]  ;;  %v9637_v59 = vld [vmem:[%s11817_s15 + $0x580] sm:$0xf] }
 0x34c   : > { %6192 = vmatpush.bf16.msra.mxu1 %v9718_v26  ;;  %6220 = vmatpush.bf16.msra.mxu3 %v9722_v38  ;;  %v5970_v44 = vpop.f32.mrf.mxu1  ;;  %v11113_v26 = vld [vmem:[%s11817_s15 + $0x8d4] sm:$0xf0]  ;;  %v10015_v38 = vld [vmem:[%s11817_s15 + $0x8d8] sm:$0xf0]  ;;  %v11018_v62 = vld [vmem:[%s11817_s15 + $0x5dc] sm:$0xf0] }
 0x34d   : > { %6179 = vmatmul.bf16.vlgmr.msra.gmra.mxu0 %v12072_v28  ;;  %6207 = vmatmul.bf16.vlgmr.msra.gmra.mxu2 %v12072_v28  ;;  %v12529_v46 = vadd.f32 %v5970_v44, %v5957_v36  ;;  %v10018_v57 = vor.u32 %v11101_v63, %v10015_v38  ;;  %v10849_v21 = vld [vmem:[%s11817_s15 + $0x94] sm:$0xf0]  ;;  %v10837_v44 = vld [vmem:[%s11817_s15 + $0x3c] sm:$0xf]  ;;  %v10405_v63 = vld [vmem:[%s11817_s15 + $0xb80] sm:$0xf] }
 0x34e   : > { %6227 = vmatpush.bf16.msrb.mxu0 %v9630_v9  ;;  %6255 = vmatpush.bf16.msrb.mxu2 %v9634_v0  ;;  %v3862_v9 = vperm.slane %v12350_v24, 5  ;;  %v10014_v0 = vor.u32 %v11113_v26, %v10013_v49  ;;  %v9725_v36 = vld [vmem:[%s11817_s15 + $0x638] sm:$0xf]  ;;  %v9727_v49 = vld [vmem:[%s11817_s15 + $0x698] sm:$0xf0]  ;;  %v8958_v38 = vor.u32 %v10849_v21, %v8957_v35 }
 0x34f   : > { %6193 = vmatmul.bf16.vlgmr.msra.gmra.mxu1 %v12082_v16  ;;  %6221 = vmatmul.bf16.vlgmr.msra.gmra.mxu3 %v12082_v16  ;;  %14022 = vst [vmem:[#allocation22_spill] sm:$0xff] %v12529_v46  ;;  %v10215_v35 = vld [vmem:[%s11817_s15 + $0xa60] sm:$0xf0] }
 0x350   : > { %6241 = vmatpush.bf16.msrb.mxu1 %v10398_v15  ;;  %6269 = vmatpush.bf16.msrb.mxu3 %v10402_v7  ;;  %v9246_v15 = vor.u32 %v10921_v52, %v9245_v47  ;;  %v9917_v7 = vld [vmem:[%s11817_s15 + $0x7b8] sm:$0xf]  ;;  %v5984_v60 = vpop.f32.mrf.mxu2  ;;  %v8959_v47 = vld [vmem:[%s11817_s15 + $0x98] sm:$0xf0] }
 0x351   : > { %v9918_v23 = vor.u32 %v11089_v12, %v9917_v7  ;;  %v11029_v52 = vld [vmem:[%s11817_s15 + $0x63c] sm:$0xf]  ;;  %v11198_v7 = vld [vmem:[%s11817_s15 + $0xb84] sm:$0xf]  ;;  %v9638_v12 = vor.u32 %v11018_v62, %v9637_v59 }
 0x352   : > { %6228 = vmatpush.bf16.msrb.mxu0 %v9534_v6  ;;  %6256 = vmatpush.bf16.msrb.mxu2 %v9538_v53  ;;  %v5985_v6 = vadd.f32 %v5984_v60, %v3862_v9  ;;  %v5998_v53 = vpop.f32.mrf.mxu3  ;;  %v9730_v60 = vor.u32 %v11029_v52, %v9727_v49  ;;  %v10934_v52 = vld [vmem:[%s11817_s15 + $0x344] sm:$0xf] }
 0x353   : > { %v9351_v49 = vld [vmem:[%s11817_s15 + $0x3a0] sm:$0xf0] }
 0x354   : > { %6242 = vmatpush.bf16.msrb.mxu1 %v10302_v5  ;;  %6270 = vmatpush.bf16.msrb.mxu3 %v10306_v17  ;;  %v5958_v5 = vpop.f32.mrf.mxu0  ;;  %v9150_v17 = vor.u32 %v10897_v58, %v9149_v10  ;;  %v5972_v19 = vpop.f32.mrf.mxu1  ;;  %v12545_v20 = vadd.f32 %v5998_v53, %v5985_v6  ;;  %v8962_v58 = vor.u32 %v10837_v44, %v8959_v47  ;;  %v9541_v6 = vld [vmem:[%s11817_s15 + $0x4c0] sm:$0xf]  ;;  %v10119_v59 = vld [vmem:[%s11817_s15 + $0x9a0] sm:$0xf0] }
 0x355   : > { %v5959_v42 = vadd.f32 %v5958_v5, %v3861_v37  ;;  %v10994_v5 = vld [vmem:[%s11817_s15 + $0x51c] sm:$0xf0] }
 0x356   : > { %6229 = vmatpush.bf16.msrb.mxu0 %v9438_v27  ;;  %6257 = vmatpush.bf16.msrb.mxu2 %v9442_v30  ;;  %14023 = vst [vmem:[#allocation23_spill] sm:$0xff] %v12545_v20  ;;  %v10873_v27 = vld [vmem:[%s11817_s15 + $0x154] sm:$0xf0]  ;;  %v9922_v30 = vor.u32 %v11077_v3, %v9919_v56  ;;  %v10309_v53 = vld [vmem:[%s11817_s15 + $0xac0] sm:$0xf] }
 0x357   : > { %v12550_v37 = vadd.f32 %v5972_v19, %v5959_v42  ;;  %v9054_v34 = vor.u32 %v10873_v27, %v9053_v1  ;;  %v11186_v56 = vld [vmem:[%s11817_s15 + $0xb1c] sm:$0xf0]  ;;  %v10982_v42 = vld [vmem:[%s11817_s15 + $0x4c4] sm:$0xf] }
 0x358   : > { %6243 = vmatpush.bf16.msrb.mxu1 %v10206_v22  ;;  %6271 = vmatpush.bf16.msrb.mxu3 %v10210_v33  ;;  %v9821_v22 = vld [vmem:[%s11817_s15 + $0x6f8] sm:$0xf]  ;;  %v11053_v33 = vld [vmem:[%s11817_s15 + $0x6fc] sm:$0xf]  ;;  %v11174_v19 = vld [vmem:[%s11817_s15 + $0xac4] sm:$0xf]  ;;  %v10310_v1 = vor.u32 %v11186_v56, %v10309_v53 }
 0x359   : > { %14024 = vst [vmem:[#allocation24_spill] sm:$0xff] %v12550_v37  ;;  %v9822_v39 = vor.u32 %v11065_v61, %v9821_v22  ;;  %v9445_v22 = vld [vmem:[%s11817_s15 + $0x400] sm:$0xf] }
 0x35a   : > { %6230 = vmatpush.bf16.msrb.mxu0 %v9342_v40  ;;  %6258 = vmatpush.bf16.msrb.mxu2 %v9346_v45  ;;  %v11041_v40 = vld [vmem:[%s11817_s15 + $0x694] sm:$0xf0]  ;;  %v5986_v45 = vpop.f32.mrf.mxu2  ;;  %v6000_v26 = vpop.f32.mrf.mxu3  ;;  %v10213_v61 = vld [vmem:[%s11817_s15 + $0xa00] sm:$0xf] }
 0x35b   : > { %v10946_v44 = vld [vmem:[%s11817_s15 + $0x39c] sm:$0xf0] }
 0x35c   : > { %6244 = vmatpush.bf16.msrb.mxu1 %v10110_v41  ;;  %6272 = vmatpush.bf16.msrb.mxu3 %v10114_v51  ;;  %v9826_v41 = vor.u32 %v11053_v33, %v9823_v4  ;;  %v5987_v51 = vadd.f32 %v5986_v45, %v3862_v9  ;;  %v9726_v9 = vor.u32 %v11041_v40, %v9725_v36  ;;  %v10958_v33 = vld [vmem:[%s11817_s15 + $0x404] sm:$0xf]  ;;  %v9349_v40 = vld [vmem:[%s11817_s15 + $0x340] sm:$0xf] }
 0x35d   : > { %v9447_v4 = vld [vmem:[%s11817_s15 + $0x460] sm:$0xf0]  ;;  %v11138_v47 = vld [vmem:[%s11817_s15 + $0x99c] sm:$0xf0] }
 0x35e   : > { %6231 = vmatpush.bf16.msrb.mxu0 %v9246_v15  ;;  %6259 = vmatpush.bf16.msrb.mxu2 %v9250_v2  ;;  %v11210_v15 = vld [vmem:[%s11817_s15 + $0xbdc] sm:$0xf0]  ;;  %v9639_v2 = vld [vmem:[%s11817_s15 + $0x5e0] sm:$0xf0]  ;;  %v12571_v10 = vadd.f32 %v6000_v26, %v5987_v51  ;;  %v9450_v36 = vor.u32 %v10958_v33, %v9447_v4 }
 0x35f   : > { %v10406_v13 = vor.u32 %v11210_v15, %v10405_v63  ;;  %v11126_v26 = vld [vmem:[%s11817_s15 + $0x944] sm:$0xf]  ;;  %v9350_v63 = vor.u32 %v10946_v44, %v9349_v40  ;;  %v10874_v40 = vld [vmem:[%s11817_s15 + $0x15c] sm:$0xf0] }
 0x360   : > { %6245 = vmatpush.bf16.msrb.mxu1 %v10014_v0  ;;  %6273 = vmatpush.bf16.msrb.mxu3 %v10018_v57  ;;  %v11006_v0 = vld [vmem:[%s11817_s15 + $0x584] sm:$0xf]  ;;  %14025 = vst [vmem:[#allocation25_spill] sm:$0xff] %v12571_v10  ;;  %v9829_v44 = vld [vmem:[%s11817_s15 + $0x700] sm:$0xf] }
 0x361   : > { %v10407_v57 = vld [vmem:[%s11817_s15 + $0xbe0] sm:$0xf0]  ;;  %v9642_v14 = vor.u32 %v11006_v0, %v9639_v2  ;;  %v9354_v0 = vor.u32 %v10934_v52, %v9351_v49  ;;  %v9253_v2 = vld [vmem:[%s11817_s15 + $0x280] sm:$0xf] }
 0x362   : > { %6232 = vmatpush.bf16.msrb.mxu0 %v9150_v17  ;;  %6260 = vmatpush.bf16.msrb.mxu2 %v9154_v25  ;;  %v10410_v3 = vor.u32 %v11198_v7, %v10407_v57  ;;  %v9543_v17 = vld [vmem:[%s11817_s15 + $0x520] sm:$0xf0]  ;;  %v9542_v25 = vor.u32 %v10994_v5, %v9541_v6  ;;  %v10122_v7 = vor.u32 %v11126_v26, %v10119_v59  ;;  %v3864_v5 = vperm.slane %v12350_v24, 7  ;;  %v8965_v59 = vld [vmem:[%s11817_s15 + $0x40] sm:$0xf] }
 0x363   : > { %v9546_v27 = vor.u32 %v10982_v42, %v9543_v17  ;;  %v10023_v6 = vld [vmem:[%s11817_s15 + $0x8e0] sm:$0xf0]  ;;  %v9157_v42 = vld [vmem:[%s11817_s15 + $0x1c0] sm:$0xf] }
 0x364   : > { %6246 = vmatpush.bf16.msrb.mxu1 %v9918_v23  ;;  %6274 = vmatpush.bf16.msrb.mxu3 %v9922_v30  ;;  %v10311_v23 = vld [vmem:[%s11817_s15 + $0xb20] sm:$0xf0]  ;;  %v10970_v30 = vld [vmem:[%s11817_s15 + $0x45c] sm:$0xf0] }
 0x365   : > { %v10314_v54 = vor.u32 %v11174_v19, %v10311_v23  ;;  %v9446_v21 = vor.u32 %v10970_v30, %v9445_v22  ;;  %v10898_v17 = vld [vmem:[%s11817_s15 + $0x21c] sm:$0xf0]  ;;  %v9159_v22 = vld [vmem:[%s11817_s15 + $0x220] sm:$0xf0] }
 0x366   : > { %6233 = vmatpush.bf16.msrb.mxu0 %v9054_v34  ;;  %6261 = vmatpush.bf16.msrb.mxu2 %v9058_v48  ;;  %v11150_v34 = vld [vmem:[%s11817_s15 + $0xa04] sm:$0xf]  ;;  %v10214_v48 = vor.u32 %v11162_v32, %v10213_v61  ;;  %v9925_v19 = vld [vmem:[%s11817_s15 + $0x7c0] sm:$0xf]  ;;  %v9158_v4 = vor.u32 %v10898_v17, %v9157_v42  ;;  %v11211_v42 = vld [vmem:[%s11817_s15 + $0xbe4] sm:$0xf0] }
 0x367   : > { %v10218_v45 = vor.u32 %v11150_v34, %v10215_v35  ;;  %v9927_v32 = vld [vmem:[%s11817_s15 + $0x820] sm:$0xf0]  ;;  %v11007_v17 = vld [vmem:[%s11817_s15 + $0x58c] sm:$0xf] }
 0x368   : > { %6247 = vmatpush.bf16.msrb.mxu1 %v9822_v39  ;;  %6275 = vmatpush.bf16.msrb.mxu3 %v9826_v41  ;;  %v3863_v39 = vperm.slane %v12350_v24, 6  ;;  %v10117_v41 = vld [vmem:[%s11817_s15 + $0x940] sm:$0xf]  ;;  %v9063_v52 = vld [vmem:[%s11817_s15 + $0x160] sm:$0xf0] }
 0x369   : > { %v10118_v15 = vor.u32 %v11138_v47, %v10117_v41  ;;  %v10862_v47 = vld [vmem:[%s11817_s15 + $0x104] sm:$0xf] }
 0x36a   : > { %6234 = vmatpush.bf16.msrb.mxu0 %v8958_v38  ;;  %6262 = vmatpush.bf16.msrb.mxu2 %v8962_v58  ;;  %v6012_v51 = vpop.f32.mrf.mxu0  ;;  %v10021_v58 = vld [vmem:[%s11817_s15 + $0x880] sm:$0xf]  ;;  %v11054_v49 = vld [vmem:[%s11817_s15 + $0x704] sm:$0xf] }
 0x36b   : > { %v6013_v62 = vadd.f32 %v6012_v51, %v3863_v39  ;;  %v9831_v51 = vld [vmem:[%s11817_s15 + $0x760] sm:$0xf0] }
 0x36c   : > { %6248 = vmatpush.bf16.msrb.mxu1 %v9726_v9  ;;  %6276 = vmatpush.bf16.msrb.mxu3 %v9730_v60  ;;  %v6026_v38 = vpop.f32.mrf.mxu1  ;;  %v10922_v9 = vld [vmem:[%s11817_s15 + $0x2dc] sm:$0xf0] }
 0x36d   : > { %6235 = vmatmul.bf16.vlgmr.msrb.gmra.mxu0 %v12072_v28  ;;  %6263 = vmatmul.bf16.vlgmr.msrb.gmra.mxu2 %v12072_v28  ;;  %v12607_v57 = vadd.f32 %v6026_v38, %v6013_v62  ;;  %v11114_v60 = vld [vmem:[%s11817_s15 + $0x8dc] sm:$0xf0]  ;;  %v9254_v53 = vor.u32 %v10922_v9, %v9253_v2  ;;  %v9066_v38 = vor.u32 %v10862_v47, %v9063_v52  ;;  %v10838_v2 = vld [vmem:[%s11817_s15 + $0x44] sm:$0xf]  ;;  %v10971_v52 = vld [vmem:[%s11817_s15 + $0x464] sm:$0xf0] }
 0x36e   : > { %6283 = vmatpush.bf16.msra.mxu0 %v9638_v12  ;;  %6311 = vmatpush.bf16.msra.mxu2 %v9642_v14  ;;  %v10910_v12 = vld [vmem:[%s11817_s15 + $0x284] sm:$0xf]  ;;  %v10850_v62 = vld [vmem:[%s11817_s15 + $0x9c] sm:$0xf0]  ;;  %v9834_v9 = vor.u32 %v11054_v49, %v9831_v51  ;;  %v10221_v49 = vld [vmem:[%s11817_s15 + $0xa08] sm:$0xf] }
 0x36f   : > { %6249 = vmatmul.bf16.vlgmr.msrb.gmra.mxu1 %v12082_v16  ;;  %6277 = vmatmul.bf16.vlgmr.msrb.gmra.mxu3 %v12082_v16  ;;  %14026 = vst [vmem:[#allocation26_spill] sm:$0xff] %v12607_v57  ;;  %v11102_v14 = vld [vmem:[%s11817_s15 + $0x884] sm:$0xf] }
 0x370   : > { %6297 = vmatpush.bf16.msra.mxu1 %v10406_v13  ;;  %6325 = vmatpush.bf16.msra.mxu3 %v10410_v3  ;;  %v9255_v13 = vld [vmem:[%s11817_s15 + $0x2e0] sm:$0xf0]  ;;  %v10022_v3 = vor.u32 %v11114_v60, %v10021_v58  ;;  %v10026_v23 = vor.u32 %v11102_v14, %v10023_v6  ;;  %v9645_v6 = vld [vmem:[%s11817_s15 + $0x588] sm:$0xf] }
 0x371   : > { %v9258_v56 = vor.u32 %v10910_v12, %v9255_v13  ;;  %v11030_v60 = vld [vmem:[%s11817_s15 + $0x644] sm:$0xf] }
 0x372   : > { %6284 = vmatpush.bf16.msra.mxu0 %v9542_v25  ;;  %6312 = vmatpush.bf16.msra.mxu2 %v9546_v27  ;;  %v6040_v25 = vpop.f32.mrf.mxu2  ;;  %v10886_v27 = vld [vmem:[%s11817_s15 + $0x1c4] sm:$0xf]  ;;  %v6014_v30 = vpop.f32.mrf.mxu0 }
 0x373   : > { %v6041_v24 = vadd.f32 %v6040_v25, %v3864_v5  ;;  %v6054_v61 = vpop.f32.mrf.mxu3  ;;  %v6015_v33 = vadd.f32 %v6014_v30, %v3863_v39  ;;  %v9735_v12 = vld [vmem:[%s11817_s15 + $0x6a0] sm:$0xf0] }
 0x374   : > { %6298 = vmatpush.bf16.msra.mxu1 %v10310_v1  ;;  %6326 = vmatpush.bf16.msra.mxu3 %v10314_v54  ;;  %v11090_v1 = vld [vmem:[%s11817_s15 + $0x81c] sm:$0xf0]  ;;  %v11078_v54 = vld [vmem:[%s11817_s15 + $0x7c4] sm:$0xf]  ;;  %v6028_v34 = vpop.f32.mrf.mxu1 }
 0x375   : > { %v12623_v35 = vadd.f32 %v6054_v61, %v6041_v24  ;;  %v9930_v41 = vor.u32 %v11078_v54, %v9927_v32  ;;  %v12628_v39 = vadd.f32 %v6028_v34, %v6015_v33  ;;  %v9549_v54 = vld [vmem:[%s11817_s15 + $0x4c8] sm:$0xf] }
 0x376   : > { %6285 = vmatpush.bf16.msra.mxu0 %v9446_v21  ;;  %6313 = vmatpush.bf16.msra.mxu2 %v9450_v36  ;;  %v9926_v21 = vor.u32 %v11090_v1, %v9925_v19  ;;  %v9061_v36 = vld [vmem:[%s11817_s15 + $0x100] sm:$0xf]  ;;  %v9647_v19 = vld [vmem:[%s11817_s15 + $0x5e8] sm:$0xf0]  ;;  %v10995_v32 = vld [vmem:[%s11817_s15 + $0x524] sm:$0xf0] }
 0x377   : > { %14027 = vst [vmem:[#allocation27_spill] sm:$0xff] %v12623_v35  ;;  %v9062_v26 = vor.u32 %v10874_v40, %v9061_v36  ;;  %v11199_v1 = vld [vmem:[%s11817_s15 + $0xb8c] sm:$0xf]  ;;  %v9650_v61 = vor.u32 %v11007_v17, %v9647_v19  ;;  %v10317_v33 = vld [vmem:[%s11817_s15 + $0xac8] sm:$0xf] }
 0x378   : > { %6299 = vmatpush.bf16.msra.mxu1 %v10214_v48  ;;  %6327 = vmatpush.bf16.msra.mxu3 %v10218_v45  ;;  %v9162_v48 = vor.u32 %v10886_v27, %v9159_v22  ;;  %14028 = vst [vmem:[#allocation28_spill] sm:$0xff] %v12628_v39  ;;  %v11066_v45 = vld [vmem:[%s11817_s15 + $0x75c] sm:$0xf0]  ;;  %v10415_v27 = vld [vmem:[%s11817_s15 + $0xbe8] sm:$0xf0]  ;;  %v9738_v22 = vor.u32 %v11030_v60, %v9735_v12 }
 0x379   : > { %v11187_v34 = vld [vmem:[%s11817_s15 + $0xb24] sm:$0xf0]  ;;  %v11175_v36 = vld [vmem:[%s11817_s15 + $0xacc] sm:$0xf] }
 0x37a   : > { %6286 = vmatpush.bf16.msra.mxu0 %v9350_v63  ;;  %6314 = vmatpush.bf16.msra.mxu2 %v9354_v0  ;;  %v9830_v63 = vor.u32 %v11066_v45, %v9829_v44  ;;  %v11042_v0 = vld [vmem:[%s11817_s15 + $0x69c] sm:$0xf0]  ;;  %v6042_v58 = vpop.f32.mrf.mxu2  ;;  %v10319_v40 = vld [vmem:[%s11817_s15 + $0xb28] sm:$0xf0]  ;;  %v9550_v44 = vor.u32 %v10995_v32, %v9549_v54  ;;  %v10318_v45 = vor.u32 %v11187_v34, %v10317_v33  ;;  %v10947_v60 = vld [vmem:[%s11817_s15 + $0x3a4] sm:$0xf0] }
 0x37b   : > { %v6043_v13 = vadd.f32 %v6042_v58, %v3864_v5  ;;  %v6056_v14 = vpop.f32.mrf.mxu3  ;;  %v12665_v51 = vld [vmem:[%s11823_s21 + $0x8] sm:$0xff] }
 0x37c   : > { %6300 = vmatpush.bf16.msra.mxu1 %v10118_v15  ;;  %6328 = vmatpush.bf16.msra.mxu3 %v10122_v7  ;;  %v9733_v15 = vld [vmem:[%s11817_s15 + $0x640] sm:$0xf]  ;;  %v8967_v7 = vld [vmem:[%s11817_s15 + $0xa0] sm:$0xf0]  ;;  %v10125_v12 = vld [vmem:[%s11817_s15 + $0x948] sm:$0xf] }
 0x37d   : > { %v9734_v5 = vor.u32 %v11042_v0, %v9733_v15  ;;  %v8970_v25 = vor.u32 %v10838_v2, %v8967_v7  ;;  %v10223_v15 = vld [vmem:[%s11817_s15 + $0xa68] sm:$0xf0]  ;;  %v3865_v2 = vperm.slane %v12665_v51, 0  ;;  %v9357_v7 = vld [vmem:[%s11817_s15 + $0x348] sm:$0xf] }
 0x37e   : > { %6287 = vmatpush.bf16.msra.mxu0 %v9254_v53  ;;  %6315 = vmatpush.bf16.msra.mxu2 %v9258_v56  ;;  %v11019_v53 = vld [vmem:[%s11817_s15 + $0x5e4] sm:$0xf0]  ;;  %v8966_v56 = vor.u32 %v10850_v62, %v8965_v59  ;;  %v10959_v62 = vld [vmem:[%s11817_s15 + $0x40c] sm:$0xf]  ;;  %v9358_v19 = vor.u32 %v10947_v60, %v9357_v7 }
 0x37f   : > { %v9646_v24 = vor.u32 %v11019_v53, %v9645_v6  ;;  %v11163_v59 = vld [vmem:[%s11817_s15 + $0xa64] sm:$0xf0]  ;;  %v10935_v6 = vld [vmem:[%s11817_s15 + $0x34c] sm:$0xf] }
 0x380   : > { %6301 = vmatpush.bf16.msra.mxu1 %v10022_v3  ;;  %6329 = vmatpush.bf16.msra.mxu3 %v10026_v23  ;;  %v10413_v3 = vld [vmem:[%s11817_s15 + $0xb88] sm:$0xf]  ;;  %v12649_v23 = vadd.f32 %v6056_v14, %v6043_v13  ;;  %v9359_v53 = vld [vmem:[%s11817_s15 + $0x3a8] sm:$0xf0] }
 0x381   : > { %v10414_v30 = vor.u32 %v11211_v42, %v10413_v3  ;;  %v11139_v14 = vld [vmem:[%s11817_s15 + $0x9a4] sm:$0xf0]  ;;  %v10127_v42 = vld [vmem:[%s11817_s15 + $0x9a8] sm:$0xf0] }
 0x382   : > { %6288 = vmatpush.bf16.msra.mxu0 %v9158_v4  ;;  %6316 = vmatpush.bf16.msra.mxu2 %v9162_v48  ;;  %14029 = vst [vmem:[#allocation29_spill] sm:$0xff] %v12649_v23  ;;  %v10418_v4 = vor.u32 %v11199_v1, %v10415_v27  ;;  %v9551_v48 = vld [vmem:[%s11817_s15 + $0x528] sm:$0xf0]  ;;  %v9362_v1 = vor.u32 %v10935_v6, %v9359_v53  ;;  %v9261_v27 = vld [vmem:[%s11817_s15 + $0x288] sm:$0xf] }
 0x383   : > { %v11115_v54 = vld [vmem:[%s11817_s15 + $0x8e4] sm:$0xf0]  ;;  %v10911_v32 = vld [vmem:[%s11817_s15 + $0x28c] sm:$0xf] }
 0x384   : > { %6302 = vmatpush.bf16.msra.mxu1 %v9926_v21  ;;  %6330 = vmatpush.bf16.msra.mxu3 %v9930_v41  ;;  %v10983_v21 = vld [vmem:[%s11817_s15 + $0x4cc] sm:$0xf]  ;;  %v9453_v41 = vld [vmem:[%s11817_s15 + $0x408] sm:$0xf] }
 0x385   : > { %v9554_v47 = vor.u32 %v10983_v21, %v9551_v48  ;;  %v9454_v0 = vor.u32 %v10971_v52, %v9453_v41  ;;  %v9263_v33 = vld [vmem:[%s11817_s15 + $0x2e8] sm:$0xf0]  ;;  %v3866_v21 = vperm.slane %v12665_v51, 1  ;;  %v10899_v41 = vld [vmem:[%s11817_s15 + $0x224] sm:$0xf0] }
 0x386   : > { %6289 = vmatpush.bf16.msra.mxu0 %v9062_v26  ;;  %6317 = vmatpush.bf16.msra.mxu2 %v9066_v38  ;;  %v10322_v26 = vor.u32 %v11175_v36, %v10319_v40  ;;  %v11151_v38 = vld [vmem:[%s11817_s15 + $0xa0c] sm:$0xf]  ;;  %v9266_v40 = vor.u32 %v10911_v32, %v9263_v33  ;;  %v10875_v6 = vld [vmem:[%s11817_s15 + $0x164] sm:$0xf0] }
 0x387   : > { %v10226_v13 = vor.u32 %v11151_v38, %v10223_v15  ;;  %v10031_v34 = vld [vmem:[%s11817_s15 + $0x8e8] sm:$0xf0]  ;;  %v9837_v53 = vld [vmem:[%s11817_s15 + $0x708] sm:$0xf] }
 0x388   : > { %6303 = vmatpush.bf16.msra.mxu1 %v9830_v63  ;;  %6331 = vmatpush.bf16.msra.mxu3 %v9834_v9  ;;  %v9455_v63 = vld [vmem:[%s11817_s15 + $0x468] sm:$0xf0]  ;;  %v10222_v9 = vor.u32 %v11163_v59, %v10221_v49  ;;  %v11091_v49 = vld [vmem:[%s11817_s15 + $0x824] sm:$0xf0] }
 0x389   : > { %v9458_v58 = vor.u32 %v10959_v62, %v9455_v63  ;;  %v9167_v59 = vld [vmem:[%s11817_s15 + $0x228] sm:$0xf0] }
 0x38a   : > { %6290 = vmatpush.bf16.msra.mxu0 %v8966_v56  ;;  %6318 = vmatpush.bf16.msra.mxu2 %v8970_v25  ;;  %v6068_v3 = vpop.f32.mrf.mxu0  ;;  %v11127_v56 = vld [vmem:[%s11817_s15 + $0x94c] sm:$0xf]  ;;  %v10126_v25 = vor.u32 %v11139_v14, %v10125_v12  ;;  %v9069_v14 = vld [vmem:[%s11817_s15 + $0x108] sm:$0xf] }
 0x38b   : > { %v6069_v17 = vadd.f32 %v6068_v3, %v3865_v2  ;;  %v11079_v15 = vld [vmem:[%s11817_s15 + $0x7cc] sm:$0xf] }
 0x38c   : > { %6304 = vmatpush.bf16.msra.mxu1 %v9734_v5  ;;  %6332 = vmatpush.bf16.msra.mxu3 %v9738_v22  ;;  %v6082_v5 = vpop.f32.mrf.mxu1  ;;  %v10923_v22 = vld [vmem:[%s11817_s15 + $0x2e4] sm:$0xf0]  ;;  %v10839_v32 = vld [vmem:[%s11817_s15 + $0x4c] sm:$0xf] }
 0x38d   : > { %6291 = vmatmul.bf16.vlgmr.msra.gmra.mxu0 %v12072_v28  ;;  %6319 = vmatmul.bf16.vlgmr.msra.gmra.mxu2 %v12072_v28  ;;  %v9262_v48 = vor.u32 %v10923_v22, %v9261_v27  ;;  %v10851_v27 = vld [vmem:[%s11817_s15 + $0xa4] sm:$0xf0] }
 0x38e   : > { %6339 = vmatpush.bf16.msrb.mxu0 %v9646_v24  ;;  %6367 = vmatpush.bf16.msrb.mxu2 %v9650_v61  ;;  %v10029_v24 = vld [vmem:[%s11817_s15 + $0x888] sm:$0xf]  ;;  %v12688_v61 = vadd.f32 %v6082_v5, %v6069_v17  ;;  %v9071_v17 = vld [vmem:[%s11817_s15 + $0x168] sm:$0xf0] }
 0x38f   : > { %6305 = vmatmul.bf16.vlgmr.msra.gmra.mxu1 %v12082_v16  ;;  %6333 = vmatmul.bf16.vlgmr.msra.gmra.mxu3 %v12082_v16  ;;  %v10030_v36 = vor.u32 %v11115_v54, %v10029_v24  ;;  %v9839_v5 = vld [vmem:[%s11817_s15 + $0x768] sm:$0xf0]  ;;  %v11043_v54 = vld [vmem:[%s11817_s15 + $0x6a4] sm:$0xf0] }
 0x390   : > { %6353 = vmatpush.bf16.msrb.mxu1 %v10414_v30  ;;  %6381 = vmatpush.bf16.msrb.mxu3 %v10418_v4  ;;  %v10130_v30 = vor.u32 %v11127_v56, %v10127_v42  ;;  %14030 = vst [vmem:[#allocation30_spill] sm:$0xff] %v12688_v61  ;;  %v11103_v4 = vld [vmem:[%s11817_s15 + $0x88c] sm:$0xf]  ;;  %v6096_v52 = vpop.f32.mrf.mxu2  ;;  %v11067_v56 = vld [vmem:[%s11817_s15 + $0x764] sm:$0xf0] }
 0x391   : > { %v6097_v62 = vadd.f32 %v6096_v52, %v3866_v21  ;;  %v10863_v42 = vld [vmem:[%s11817_s15 + $0x10c] sm:$0xf]  ;;  %v9838_v22 = vor.u32 %v11067_v56, %v9837_v53  ;;  %v11188_v53 = vld [vmem:[%s11817_s15 + $0xb2c] sm:$0xf0]  ;;  %v9559_v56 = vld [vmem:[%s11817_s15 + $0x530] sm:$0xf0] }
 0x392   : > { %6340 = vmatpush.bf16.msrb.mxu0 %v9550_v44  ;;  %6368 = vmatpush.bf16.msrb.mxu2 %v9554_v47  ;;  %v9165_v44 = vld [vmem:[%s11817_s15 + $0x1c8] sm:$0xf]  ;;  %v10034_v47 = vor.u32 %v11103_v4, %v10031_v34  ;;  %v6070_v63 = vpop.f32.mrf.mxu0  ;;  %v6110_v38 = vpop.f32.mrf.mxu3  ;;  %v9074_v24 = vor.u32 %v10863_v42, %v9071_v17  ;;  %v8975_v34 = vld [vmem:[%s11817_s15 + $0xa8] sm:$0xf0]  ;;  %v11176_v42 = vld [vmem:[%s11817_s15 + $0xad4] sm:$0xf] }
 0x393   : > { %v12704_v60 = vadd.f32 %v6110_v38, %v6097_v62  ;;  %v11200_v38 = vld [vmem:[%s11817_s15 + $0xb94] sm:$0xf] }
 0x394   : > { %6354 = vmatpush.bf16.msrb.mxu1 %v10318_v45  ;;  %6382 = vmatpush.bf16.msrb.mxu3 %v10322_v26  ;;  %v9933_v45 = vld [vmem:[%s11817_s15 + $0x7c8] sm:$0xf]  ;;  %v10887_v26 = vld [vmem:[%s11817_s15 + $0x1cc] sm:$0xf]  ;;  %v6084_v7 = vpop.f32.mrf.mxu1  ;;  %v10327_v17 = vld [vmem:[%s11817_s15 + $0xb30] sm:$0xf0] }
 0x395   : > { %v9934_v12 = vor.u32 %v11091_v49, %v9933_v45  ;;  %v11020_v45 = vld [vmem:[%s11817_s15 + $0x5ec] sm:$0xf0] }
 0x396   : > { %6341 = vmatpush.bf16.msrb.mxu0 %v9454_v0  ;;  %6369 = vmatpush.bf16.msrb.mxu2 %v9458_v58  ;;  %v9935_v0 = vld [vmem:[%s11817_s15 + $0x828] sm:$0xf0]  ;;  %v9166_v58 = vor.u32 %v10899_v41, %v9165_v44  ;;  %v9653_v41 = vld [vmem:[%s11817_s15 + $0x590] sm:$0xf] }
 0x397   : > { %v9938_v3 = vor.u32 %v11079_v15, %v9935_v0  ;;  %v11212_v49 = vld [vmem:[%s11817_s15 + $0xbec] sm:$0xf0]  ;;  %v10423_v15 = vld [vmem:[%s11817_s15 + $0xbf0] sm:$0xf0] }
 0x398   : > { %6355 = vmatpush.bf16.msrb.mxu1 %v10222_v9  ;;  %6383 = vmatpush.bf16.msrb.mxu3 %v10226_v13  ;;  %v6071_v9 = vadd.f32 %v6070_v63, %v3865_v2  ;;  %v9170_v13 = vor.u32 %v10887_v26, %v9167_v59  ;;  %v6098_v4 = vpop.f32.mrf.mxu2  ;;  %v11008_v26 = vld [vmem:[%s11817_s15 + $0x594] sm:$0xf]  ;;  %v8978_v63 = vor.u32 %v10839_v32, %v8975_v34 }
 0x399   : > { %v9655_v59 = vld [vmem:[%s11817_s15 + $0x5f0] sm:$0xf0] }
 0x39a   : > { %6342 = vmatpush.bf16.msrb.mxu0 %v9358_v19  ;;  %6370 = vmatpush.bf16.msrb.mxu2 %v9362_v1  ;;  %v12709_v2 = vadd.f32 %v6084_v7, %v6071_v9  ;;  %v11055_v19 = vld [vmem:[%s11817_s15 + $0x70c] sm:$0xf]  ;;  %v8973_v1 = vld [vmem:[%s11817_s15 + $0x48] sm:$0xf]  ;;  %v6112_v44 = vpop.f32.mrf.mxu3  ;;  %v9654_v9 = vor.u32 %v11020_v45, %v9653_v41  ;;  %v9658_v7 = vor.u32 %v11008_v26, %v9655_v59  ;;  %v9463_v32 = vld [vmem:[%s11817_s15 + $0x470] sm:$0xf0] }
 0x39b   : > { %v9842_v33 = vor.u32 %v11055_v19, %v9839_v5  ;;  %v8974_v52 = vor.u32 %v10851_v27, %v8973_v1  ;;  %v9461_v1 = vld [vmem:[%s11817_s15 + $0x410] sm:$0xf]  ;;  %v9367_v26 = vld [vmem:[%s11817_s15 + $0x3b0] sm:$0xf0] }
 0x39c   : > { %6356 = vmatpush.bf16.msrb.mxu1 %v10126_v25  ;;  %6384 = vmatpush.bf16.msrb.mxu3 %v10130_v30  ;;  %14031 = vst [vmem:[#allocation31_spill] sm:$0xff] %v12709_v2  ;;  %v9070_v25 = vor.u32 %v10875_v6, %v9069_v14  ;;  %v9741_v30 = vld [vmem:[%s11817_s15 + $0x648] sm:$0xf]  ;;  %v10325_v14 = vld [vmem:[%s11817_s15 + $0xad0] sm:$0xf]  ;;  %v10426_v6 = vor.u32 %v11200_v38, %v10423_v15 }
 0x39d   : > { %v10326_v5 = vor.u32 %v11188_v53, %v10325_v14  ;;  %v10972_v27 = vld [vmem:[%s11817_s15 + $0x46c] sm:$0xf0] }
 0x39e   : > { %6343 = vmatpush.bf16.msrb.mxu0 %v9262_v48  ;;  %6371 = vmatpush.bf16.msrb.mxu2 %v9266_v40  ;;  %v11031_v48 = vld [vmem:[%s11817_s15 + $0x64c] sm:$0xf]  ;;  %v6099_v40 = vadd.f32 %v6098_v4, %v3866_v21  ;;  %v9742_v21 = vor.u32 %v11043_v54, %v9741_v30  ;;  %v11164_v30 = vld [vmem:[%s11817_s15 + $0xa6c] sm:$0xf0]  ;;  %v10960_v54 = vld [vmem:[%s11817_s15 + $0x414] sm:$0xf]  ;;  %v9462_v34 = vor.u32 %v10972_v27, %v9461_v1 }
 0x39f   : > { %v10231_v4 = vld [vmem:[%s11817_s15 + $0xa70] sm:$0xf0]  ;;  %v10948_v41 = vld [vmem:[%s11817_s15 + $0x3ac] sm:$0xf0] }
 0x3a0   : > { %6357 = vmatpush.bf16.msrb.mxu1 %v10030_v36  ;;  %6385 = vmatpush.bf16.msrb.mxu3 %v10034_v47  ;;  %v9743_v36 = vld [vmem:[%s11817_s15 + $0x6a8] sm:$0xf0]  ;;  %v10421_v47 = vld [vmem:[%s11817_s15 + $0xb90] sm:$0xf]  ;;  %v12730_v62 = vadd.f32 %v6112_v44, %v6099_v40  ;;  %v9466_v40 = vor.u32 %v10960_v54, %v9463_v32 }
 0x3a1   : > { %v9746_v0 = vor.u32 %v11031_v48, %v9743_v36  ;;  %v3867_v48 = vperm.slane %v12665_v51, 2  ;;  %v9365_v44 = vld [vmem:[%s11817_s15 + $0x350] sm:$0xf] }
 0x3a2   : > { %6344 = vmatpush.bf16.msrb.mxu0 %v9166_v58  ;;  %6372 = vmatpush.bf16.msrb.mxu2 %v9170_v13  ;;  %v10422_v58 = vor.u32 %v11212_v49, %v10421_v47  ;;  %v10996_v13 = vld [vmem:[%s11817_s15 + $0x52c] sm:$0xf0]  ;;  %v10936_v49 = vld [vmem:[%s11817_s15 + $0x354] sm:$0xf]  ;;  %v9366_v15 = vor.u32 %v10948_v41, %v9365_v44 }
 0x3a3   : > { %v10133_v45 = vld [vmem:[%s11817_s15 + $0x950] sm:$0xf]  ;;  %v11080_v44 = vld [vmem:[%s11817_s15 + $0x7d4] sm:$0xf] }
 0x3a4   : > { %6358 = vmatpush.bf16.msrb.mxu1 %v9934_v12  ;;  %6386 = vmatpush.bf16.msrb.mxu3 %v9938_v3  ;;  %v9557_v12 = vld [vmem:[%s11817_s15 + $0x4d0] sm:$0xf]  ;;  %v10984_v3 = vld [vmem:[%s11817_s15 + $0x4d4] sm:$0xf] }
 0x3a5   : > { %v9558_v19 = vor.u32 %v10996_v13, %v9557_v12  ;;  %v10924_v12 = vld [vmem:[%s11817_s15 + $0x2ec] sm:$0xf0]  ;;  %v9943_v41 = vld [vmem:[%s11817_s15 + $0x830] sm:$0xf0] }
 0x3a6   : > { %6345 = vmatpush.bf16.msrb.mxu0 %v9070_v25  ;;  %6373 = vmatpush.bf16.msrb.mxu2 %v9074_v24  ;;  %v9562_v25 = vor.u32 %v10984_v3, %v9559_v56  ;;  %v10330_v24 = vor.u32 %v11176_v42, %v10327_v17  ;;  %v10037_v13 = vld [vmem:[%s11817_s15 + $0x890] sm:$0xf]  ;;  %v10912_v3 = vld [vmem:[%s11817_s15 + $0x294] sm:$0xf] }
 0x3a7   : > { %v11116_v53 = vld [vmem:[%s11817_s15 + $0x8ec] sm:$0xf0]  ;;  %v9271_v56 = vld [vmem:[%s11817_s15 + $0x2f0] sm:$0xf0] }
 0x3a8   : > { %6359 = vmatpush.bf16.msrb.mxu1 %v9838_v22  ;;  %6387 = vmatpush.bf16.msrb.mxu3 %v9842_v33  ;;  %v10229_v22 = vld [vmem:[%s11817_s15 + $0xa10] sm:$0xf]  ;;  %v11152_v33 = vld [vmem:[%s11817_s15 + $0xa14] sm:$0xf]  ;;  %v9274_v1 = vor.u32 %v10912_v3, %v9271_v56 }
 0x3a9   : > { %v10230_v36 = vor.u32 %v11164_v30, %v10229_v22  ;;  %v10234_v47 = vor.u32 %v11152_v33, %v10231_v4  ;;  %v11104_v42 = vld [vmem:[%s11817_s15 + $0x894] sm:$0xf]  ;;  %v9173_v27 = vld [vmem:[%s11817_s15 + $0x1d0] sm:$0xf] }
 0x3aa   : > { %6346 = vmatpush.bf16.msrb.mxu0 %v8974_v52  ;;  %6374 = vmatpush.bf16.msrb.mxu2 %v8978_v63  ;;  %v11140_v52 = vld [vmem:[%s11817_s15 + $0x9ac] sm:$0xf0]  ;;  %v6124_v59 = vpop.f32.mrf.mxu0  ;;  %v10135_v63 = vld [vmem:[%s11817_s15 + $0x9b0] sm:$0xf0] }
 0x3ab   : > { %v6125_v38 = vadd.f32 %v6124_v59, %v3867_v48  ;;  %v10039_v17 = vld [vmem:[%s11817_s15 + $0x8f0] sm:$0xf0]  ;;  %v10900_v22 = vld [vmem:[%s11817_s15 + $0x22c] sm:$0xf0] }
 0x3ac   : > { %6360 = vmatpush.bf16.msrb.mxu1 %v9742_v21  ;;  %6388 = vmatpush.bf16.msrb.mxu3 %v9746_v0  ;;  %v11128_v21 = vld [vmem:[%s11817_s15 + $0x954] sm:$0xf]  ;;  %v6138_v0 = vpop.f32.mrf.mxu1  ;;  %v10042_v30 = vor.u32 %v11104_v42, %v10039_v17  ;;  %v11092_v32 = vld [vmem:[%s11817_s15 + $0x82c] sm:$0xf0] }
 0x3ad   : > { %6347 = vmatmul.bf16.vlgmr.msrb.gmra.mxu0 %v12072_v28  ;;  %6375 = vmatmul.bf16.vlgmr.msrb.gmra.mxu2 %v12072_v28  ;;  %v10138_v14 = vor.u32 %v11128_v21, %v10135_v63  ;;  %v10888_v33 = vld [vmem:[%s11817_s15 + $0x1d4] sm:$0xf]  ;;  %v9077_v21 = vld [vmem:[%s11817_s15 + $0x110] sm:$0xf] }
 0x3ae   : > { %6395 = vmatpush.bf16.msra.mxu0 %v9654_v9  ;;  %6423 = vmatpush.bf16.msra.mxu2 %v9658_v7  ;;  %v10134_v9 = vor.u32 %v11140_v52, %v10133_v45  ;;  %v9269_v7 = vld [vmem:[%s11817_s15 + $0x290] sm:$0xf]  ;;  %v9175_v4 = vld [vmem:[%s11817_s15 + $0x230] sm:$0xf0] }
 0x3af   : > { %6361 = vmatmul.bf16.vlgmr.msrb.gmra.mxu1 %v12082_v16  ;;  %6389 = vmatmul.bf16.vlgmr.msrb.gmra.mxu3 %v12082_v16  ;;  %v9178_v59 = vor.u32 %v10888_v33, %v9175_v4  ;;  %v10876_v63 = vld [vmem:[%s11817_s15 + $0x16c] sm:$0xf0]  ;;  %v11021_v33 = vld [vmem:[%s11817_s15 + $0x5f4] sm:$0xf0] }
 0x3b0   : > { %6409 = vmatpush.bf16.msra.mxu1 %v10422_v58  ;;  %6437 = vmatpush.bf16.msra.mxu3 %v10426_v6  ;;  %v9370_v58 = vor.u32 %v10936_v49, %v9367_v26  ;;  %v12766_v6 = vadd.f32 %v6138_v0, %v6125_v38  ;;  %v6152_v54 = vpop.f32.mrf.mxu2  ;;  %v9845_v38 = vld [vmem:[%s11817_s15 + $0x710] sm:$0xf]  ;;  %v10429_v4 = vld [vmem:[%s11817_s15 + $0xb98] sm:$0xf] }
 0x3b1   : > { %v11068_v0 = vld [vmem:[%s11817_s15 + $0x76c] sm:$0xf0] }
 0x3b2   : > { %6396 = vmatpush.bf16.msra.mxu0 %v9558_v19  ;;  %6424 = vmatpush.bf16.msra.mxu2 %v9562_v25  ;;  %14032 = vst [vmem:[#allocation32_spill] sm:$0xff] %v12766_v6  ;;  %v3868_v19 = vperm.slane %v12665_v51, 3  ;;  %v10038_v25 = vor.u32 %v11116_v53, %v10037_v13  ;;  %v9078_v13 = vor.u32 %v10876_v63, %v9077_v21  ;;  %v10852_v53 = vld [vmem:[%s11817_s15 + $0xac] sm:$0xf0] }
 0x3b3   : > { %v9846_v3 = vor.u32 %v11068_v0, %v9845_v38  ;;  %v9749_v42 = vld [vmem:[%s11817_s15 + $0x650] sm:$0xf]  ;;  %v9565_v38 = vld [vmem:[%s11817_s15 + $0x4d8] sm:$0xf] }
 0x3b4   : > { %6410 = vmatpush.bf16.msra.mxu1 %v10326_v5  ;;  %6438 = vmatpush.bf16.msra.mxu3 %v10330_v24  ;;  %v9270_v5 = vor.u32 %v10924_v12, %v9269_v7  ;;  %v9941_v24 = vld [vmem:[%s11817_s15 + $0x7d0] sm:$0xf]  ;;  %v6140_v52 = vpop.f32.mrf.mxu1  ;;  %v11056_v7 = vld [vmem:[%s11817_s15 + $0x714] sm:$0xf]  ;;  %v10333_v0 = vld [vmem:[%s11817_s15 + $0xad8] sm:$0xf] }
 0x3b5   : > { %v9942_v26 = vor.u32 %v11092_v32, %v9941_v24  ;;  %v9847_v12 = vld [vmem:[%s11817_s15 + $0x770] sm:$0xf0]  ;;  %v11044_v17 = vld [vmem:[%s11817_s15 + $0x6ac] sm:$0xf0]  ;;  %v9661_v32 = vld [vmem:[%s11817_s15 + $0x598] sm:$0xf] }
 0x3b6   : > { %6397 = vmatpush.bf16.msra.mxu0 %v9462_v34  ;;  %6425 = vmatpush.bf16.msra.mxu2 %v9466_v40  ;;  %v6153_v34 = vadd.f32 %v6152_v54, %v3868_v19  ;;  %v6166_v40 = vpop.f32.mrf.mxu3  ;;  %v9751_v24 = vld [vmem:[%s11817_s15 + $0x6b0] sm:$0xf0] }
 0x3b8   : > { %6411 = vmatpush.bf16.msra.mxu1 %v10230_v36  ;;  %6439 = vmatpush.bf16.msra.mxu3 %v10234_v47  ;;  %v6126_v36 = vpop.f32.mrf.mxu0  ;;  %v9174_v47 = vor.u32 %v10900_v22, %v9173_v27  ;;  %v12782_v49 = vadd.f32 %v6166_v40, %v6153_v34  ;;  %v8983_v27 = vld [vmem:[%s11817_s15 + $0xb0] sm:$0xf0]  ;;  %v11009_v40 = vld [vmem:[%s11817_s15 + $0x59c] sm:$0xf] }
 0x3b9   : > { %v6127_v45 = vadd.f32 %v6126_v36, %v3867_v48  ;;  %v11032_v22 = vld [vmem:[%s11817_s15 + $0x654] sm:$0xf]  ;;  %v11213_v36 = vld [vmem:[%s11817_s15 + $0xbf4] sm:$0xf0] }
 0x3ba   : > { %6398 = vmatpush.bf16.msra.mxu0 %v9366_v15  ;;  %6426 = vmatpush.bf16.msra.mxu2 %v9370_v58  ;;  %v9946_v15 = vor.u32 %v11080_v44, %v9943_v41  ;;  %v9079_v58 = vld [vmem:[%s11817_s15 + $0x170] sm:$0xf0]  ;;  %v9663_v44 = vld [vmem:[%s11817_s15 + $0x5f8] sm:$0xf0]  ;;  %v10430_v21 = vor.u32 %v11213_v36, %v10429_v4  ;;  %v9373_v4 = vld [vmem:[%s11817_s15 + $0x358] sm:$0xf] }
 0x3bb   : > { %v12787_v48 = vadd.f32 %v6140_v52, %v6127_v45  ;;  %v10431_v52 = vld [vmem:[%s11817_s15 + $0xbf8] sm:$0xf0]  ;;  %v9666_v63 = vor.u32 %v11009_v40, %v9663_v44  ;;  %v10141_v36 = vld [vmem:[%s11817_s15 + $0x958] sm:$0xf] }
 0x3bc   : > { %6412 = vmatpush.bf16.msra.mxu1 %v10134_v9  ;;  %6440 = vmatpush.bf16.msra.mxu3 %v10138_v14  ;;  %v10864_v9 = vld [vmem:[%s11817_s15 + $0x114] sm:$0xf]  ;;  %v8981_v14 = vld [vmem:[%s11817_s15 + $0x50] sm:$0xf]  ;;  %v11141_v44 = vld [vmem:[%s11817_s15 + $0x9b4] sm:$0xf0] }
 0x3bd   : > { %v9082_v56 = vor.u32 %v10864_v9, %v9079_v58  ;;  %v8982_v34 = vor.u32 %v10852_v53, %v8981_v14  ;;  %v11189_v58 = vld [vmem:[%s11817_s15 + $0xb34] sm:$0xf0]  ;;  %v10335_v14 = vld [vmem:[%s11817_s15 + $0xb38] sm:$0xf0] }
 0x3be   : > { %6399 = vmatpush.bf16.msra.mxu0 %v9270_v5  ;;  %6427 = vmatpush.bf16.msra.mxu2 %v9274_v1  ;;  %v10840_v5 = vld [vmem:[%s11817_s15 + $0x54] sm:$0xf]  ;;  %v6154_v1 = vpop.f32.mrf.mxu2  ;;  %v6168_v54 = vpop.f32.mrf.mxu3 }
 0x3bf   : > { %v8986_v45 = vor.u32 %v10840_v5, %v8983_v27  ;;  %v10237_v5 = vld [vmem:[%s11817_s15 + $0xa18] sm:$0xf]  ;;  %v10961_v27 = vld [vmem:[%s11817_s15 + $0x41c] sm:$0xf] }
 0x3c0   : > { %6413 = vmatpush.bf16.msra.mxu1 %v10038_v25  ;;  %6441 = vmatpush.bf16.msra.mxu3 %v10042_v30  ;;  %v9850_v25 = vor.u32 %v11056_v7, %v9847_v12  ;;  %v6155_v30 = vadd.f32 %v6154_v1, %v3868_v19  ;;  %v9750_v19 = vor.u32 %v11044_v17, %v9749_v42  ;;  %v10985_v7 = vld [vmem:[%s11817_s15 + $0x4dc] sm:$0xf]  ;;  %v9469_v42 = vld [vmem:[%s11817_s15 + $0x418] sm:$0xf] }
 0x3c1   : > { %v9567_v12 = vld [vmem:[%s11817_s15 + $0x538] sm:$0xf0]  ;;  %v10973_v17 = vld [vmem:[%s11817_s15 + $0x474] sm:$0xf0] }
 0x3c2   : > { %6400 = vmatpush.bf16.msra.mxu0 %v9174_v47  ;;  %6428 = vmatpush.bf16.msra.mxu2 %v9178_v59  ;;  %v12808_v41 = vadd.f32 %v6168_v54, %v6155_v30  ;;  %v11201_v47 = vld [vmem:[%s11817_s15 + $0xb9c] sm:$0xf]  ;;  %v9662_v59 = vor.u32 %v11021_v33, %v9661_v32  ;;  %v11165_v1 = vld [vmem:[%s11817_s15 + $0xa74] sm:$0xf0]  ;;  %v9470_v54 = vor.u32 %v10973_v17, %v9469_v42 }
 0x3c3   : > { %v10434_v9 = vor.u32 %v11201_v47, %v10431_v52  ;;  %v10239_v30 = vld [vmem:[%s11817_s15 + $0xa78] sm:$0xf0]  ;;  %v10238_v32 = vor.u32 %v11165_v1, %v10237_v5  ;;  %v10901_v42 = vld [vmem:[%s11817_s15 + $0x234] sm:$0xf0] }
 0x3c4   : > { %6414 = vmatpush.bf16.msra.mxu1 %v9942_v26  ;;  %6442 = vmatpush.bf16.msra.mxu3 %v9946_v15  ;;  %v9754_v26 = vor.u32 %v11032_v22, %v9751_v24  ;;  %v10997_v15 = vld [vmem:[%s11817_s15 + $0x534] sm:$0xf0]  ;;  %v9471_v22 = vld [vmem:[%s11817_s15 + $0x478] sm:$0xf0] }
 0x3c5   : > { %v9566_v53 = vor.u32 %v10997_v15, %v9565_v38  ;;  %v11153_v24 = vld [vmem:[%s11817_s15 + $0xa1c] sm:$0xf]  ;;  %v9474_v33 = vor.u32 %v10961_v27, %v9471_v22  ;;  %v10925_v38 = vld [vmem:[%s11817_s15 + $0x2f4] sm:$0xf0] }
 0x3c6   : > { %6401 = vmatpush.bf16.msra.mxu0 %v9078_v13  ;;  %6429 = vmatpush.bf16.msra.mxu2 %v9082_v56  ;;  %v11177_v13 = vld [vmem:[%s11817_s15 + $0xadc] sm:$0xf]  ;;  %v9570_v56 = vor.u32 %v10985_v7, %v9567_v12  ;;  %v10242_v40 = vor.u32 %v11153_v24, %v10239_v30  ;;  %v10045_v15 = vld [vmem:[%s11817_s15 + $0x898] sm:$0xf] }
 0x3c7   : > { %v11129_v47 = vld [vmem:[%s11817_s15 + $0x95c] sm:$0xf]  ;;  %v9949_v17 = vld [vmem:[%s11817_s15 + $0x7d8] sm:$0xf] }
 0x3c8   : > { %6415 = vmatpush.bf16.msra.mxu1 %v9846_v3  ;;  %6443 = vmatpush.bf16.msra.mxu3 %v9850_v25  ;;  %v10334_v3 = vor.u32 %v11189_v58, %v10333_v0  ;;  %v10338_v25 = vor.u32 %v11177_v13, %v10335_v14  ;;  %v10143_v52 = vld [vmem:[%s11817_s15 + $0x9b8] sm:$0xf0] }
 0x3c9   : > { %v10146_v0 = vor.u32 %v11129_v47, %v10143_v52  ;;  %v10913_v58 = vld [vmem:[%s11817_s15 + $0x29c] sm:$0xf] }
 0x3ca   : > { %6402 = vmatpush.bf16.msra.mxu0 %v8982_v34  ;;  %6430 = vmatpush.bf16.msra.mxu2 %v8986_v45  ;;  %v10949_v34 = vld [vmem:[%s11817_s15 + $0x3b4] sm:$0xf0]  ;;  %v9375_v45 = vld [vmem:[%s11817_s15 + $0x3b8] sm:$0xf0] }
 0x3cb   : > { %v9279_v7 = vld [vmem:[%s11817_s15 + $0x2f8] sm:$0xf0] }
 0x3cc   : > { %6416 = vmatpush.bf16.msra.mxu1 %v9750_v19  ;;  %6444 = vmatpush.bf16.msra.mxu3 %v9754_v26  ;;  %v10937_v19 = vld [vmem:[%s11817_s15 + $0x35c] sm:$0xf]  ;;  %v9374_v26 = vor.u32 %v10949_v34, %v9373_v4  ;;  %v10877_v4 = vld [vmem:[%s11817_s15 + $0x174] sm:$0xf0] }
 0x3cd   : > { %6403 = vmatmul.bf16.vlgmr.msra.gmra.mxu0 %v12072_v28  ;;  %6431 = vmatmul.bf16.vlgmr.msra.gmra.mxu2 %v12072_v28  ;;  %v11105_v12 = vld [vmem:[%s11817_s15 + $0x89c] sm:$0xf]  ;;  %v9853_v34 = vld [vmem:[%s11817_s15 + $0x718] sm:$0xf] }
 0x3ce   : > { %6451 = vmatpush.bf16.msrb.mxu0 %v9662_v59  ;;  %6479 = vmatpush.bf16.msrb.mxu2 %v9666_v63  ;;  %v10142_v59 = vor.u32 %v11141_v44, %v10141_v36  ;;  %v9277_v63 = vld [vmem:[%s11817_s15 + $0x298] sm:$0xf]  ;;  %v10047_v13 = vld [vmem:[%s11817_s15 + $0x8f8] sm:$0xf0] }
 0x3cf   : > { %6417 = vmatmul.bf16.vlgmr.msra.gmra.mxu1 %v12082_v16  ;;  %6445 = vmatmul.bf16.vlgmr.msra.gmra.mxu3 %v12082_v16  ;;  %v9278_v14 = vor.u32 %v10925_v38, %v9277_v63  ;;  %v10050_v5 = vor.u32 %v11105_v12, %v10047_v13  ;;  %v10889_v1 = vld [vmem:[%s11817_s15 + $0x1dc] sm:$0xf]  ;;  %v10853_v63 = vld [vmem:[%s11817_s15 + $0xb4] sm:$0xf0] }
 0x3d0   : > { %6465 = vmatpush.bf16.msrb.mxu1 %v10430_v21  ;;  %6493 = vmatpush.bf16.msrb.mxu3 %v10434_v9  ;;  %v9378_v21 = vor.u32 %v10937_v19, %v9375_v45  ;;  %v11117_v9 = vld [vmem:[%s11817_s15 + $0x8f4] sm:$0xf0]  ;;  %v9183_v27 = vld [vmem:[%s11817_s15 + $0x238] sm:$0xf0] }
 0x3d1   : > { %v11081_v22 = vld [vmem:[%s11817_s15 + $0x7dc] sm:$0xf]  ;;  %v9757_v38 = vld [vmem:[%s11817_s15 + $0x658] sm:$0xf] }
 0x3d2   : > { %6452 = vmatpush.bf16.msrb.mxu0 %v9566_v53  ;;  %6480 = vmatpush.bf16.msrb.mxu2 %v9570_v56  ;;  %v10046_v53 = vor.u32 %v11117_v9, %v10045_v15  ;;  %v9181_v56 = vld [vmem:[%s11817_s15 + $0x1d8] sm:$0xf]  ;;  %v9951_v24 = vld [vmem:[%s11817_s15 + $0x838] sm:$0xf0] }
 0x3d3   : > { %v9182_v30 = vor.u32 %v10901_v42, %v9181_v56  ;;  %v9954_v36 = vor.u32 %v11081_v22, %v9951_v24  ;;  %v10865_v44 = vld [vmem:[%s11817_s15 + $0x11c] sm:$0xf]  ;;  %v6180_v56 = vpop.f32.mrf.mxu0  ;;  %v6194_v42 = vpop.f32.mrf.mxu1 }
 0x3d4   : > { %6466 = vmatpush.bf16.msrb.mxu1 %v10334_v3  ;;  %6494 = vmatpush.bf16.msrb.mxu3 %v10338_v25  ;;  %v9282_v3 = vor.u32 %v10913_v58, %v9279_v7  ;;  %v11093_v25 = vld [vmem:[%s11817_s15 + $0x834] sm:$0xf0]  ;;  %v9087_v19 = vld [vmem:[%s11817_s15 + $0x178] sm:$0xf0] }
 0x3d5   : > { %v11057_v45 = vld [vmem:[%s11817_s15 + $0x71c] sm:$0xf] }
 0x3d6   : > { %6453 = vmatpush.bf16.msrb.mxu0 %v9470_v54  ;;  %6481 = vmatpush.bf16.msrb.mxu2 %v9474_v33  ;;  %v9950_v54 = vor.u32 %v11093_v25, %v9949_v17  ;;  %v9085_v33 = vld [vmem:[%s11817_s15 + $0x118] sm:$0xf]  ;;  %v9855_v47 = vld [vmem:[%s11817_s15 + $0x778] sm:$0xf0]  ;;  %v6208_v17 = vpop.f32.mrf.mxu2 }
 0x3d7   : > { %v9086_v52 = vor.u32 %v10877_v4, %v9085_v33  ;;  %v9858_v15 = vor.u32 %v11057_v45, %v9855_v47  ;;  %v10841_v9 = vld [vmem:[%s11817_s15 + $0x5c] sm:$0xf] }
 0x3d8   : > { %6467 = vmatpush.bf16.msrb.mxu1 %v10238_v32  ;;  %6495 = vmatpush.bf16.msrb.mxu3 %v10242_v40  ;;  %v9186_v32 = vor.u32 %v10889_v1, %v9183_v27  ;;  %v11069_v40 = vld [vmem:[%s11817_s15 + $0x774] sm:$0xf0]  ;;  %v8991_v58 = vld [vmem:[%s11817_s15 + $0xb8] sm:$0xf0] }
 0x3d9   : > { %v11033_v7 = vld [vmem:[%s11817_s15 + $0x65c] sm:$0xf] }
 0x3da   : > { %6454 = vmatpush.bf16.msrb.mxu0 %v9374_v26  ;;  %6482 = vmatpush.bf16.msrb.mxu2 %v9378_v21  ;;  %v9854_v26 = vor.u32 %v11069_v40, %v9853_v34  ;;  %v8989_v21 = vld [vmem:[%s11817_s15 + $0x58] sm:$0xf]  ;;  %v9759_v12 = vld [vmem:[%s11817_s15 + $0x6b8] sm:$0xf0] }
 0x3db   : > { %v8990_v13 = vor.u32 %v10853_v63, %v8989_v21  ;;  %v6182_v25 = vpop.f32.mrf.mxu0  ;;  %v12876_v1 = vpop.f32.mrf.mxu1 }
 0x3dc   : > { %6468 = vmatpush.bf16.msrb.mxu1 %v10142_v59  ;;  %6496 = vmatpush.bf16.msrb.mxu3 %v10146_v0  ;;  %v9090_v59 = vor.u32 %v10865_v44, %v9087_v19  ;;  %v11045_v0 = vld [vmem:[%s11817_s15 + $0x6b4] sm:$0xf0] }
 0x3de   : > { %6455 = vmatpush.bf16.msrb.mxu0 %v9278_v14  ;;  %6483 = vmatpush.bf16.msrb.mxu2 %v9282_v3  ;;  %v9758_v14 = vor.u32 %v11045_v0, %v9757_v38  ;;  %v9762_v3 = vor.u32 %v11033_v7, %v9759_v12  ;;  %v12878_v27 = vpop.f32.mrf.mxu2  ;;  %v6534_v7 = vmax.f32 %v12401_v31, %v12420_v11 }
 0x3e0   : > { %6469 = vmatpush.bf16.msrb.mxu1 %v10046_v53  ;;  %6497 = vmatpush.bf16.msrb.mxu3 %v10050_v5  ;;  %v8994_v53 = vor.u32 %v10841_v9, %v8991_v58  ;;  %v6222_v5 = vpop.f32.mrf.mxu3 }
 0x3e2   : > { %6456 = vmatpush.bf16.msrb.mxu0 %v9182_v30  ;;  %6484 = vmatpush.bf16.msrb.mxu2 %v9186_v32 }
 0x3e4   : > { %6470 = vmatpush.bf16.msrb.mxu1 %v9950_v54  ;;  %6498 = vmatpush.bf16.msrb.mxu3 %v9954_v36 }
 0x3e6   : > { %6457 = vmatpush.bf16.msrb.mxu0 %v9086_v52  ;;  %6485 = vmatpush.bf16.msrb.mxu2 %v9090_v59  ;;  %v6509_v52 = vmax.f32 %v12379_v8, %v12397_v29 }
 0x3e8   : > { %6471 = vmatpush.bf16.msrb.mxu1 %v9854_v26  ;;  %6499 = vmatpush.bf16.msrb.mxu3 %v9858_v15  ;;  %v12880_v22 = vpop.f32.mrf.mxu3  ;;  %v6510_v63 = vmax.f32 %v12451_v50, %v6509_v52 }
 0x3ea   : > { %6458 = vmatpush.bf16.msrb.mxu0 %v8990_v13  ;;  %6486 = vmatpush.bf16.msrb.mxu2 %v8994_v53  ;;  %v6236_v24 = vpop.f32.mrf.mxu0  ;;  %v6511_v15 = vmax.f32 %v12467_v43, %v6510_v63  ;;  %v6535_v13 = vmax.f32 %v12472_v18, %v6534_v7  ;;  %v3871_v7 = vperm.slane %v12665_v51, 6 }
 0x3ec   : > { %6472 = vmatpush.bf16.msrb.mxu1 %v9758_v14  ;;  %6500 = vmatpush.bf16.msrb.mxu3 %v9762_v3  ;;  %v6250_v30 = vpop.f32.mrf.mxu1  ;;  %v6512_v9 = vmax.f32 %v12529_v46, %v6511_v15  ;;  %v3869_v3 = vperm.slane %v12665_v51, 4  ;;  %v6536_v52 = vmax.f32 %v12493_v55, %v6535_v13  ;;  %v3870_v15 = vperm.slane %v12665_v51, 5 }
 0x3ed   : > { %6459 = vmatmul.bf16.vlgmr.msrb.gmra.mxu0 %v12072_v28  ;;  %6487 = vmatmul.bf16.vlgmr.msrb.gmra.mxu2 %v12072_v28  ;;  %v3872_v55 = vperm.slane %v12665_v51, 7 }
 0x3ee   : > { %v6513_v12 = vmax.f32 %v12545_v20, %v6512_v9  ;;  %v6537_v46 = vmax.f32 %v12550_v37, %v6536_v52  ;;  %v6181_v31 = vadd.f32 %v6180_v56, %v3869_v3  ;;  %v12937_v20 = vld [vmem:[%s11823_s21 + $0x10] sm:$0xff] }
 0x3ef   : > { %6473 = vmatmul.bf16.vlgmr.msrb.gmra.mxu1 %v12082_v16  ;;  %6501 = vmatmul.bf16.vlgmr.msrb.gmra.mxu3 %v12082_v16 }
 0x3f0   : > { %v6264_v54 = vpop.f32.mrf.mxu2  ;;  %v6514_v53 = vmax.f32 %v12607_v57, %v6513_v12  ;;  %v6538_v57 = vmax.f32 %v12571_v10, %v6537_v46  ;;  %v12943_v56 = vadd.f32 %v6194_v42, %v6181_v31 }
 0x3f2   : > { %v12882_v32 = vpop.f32.mrf.mxu3  ;;  %v12884_v33 = vpop.f32.mrf.mxu0  ;;  %v6515_v63 = vmax.f32 %v12623_v35, %v6514_v53  ;;  %v6209_v53 = vadd.f32 %v6208_v17, %v3870_v15  ;;  %v6539_v52 = vmax.f32 %v12628_v39, %v6538_v57  ;;  %v3873_v35 = vperm.slane %v12937_v20, 0 }
 0x3f3   : > { %v3874_v17 = vperm.slane %v12937_v20, 1  ;;  %v6183_v57 = vadd.f32 %v6182_v25, %v3869_v3  ;;  %v3876_v25 = vperm.slane %v12937_v20, 3 }
 0x3f4   : > { %v12886_v28 = vpop.f32.mrf.mxu1  ;;  %v6516_v9 = vmax.f32 %v12688_v61, %v6515_v63  ;;  %v6237_v61 = vadd.f32 %v6236_v24, %v3871_v7  ;;  %v6540_v43 = vmax.f32 %v12649_v23, %v6539_v52  ;;  %v12948_v10 = vadd.f32 %v6222_v5, %v6209_v53 }
 0x3f5   : > { %v3875_v24 = vperm.slane %v12937_v20, 2  ;;  %v6211_v5 = vadd.f32 %v12878_v27, %v3870_v15 }
 0x3f6   : > { %v6517_v13 = vmax.f32 %v12704_v60, %v6516_v9  ;;  %v6265_v9 = vadd.f32 %v6264_v54, %v3872_v55  ;;  %v6541_v51 = vmax.f32 %v12709_v2, %v6540_v43  ;;  %v12953_v31 = vadd.f32 %v6250_v30, %v6237_v61 }
 0x3f7   : > { %v12965_v30 = vadd.f32 %v12876_v1, %v6183_v57 }
 0x3f8   : > { %v12888_v16 = vpop.f32.mrf.mxu2  ;;  %v6518_v63 = vmax.f32 %v12766_v6, %v6517_v13  ;;  %v6542_v52 = vmax.f32 %v12730_v62, %v6541_v51  ;;  %v12960_v53 = vadd.f32 %v12882_v32, %v6265_v9  ;;  %v3877_v32 = vperm.slane %v12937_v20, 4 }
 0x3f9   : > { %v6267_v9 = vadd.f32 %v12888_v16, %v3872_v55 }
 0x3fa   : > { %v12890_v4 = vpop.f32.mrf.mxu3  ;;  %v6519_v46 = vmax.f32 %v12782_v49, %v6518_v63  ;;  %v6543_v61 = vmax.f32 %v12787_v48, %v6542_v52 }
 0x3fc   : > { %v6520_v13 = vmax.f32 %v12943_v56, %v6519_v46  ;;  %v12975_v46 = vadd.f32 %v12880_v22, %v6211_v5 }
 0x3fe   : > { %v6521_v54 = vmax.f32 %v12948_v10, %v6520_v13 }
 0x400   : > { %v6522_v63 = vmax.f32 %v12953_v31, %v6521_v54 }
 0x402   : > { %v6523_v1 = vmax.f32 %v12960_v53, %v6522_v63 }
 0x40a   : > { %v6292_v34 = vpop.f32.mrf.mxu0 }
 0x40b   : > { %v6293_v42 = vadd.f32 %v6292_v34, %v3873_v35  ;;  %v6239_v34 = vadd.f32 %v12884_v33, %v3871_v7 }
 0x40c   : > { %v12892_v36 = vpop.f32.mrf.mxu1 }
 0x40d   : > { %v12970_v27 = vadd.f32 %v12892_v36, %v6293_v42  ;;  %v3878_v36 = vperm.slane %v12937_v20, 5  ;;  %v12986_v57 = vadd.f32 %v12886_v28, %v6239_v34 }
 0x40f   : > { %v6524_v13 = vmax.f32 %v12970_v27, %v6523_v1 }
 0x410   : > { %v6320_v40 = vpop.f32.mrf.mxu2 }
 0x411   : > { %v6321_v43 = vadd.f32 %v6320_v40, %v3874_v17  ;;  %v6544_v40 = vmax.f32 %v12808_v41, %v6543_v61 }
 0x412   : > { %v12894_v44 = vpop.f32.mrf.mxu3  ;;  %v12896_v19 = vpop.f32.mrf.mxu0 }
 0x413   : > { %v12980_v33 = vadd.f32 %v12894_v44, %v6321_v43  ;;  %v6295_v22 = vadd.f32 %v12896_v19, %v3873_v35  ;;  %v3879_v44 = vperm.slane %v12937_v20, 6 }
 0x414   : > { %v12898_v45 = vpop.f32.mrf.mxu1 }
 0x415   : > { %v6525_v28 = vmax.f32 %v12980_v33, %v6524_v13  ;;  %v13005_v43 = vadd.f32 %v12898_v45, %v6295_v22  ;;  %v3880_v45 = vperm.slane %v12937_v20, 7 }
 0x418   : > { %v12900_v47 = vpop.f32.mrf.mxu2 }
 0x419   : > { %v6323_v52 = vadd.f32 %v12900_v47, %v3874_v17 }
 0x41a   : > { %v12904_v26 = vpop.f32.mrf.mxu3 }
 0x42a   : > { %v6348_v59 = vpop.f32.mrf.mxu0 }
 0x42b   : > { %v6349_v15 = vadd.f32 %v6348_v59, %v3875_v24  ;;  %v6545_v59 = vmax.f32 %v12965_v30, %v6544_v40 }
 0x42c   : > { %v12906_v21 = vpop.f32.mrf.mxu1 }
 0x42d   : > { %v12991_v55 = vadd.f32 %v12906_v21, %v6349_v15  ;;  %v6546_v42 = vmax.f32 %v12975_v46, %v6545_v59 }
 0x430   : > { %v12909_v38 = vpop.f32.mrf.mxu2 }
 0x431   : > { %v6377_v7 = vadd.f32 %v12909_v38, %v3876_v25  ;;  %v12996_v38 = vadd.f32 %v12890_v4, %v6267_v9  ;;  %v6526_v4 = vmax.f32 %v12991_v55, %v6525_v28 }
 0x432   : > { %v12912_v0 = vpop.f32.mrf.mxu3  ;;  %v12915_v58 = vpop.f32.mrf.mxu0 }
 0x433   : > { %v13001_v35 = vadd.f32 %v12912_v0, %v6377_v7  ;;  %v6351_v61 = vadd.f32 %v12915_v58, %v3875_v24  ;;  %v13013_v0 = vadd.f32 %v12904_v26, %v6323_v52 }
 0x434   : > { %v12921_v14 = vpop.f32.mrf.mxu1 }
 0x435   : > { %v6527_v63 = vmax.f32 %v13001_v35, %v6526_v4  ;;  %v11649_v4 = vmov 0  }
 0x436   : > { %11320 = vset.pattern.permute.xlu1 %v11649_v4  ;;  %11321 = vset.pattern.permute.xlu0 %v11649_v4 }
 0x438   : > { %v12929_v11 = vpop.f32.mrf.mxu2 }
 0x439   : > { %v6379_v15 = vadd.f32 %v12929_v11, %v3876_v25 }
 0x43a   : > { %v12933_v18 = vpop.f32.mrf.mxu3 }
 0x43b   : > { %v13029_v59 = vadd.f32 %v12933_v18, %v6379_v15  ;;  %v13060_v15 = vld [vmem:[#allocation3 + $0x8] sm:$0xff] }
 0x44a   : > { %v6404_v12 = vpop.f32.mrf.mxu0 }
 0x44b   : > { %v6405_v16 = vadd.f32 %v6404_v12, %v3877_v32  ;;  %v6547_v12 = vmax.f32 %v12986_v57, %v6546_v42 }
 0x44c   : > { %v6418_v37 = vpop.f32.mrf.mxu1 }
 0x44d   : > { %v13009_v34 = vadd.f32 %v6418_v37, %v6405_v16  ;;  %v6548_v17 = vmax.f32 %v12996_v38, %v6547_v12  ;;  %v13022_v37 = vadd.f32 %v12921_v14, %v6351_v61 }
 0x44f   : > { %v6549_v58 = vmax.f32 %v13005_v43, %v6548_v17  ;;  %v6528_v24 = vmax.f32 %v13009_v34, %v6527_v63 }
 0x450   : > { %v6432_v39 = vpop.f32.mrf.mxu2 }
 0x451   : > { %v6433_v19 = vadd.f32 %v6432_v39, %v3878_v36  ;;  %v6550_v26 = vmax.f32 %v13013_v0, %v6549_v58 }
 0x452   : > { %v6446_v6 = vpop.f32.mrf.mxu3  ;;  %v6406_v3 = vpop.f32.mrf.mxu0 }
 0x453   : > { %v13017_v40 = vadd.f32 %v6446_v6, %v6433_v19  ;;  %v6407_v9 = vadd.f32 %v6406_v3, %v3877_v32  ;;  %v6551_v14 = vmax.f32 %v13022_v37, %v6550_v26 }
 0x454   : > { %v6420_v51 = vpop.f32.mrf.mxu1 }
 0x455   : > { %v6529_v11 = vmax.f32 %v13017_v40, %v6528_v24  ;;  %v13033_v13 = vadd.f32 %v6420_v51, %v6407_v9  ;;  %v6552_v42 = vmax.f32 %v13029_v59, %v6551_v14  ;;  %v14034_v14 = vld [vmem:[#allocation22_spill] sm:$0xff] }
 0x458   : > { %v6434_v5 = vpop.f32.mrf.mxu2 }
 0x459   : > { %v6435_v6 = vadd.f32 %v6434_v5, %v3878_v36  ;;  %v6553_v36 = vmax.f32 %v13033_v13, %v6552_v42  ;;  %v14035_v42 = vld [vmem:[#allocation23_spill] sm:$0xff] }
 0x45a   : > { %v6448_v54 = vpop.f32.mrf.mxu3 }
 0x45b   : > { %v13039_v52 = vadd.f32 %v6448_v54, %v6435_v6  ;;  %v14033_v6 = vld [vmem:[#allocation19_spill] sm:$0xff] }
 0x45d   : > { %v6554_v51 = vmax.f32 %v13039_v52, %v6553_v36  ;;  %v14036_v36 = vld [vmem:[#allocation26_spill] sm:$0xff] }
 0x46a   : > { %v6460_v21 = vpop.f32.mrf.mxu0 }
 0x46b   : > { %v6461_v47 = vadd.f32 %v6460_v21, %v3879_v44 }
 0x46c   : > { %v6474_v39 = vpop.f32.mrf.mxu1 }
 0x46d   : > { %v13025_v1 = vadd.f32 %v6474_v39, %v6461_v47  ;;  %v13050_v47 = vld [vmem:[#allocation3] sm:$0xff] }
 0x46f   : > { %v6530_v3 = vmax.f32 %v13025_v1, %v6529_v11 }
 0x470   : > { %v6488_v7 = vpop.f32.mrf.mxu2 }
 0x471   : > { %v6489_v20 = vadd.f32 %v6488_v7, %v3880_v45 }
 0x472   : > { %v6502_v25 = vpop.f32.mrf.mxu3  ;;  %v6462_v22 = vpop.f32.mrf.mxu0 }
 0x473   : > { %v13036_v32 = vadd.f32 %v6502_v25, %v6489_v20  ;;  %v6463_v16 = vadd.f32 %v6462_v22, %v3879_v44 }
 0x474   : > { %v6476_v28 = vpop.f32.mrf.mxu1 }
 0x475   : > { %v6531_v18 = vmax.f32 %v13036_v32, %v6530_v3  ;;  %v13043_v5 = vadd.f32 %v6476_v28, %v6463_v16 }
 0x477   : > { %6532 = vmax.xlane.f32.xlu0 %v6531_v18  ;;  %v6555_v61 = vmax.f32 %v13043_v5, %v6554_v51 }
 0x478   : > { %v6490_v19 = vpop.f32.mrf.mxu2 }
 0x479   : > { %v6491_v21 = vadd.f32 %v6490_v19, %v3880_v45 }
 0x47a   : > { %v6504_v12 = vpop.f32.mrf.mxu3 }
 0x47b   : > { %v13047_v44 = vadd.f32 %v6504_v12, %v6491_v21  ;;  %v14037_v21 = vld [vmem:[#allocation27_spill] sm:$0xff] }
 0x47d   : > { %v6556_v54 = vmax.f32 %v13047_v44, %v6555_v61 }
 0x47f   : > { %6557 = vmax.xlane.f32.xlu0 %v6556_v54 }
 0x4ea   : > { %v6533_v17 = vpop.xlane.xlu0 %6532 }
 0x4eb   : > { %v13053_v39 = vmax.f32 %v13050_v47, %v6533_v17  ;;  %v14038_v17 = vld [vmem:[#allocation30_spill] sm:$0xff] }
 0x4ed   : > { %6780 = vst.msk [vmem:[#allocation3] sm:$0xff] %vm6777_vm1, %v13053_v39  ;;  %6573 = vperm.xlu1 %11320, %v13053_v39  }
 0x4f2   : > { %v6558_v45 = vpop.xlane.xlu0 %6557 }
 0x4f3   : > { %v13063_v58 = vmax.f32 %v13060_v15, %v6558_v45 }
 0x4f5   : > { %6781 = vst.msk [vmem:[#allocation3 + $0x8] sm:$0xff] %vm6777_vm1, %v13063_v58  ;;  %6578 = vperm.xlu1 %11320, %v13063_v58  }
 0x55f   : > { %v13070_v9 = vpop.permute.xlu1 %6573 }
 0x560   : > { %v6581_v26 = vsub.f32 %v12379_v8, %v13070_v9  ;;  %v6582_v7 = vsub.f32 %v12397_v29, %v13070_v9  ;;  %v6583_v11 = vsub.f32 %v12451_v50, %v13070_v9  ;;  %v6584_v20 = vsub.f32 %v14033_v6, %v13070_v9 }
 0x561   : > { %v6585_v3 = vsub.f32 %v14034_v14, %v13070_v9  ;;  %v6586_v18 = vsub.f32 %v14035_v42, %v13070_v9  ;;  %v6587_v19 = vsub.f32 %v14036_v36, %v13070_v9  ;;  %v6588_v12 = vsub.f32 %v14037_v21, %v13070_v9  ;;  %v14039_v14 = vld [vmem:[#allocation32_spill] sm:$0xff] }
 0x562   : > { %v6629_v25 = vmul.f32 1.442695, %v6581_v26  ;;  %v6631_v22 = vmul.f32 1.442695, %v6582_v7  ;;  %v6633_v16 = vmul.f32 1.442695, %v6583_v11  ;;  %v6589_v45 = vsub.f32 %v14038_v17, %v13070_v9 }
 0x563   : > { %v6635_v28 = vmul.f32 1.442695, %v6584_v20  ;;  %v6637_v51 = vmul.f32 1.442695, %v6585_v3  ;;  %v6639_v61 = vmul.f32 1.442695, %v6586_v18  ;;  %v6590_v6 = vsub.f32 %v12704_v60, %v13070_v9 }
 0x564   : > { %11322 = vpow2.f32 %v6629_v25  ;;  %v6641_v26 = vmul.f32 1.442695, %v6587_v19  ;;  %v6643_v20 = vmul.f32 1.442695, %v6588_v12  ;;  %v6591_v3 = vsub.f32 %v14039_v14, %v13070_v9  ;;  %v14040_v17 = vld [vmem:[#allocation17_spill] sm:$0xff] }
 0x565   : > { %11324 = vpow2.f32 %v6631_v22  ;;  %v6592_v36 = vsub.f32 %v12782_v49, %v13070_v9  ;;  %v6647_v19 = vmul.f32 1.442695, %v6590_v6 }
 0x566   : > { %11326 = vpow2.f32 %v6633_v16  ;;  %v6645_v16 = vmul.f32 1.442695, %v6589_v45 }
 0x567   : > { %11328 = vpow2.f32 %v6635_v28  ;;  %v13094_v28 = vpop.permute.xlu1 %6578 }
 0x568   : > { %11330 = vpow2.f32 %v6637_v51  ;;  %v6593_v51 = vsub.f32 %v12943_v56, %v13070_v9  ;;  %v6605_v45 = vsub.f32 %v14040_v17, %v13094_v28 }
 0x569   : > { %11332 = vpow2.f32 %v6639_v61  ;;  %v6594_v61 = vsub.f32 %v12948_v10, %v13070_v9 }
 0x56a   : > { %v11323_v54 = vpop.eup %11322  ;;  %11334 = vpow2.f32 %v6641_v26 }
 0x56b   : > { %v11325_v4 = vpop.eup %11324  ;;  %11336 = vpow2.f32 %v6643_v20  ;;  %v6595_v20 = vsub.f32 %v12953_v31, %v13070_v9 }
 0x56c   : > { %v6725_v7 = vadd.f32 %v11325_v4, %v11323_v54  ;;  %v11327_v11 = vpop.eup %11326  ;;  %11338 = vpow2.f32 %v6645_v16  ;;  %v6649_v54 = vmul.f32 1.442695, %v6591_v3  ;;  %v14042_v3 = vld [vmem:[#allocation20_spill] sm:$0xff] }
 0x56d   : > { %v11329_v22 = vpop.eup %11328  ;;  %11340 = vpow2.f32 %v6647_v19  ;;  %v6607_v16 = vsub.f32 %v14042_v3, %v13094_v28  ;;  %v6677_v19 = vmul.f32 1.442695, %v6605_v45  ;;  %v6598_v45 = vsub.f32 %v12980_v33, %v13070_v9 }
 0x56e   : > { %v6726_v25 = vadd.f32 %v11327_v11, %v6725_v7  ;;  %v11331_v18 = vpop.eup %11330  ;;  %v6651_v7 = vmul.f32 1.442695, %v6592_v36  ;;  %v14041_v11 = vld [vmem:[#allocation18_spill] sm:$0xff]  ;;  %11342 = vpow2.f32 %v6649_v54  ;;  %v6657_v54 = vmul.f32 1.442695, %v6595_v20 }
 0x56f   : > { %v11333_v12 = vpop.eup %11332  ;;  %v6606_v6 = vsub.f32 %v14041_v11, %v13094_v28  ;;  %v6681_v24 = vmul.f32 1.442695, %v6607_v16  ;;  %v6599_v20 = vsub.f32 %v12991_v55, %v13070_v9  ;;  %v14046_v16 = vld [vmem:[#allocation28_spill] sm:$0xff] }
 0x570   : > { %v6727_v42 = vadd.f32 %v11329_v22, %v6726_v25  ;;  %v11335_v26 = vpop.eup %11334  ;;  %v6653_v25 = vmul.f32 1.442695, %v6593_v51  ;;  %11344 = vpow2.f32 %v6651_v7  ;;  %v6597_v51 = vsub.f32 %v12970_v27, %v13070_v9 }
 0x571   : > { %v11337_v14 = vpop.eup %11336  ;;  %v6679_v11 = vmul.f32 1.442695, %v6606_v6  ;;  %v14045_v6 = vld [vmem:[#allocation25_spill] sm:$0xff] }
 0x572   : > { %v6728_v21 = vadd.f32 %v11331_v18, %v6727_v42  ;;  %v6655_v42 = vmul.f32 1.442695, %v6594_v61  ;;  %v6596_v18 = vsub.f32 %v12960_v53, %v13070_v9  ;;  %v11339_v36 = vpop.eup %11338  ;;  %11346 = vpow2.f32 %v6653_v25 }
 0x574   : > { %v6729_v4 = vadd.f32 %v11333_v12, %v6728_v21  ;;  %v14043_v12 = vld [vmem:[#allocation21_spill] sm:$0xff]  ;;  %11348 = vpow2.f32 %v6655_v42  ;;  %v6659_v7 = vmul.f32 1.442695, %v6596_v18  ;;  %v6661_v42 = vmul.f32 1.442695, %v6597_v51 }
 0x575   : > { %v6608_v17 = vsub.f32 %v14043_v12, %v13094_v28  ;;  %11350 = vpow2.f32 %v6677_v19  ;;  %v6610_v12 = vsub.f32 %v14045_v6, %v13094_v28  ;;  %v6600_v19 = vsub.f32 %v13001_v35, %v13070_v9 }
 0x576   : > { %v6730_v22 = vadd.f32 %v11335_v26, %v6729_v4  ;;  %v11341_v4 = vpop.eup %11340  ;;  %v14044_v26 = vld [vmem:[#allocation24_spill] sm:$0xff]  ;;  %11352 = vpow2.f32 %v6679_v11  ;;  %v6612_v6 = vsub.f32 %v12649_v23, %v13094_v28 }
 0x577   : > { %v6609_v3 = vsub.f32 %v14044_v26, %v13094_v28  ;;  %v6683_v25 = vmul.f32 1.442695, %v6608_v17  ;;  %11354 = vpow2.f32 %v6657_v54  ;;  %v6611_v26 = vsub.f32 %v14046_v16, %v13094_v28 }
 0x578   : > { %v6731_v21 = vadd.f32 %v11337_v14, %v6730_v22  ;;  %v11343_v14 = vpop.eup %11342  ;;  %11356 = vpow2.f32 %v6681_v24  ;;  %v6687_v51 = vmul.f32 1.442695, %v6610_v12  ;;  %v6665_v24 = vmul.f32 1.442695, %v6599_v20 }
 0x579   : > { %v6685_v18 = vmul.f32 1.442695, %v6609_v3  ;;  %11358 = vpow2.f32 %v6659_v7  ;;  %v6602_v16 = vsub.f32 %v13017_v40, %v13070_v9  ;;  %v6689_v7 = vmul.f32 1.442695, %v6611_v26 }
 0x57a   : > { %v6732_v61 = vadd.f32 %v11339_v36, %v6731_v21  ;;  %v11345_v36 = vpop.eup %11344  ;;  %11360 = vpow2.f32 %v6683_v25  ;;  %v6667_v25 = vmul.f32 1.442695, %v6600_v19  ;;  %v6614_v20 = vsub.f32 %v12730_v62, %v13094_v28 }
 0x57b   : > { %11362 = vpow2.f32 %v6661_v42  ;;  %v6603_v42 = vsub.f32 %v13025_v1, %v13070_v9  ;;  %v6604_v19 = vsub.f32 %v13036_v32, %v13070_v9 }
 0x57c   : > { %v6733_v22 = vadd.f32 %v11341_v4, %v6732_v61  ;;  %v11347_v61 = vpop.eup %11346  ;;  %v6663_v4 = vmul.f32 1.442695, %v6598_v45  ;;  %v6613_v45 = vsub.f32 %v12709_v2, %v13094_v28  ;;  %11364 = vpow2.f32 %v6685_v18 }
 0x57d   : > { %v11349_v17 = vpop.eup %11348 }
 0x57e   : > { %v6734_v21 = vadd.f32 %v11343_v14, %v6733_v22  ;;  %v11351_v54 = vpop.eup %11350  ;;  %v6601_v22 = vsub.f32 %v13009_v34, %v13070_v9  ;;  %11366 = vpow2.f32 %v6663_v4  ;;  %v6615_v4 = vsub.f32 %v12787_v48, %v13094_v28 }
 0x57f   : > { %v11353_v14 = vpop.eup %11352  ;;  %11368 = vpow2.f32 %v6687_v51 }
 0x580   : > { %v6735_v11 = vadd.f32 %v11345_v36, %v6734_v21  ;;  %v11355_v21 = vpop.eup %11354  ;;  %v6750_v36 = vadd.f32 %v11353_v14, %v11351_v54  ;;  %11370 = vpow2.f32 %v6665_v24  ;;  %v6669_v23 = vmul.f32 1.442695, %v6601_v22 }
 0x581   : > { %v11357_v63 = vpop.eup %11356  ;;  %11372 = vpow2.f32 %v6689_v7  ;;  %v6616_v22 = vsub.f32 %v12808_v41, %v13094_v28  ;;  %v6697_v7 = vmul.f32 1.442695, %v6615_v4 }
 0x582   : > { %v6736_v3 = vadd.f32 %v11347_v61, %v6735_v11  ;;  %v6691_v61 = vmul.f32 1.442695, %v6612_v6  ;;  %v11359_v11 = vpop.eup %11358  ;;  %v6751_v18 = vadd.f32 %v11357_v63, %v6750_v36  ;;  %11374 = vpow2.f32 %v6667_v25 }
 0x583   : > { %v11361_v26 = vpop.eup %11360  ;;  %v6695_v63 = vmul.f32 1.442695, %v6614_v20  ;;  %v6618_v20 = vsub.f32 %v12975_v46, %v13094_v28 }
 0x584   : > { %v6737_v12 = vadd.f32 %v11349_v17, %v6736_v3  ;;  %v6693_v17 = vmul.f32 1.442695, %v6613_v45  ;;  %v11363_v54 = vpop.eup %11362  ;;  %v6671_v3 = vmul.f32 1.442695, %v6602_v16  ;;  %v6752_v51 = vadd.f32 %v11361_v26, %v6751_v18 }
 0x585   : > { %v11365_v6 = vpop.eup %11364  ;;  %11376 = vpow2.f32 %v6691_v61  ;;  %v6617_v45 = vsub.f32 %v12965_v30, %v13094_v28 }
 0x586   : > { %v6738_v2 = vadd.f32 %v11355_v21, %v6737_v12  ;;  %v11367_v24 = vpop.eup %11366  ;;  %11378 = vpow2.f32 %v6669_v23  ;;  %v6673_v21 = vmul.f32 1.442695, %v6603_v42  ;;  %v6753_v12 = vadd.f32 %v11365_v6, %v6752_v51 }
 0x587   : > { %v11369_v36 = vpop.eup %11368  ;;  %11380 = vpow2.f32 %v6693_v17  ;;  %v6699_v23 = vmul.f32 1.442695, %v6616_v22  ;;  %v6619_v17 = vsub.f32 %v12986_v57, %v13094_v28  ;;  %v6701_v4 = vmul.f32 1.442695, %v6617_v45 }
 0x588   : > { %v6739_v14 = vadd.f32 %v11359_v11, %v6738_v2  ;;  %v11371_v16 = vpop.eup %11370  ;;  %11382 = vpow2.f32 %v6671_v3  ;;  %v6675_v2 = vmul.f32 1.442695, %v6604_v19  ;;  %v6754_v11 = vadd.f32 %v11369_v36, %v6753_v12 }
 0x589   : > { %v11373_v18 = vpop.eup %11372  ;;  %11384 = vpow2.f32 %v6695_v63  ;;  %v6620_v6 = vsub.f32 %v12996_v38, %v13094_v28  ;;  %v6703_v22 = vmul.f32 1.442695, %v6618_v20  ;;  %v6621_v12 = vsub.f32 %v13005_v43, %v13094_v28 }
 0x58a   : > { %v6740_v9 = vadd.f32 %v11363_v54, %v6739_v14  ;;  %v11375_v42 = vpop.eup %11374  ;;  %11386 = vpow2.f32 %v6673_v21  ;;  %v6755_v26 = vadd.f32 %v11373_v18, %v6754_v11  ;;  %v6705_v36 = vmul.f32 1.442695, %v6619_v17 }
 0x58b   : > { %v11377_v54 = vpop.eup %11376  ;;  %11388 = vpow2.f32 %v6697_v7  ;;  %v6707_v11 = vmul.f32 1.442695, %v6620_v6  ;;  %v6625_v6 = vsub.f32 %v13033_v13, %v13094_v28 }
 0x58c   : > { %v6741_v25 = vadd.f32 %v11367_v24, %v6740_v9  ;;  %v11379_v3 = vpop.eup %11378  ;;  %11390 = vpow2.f32 %v6675_v2  ;;  %v6756_v14 = vadd.f32 %v11377_v54, %v6755_v26  ;;  %v6709_v26 = vmul.f32 1.442695, %v6621_v12 }
 0x58d   : > { %v11381_v51 = vpop.eup %11380  ;;  %11392 = vpow2.f32 %v6699_v23 }
 0x58e   : > { %v6742_v61 = vadd.f32 %v11371_v16, %v6741_v25  ;;  %v11383_v63 = vpop.eup %11382  ;;  %v6757_v21 = vadd.f32 %v11381_v51, %v6756_v14  ;;  %11394 = vpow2.f32 %v6701_v4  ;;  %v6622_v25 = vsub.f32 %v13013_v0, %v13094_v28 }
 0x58f   : > { %v11385_v9 = vpop.eup %11384  ;;  %11396 = vpow2.f32 %v6703_v22 }
 0x590   : > { %v6743_v19 = vadd.f32 %v11375_v42, %v6742_v61  ;;  %v11387_v45 = vpop.eup %11386  ;;  %v6758_v16 = vadd.f32 %v11385_v9, %v6757_v21  ;;  %v6623_v61 = vsub.f32 %v13022_v37, %v13094_v28  ;;  %11398 = vpow2.f32 %v6705_v36 }
 0x591   : > { %v11389_v2 = vpop.eup %11388  ;;  %11400 = vpow2.f32 %v6707_v11  ;;  %v6626_v21 = vsub.f32 %v13039_v52, %v13094_v28 }
 0x592   : > { %v6744_v24 = vadd.f32 %v11379_v3, %v6743_v19  ;;  %v11391_v18 = vpop.eup %11390  ;;  %v6759_v23 = vadd.f32 %v11389_v2, %v6758_v16  ;;  %v6624_v3 = vsub.f32 %v13029_v59, %v13094_v28  ;;  %v6711_v19 = vmul.f32 1.442695, %v6622_v25 }
 0x593   : > { %v11393_v42 = vpop.eup %11392  ;;  %11402 = vpow2.f32 %v6709_v26  ;;  %v6713_v22 = vmul.f32 1.442695, %v6623_v61  ;;  %v6628_v25 = vsub.f32 %v13047_v44, %v13094_v28  ;;  %v6719_v11 = vmul.f32 1.442695, %v6626_v21 }
 0x594   : > { %v6745_v7 = vadd.f32 %v11383_v63, %v6744_v24  ;;  %v6760_v17 = vadd.f32 %v11393_v42, %v6759_v23  ;;  %v11395_v4 = vpop.eup %11394  ;;  %11404 = vpow2.f32 %v6711_v19  ;;  %v6715_v9 = vmul.f32 1.442695, %v6624_v3 }
 0x595   : > { %v11397_v51 = vpop.eup %11396  ;;  %11406 = vpow2.f32 %v6713_v22  ;;  %v6723_v26 = vmul.f32 1.442695, %v6628_v25 }
 0x596   : > { %v6746_v20 = vadd.f32 %v11387_v45, %v6745_v7  ;;  %v6761_v14 = vadd.f32 %v11395_v4, %v6760_v17  ;;  %v11399_v24 = vpop.eup %11398  ;;  %v6627_v45 = vsub.f32 %v13043_v5, %v13094_v28  ;;  %v6717_v7 = vmul.f32 1.442695, %v6625_v6 }
 0x597   : > { %v11401_v36 = vpop.eup %11400  ;;  %11408 = vpow2.f32 %v6715_v9 }
 0x598   : > { %v6747_v54 = vadd.f32 %v11391_v18, %v6746_v20  ;;  %v6762_v63 = vadd.f32 %v11397_v51, %v6761_v14  ;;  %11410 = vpow2.f32 %v6717_v7  ;;  %v6721_v23 = vmul.f32 1.442695, %v6627_v45 }
 0x599   : > { %v11403_v2 = vpop.eup %11402  ;;  %11412 = vpow2.f32 %v6719_v11  ;;  %v6562_v11 = vld [vmem:[#allocation4 + $0x8] sm:$0xff] }
 0x59a   : > { %6748 = vadd.xlane.f32.xlu2 %v6747_v54  ;;  %v6763_v12 = vadd.f32 %v11399_v24, %v6762_v63  ;;  %v11405_v20 = vpop.eup %11404  ;;  %11414 = vpow2.f32 %v6721_v23  ;;  %v14047_v24 = vsub.f32 %v13050_v47, %v13053_v39 }
 0x59b   : > { %v11407_v61 = vpop.eup %11406  ;;  %11416 = vpow2.f32 %v6723_v26 }
 0x59c   : > { %v6764_v16 = vadd.f32 %v11401_v36, %v6763_v12  ;;  %v6565_v21 = vmul.f32 1.442695, %v14047_v24  ;;  %v6561_v12 = vld [vmem:[#allocation4] sm:$0xff] }
 0x59d   : > { %v11409_v17 = vpop.eup %11408 }
 0x59e   : > { %v6765_v18 = vadd.f32 %v11403_v2, %v6764_v16  ;;  %v11411_v3 = vpop.eup %11410  ;;  %11418 = vpow2.f32 %v6565_v21  ;;  %v14048_v16 = vsub.f32 %v13060_v15, %v13063_v58 }
 0x59f   : > { %v11413_v14 = vpop.eup %11412 }
 0x5a0   : > { %v6766_v42 = vadd.f32 %v11405_v20, %v6765_v18  ;;  %v11415_v28 = vpop.eup %11414  ;;  %v6567_v2 = vmul.f32 1.442695, %v14048_v16 }
 0x5a1   : > { %v11417_v22 = vpop.eup %11416 }
 0x5a2   : > { %v6767_v54 = vadd.f32 %v11407_v61, %v6766_v42  ;;  %11420 = vpow2.f32 %v6567_v2 }
 0x5a4   : > { %v6768_v4 = vadd.f32 %v11409_v17, %v6767_v54  ;;  %v11419_v9 = vpop.eup %11418 }
 0x5a5   : > { %v6569_v36 = vmul.f32 %v11419_v9, %v6561_v12 }
 0x5a6   : > { %v6769_v19 = vadd.f32 %v11411_v3, %v6768_v4 }
 0x5a8   : > { %v6770_v51 = vadd.f32 %v11413_v14, %v6769_v19  ;;  %v11421_v25 = vpop.eup %11420 }
 0x5a9   : > { %v6570_v18 = vmul.f32 %v11421_v25, %v6562_v11 }
 0x5aa   : > { %v6771_v6 = vadd.f32 %v11415_v28, %v6770_v51 }
 0x5ac   : > { %v6772_v63 = vadd.f32 %v11417_v22, %v6771_v6 }
 0x5ae   : > { %6773 = vadd.xlane.f32.xlu2 %v6772_v63 }
 0x60d   : > { %v6749_v45 = vpop.xlane.xlu2 %6748 }
 0x60e   : > { %v6775_v7 = vadd.f32 %v6749_v45, %v6569_v36 }
 0x610   : > { %6778 = vst.msk [vmem:[#allocation4] sm:$0xff] %vm6777_vm1, %v6775_v7 }
 0x620   : > { %6784 = sbr.rel (%p7346_p1) target bundleno = 1621 (0x655), region = 72 }
 0x621   : > { %v6774_v20 = vpop.xlane.xlu2 %6773 }
 0x622   : > { %v6776_v23 = vadd.f32 %v6774_v20, %v6570_v18 }
 0x624   : > { %6779 = vst.msk [vmem:[#allocation4 + $0x8] sm:$0xff] %vm6777_vm1, %v6776_v23 }
 0x625   : > { %6785 = vst [vmem:[%s14049_s30] sm:$0xff] %v12379_v8  ;;  %v14050_v47 = vld [vmem:[#allocation19_spill] sm:$0xff]  ;;  %v14051_v39 = vld [vmem:[#allocation22_spill] sm:$0xff]  ;;  %v14056_v26 = vld [vmem:[#allocation32_spill] sm:$0xff] }
 0x626   : > { %6786 = vst [vmem:[%s14049_s30 + $0x8] sm:$0xff] %v12397_v29  ;;  %v14052_v15 = vld [vmem:[#allocation23_spill] sm:$0xff]  ;;  %v14053_v58 = vld [vmem:[#allocation26_spill] sm:$0xff]  ;;  %v14057_v54 = vld [vmem:[#allocation17_spill] sm:$0xff] }
 0x627   : > { %6787 = vst [vmem:[%s14049_s30 + $0x10] sm:$0xff] %v12451_v50  ;;  %v14054_v42 = vld [vmem:[#allocation27_spill] sm:$0xff]  ;;  %v14055_v61 = vld [vmem:[#allocation30_spill] sm:$0xff]  ;;  %v14059_v4 = vld [vmem:[#allocation20_spill] sm:$0xff] }
 0x628   : > { %6788 = vst [vmem:[%s14049_s30 + $0x18] sm:$0xff] %v14050_v47  ;;  %v14058_v17 = vld [vmem:[#allocation18_spill] sm:$0xff]  ;;  %v14060_v3 = vld [vmem:[#allocation21_spill] sm:$0xff]  ;;  %v14061_v19 = vld [vmem:[#allocation24_spill] sm:$0xff] }
 0x629   : > { %6789 = vst [vmem:[%s14049_s30 + $0x20] sm:$0xff] %v14051_v39  ;;  %v14062_v14 = vld [vmem:[#allocation25_spill] sm:$0xff]  ;;  %v14063_v51 = vld [vmem:[#allocation28_spill] sm:$0xff]  ;;  %v14065_v6 = vld [vmem:[#allocation31_spill] sm:$0xff] }
 0x62a   : > { %6790 = vst [vmem:[%s14049_s30 + $0x28] sm:$0xff] %v14052_v15  ;;  %v14064_v28 = vld [vmem:[#allocation29_spill] sm:$0xff] }
 0x62b   : > { %6791 = vst [vmem:[%s14049_s30 + $0x30] sm:$0xff] %v14053_v58 }
 0x62c   : > { %6792 = vst [vmem:[%s14049_s30 + $0x38] sm:$0xff] %v14054_v42 }
 0x62d   : > { %6793 = vst [vmem:[%s14049_s30 + $0x40] sm:$0xff] %v14055_v61 }
 0x62e   : > { %6794 = vst [vmem:[%s14049_s30 + $0x48] sm:$0xff] %v12704_v60 }
 0x62f   : > { %6795 = vst [vmem:[%s14049_s30 + $0x50] sm:$0xff] %v14056_v26 }
 0x630   : > { %6796 = vst [vmem:[%s14049_s30 + $0x58] sm:$0xff] %v12782_v49 }
 0x631   : > { %6797 = vst [vmem:[%s14049_s30 + $0x60] sm:$0xff] %v12943_v56 }
 0x632   : > { %6798 = vst [vmem:[%s14049_s30 + $0x68] sm:$0xff] %v12948_v10 }
 0x633   : > { %6799 = vst [vmem:[%s14049_s30 + $0x70] sm:$0xff] %v12953_v31 }
 0x634   : > { %6800 = vst [vmem:[%s14049_s30 + $0x78] sm:$0xff] %v12960_v53 }
 0x635   : > { %6801 = vst [vmem:[%s14049_s30 + $0x80] sm:$0xff] %v12970_v27 }
 0x636   : > { %6802 = vst [vmem:[%s14049_s30 + $0x88] sm:$0xff] %v12980_v33 }
 0x637   : > { %6803 = vst [vmem:[%s14049_s30 + $0x90] sm:$0xff] %v12991_v55 }
 0x638   : > { %6804 = vst [vmem:[%s14049_s30 + $0x98] sm:$0xff] %v13001_v35 }
 0x639   : > { %6805 = vst [vmem:[%s14049_s30 + $0xa0] sm:$0xff] %v13009_v34 }
 0x63a   : > { %6806 = vst [vmem:[%s14049_s30 + $0xa8] sm:$0xff] %v13017_v40 }
 0x63b   : > { %6807 = vst [vmem:[%s14049_s30 + $0xb0] sm:$0xff] %v13025_v1 }
 0x63c   : > { %6808 = vst [vmem:[%s14049_s30 + $0xb8] sm:$0xff] %v13036_v32 }
 0x63d   : > { %6809 = vst [vmem:[%s14049_s30 + $0x180] sm:$0xff] %v14057_v54 }
 0x63e   : > { %6810 = vst [vmem:[%s14049_s30 + $0x188] sm:$0xff] %v14058_v17 }
 0x63f   : > { %6811 = vst [vmem:[%s14049_s30 + $0x190] sm:$0xff] %v14059_v4 }
 0x640   : > { %6812 = vst [vmem:[%s14049_s30 + $0x198] sm:$0xff] %v14060_v3 }
 0x641   : > { %6813 = vst [vmem:[%s14049_s30 + $0x1a0] sm:$0xff] %v14061_v19 }
 0x642   : > { %6814 = vst [vmem:[%s14049_s30 + $0x1a8] sm:$0xff] %v14062_v14 }
 0x643   : > { %6815 = vst [vmem:[%s14049_s30 + $0x1b0] sm:$0xff] %v14063_v51 }
 0x644   : > { %6816 = vst [vmem:[%s14049_s30 + $0x1b8] sm:$0xff] %v14064_v28 }
 0x645   : > { %6817 = vst [vmem:[%s14049_s30 + $0x1c0] sm:$0xff] %v14065_v6 }
 0x646   : > { %6818 = vst [vmem:[%s14049_s30 + $0x1c8] sm:$0xff] %v12730_v62 }
 0x647   : > { %6819 = vst [vmem:[%s14049_s30 + $0x1d0] sm:$0xff] %v12787_v48 }
 0x648   : > { %6820 = vst [vmem:[%s14049_s30 + $0x1d8] sm:$0xff] %v12808_v41 }
 0x649   : > { %6821 = vst [vmem:[%s14049_s30 + $0x1e0] sm:$0xff] %v12965_v30 }
 0x64a   : > { %6822 = vst [vmem:[%s14049_s30 + $0x1e8] sm:$0xff] %v12975_v46 }
 0x64b   : > { %6823 = vst [vmem:[%s14049_s30 + $0x1f0] sm:$0xff] %v12986_v57 }
 0x64c   : > { %6824 = vst [vmem:[%s14049_s30 + $0x1f8] sm:$0xff] %v12996_v38 }
 0x64d   : > { %6825 = vst [vmem:[%s14049_s30 + $0x200] sm:$0xff] %v13005_v43 }
 0x64e   : > { %6826 = vst [vmem:[%s14049_s30 + $0x208] sm:$0xff] %v13013_v0 }
 0x64f   : > { %6827 = vst [vmem:[%s14049_s30 + $0x210] sm:$0xff] %v13022_v37 }
 0x650   : > { %6828 = vst [vmem:[%s14049_s30 + $0x218] sm:$0xff] %v13029_v59 }
 0x651   : > { %6829 = vst [vmem:[%s14049_s30 + $0x220] sm:$0xff] %v13033_v13 }
 0x652   : > { %6830 = vst [vmem:[%s14049_s30 + $0x228] sm:$0xff] %v13039_v52 }
 0x653   : > { %6831 = vst [vmem:[%s14049_s30 + $0x230] sm:$0xff] %v13043_v5 }
 0x654   : > { %6832 = vst [vmem:[%s14049_s30 + $0x238] sm:$0xff] %v13047_v44 }
 0x655 PF: > { %p10436_p2 = scmp.ne.s32.totalorder %s11627_s24, 1 }
 0x656   : > { %s14066_s24 = sld [smem:[#allocation37_spill]] (!%p10436_p2) }
 0x657   : > { %6836 = sbr.rel (%p10436_p2) target bundleno = 1853 (0x73d), region = 76 }
 0x65c   : > { %v6887_v22 = vld [vmem:[#allocation4] sm:$0xff]  ;;  %v11650_v63 = vmov 0   ;;  %v6888_v24 = vld [vmem:[#allocation4 + $0x8] sm:$0xff]  ;;  %v6885_v9 = vld [vmem:[#allocation3] sm:$0xff] }
 0x65d   : > { %11422 = vset.pattern.permute.xlu0 %v11650_v63  ;;  %11423 = vlog2.f32 %v6887_v22  ;;  %v6886_v16 = vld [vmem:[#allocation3 + $0x8] sm:$0xff]  ;;  %v6895_v25 = vld [vmem:[%s14066_s24] sm:$0xff]  ;;  %v6896_v11 = vld [vmem:[%s14066_s24 + $0x8] sm:$0xff] }
 0x65e   : > { %11425 = vlog2.f32 %v6888_v24  ;;  %v6897_v18 = vld [vmem:[%s14066_s24 + $0x10] sm:$0xff]  ;;  %v6898_v20 = vld [vmem:[%s14066_s24 + $0x18] sm:$0xff]  ;;  %v6899_v47 = vld [vmem:[%s14066_s24 + $0x20] sm:$0xff] }
 0x65f   : > { %v6900_v39 = vld [vmem:[%s14066_s24 + $0x28] sm:$0xff]  ;;  %v6901_v61 = vld [vmem:[%s14066_s24 + $0x30] sm:$0xff]  ;;  %v6902_v54 = vld [vmem:[%s14066_s24 + $0x38] sm:$0xff] }
 0x660   : > { %v6903_v4 = vld [vmem:[%s14066_s24 + $0x40] sm:$0xff]  ;;  %v6904_v19 = vld [vmem:[%s14066_s24 + $0x48] sm:$0xff]  ;;  %v6905_v51 = vld [vmem:[%s14066_s24 + $0x50] sm:$0xff] }
 0x661   : > { %v6906_v6 = vld [vmem:[%s14066_s24 + $0x58] sm:$0xff]  ;;  %v6907_v63 = vld [vmem:[%s14066_s24 + $0x60] sm:$0xff] }
 0x663   : > { %v11424_v21 = vpop.eup %11423 }
 0x664   : > { %v6890_v12 = vmul.f32 0.6931472, %v11424_v21  ;;  %v11426_v36 = vpop.eup %11425  ;;  %v6908_v21 = vld [vmem:[%s14066_s24 + $0x68] sm:$0xff] }
 0x665   : > { %v6892_v7 = vmul.f32 0.6931472, %v11426_v36 }
 0x666   : > { %v6893_v45 = vadd.f32 %v6890_v12, %v6885_v9  ;;  %v6909_v12 = vld [vmem:[%s14066_s24 + $0x70] sm:$0xff] }
 0x667   : > { %v6894_v2 = vadd.f32 %v6892_v7, %v6886_v16  ;;  %v6911_v16 = vld [vmem:[%s14066_s24 + $0x80] sm:$0xff] }
 0x668   : > { %6993 = vperm.xlu0 %11422, %v6893_v45   ;;  %v6910_v45 = vld [vmem:[%s14066_s24 + $0x78] sm:$0xff] }
 0x670   : > { %6998 = vperm.xlu0 %11422, %v6894_v2  }
 0x6da   : > { %v13385_v23 = vpop.permute.xlu0 %6993 }
 0x6db   : > { %v7001_v15 = vsub.f32 %v6895_v25, %v13385_v23  ;;  %v7002_v58 = vsub.f32 %v6896_v11, %v13385_v23  ;;  %v7003_v42 = vsub.f32 %v6897_v18, %v13385_v23  ;;  %v7004_v26 = vsub.f32 %v6898_v20, %v13385_v23  ;;  %v6912_v25 = vld [vmem:[%s14066_s24 + $0x88] sm:$0xff]  ;;  %v6913_v18 = vld [vmem:[%s14066_s24 + $0x90] sm:$0xff] }
 0x6dc   : > { %v7005_v17 = vsub.f32 %v6899_v47, %v13385_v23  ;;  %v7006_v3 = vsub.f32 %v6900_v39, %v13385_v23  ;;  %v7007_v14 = vsub.f32 %v6901_v61, %v13385_v23  ;;  %v7008_v28 = vsub.f32 %v6902_v54, %v13385_v23  ;;  %v6914_v47 = vld [vmem:[%s14066_s24 + $0x98] sm:$0xff] }
 0x6dd   : > { %7097 = vst [vmem:[%s14066_s24] sm:$0xff] %v7001_v15  ;;  %v7009_v22 = vsub.f32 %v6903_v4, %v13385_v23  ;;  %v7010_v24 = vsub.f32 %v6904_v19, %v13385_v23  ;;  %v7011_v9 = vsub.f32 %v6905_v51, %v13385_v23  ;;  %v7012_v36 = vsub.f32 %v6906_v6, %v13385_v23  ;;  %v6915_v15 = vld [vmem:[%s14066_s24 + $0xa0] sm:$0xff] }
 0x6de   : > { %7098 = vst [vmem:[%s14066_s24 + $0x8] sm:$0xff] %v7002_v58  ;;  %v7013_v7 = vsub.f32 %v6907_v63, %v13385_v23  ;;  %v7014_v2 = vsub.f32 %v6908_v21, %v13385_v23  ;;  %v7015_v11 = vsub.f32 %v6909_v12, %v13385_v23  ;;  %v7016_v20 = vsub.f32 %v6910_v45, %v13385_v23  ;;  %v14070_v21 = vld [vmem:[#allocation26_spill] sm:$0xff]  ;;  %v14071_v12 = vld [vmem:[#allocation27_spill] sm:$0xff] }
 0x6df   : > { %7099 = vst [vmem:[%s14066_s24 + $0x10] sm:$0xff] %v7003_v42  ;;  %v7017_v39 = vsub.f32 %v6911_v16, %v13385_v23  ;;  %v7018_v58 = vsub.f32 %v6912_v25, %v13385_v23  ;;  %v6916_v42 = vld [vmem:[%s14066_s24 + $0xa8] sm:$0xff]  ;;  %v7019_v61 = vsub.f32 %v6913_v18, %v13385_v23  ;;  %v7020_v54 = vsub.f32 %v6914_v47, %v13385_v23  ;;  %v14072_v45 = vld [vmem:[#allocation30_spill] sm:$0xff] }
 0x6e0   : > { %7100 = vst [vmem:[%s14066_s24 + $0x18] sm:$0xff] %v7004_v26  ;;  %v6917_v26 = vld [vmem:[%s14066_s24 + $0xb0] sm:$0xff]  ;;  %v7021_v4 = vsub.f32 %v6915_v15, %v13385_v23  ;;  %v7025_v51 = vsub.f32 %v12379_v8, %v13385_v23  ;;  %v7027_v6 = vsub.f32 %v12451_v50, %v13385_v23  ;;  %v14067_v8 = vld [vmem:[#allocation19_spill] sm:$0xff]  ;;  %v7034_v16 = vsub.f32 %v12704_v60, %v13385_v23 }
 0x6e1   : > { %7101 = vst [vmem:[%s14066_s24 + $0x20] sm:$0xff] %v7005_v17  ;;  %v6918_v17 = vld [vmem:[%s14066_s24 + $0xb8] sm:$0xff]  ;;  %v7023_v19 = vsub.f32 %v6917_v26, %v13385_v23  ;;  %v7037_v60 = vsub.f32 %v12943_v56, %v13385_v23  ;;  %v7038_v18 = vsub.f32 %v12948_v10, %v13385_v23  ;;  %v7040_v56 = vsub.f32 %v12960_v53, %v13385_v23 }
 0x6e2   : > { %7102 = vst [vmem:[%s14066_s24 + $0x28] sm:$0xff] %v7006_v3  ;;  %v7022_v3 = vsub.f32 %v6916_v42, %v13385_v23  ;;  %v14069_v50 = vld [vmem:[#allocation23_spill] sm:$0xff]  ;;  %v7041_v10 = vsub.f32 %v12970_v27, %v13385_v23  ;;  %v7043_v53 = vsub.f32 %v12991_v55, %v13385_v23  ;;  %v7044_v27 = vsub.f32 %v13001_v35, %v13385_v23 }
 0x6e3   : > { %7103 = vst [vmem:[%s14066_s24 + $0x30] sm:$0xff] %v7007_v14  ;;  %v7024_v14 = vsub.f32 %v6918_v17, %v13385_v23  ;;  %v6943_v55 = vld [vmem:[%s14066_s24 + $0x180] sm:$0xff]  ;;  %v7046_v35 = vsub.f32 %v13017_v40, %v13385_v23  ;;  %v7047_v47 = vsub.f32 %v13025_v1, %v13385_v23  ;;  %v7048_v40 = vsub.f32 %v13036_v32, %v13385_v23  ;;  %v6946_v15 = vld [vmem:[%s14066_s24 + $0x198] sm:$0xff] }
 0x6e4   : > { %7104 = vst [vmem:[%s14066_s24 + $0x38] sm:$0xff] %v7008_v28  ;;  %v7026_v28 = vsub.f32 %v12397_v29, %v13385_v23  ;;  %v14068_v29 = vld [vmem:[#allocation22_spill] sm:$0xff] }
 0x6e5   : > { %7105 = vst [vmem:[%s14066_s24 + $0x40] sm:$0xff] %v7009_v22  ;;  %v7028_v22 = vsub.f32 %v14067_v8, %v13385_v23  ;;  %v7029_v63 = vsub.f32 %v14068_v29, %v13385_v23 }
 0x6e6   : > { %7106 = vst [vmem:[%s14066_s24 + $0x48] sm:$0xff] %v7010_v24  ;;  %v7030_v24 = vsub.f32 %v14069_v50, %v13385_v23 }
 0x6e7   : > { %7107 = vst [vmem:[%s14066_s24 + $0x50] sm:$0xff] %v7011_v9  ;;  %v7031_v9 = vsub.f32 %v14070_v21, %v13385_v23 }
 0x6e8   : > { %7108 = vst [vmem:[%s14066_s24 + $0x58] sm:$0xff] %v7012_v36  ;;  %v7032_v36 = vsub.f32 %v14071_v12, %v13385_v23 }
 0x6e9   : > { %7109 = vst [vmem:[%s14066_s24 + $0x60] sm:$0xff] %v7013_v7  ;;  %v7033_v7 = vsub.f32 %v14072_v45, %v13385_v23 }
 0x6ea   : > { %7110 = vst [vmem:[%s14066_s24 + $0x68] sm:$0xff] %v7014_v2  ;;  %v14073_v2 = vld [vmem:[#allocation32_spill] sm:$0xff] }
 0x6eb   : > { %7111 = vst [vmem:[%s14066_s24 + $0x70] sm:$0xff] %v7015_v11  ;;  %v7035_v25 = vsub.f32 %v14073_v2, %v13385_v23  ;;  %v7036_v11 = vsub.f32 %v12782_v49, %v13385_v23  ;;  %v7039_v49 = vsub.f32 %v12953_v31, %v13385_v23  ;;  %v7042_v31 = vsub.f32 %v12980_v33, %v13385_v23  ;;  %v6961_v2 = vld [vmem:[%s14066_s24 + $0x210] sm:$0xff] }
 0x6ec   : > { %7112 = vst [vmem:[%s14066_s24 + $0x78] sm:$0xff] %v7016_v20  ;;  %v7045_v33 = vsub.f32 %v13009_v34, %v13385_v23  ;;  %v13636_v20 = vpop.permute.xlu0 %6998  ;;  %v6944_v34 = vld [vmem:[%s14066_s24 + $0x188] sm:$0xff] }
 0x6ed   : > { %7113 = vst [vmem:[%s14066_s24 + $0x80] sm:$0xff] %v7017_v39  ;;  %v6945_v39 = vld [vmem:[%s14066_s24 + $0x190] sm:$0xff]  ;;  %v7049_v1 = vsub.f32 %v6943_v55, %v13636_v20  ;;  %v7050_v32 = vsub.f32 %v6944_v34, %v13636_v20  ;;  %v6948_v23 = vld [vmem:[%s14066_s24 + $0x1a8] sm:$0xff]  ;;  %v7052_v26 = vsub.f32 %v6946_v15, %v13636_v20 }
 0x6ee   : > { %7114 = vst [vmem:[%s14066_s24 + $0x88] sm:$0xff] %v7018_v58  ;;  %v6947_v58 = vld [vmem:[%s14066_s24 + $0x1a0] sm:$0xff]  ;;  %v7051_v42 = vsub.f32 %v6945_v39, %v13636_v20 }
 0x6ef   : > { %7115 = vst [vmem:[%s14066_s24 + $0x90] sm:$0xff] %v7019_v61  ;;  %v6949_v61 = vld [vmem:[%s14066_s24 + $0x1b0] sm:$0xff]  ;;  %v7053_v17 = vsub.f32 %v6947_v58, %v13636_v20 }
 0x6f0   : > { %7116 = vst [vmem:[%s14066_s24 + $0x98] sm:$0xff] %v7020_v54  ;;  %v6950_v54 = vld [vmem:[%s14066_s24 + $0x1b8] sm:$0xff] }
 0x6f1   : > { %7117 = vst [vmem:[%s14066_s24 + $0xa0] sm:$0xff] %v7021_v4  ;;  %v6951_v4 = vld [vmem:[%s14066_s24 + $0x1c0] sm:$0xff] }
 0x6f2   : > { %7118 = vst [vmem:[%s14066_s24 + $0xa8] sm:$0xff] %v7022_v3  ;;  %v7054_v3 = vsub.f32 %v6948_v23, %v13636_v20  ;;  %v7057_v8 = vsub.f32 %v6951_v4, %v13636_v20 }
 0x6f3   : > { %7119 = vst [vmem:[%s14066_s24 + $0xb0] sm:$0xff] %v7023_v19  ;;  %v6952_v19 = vld [vmem:[%s14066_s24 + $0x1c8] sm:$0xff] }
 0x6f4   : > { %7120 = vst [vmem:[%s14066_s24 + $0xb8] sm:$0xff] %v7024_v14  ;;  %v7055_v14 = vsub.f32 %v6949_v61, %v13636_v20  ;;  %v7058_v29 = vsub.f32 %v6952_v19, %v13636_v20 }
 0x6f5   : > { %7121 = vst [vmem:[%s14066_s24 + $0xc0] sm:$0xff] %v7025_v51  ;;  %v6953_v51 = vld [vmem:[%s14066_s24 + $0x1d0] sm:$0xff] }
 0x6f6   : > { %7122 = vst [vmem:[%s14066_s24 + $0xc8] sm:$0xff] %v7026_v28  ;;  %v7056_v28 = vsub.f32 %v6950_v54, %v13636_v20  ;;  %v7059_v50 = vsub.f32 %v6953_v51, %v13636_v20 }
 0x6f7   : > { %7123 = vst [vmem:[%s14066_s24 + $0xd0] sm:$0xff] %v7027_v6  ;;  %v6954_v6 = vld [vmem:[%s14066_s24 + $0x1d8] sm:$0xff] }
 0x6f8   : > { %7124 = vst [vmem:[%s14066_s24 + $0xd8] sm:$0xff] %v7028_v22  ;;  %v6955_v22 = vld [vmem:[%s14066_s24 + $0x1e0] sm:$0xff]  ;;  %v7060_v21 = vsub.f32 %v6954_v6, %v13636_v20  ;;  %v7083_v6 = vsub.f32 %v12787_v48, %v13636_v20  ;;  %v7086_v48 = vsub.f32 %v12975_v46, %v13636_v20  ;;  %v7089_v46 = vsub.f32 %v13005_v43, %v13636_v20 }
 0x6f9   : > { %7125 = vst [vmem:[%s14066_s24 + $0xe0] sm:$0xff] %v7029_v63  ;;  %v6956_v63 = vld [vmem:[%s14066_s24 + $0x1e8] sm:$0xff]  ;;  %v7061_v12 = vsub.f32 %v6955_v22, %v13636_v20  ;;  %v7092_v43 = vsub.f32 %v13029_v59, %v13636_v20  ;;  %v7095_v59 = vsub.f32 %v13043_v5, %v13636_v20 }
 0x6fa   : > { %7126 = vst [vmem:[%s14066_s24 + $0xe8] sm:$0xff] %v7030_v24  ;;  %v6957_v24 = vld [vmem:[%s14066_s24 + $0x1f0] sm:$0xff]  ;;  %v7062_v45 = vsub.f32 %v6956_v63, %v13636_v20 }
 0x6fb   : > { %7127 = vst [vmem:[%s14066_s24 + $0xf0] sm:$0xff] %v7031_v9  ;;  %v6958_v9 = vld [vmem:[%s14066_s24 + $0x1f8] sm:$0xff] }
 0x6fc   : > { %7128 = vst [vmem:[%s14066_s24 + $0xf8] sm:$0xff] %v7032_v36  ;;  %v6959_v36 = vld [vmem:[%s14066_s24 + $0x200] sm:$0xff] }
 0x6fd   : > { %7129 = vst [vmem:[%s14066_s24 + $0x100] sm:$0xff] %v7033_v7  ;;  %v6960_v7 = vld [vmem:[%s14066_s24 + $0x208] sm:$0xff] }
 0x6fe   : > { %7130 = vst [vmem:[%s14066_s24 + $0x108] sm:$0xff] %v7034_v16  ;;  %v7063_v16 = vsub.f32 %v6957_v24, %v13636_v20 }
 0x6ff   : > { %7131 = vst [vmem:[%s14066_s24 + $0x110] sm:$0xff] %v7035_v25  ;;  %v7064_v25 = vsub.f32 %v6958_v9, %v13636_v20 }
 0x700   : > { %7132 = vst [vmem:[%s14066_s24 + $0x118] sm:$0xff] %v7036_v11  ;;  %v6962_v11 = vld [vmem:[%s14066_s24 + $0x218] sm:$0xff] }
 0x701   : > { %7133 = vst [vmem:[%s14066_s24 + $0x120] sm:$0xff] %v7037_v60  ;;  %v7065_v60 = vsub.f32 %v6959_v36, %v13636_v20 }
 0x702   : > { %7134 = vst [vmem:[%s14066_s24 + $0x128] sm:$0xff] %v7038_v18  ;;  %v6963_v18 = vld [vmem:[%s14066_s24 + $0x220] sm:$0xff] }
 0x703   : > { %7135 = vst [vmem:[%s14066_s24 + $0x130] sm:$0xff] %v7039_v49  ;;  %v7066_v49 = vsub.f32 %v6960_v7, %v13636_v20 }
 0x704   : > { %7136 = vst [vmem:[%s14066_s24 + $0x138] sm:$0xff] %v7040_v56  ;;  %v6964_v56 = vld [vmem:[%s14066_s24 + $0x228] sm:$0xff] }
 0x705   : > { %7137 = vst [vmem:[%s14066_s24 + $0x140] sm:$0xff] %v7041_v10  ;;  %v7067_v10 = vsub.f32 %v6961_v2, %v13636_v20  ;;  %v7070_v55 = vsub.f32 %v6964_v56, %v13636_v20 }
 0x706   : > { %7138 = vst [vmem:[%s14066_s24 + $0x148] sm:$0xff] %v7042_v31  ;;  %v6965_v31 = vld [vmem:[%s14066_s24 + $0x230] sm:$0xff] }
 0x707   : > { %7139 = vst [vmem:[%s14066_s24 + $0x150] sm:$0xff] %v7043_v53  ;;  %v7068_v53 = vsub.f32 %v6962_v11, %v13636_v20 }
 0x708   : > { %7140 = vst [vmem:[%s14066_s24 + $0x158] sm:$0xff] %v7044_v27  ;;  %v6966_v27 = vld [vmem:[%s14066_s24 + $0x238] sm:$0xff] }
 0x709   : > { %7141 = vst [vmem:[%s14066_s24 + $0x160] sm:$0xff] %v7045_v33  ;;  %v7069_v33 = vsub.f32 %v6963_v18, %v13636_v20  ;;  %v7072_v34 = vsub.f32 %v6966_v27, %v13636_v20 }
 0x70a   : > { %7142 = vst [vmem:[%s14066_s24 + $0x168] sm:$0xff] %v7046_v35  ;;  %v7071_v35 = vsub.f32 %v6965_v31, %v13636_v20 }
 0x70b   : > { %7143 = vst [vmem:[%s14066_s24 + $0x170] sm:$0xff] %v7047_v47  ;;  %v14074_v47 = vld [vmem:[#allocation17_spill] sm:$0xff] }
 0x70c   : > { %7144 = vst [vmem:[%s14066_s24 + $0x178] sm:$0xff] %v7048_v40  ;;  %v7073_v39 = vsub.f32 %v14074_v47, %v13636_v20  ;;  %v14075_v40 = vld [vmem:[#allocation18_spill] sm:$0xff] }
 0x70d   : > { %7145 = vst [vmem:[%s14066_s24 + $0x180] sm:$0xff] %v7049_v1  ;;  %v7074_v15 = vsub.f32 %v14075_v40, %v13636_v20  ;;  %v14076_v1 = vld [vmem:[#allocation20_spill] sm:$0xff] }
 0x70e   : > { %7146 = vst [vmem:[%s14066_s24 + $0x188] sm:$0xff] %v7050_v32  ;;  %v7075_v58 = vsub.f32 %v14076_v1, %v13636_v20  ;;  %v14077_v32 = vld [vmem:[#allocation21_spill] sm:$0xff] }
 0x70f   : > { %7147 = vst [vmem:[%s14066_s24 + $0x190] sm:$0xff] %v7051_v42  ;;  %v7076_v23 = vsub.f32 %v14077_v32, %v13636_v20  ;;  %v14078_v42 = vld [vmem:[#allocation24_spill] sm:$0xff] }
 0x710   : > { %7148 = vst [vmem:[%s14066_s24 + $0x198] sm:$0xff] %v7052_v26  ;;  %v7077_v61 = vsub.f32 %v14078_v42, %v13636_v20  ;;  %v14079_v26 = vld [vmem:[#allocation25_spill] sm:$0xff] }
 0x711   : > { %7149 = vst [vmem:[%s14066_s24 + $0x1a0] sm:$0xff] %v7053_v17  ;;  %v7078_v54 = vsub.f32 %v14079_v26, %v13636_v20  ;;  %v14080_v17 = vld [vmem:[#allocation28_spill] sm:$0xff] }
 0x712   : > { %7150 = vst [vmem:[%s14066_s24 + $0x1a8] sm:$0xff] %v7054_v3  ;;  %v7079_v4 = vsub.f32 %v14080_v17, %v13636_v20  ;;  %v14081_v3 = vld [vmem:[#allocation29_spill] sm:$0xff] }
 0x713   : > { %7151 = vst [vmem:[%s14066_s24 + $0x1b0] sm:$0xff] %v7055_v14  ;;  %v7080_v19 = vsub.f32 %v14081_v3, %v13636_v20  ;;  %v14082_v14 = vld [vmem:[#allocation31_spill] sm:$0xff] }
 0x714   : > { %7152 = vst [vmem:[%s14066_s24 + $0x1b8] sm:$0xff] %v7056_v28  ;;  %v7081_v51 = vsub.f32 %v14082_v14, %v13636_v20  ;;  %v7082_v28 = vsub.f32 %v12730_v62, %v13636_v20  ;;  %v7085_v62 = vsub.f32 %v12965_v30, %v13636_v20  ;;  %v7088_v30 = vsub.f32 %v12996_v38, %v13636_v20 }
 0x715   : > { %7153 = vst [vmem:[%s14066_s24 + $0x1c0] sm:$0xff] %v7057_v8  ;;  %v7084_v8 = vsub.f32 %v12808_v41, %v13636_v20  ;;  %v7087_v41 = vsub.f32 %v12986_v57, %v13636_v20  ;;  %v7090_v57 = vsub.f32 %v13013_v0, %v13636_v20  ;;  %v7091_v38 = vsub.f32 %v13022_v37, %v13636_v20 }
 0x716   : > { %7154 = vst [vmem:[%s14066_s24 + $0x1c8] sm:$0xff] %v7058_v29  ;;  %v7093_v0 = vsub.f32 %v13033_v13, %v13636_v20  ;;  %v7094_v37 = vsub.f32 %v13039_v52, %v13636_v20  ;;  %v7096_v13 = vsub.f32 %v13047_v44, %v13636_v20 }
 0x717   : > { %7155 = vst [vmem:[%s14066_s24 + $0x1d0] sm:$0xff] %v7059_v50 }
 0x718   : > { %7156 = vst [vmem:[%s14066_s24 + $0x1d8] sm:$0xff] %v7060_v21 }
 0x719   : > { %7157 = vst [vmem:[%s14066_s24 + $0x1e0] sm:$0xff] %v7061_v12 }
 0x71a   : > { %7158 = vst [vmem:[%s14066_s24 + $0x1e8] sm:$0xff] %v7062_v45 }
 0x71b   : > { %7159 = vst [vmem:[%s14066_s24 + $0x1f0] sm:$0xff] %v7063_v16 }
 0x71c   : > { %7160 = vst [vmem:[%s14066_s24 + $0x1f8] sm:$0xff] %v7064_v25 }
 0x71d   : > { %7161 = vst [vmem:[%s14066_s24 + $0x200] sm:$0xff] %v7065_v60 }
 0x71e   : > { %7162 = vst [vmem:[%s14066_s24 + $0x208] sm:$0xff] %v7066_v49 }
 0x71f   : > { %7163 = vst [vmem:[%s14066_s24 + $0x210] sm:$0xff] %v7067_v10 }
 0x720   : > { %7164 = vst [vmem:[%s14066_s24 + $0x218] sm:$0xff] %v7068_v53 }
 0x721   : > { %7165 = vst [vmem:[%s14066_s24 + $0x220] sm:$0xff] %v7069_v33 }
 0x722   : > { %7166 = vst [vmem:[%s14066_s24 + $0x228] sm:$0xff] %v7070_v55 }
 0x723   : > { %7167 = vst [vmem:[%s14066_s24 + $0x230] sm:$0xff] %v7071_v35 }
 0x724   : > { %7168 = vst [vmem:[%s14066_s24 + $0x238] sm:$0xff] %v7072_v34 }
 0x725   : > { %7169 = vst [vmem:[%s14066_s24 + $0x240] sm:$0xff] %v7073_v39 }
 0x726   : > { %7170 = vst [vmem:[%s14066_s24 + $0x248] sm:$0xff] %v7074_v15 }
 0x727   : > { %7171 = vst [vmem:[%s14066_s24 + $0x250] sm:$0xff] %v7075_v58 }
 0x728   : > { %7172 = vst [vmem:[%s14066_s24 + $0x258] sm:$0xff] %v7076_v23 }
 0x729   : > { %7173 = vst [vmem:[%s14066_s24 + $0x260] sm:$0xff] %v7077_v61 }
 0x72a   : > { %7174 = vst [vmem:[%s14066_s24 + $0x268] sm:$0xff] %v7078_v54 }
 0x72b   : > { %7175 = vst [vmem:[%s14066_s24 + $0x270] sm:$0xff] %v7079_v4 }
 0x72c   : > { %7176 = vst [vmem:[%s14066_s24 + $0x278] sm:$0xff] %v7080_v19 }
 0x72d   : > { %7177 = vst [vmem:[%s14066_s24 + $0x280] sm:$0xff] %v7081_v51 }
 0x72e   : > { %7178 = vst [vmem:[%s14066_s24 + $0x288] sm:$0xff] %v7082_v28 }
 0x72f   : > { %7179 = vst [vmem:[%s14066_s24 + $0x290] sm:$0xff] %v7083_v6 }
 0x730   : > { %7180 = vst [vmem:[%s14066_s24 + $0x298] sm:$0xff] %v7084_v8 }
 0x731   : > { %7181 = vst [vmem:[%s14066_s24 + $0x2a0] sm:$0xff] %v7085_v62 }
 0x732   : > { %7182 = vst [vmem:[%s14066_s24 + $0x2a8] sm:$0xff] %v7086_v48 }
 0x733   : > { %7183 = vst [vmem:[%s14066_s24 + $0x2b0] sm:$0xff] %v7087_v41 }
 0x734   : > { %7184 = vst [vmem:[%s14066_s24 + $0x2b8] sm:$0xff] %v7088_v30 }
 0x735   : > { %7185 = vst [vmem:[%s14066_s24 + $0x2c0] sm:$0xff] %v7089_v46 }
 0x736   : > { %7186 = vst [vmem:[%s14066_s24 + $0x2c8] sm:$0xff] %v7090_v57 }
 0x737   : > { %7187 = vst [vmem:[%s14066_s24 + $0x2d0] sm:$0xff] %v7091_v38 }
 0x738   : > { %7188 = vst [vmem:[%s14066_s24 + $0x2d8] sm:$0xff] %v7092_v43 }
 0x739   : > { %7189 = vst [vmem:[%s14066_s24 + $0x2e0] sm:$0xff] %v7093_v0 }
 0x73a   : > { %7190 = vst [vmem:[%s14066_s24 + $0x2e8] sm:$0xff] %v7094_v37 }
 0x73b   : > { %7191 = vst [vmem:[%s14066_s24 + $0x2f0] sm:$0xff] %v7095_v59 }
 0x73c   : > { %7192 = vst [vmem:[%s14066_s24 + $0x2f8] sm:$0xff] %v7096_v13 }
 0x73d PF: > { %s21_s26 = sadd.s32 1, %s11635_s26   ;;  %s14083_s27 = sld [smem:[#allocation16_spill]] }
 0x73e   : > { %p18_p3 = scmp.ge.s32.totalorder %s21_s26, 4   ;;  %s14084_s21 = smov %s11619_s22 }
 0x73f   : > { %s14085_s22 = smov %s11623_s23  ;;  %s14086_s23 = smov %s11778_s10 }
 0x740   : > { %s14087_s24 = smov %s11631_s25  ;;  %20 = sbr.rel (!%p18_p3) target bundleno = 12 (0xc), region = 123 }
 0x743   : > { %s14088_s25 = smov %s14083_s27 }
 0x745   :  { %7217 = vsyncpa [#allocation6], 1 }
 0x746   :  { %7219 = vsyncpa [#allocation6 + $0x1], 1 }
 0x747   :  { %7220 = vsyncpa [#allocation8], 1 }
 0x748   :  { %7221 = vsyncpa [#allocation11], 1 }
 0x749   :  { %7223 = vsyncpa [#allocation11 + $0x1], 1 }

</bundles_post_ra>
